<compile_context>
chip_gen: v7x
topology: tpu7x:2x2x1
jax: 0.10.0
libtpu: 0.0.40
codegen_flags: <defaults>
</compile_context>

<pallas_src>
import jax
import jax.numpy as jnp
from jax.experimental import pallas as pl
from jax.experimental.pallas import tpu as pltpu


# ----------------------------- Pallas kernel --------------------------------

def _conv3x3_s2(A, sel_ref, w_ref, b_ref, hout, wout, cout):
    """3x3 / stride-2 / pad-1 conv + bias + ReLU on a VMEM-resident image.

    A       : (Hp, Wp, Cin) zero-padded input (value, channels-last)
    sel_ref : (3, wout, Wp) constant; sel[kw, v, w] = 1 iff w == 2*v + kw
    w_ref   : (3, 3, Cin, Cout) conv weight in (kh, kw, ic, oc) order
    b_ref   : (1, Cout) bias
    """
    hp, wp, cin = A.shape
    # Hoist the 3 column-selection broadcasts out of the tap loop.
    sel_b = [jnp.broadcast_to(sel_ref[kw], (hout, wout, wp)) for kw in range(3)]
    acc = jnp.zeros((hout, wout, cout), jnp.float32)
    for kh in range(3):
        # rows 2*oh + kh (oh = 0..hout-1): leading-dim slice + reshape only,
        # last two dims (Wp, Cin) untouched -> layout-safe.
        p = A[kh:kh + 2 * hout].reshape(hout, 2, wp, cin)[:, 0]      # (hout, Wp, Cin)
        for kw in range(3):
            # columns 2*ow + kw via constant selection matmul, batched over rows.
            t = jnp.einsum('hvw,hwc->hvc', sel_b[kw], p,
                           preferred_element_type=jnp.float32)       # (hout, wout, Cin)
            w_b = jnp.broadcast_to(w_ref[kh, kw], (hout, cin, cout))
            acc = acc + jnp.einsum('hvc,hco->hvo', t, w_b,
                                   preferred_element_type=jnp.float32)
    return jnp.maximum(acc + b_ref[...], 0.0)


def _mnist_cnn_kernel(x_ref, sel1_ref, sel2_ref, sel3_ref,
                      w1_ref, b1_ref, w2_ref, b2_ref, w3_ref, b3_ref,
                      out_ref, pad2_ref, pad3_ref):
    # conv1: (30, 30, 8) -> (14, 14, 16)   (input channel padded 1 -> 8 on host)
    a1 = _conv3x3_s2(x_ref[0], sel1_ref, w1_ref, b1_ref, 14, 14, 16)

    # zero-pad conv1 output in VMEM scratch; conv2: (16, 16, 16) -> (7, 7, 16)
    pad2_ref[...] = jnp.zeros((16, 16, 16), jnp.float32)
    pad2_ref[1:15, 1:15, :] = a1
    a2 = _conv3x3_s2(pad2_ref[...], sel2_ref, w2_ref, b2_ref, 7, 7, 16)

    # zero-pad conv2 output; conv3: (10, 10, 16) -> (4, 4, 10)
    pad3_ref[...] = jnp.zeros((10, 10, 16), jnp.float32)
    pad3_ref[1:8, 1:8, :] = a2
    a3 = _conv3x3_s2(pad3_ref[...], sel3_ref, w3_ref, b3_ref, 4, 4, 10)

    # fused avg_pool2d(4) + flatten: mean over the full 4x4 window -> (1, 10)
    out_ref[0] = jnp.mean(jnp.mean(a3, axis=0), axis=0, keepdims=True)


# ----------------------------- Host wrapper ----------------------------------

def _make_sel(wout, wp):
    """(3, wout, wp) constants with sel[kw, v, w] = 1 iff w == 2*v + kw."""
    v = jnp.arange(wout)[:, None]
    w = jnp.arange(wp)[None, :]
    return jnp.stack([(w == 2 * v + kw) for kw in range(3)]).astype(jnp.float32)


def mnist_cnn_forward(x, params):
    x = x.reshape(-1, 1, 28, 28).astype(jnp.float32)       # xb.view(-1, 1, 28, 28)
    b = x.shape[0]
    (w1, b1), (w2, b2), (w3, b3) = params

    # Host-side layout prep (tiny XLA glue on tiny tensors): spatial pad the
    # input, pad its channel 1 -> 8, transpose weights to (kh, kw, ic, oc),
    # build the constant stride-2 column-selection matrices.
    xp = jnp.pad(x[:, 0], ((0, 0), (1, 1), (1, 1)))[..., None]   # (B, 30, 30, 1)
    xp = jnp.pad(xp, ((0, 0), (0, 0), (0, 0), (0, 7)))           # (B, 30, 30, 8)

    w1k = jnp.pad(jnp.transpose(w1, (2, 3, 1, 0)),
                  ((0, 0), (0, 0), (0, 7), (0, 0)))              # (3, 3, 8, 16)
    w2k = jnp.transpose(w2, (2, 3, 1, 0))                        # (3, 3, 16, 16)
    w3k = jnp.transpose(w3, (2, 3, 1, 0))                        # (3, 3, 16, 10)
    b1r, b2r, b3r = b1.reshape(1, 16), b2.reshape(1, 16), b3.reshape(1, 10)

    sel1, sel2, sel3 = _make_sel(14, 30), _make_sel(7, 16), _make_sel(4, 10)

    def const_spec(*shape):
        return pl.BlockSpec(shape, lambda i, s=len(shape): (0,) * s)

    out = pl.pallas_call(
        _mnist_cnn_kernel,
        out_shape=jax.ShapeDtypeStruct((b, 1, 10), jnp.float32),
        grid_spec=pltpu.PrefetchScalarGridSpec(
            num_scalar_prefetch=0,
            grid=(b,),                                   # one image per grid step
            in_specs=[
                pl.BlockSpec((1, 30, 30, 8), lambda i: (i, 0, 0, 0)),
                const_spec(3, 14, 30),                   # sel1
                const_spec(3, 7, 16),                    # sel2
                const_spec(3, 4, 10),                    # sel3
                const_spec(3, 3, 8, 16),                 # w1
                const_spec(1, 16),                       # b1
                const_spec(3, 3, 16, 16),                # w2
                const_spec(1, 16),                       # b2
                const_spec(3, 3, 16, 10),                # w3
                const_spec(1, 10),                       # b3
            ],
            out_specs=pl.BlockSpec((1, 1, 10), lambda i: (i, 0, 0)),
            scratch_shapes=[pltpu.VMEM((16, 16, 16), jnp.float32),
                            pltpu.VMEM((10, 10, 16), jnp.float32)],
        ),
        compiler_params=pltpu.CompilerParams(
            dimension_semantics=("parallel",)),
    )(xp, sel1, sel2, sel3, w1k, b1r, w2k, b2r, w3k, b3r)
    return out.reshape(b, 10)


# ----------------------------- Params & reference ----------------------------

def init_params(key):
    """Deterministic init matching the PyTorch module's parameter shapes."""
    shapes = [
        (16, 1, 3, 3),   # conv1
        (16, 16, 3, 3),  # conv2
        (10, 16, 3, 3),  # conv3
    ]
    params = []
    for shp in shapes:
        key, kw, kb = jax.random.split(key, 3)
        fan_in = shp[1] * shp[2] * shp[3]
        bound = 1.0 / jnp.sqrt(fan_in)
        w = jax.random.uniform(kw, shp, jnp.float32, -bound, bound)
        bb = jax.random.uniform(kb, (shp[0],), jnp.float32, -bound, bound)
        params.append((w, bb))
    return params


def _reference_forward(x, params):
    """Pure-JAX reference of the PyTorch module (for a numerical self-check)."""
    x = x.reshape(-1, 1, 28, 28).astype(jnp.float32)
    for w, bb in params:
        x = jax.lax.conv_general_dilated(
            x, w, window_strides=(2, 2), padding=((1, 1), (1, 1)),
            dimension_numbers=('NCHW', 'OIHW', 'NCHW'),
            precision=jax.lax.Precision.HIGHEST)
        x = jax.nn.relu(x + bb[None, :, None, None])
    return jnp.mean(x, axis=(2, 3))


if __name__ == "__main__":
    key = jax.random.PRNGKey(0)
    key, kx = jax.random.split(key)
    # MNIST-shaped input (the module's view requires 28x28); small batch = 2.
    x = jax.random.normal(kx, (2, 1, 28, 28), jnp.float32)
    params = init_params(key)

    out = jax.jit(mnist_cnn_forward)(x, params)
    out = jax.block_until_ready(out)
    assert out.shape == (2, 10), out.shape

    ref = jax.block_until_ready(jax.jit(_reference_forward)(x, params))
    err = float(jnp.max(jnp.abs(out - ref)))
    assert err < 1e-2, f"kernel/reference mismatch: max abs err = {err}"

    print("KERNEL_OK")
</pallas_src>

<mosaic_0001>
module attributes {stable_mosaic.version = 11 : i64} {
  func.func @_mnist_cnn_kernel(%arg0: i32, %arg1: memref<1x30x30x8xf32, #tpu.memory_space<vmem>>, %arg2: memref<3x14x30xf32, #tpu.memory_space<vmem>>, %arg3: memref<3x7x16xf32, #tpu.memory_space<vmem>>, %arg4: memref<3x4x10xf32, #tpu.memory_space<vmem>>, %arg5: memref<3x3x8x16xf32, #tpu.memory_space<vmem>>, %arg6: memref<1x16xf32, #tpu.memory_space<vmem>>, %arg7: memref<3x3x16x16xf32, #tpu.memory_space<vmem>>, %arg8: memref<1x16xf32, #tpu.memory_space<vmem>>, %arg9: memref<3x3x16x10xf32, #tpu.memory_space<vmem>>, %arg10: memref<1x10xf32, #tpu.memory_space<vmem>>, %arg11: memref<1x1x10xf32, #tpu.memory_space<vmem>>, %arg12: memref<16x16x16xf32, #tpu.memory_space<vmem>>, %arg13: memref<10x10x16xf32, #tpu.memory_space<vmem>>) attributes {dimension_semantics = [#tpu.dimension_semantics<parallel>], iteration_bounds = array<i64: 2>, scalar_prefetch = 0 : i64, scratch_operands = 2 : i64, tpu.core_type = #tpu.core_type<tc>, window_params = [{transform_indices = @transform_0, window_bounds = array<i64: 1, 30, 30, 8>}, {pipeline_mode = #tpu.pipeline_mode<synchronous>, transform_indices = @transform_1, window_bounds = array<i64: 3, 14, 30>}, {pipeline_mode = #tpu.pipeline_mode<synchronous>, transform_indices = @transform_2, window_bounds = array<i64: 3, 7, 16>}, {pipeline_mode = #tpu.pipeline_mode<synchronous>, transform_indices = @transform_3, window_bounds = array<i64: 3, 4, 10>}, {pipeline_mode = #tpu.pipeline_mode<synchronous>, transform_indices = @transform_4, window_bounds = array<i64: 3, 3, 8, 16>}, {pipeline_mode = #tpu.pipeline_mode<synchronous>, transform_indices = @transform_5, window_bounds = array<i64: 1, 16>}, {pipeline_mode = #tpu.pipeline_mode<synchronous>, transform_indices = @transform_6, window_bounds = array<i64: 3, 3, 16, 16>}, {pipeline_mode = #tpu.pipeline_mode<synchronous>, transform_indices = @transform_7, window_bounds = array<i64: 1, 16>}, {pipeline_mode = #tpu.pipeline_mode<synchronous>, transform_indices = @transform_8, window_bounds = array<i64: 3, 3, 16, 10>}, {pipeline_mode = #tpu.pipeline_mode<synchronous>, transform_indices = @transform_9, window_bounds = array<i64: 1, 10>}, {transform_indices = @transform_10, window_bounds = array<i64: 1, 1, 10>}]} {
    %c0 = arith.constant 0 : index
    %c0_0 = arith.constant 0 : index
    %c0_1 = arith.constant 0 : index
    %c0_2 = arith.constant 0 : index
    %0 = vector.load %arg1[%c0, %c0_0, %c0_1, %c0_2] : memref<1x30x30x8xf32, #tpu.memory_space<vmem>>, vector<1x30x30x8xf32>
    %1 = vector.shape_cast %0 : vector<1x30x30x8xf32> to vector<30x30x8xf32>
    %c0_3 = arith.constant 0 : index
    %c0_4 = arith.constant 0 : index
    %c0_5 = arith.constant 0 : index
    %2 = vector.load %arg2[%c0_3, %c0_4, %c0_5] : memref<3x14x30xf32, #tpu.memory_space<vmem>>, vector<1x14x30xf32>
    %3 = vector.shape_cast %2 : vector<1x14x30xf32> to vector<14x30xf32>
    %4 = vector.shape_cast %3 : vector<14x30xf32> to vector<1x14x30xf32>
    %5 = vector.broadcast %4 : vector<1x14x30xf32> to vector<14x14x30xf32>
    %c1 = arith.constant 1 : index
    %c0_6 = arith.constant 0 : index
    %c0_7 = arith.constant 0 : index
    %6 = vector.load %arg2[%c1, %c0_6, %c0_7] : memref<3x14x30xf32, #tpu.memory_space<vmem>>, vector<1x14x30xf32>
    %7 = vector.shape_cast %6 : vector<1x14x30xf32> to vector<14x30xf32>
    %8 = vector.shape_cast %7 : vector<14x30xf32> to vector<1x14x30xf32>
    %9 = vector.broadcast %8 : vector<1x14x30xf32> to vector<14x14x30xf32>
    %c2 = arith.constant 2 : index
    %c0_8 = arith.constant 0 : index
    %c0_9 = arith.constant 0 : index
    %10 = vector.load %arg2[%c2, %c0_8, %c0_9] : memref<3x14x30xf32, #tpu.memory_space<vmem>>, vector<1x14x30xf32>
    %11 = vector.shape_cast %10 : vector<1x14x30xf32> to vector<14x30xf32>
    %12 = vector.shape_cast %11 : vector<14x30xf32> to vector<1x14x30xf32>
    %13 = vector.broadcast %12 : vector<1x14x30xf32> to vector<14x14x30xf32>
    %cst = arith.constant 0.000000e+00 : f32
    %14 = vector.broadcast %cst : f32 to vector<14x14x16xf32>
    %15 = vector.extract_strided_slice %1 {offsets = [0, 0, 0], sizes = [28, 30, 8], strides = [1, 1, 1]} : vector<30x30x8xf32> to vector<28x30x8xf32>
    %16 = vector.shape_cast %15 : vector<28x30x8xf32> to vector<14x2x30x8xf32>
    %17 = vector.extract_strided_slice %16 {offsets = [0, 0, 0, 0], sizes = [14, 1, 30, 8], strides = [1, 1, 1, 1]} : vector<14x2x30x8xf32> to vector<14x1x30x8xf32>
    %18 = vector.shape_cast %17 : vector<14x1x30x8xf32> to vector<14x30x8xf32>
    "tpu.trace_start"() <{level = 10 : i32, message = "hvw,hwc->hvc"}> : () -> ()
    %cst_10 = arith.constant dense<0.000000e+00> : vector<14x14x8xf32>
    %19 = tpu.matmul %5, %18, %cst_10 {dimension_numbers = #tpu.dot_dimension_numbers<[2], [1], [1], [2], [0, 0, 0, 1, 1, 2], [0], [0]>} : vector<14x14x30xf32>, vector<14x30x8xf32>, vector<14x14x8xf32> -> vector<14x14x8xf32>
    "tpu.trace_stop"() : () -> ()
    %c0_11 = arith.constant 0 : index
    %c0_12 = arith.constant 0 : index
    %c0_13 = arith.constant 0 : index
    %c0_14 = arith.constant 0 : index
    %20 = vector.load %arg5[%c0_11, %c0_12, %c0_13, %c0_14] : memref<3x3x8x16xf32, #tpu.memory_space<vmem>>, vector<1x1x8x16xf32>
    %21 = vector.shape_cast %20 : vector<1x1x8x16xf32> to vector<8x16xf32>
    %22 = vector.shape_cast %21 : vector<8x16xf32> to vector<1x8x16xf32>
    %23 = vector.broadcast %22 : vector<1x8x16xf32> to vector<14x8x16xf32>
    "tpu.trace_start"() <{level = 10 : i32, message = "hvc,hco->hvo"}> : () -> ()
    %cst_15 = arith.constant dense<0.000000e+00> : vector<14x14x16xf32>
    %24 = tpu.matmul %19, %23, %cst_15 {dimension_numbers = #tpu.dot_dimension_numbers<[2], [1], [1], [2], [0, 0, 0, 1, 1, 2], [0], [0]>} : vector<14x14x8xf32>, vector<14x8x16xf32>, vector<14x14x16xf32> -> vector<14x14x16xf32>
    "tpu.trace_stop"() : () -> ()
    %25 = arith.addf %14, %24 : vector<14x14x16xf32>
    "tpu.trace_start"() <{level = 10 : i32, message = "hvw,hwc->hvc"}> : () -> ()
    %cst_16 = arith.constant dense<0.000000e+00> : vector<14x14x8xf32>
    %26 = tpu.matmul %9, %18, %cst_16 {dimension_numbers = #tpu.dot_dimension_numbers<[2], [1], [1], [2], [0, 0, 0, 1, 1, 2], [0], [0]>} : vector<14x14x30xf32>, vector<14x30x8xf32>, vector<14x14x8xf32> -> vector<14x14x8xf32>
    "tpu.trace_stop"() : () -> ()
    %c0_17 = arith.constant 0 : index
    %c1_18 = arith.constant 1 : index
    %c0_19 = arith.constant 0 : index
    %c0_20 = arith.constant 0 : index
    %27 = vector.load %arg5[%c0_17, %c1_18, %c0_19, %c0_20] : memref<3x3x8x16xf32, #tpu.memory_space<vmem>>, vector<1x1x8x16xf32>
    %28 = vector.shape_cast %27 : vector<1x1x8x16xf32> to vector<8x16xf32>
    %29 = vector.shape_cast %28 : vector<8x16xf32> to vector<1x8x16xf32>
    %30 = vector.broadcast %29 : vector<1x8x16xf32> to vector<14x8x16xf32>
    "tpu.trace_start"() <{level = 10 : i32, message = "hvc,hco->hvo"}> : () -> ()
    %cst_21 = arith.constant dense<0.000000e+00> : vector<14x14x16xf32>
    %31 = tpu.matmul %26, %30, %cst_21 {dimension_numbers = #tpu.dot_dimension_numbers<[2], [1], [1], [2], [0, 0, 0, 1, 1, 2], [0], [0]>} : vector<14x14x8xf32>, vector<14x8x16xf32>, vector<14x14x16xf32> -> vector<14x14x16xf32>
    "tpu.trace_stop"() : () -> ()
    %32 = arith.addf %25, %31 : vector<14x14x16xf32>
    "tpu.trace_start"() <{level = 10 : i32, message = "hvw,hwc->hvc"}> : () -> ()
    %cst_22 = arith.constant dense<0.000000e+00> : vector<14x14x8xf32>
    %33 = tpu.matmul %13, %18, %cst_22 {dimension_numbers = #tpu.dot_dimension_numbers<[2], [1], [1], [2], [0, 0, 0, 1, 1, 2], [0], [0]>} : vector<14x14x30xf32>, vector<14x30x8xf32>, vector<14x14x8xf32> -> vector<14x14x8xf32>
    "tpu.trace_stop"() : () -> ()
    %c0_23 = arith.constant 0 : index
    %c2_24 = arith.constant 2 : index
    %c0_25 = arith.constant 0 : index
    %c0_26 = arith.constant 0 : index
    %34 = vector.load %arg5[%c0_23, %c2_24, %c0_25, %c0_26] : memref<3x3x8x16xf32, #tpu.memory_space<vmem>>, vector<1x1x8x16xf32>
    %35 = vector.shape_cast %34 : vector<1x1x8x16xf32> to vector<8x16xf32>
    %36 = vector.shape_cast %35 : vector<8x16xf32> to vector<1x8x16xf32>
    %37 = vector.broadcast %36 : vector<1x8x16xf32> to vector<14x8x16xf32>
    "tpu.trace_start"() <{level = 10 : i32, message = "hvc,hco->hvo"}> : () -> ()
    %cst_27 = arith.constant dense<0.000000e+00> : vector<14x14x16xf32>
    %38 = tpu.matmul %33, %37, %cst_27 {dimension_numbers = #tpu.dot_dimension_numbers<[2], [1], [1], [2], [0, 0, 0, 1, 1, 2], [0], [0]>} : vector<14x14x8xf32>, vector<14x8x16xf32>, vector<14x14x16xf32> -> vector<14x14x16xf32>
    "tpu.trace_stop"() : () -> ()
    %39 = arith.addf %32, %38 : vector<14x14x16xf32>
    %40 = vector.extract_strided_slice %1 {offsets = [1, 0, 0], sizes = [28, 30, 8], strides = [1, 1, 1]} : vector<30x30x8xf32> to vector<28x30x8xf32>
    %41 = vector.shape_cast %40 : vector<28x30x8xf32> to vector<14x2x30x8xf32>
    %42 = vector.extract_strided_slice %41 {offsets = [0, 0, 0, 0], sizes = [14, 1, 30, 8], strides = [1, 1, 1, 1]} : vector<14x2x30x8xf32> to vector<14x1x30x8xf32>
    %43 = vector.shape_cast %42 : vector<14x1x30x8xf32> to vector<14x30x8xf32>
    "tpu.trace_start"() <{level = 10 : i32, message = "hvw,hwc->hvc"}> : () -> ()
    %cst_28 = arith.constant dense<0.000000e+00> : vector<14x14x8xf32>
    %44 = tpu.matmul %5, %43, %cst_28 {dimension_numbers = #tpu.dot_dimension_numbers<[2], [1], [1], [2], [0, 0, 0, 1, 1, 2], [0], [0]>} : vector<14x14x30xf32>, vector<14x30x8xf32>, vector<14x14x8xf32> -> vector<14x14x8xf32>
    "tpu.trace_stop"() : () -> ()
    %c1_29 = arith.constant 1 : index
    %c0_30 = arith.constant 0 : index
    %c0_31 = arith.constant 0 : index
    %c0_32 = arith.constant 0 : index
    %45 = vector.load %arg5[%c1_29, %c0_30, %c0_31, %c0_32] : memref<3x3x8x16xf32, #tpu.memory_space<vmem>>, vector<1x1x8x16xf32>
    %46 = vector.shape_cast %45 : vector<1x1x8x16xf32> to vector<8x16xf32>
    %47 = vector.shape_cast %46 : vector<8x16xf32> to vector<1x8x16xf32>
    %48 = vector.broadcast %47 : vector<1x8x16xf32> to vector<14x8x16xf32>
    "tpu.trace_start"() <{level = 10 : i32, message = "hvc,hco->hvo"}> : () -> ()
    %cst_33 = arith.constant dense<0.000000e+00> : vector<14x14x16xf32>
    %49 = tpu.matmul %44, %48, %cst_33 {dimension_numbers = #tpu.dot_dimension_numbers<[2], [1], [1], [2], [0, 0, 0, 1, 1, 2], [0], [0]>} : vector<14x14x8xf32>, vector<14x8x16xf32>, vector<14x14x16xf32> -> vector<14x14x16xf32>
    "tpu.trace_stop"() : () -> ()
    %50 = arith.addf %39, %49 : vector<14x14x16xf32>
    "tpu.trace_start"() <{level = 10 : i32, message = "hvw,hwc->hvc"}> : () -> ()
    %cst_34 = arith.constant dense<0.000000e+00> : vector<14x14x8xf32>
    %51 = tpu.matmul %9, %43, %cst_34 {dimension_numbers = #tpu.dot_dimension_numbers<[2], [1], [1], [2], [0, 0, 0, 1, 1, 2], [0], [0]>} : vector<14x14x30xf32>, vector<14x30x8xf32>, vector<14x14x8xf32> -> vector<14x14x8xf32>
    "tpu.trace_stop"() : () -> ()
    %c1_35 = arith.constant 1 : index
    %c1_36 = arith.constant 1 : index
    %c0_37 = arith.constant 0 : index
    %c0_38 = arith.constant 0 : index
    %52 = vector.load %arg5[%c1_35, %c1_36, %c0_37, %c0_38] : memref<3x3x8x16xf32, #tpu.memory_space<vmem>>, vector<1x1x8x16xf32>
    %53 = vector.shape_cast %52 : vector<1x1x8x16xf32> to vector<8x16xf32>
    %54 = vector.shape_cast %53 : vector<8x16xf32> to vector<1x8x16xf32>
    %55 = vector.broadcast %54 : vector<1x8x16xf32> to vector<14x8x16xf32>
    "tpu.trace_start"() <{level = 10 : i32, message = "hvc,hco->hvo"}> : () -> ()
    %cst_39 = arith.constant dense<0.000000e+00> : vector<14x14x16xf32>
    %56 = tpu.matmul %51, %55, %cst_39 {dimension_numbers = #tpu.dot_dimension_numbers<[2], [1], [1], [2], [0, 0, 0, 1, 1, 2], [0], [0]>} : vector<14x14x8xf32>, vector<14x8x16xf32>, vector<14x14x16xf32> -> vector<14x14x16xf32>
    "tpu.trace_stop"() : () -> ()
    %57 = arith.addf %50, %56 : vector<14x14x16xf32>
    "tpu.trace_start"() <{level = 10 : i32, message = "hvw,hwc->hvc"}> : () -> ()
    %cst_40 = arith.constant dense<0.000000e+00> : vector<14x14x8xf32>
    %58 = tpu.matmul %13, %43, %cst_40 {dimension_numbers = #tpu.dot_dimension_numbers<[2], [1], [1], [2], [0, 0, 0, 1, 1, 2], [0], [0]>} : vector<14x14x30xf32>, vector<14x30x8xf32>, vector<14x14x8xf32> -> vector<14x14x8xf32>
    "tpu.trace_stop"() : () -> ()
    %c1_41 = arith.constant 1 : index
    %c2_42 = arith.constant 2 : index
    %c0_43 = arith.constant 0 : index
    %c0_44 = arith.constant 0 : index
    %59 = vector.load %arg5[%c1_41, %c2_42, %c0_43, %c0_44] : memref<3x3x8x16xf32, #tpu.memory_space<vmem>>, vector<1x1x8x16xf32>
    %60 = vector.shape_cast %59 : vector<1x1x8x16xf32> to vector<8x16xf32>
    %61 = vector.shape_cast %60 : vector<8x16xf32> to vector<1x8x16xf32>
    %62 = vector.broadcast %61 : vector<1x8x16xf32> to vector<14x8x16xf32>
    "tpu.trace_start"() <{level = 10 : i32, message = "hvc,hco->hvo"}> : () -> ()
    %cst_45 = arith.constant dense<0.000000e+00> : vector<14x14x16xf32>
    %63 = tpu.matmul %58, %62, %cst_45 {dimension_numbers = #tpu.dot_dimension_numbers<[2], [1], [1], [2], [0, 0, 0, 1, 1, 2], [0], [0]>} : vector<14x14x8xf32>, vector<14x8x16xf32>, vector<14x14x16xf32> -> vector<14x14x16xf32>
    "tpu.trace_stop"() : () -> ()
    %64 = arith.addf %57, %63 : vector<14x14x16xf32>
    %65 = vector.extract_strided_slice %1 {offsets = [2, 0, 0], sizes = [28, 30, 8], strides = [1, 1, 1]} : vector<30x30x8xf32> to vector<28x30x8xf32>
    %66 = vector.shape_cast %65 : vector<28x30x8xf32> to vector<14x2x30x8xf32>
    %67 = vector.extract_strided_slice %66 {offsets = [0, 0, 0, 0], sizes = [14, 1, 30, 8], strides = [1, 1, 1, 1]} : vector<14x2x30x8xf32> to vector<14x1x30x8xf32>
    %68 = vector.shape_cast %67 : vector<14x1x30x8xf32> to vector<14x30x8xf32>
    "tpu.trace_start"() <{level = 10 : i32, message = "hvw,hwc->hvc"}> : () -> ()
    %cst_46 = arith.constant dense<0.000000e+00> : vector<14x14x8xf32>
    %69 = tpu.matmul %5, %68, %cst_46 {dimension_numbers = #tpu.dot_dimension_numbers<[2], [1], [1], [2], [0, 0, 0, 1, 1, 2], [0], [0]>} : vector<14x14x30xf32>, vector<14x30x8xf32>, vector<14x14x8xf32> -> vector<14x14x8xf32>
    "tpu.trace_stop"() : () -> ()
    %c2_47 = arith.constant 2 : index
    %c0_48 = arith.constant 0 : index
    %c0_49 = arith.constant 0 : index
    %c0_50 = arith.constant 0 : index
    %70 = vector.load %arg5[%c2_47, %c0_48, %c0_49, %c0_50] : memref<3x3x8x16xf32, #tpu.memory_space<vmem>>, vector<1x1x8x16xf32>
    %71 = vector.shape_cast %70 : vector<1x1x8x16xf32> to vector<8x16xf32>
    %72 = vector.shape_cast %71 : vector<8x16xf32> to vector<1x8x16xf32>
    %73 = vector.broadcast %72 : vector<1x8x16xf32> to vector<14x8x16xf32>
    "tpu.trace_start"() <{level = 10 : i32, message = "hvc,hco->hvo"}> : () -> ()
    %cst_51 = arith.constant dense<0.000000e+00> : vector<14x14x16xf32>
    %74 = tpu.matmul %69, %73, %cst_51 {dimension_numbers = #tpu.dot_dimension_numbers<[2], [1], [1], [2], [0, 0, 0, 1, 1, 2], [0], [0]>} : vector<14x14x8xf32>, vector<14x8x16xf32>, vector<14x14x16xf32> -> vector<14x14x16xf32>
    "tpu.trace_stop"() : () -> ()
    %75 = arith.addf %64, %74 : vector<14x14x16xf32>
    "tpu.trace_start"() <{level = 10 : i32, message = "hvw,hwc->hvc"}> : () -> ()
    %cst_52 = arith.constant dense<0.000000e+00> : vector<14x14x8xf32>
    %76 = tpu.matmul %9, %68, %cst_52 {dimension_numbers = #tpu.dot_dimension_numbers<[2], [1], [1], [2], [0, 0, 0, 1, 1, 2], [0], [0]>} : vector<14x14x30xf32>, vector<14x30x8xf32>, vector<14x14x8xf32> -> vector<14x14x8xf32>
    "tpu.trace_stop"() : () -> ()
    %c2_53 = arith.constant 2 : index
    %c1_54 = arith.constant 1 : index
    %c0_55 = arith.constant 0 : index
    %c0_56 = arith.constant 0 : index
    %77 = vector.load %arg5[%c2_53, %c1_54, %c0_55, %c0_56] : memref<3x3x8x16xf32, #tpu.memory_space<vmem>>, vector<1x1x8x16xf32>
    %78 = vector.shape_cast %77 : vector<1x1x8x16xf32> to vector<8x16xf32>
    %79 = vector.shape_cast %78 : vector<8x16xf32> to vector<1x8x16xf32>
    %80 = vector.broadcast %79 : vector<1x8x16xf32> to vector<14x8x16xf32>
    "tpu.trace_start"() <{level = 10 : i32, message = "hvc,hco->hvo"}> : () -> ()
    %cst_57 = arith.constant dense<0.000000e+00> : vector<14x14x16xf32>
    %81 = tpu.matmul %76, %80, %cst_57 {dimension_numbers = #tpu.dot_dimension_numbers<[2], [1], [1], [2], [0, 0, 0, 1, 1, 2], [0], [0]>} : vector<14x14x8xf32>, vector<14x8x16xf32>, vector<14x14x16xf32> -> vector<14x14x16xf32>
    "tpu.trace_stop"() : () -> ()
    %82 = arith.addf %75, %81 : vector<14x14x16xf32>
    "tpu.trace_start"() <{level = 10 : i32, message = "hvw,hwc->hvc"}> : () -> ()
    %cst_58 = arith.constant dense<0.000000e+00> : vector<14x14x8xf32>
    %83 = tpu.matmul %13, %68, %cst_58 {dimension_numbers = #tpu.dot_dimension_numbers<[2], [1], [1], [2], [0, 0, 0, 1, 1, 2], [0], [0]>} : vector<14x14x30xf32>, vector<14x30x8xf32>, vector<14x14x8xf32> -> vector<14x14x8xf32>
    "tpu.trace_stop"() : () -> ()
    %c2_59 = arith.constant 2 : index
    %c2_60 = arith.constant 2 : index
    %c0_61 = arith.constant 0 : index
    %c0_62 = arith.constant 0 : index
    %84 = vector.load %arg5[%c2_59, %c2_60, %c0_61, %c0_62] : memref<3x3x8x16xf32, #tpu.memory_space<vmem>>, vector<1x1x8x16xf32>
    %85 = vector.shape_cast %84 : vector<1x1x8x16xf32> to vector<8x16xf32>
    %86 = vector.shape_cast %85 : vector<8x16xf32> to vector<1x8x16xf32>
    %87 = vector.broadcast %86 : vector<1x8x16xf32> to vector<14x8x16xf32>
    "tpu.trace_start"() <{level = 10 : i32, message = "hvc,hco->hvo"}> : () -> ()
    %cst_63 = arith.constant dense<0.000000e+00> : vector<14x14x16xf32>
    %88 = tpu.matmul %83, %87, %cst_63 {dimension_numbers = #tpu.dot_dimension_numbers<[2], [1], [1], [2], [0, 0, 0, 1, 1, 2], [0], [0]>} : vector<14x14x8xf32>, vector<14x8x16xf32>, vector<14x14x16xf32> -> vector<14x14x16xf32>
    "tpu.trace_stop"() : () -> ()
    %89 = arith.addf %82, %88 : vector<14x14x16xf32>
    %c0_64 = arith.constant 0 : index
    %c0_65 = arith.constant 0 : index
    %90 = vector.load %arg6[%c0_64, %c0_65] : memref<1x16xf32, #tpu.memory_space<vmem>>, vector<1x16xf32>
    %91 = vector.shape_cast %90 : vector<1x16xf32> to vector<1x1x16xf32>
    %92 = vector.broadcast %91 : vector<1x1x16xf32> to vector<14x14x16xf32>
    %93 = arith.addf %89, %92 : vector<14x14x16xf32>
    %cst_66 = arith.constant 0.000000e+00 : f32
    %94 = vector.broadcast %cst_66 : f32 to vector<14x14x16xf32>
    %95 = arith.maximumf %93, %94 : vector<14x14x16xf32>
    %cst_67 = arith.constant 0.000000e+00 : f32
    %96 = vector.broadcast %cst_67 : f32 to vector<16x16x16xf32>
    %c0_68 = arith.constant 0 : index
    %c0_69 = arith.constant 0 : index
    %c0_70 = arith.constant 0 : index
    %97 = vector.load %arg12[%c0_68, %c0_69, %c0_70] : memref<16x16x16xf32, #tpu.memory_space<vmem>>, vector<16x16x16xf32>
    tpu.vector_store %arg12[%c0_68, %c0_69, %c0_70], %96 {strides = array<i32>} : memref<16x16x16xf32, #tpu.memory_space<vmem>>, vector<16x16x16xf32>,
    %c1_71 = arith.constant 1 : index
    %c1_72 = arith.constant 1 : index
    %c0_73 = arith.constant 0 : index
    %98 = vector.load %arg12[%c1_71, %c1_72, %c0_73] : memref<16x16x16xf32, #tpu.memory_space<vmem>>, vector<14x14x16xf32>
    tpu.vector_store %arg12[%c1_71, %c1_72, %c0_73], %95 {strides = array<i32>} : memref<16x16x16xf32, #tpu.memory_space<vmem>>, vector<14x14x16xf32>,
    %c0_74 = arith.constant 0 : index
    %c0_75 = arith.constant 0 : index
    %c0_76 = arith.constant 0 : index
    %99 = vector.load %arg12[%c0_74, %c0_75, %c0_76] : memref<16x16x16xf32, #tpu.memory_space<vmem>>, vector<16x16x16xf32>
    %c0_77 = arith.constant 0 : index
    %c0_78 = arith.constant 0 : index
    %c0_79 = arith.constant 0 : index
    %100 = vector.load %arg3[%c0_77, %c0_78, %c0_79] : memref<3x7x16xf32, #tpu.memory_space<vmem>>, vector<1x7x16xf32>
    %101 = vector.shape_cast %100 : vector<1x7x16xf32> to vector<7x16xf32>
    %102 = vector.shape_cast %101 : vector<7x16xf32> to vector<1x7x16xf32>
    %103 = vector.broadcast %102 : vector<1x7x16xf32> to vector<7x7x16xf32>
    %c1_80 = arith.constant 1 : index
    %c0_81 = arith.constant 0 : index
    %c0_82 = arith.constant 0 : index
    %104 = vector.load %arg3[%c1_80, %c0_81, %c0_82] : memref<3x7x16xf32, #tpu.memory_space<vmem>>, vector<1x7x16xf32>
    %105 = vector.shape_cast %104 : vector<1x7x16xf32> to vector<7x16xf32>
    %106 = vector.shape_cast %105 : vector<7x16xf32> to vector<1x7x16xf32>
    %107 = vector.broadcast %106 : vector<1x7x16xf32> to vector<7x7x16xf32>
    %c2_83 = arith.constant 2 : index
    %c0_84 = arith.constant 0 : index
    %c0_85 = arith.constant 0 : index
    %108 = vector.load %arg3[%c2_83, %c0_84, %c0_85] : memref<3x7x16xf32, #tpu.memory_space<vmem>>, vector<1x7x16xf32>
    %109 = vector.shape_cast %108 : vector<1x7x16xf32> to vector<7x16xf32>
    %110 = vector.shape_cast %109 : vector<7x16xf32> to vector<1x7x16xf32>
    %111 = vector.broadcast %110 : vector<1x7x16xf32> to vector<7x7x16xf32>
    %cst_86 = arith.constant 0.000000e+00 : f32
    %112 = vector.broadcast %cst_86 : f32 to vector<7x7x16xf32>
    %113 = vector.extract_strided_slice %99 {offsets = [0, 0, 0], sizes = [14, 16, 16], strides = [1, 1, 1]} : vector<16x16x16xf32> to vector<14x16x16xf32>
    %114 = vector.shape_cast %113 : vector<14x16x16xf32> to vector<7x2x16x16xf32>
    %115 = vector.extract_strided_slice %114 {offsets = [0, 0, 0, 0], sizes = [7, 1, 16, 16], strides = [1, 1, 1, 1]} : vector<7x2x16x16xf32> to vector<7x1x16x16xf32>
    %116 = vector.shape_cast %115 : vector<7x1x16x16xf32> to vector<7x16x16xf32>
    "tpu.trace_start"() <{level = 10 : i32, message = "hvw,hwc->hvc"}> : () -> ()
    %cst_87 = arith.constant dense<0.000000e+00> : vector<7x7x16xf32>
    %117 = tpu.matmul %103, %116, %cst_87 {dimension_numbers = #tpu.dot_dimension_numbers<[2], [1], [1], [2], [0, 0, 0, 1, 1, 2], [0], [0]>} : vector<7x7x16xf32>, vector<7x16x16xf32>, vector<7x7x16xf32> -> vector<7x7x16xf32>
    "tpu.trace_stop"() : () -> ()
    %c0_88 = arith.constant 0 : index
    %c0_89 = arith.constant 0 : index
    %c0_90 = arith.constant 0 : index
    %c0_91 = arith.constant 0 : index
    %118 = vector.load %arg7[%c0_88, %c0_89, %c0_90, %c0_91] : memref<3x3x16x16xf32, #tpu.memory_space<vmem>>, vector<1x1x16x16xf32>
    %119 = vector.shape_cast %118 : vector<1x1x16x16xf32> to vector<16x16xf32>
    %120 = vector.shape_cast %119 : vector<16x16xf32> to vector<1x16x16xf32>
    %121 = vector.broadcast %120 : vector<1x16x16xf32> to vector<7x16x16xf32>
    "tpu.trace_start"() <{level = 10 : i32, message = "hvc,hco->hvo"}> : () -> ()
    %cst_92 = arith.constant dense<0.000000e+00> : vector<7x7x16xf32>
    %122 = tpu.matmul %117, %121, %cst_92 {dimension_numbers = #tpu.dot_dimension_numbers<[2], [1], [1], [2], [0, 0, 0, 1, 1, 2], [0], [0]>} : vector<7x7x16xf32>, vector<7x16x16xf32>, vector<7x7x16xf32> -> vector<7x7x16xf32>
    "tpu.trace_stop"() : () -> ()
    %123 = arith.addf %112, %122 : vector<7x7x16xf32>
    "tpu.trace_start"() <{level = 10 : i32, message = "hvw,hwc->hvc"}> : () -> ()
    %cst_93 = arith.constant dense<0.000000e+00> : vector<7x7x16xf32>
    %124 = tpu.matmul %107, %116, %cst_93 {dimension_numbers = #tpu.dot_dimension_numbers<[2], [1], [1], [2], [0, 0, 0, 1, 1, 2], [0], [0]>} : vector<7x7x16xf32>, vector<7x16x16xf32>, vector<7x7x16xf32> -> vector<7x7x16xf32>
    "tpu.trace_stop"() : () -> ()
    %c0_94 = arith.constant 0 : index
    %c1_95 = arith.constant 1 : index
    %c0_96 = arith.constant 0 : index
    %c0_97 = arith.constant 0 : index
    %125 = vector.load %arg7[%c0_94, %c1_95, %c0_96, %c0_97] : memref<3x3x16x16xf32, #tpu.memory_space<vmem>>, vector<1x1x16x16xf32>
    %126 = vector.shape_cast %125 : vector<1x1x16x16xf32> to vector<16x16xf32>
    %127 = vector.shape_cast %126 : vector<16x16xf32> to vector<1x16x16xf32>
    %128 = vector.broadcast %127 : vector<1x16x16xf32> to vector<7x16x16xf32>
    "tpu.trace_start"() <{level = 10 : i32, message = "hvc,hco->hvo"}> : () -> ()
    %cst_98 = arith.constant dense<0.000000e+00> : vector<7x7x16xf32>
    %129 = tpu.matmul %124, %128, %cst_98 {dimension_numbers = #tpu.dot_dimension_numbers<[2], [1], [1], [2], [0, 0, 0, 1, 1, 2], [0], [0]>} : vector<7x7x16xf32>, vector<7x16x16xf32>, vector<7x7x16xf32> -> vector<7x7x16xf32>
    "tpu.trace_stop"() : () -> ()
    %130 = arith.addf %123, %129 : vector<7x7x16xf32>
    "tpu.trace_start"() <{level = 10 : i32, message = "hvw,hwc->hvc"}> : () -> ()
    %cst_99 = arith.constant dense<0.000000e+00> : vector<7x7x16xf32>
    %131 = tpu.matmul %111, %116, %cst_99 {dimension_numbers = #tpu.dot_dimension_numbers<[2], [1], [1], [2], [0, 0, 0, 1, 1, 2], [0], [0]>} : vector<7x7x16xf32>, vector<7x16x16xf32>, vector<7x7x16xf32> -> vector<7x7x16xf32>
    "tpu.trace_stop"() : () -> ()
    %c0_100 = arith.constant 0 : index
    %c2_101 = arith.constant 2 : index
    %c0_102 = arith.constant 0 : index
    %c0_103 = arith.constant 0 : index
    %132 = vector.load %arg7[%c0_100, %c2_101, %c0_102, %c0_103] : memref<3x3x16x16xf32, #tpu.memory_space<vmem>>, vector<1x1x16x16xf32>
    %133 = vector.shape_cast %132 : vector<1x1x16x16xf32> to vector<16x16xf32>
    %134 = vector.shape_cast %133 : vector<16x16xf32> to vector<1x16x16xf32>
    %135 = vector.broadcast %134 : vector<1x16x16xf32> to vector<7x16x16xf32>
    "tpu.trace_start"() <{level = 10 : i32, message = "hvc,hco->hvo"}> : () -> ()
    %cst_104 = arith.constant dense<0.000000e+00> : vector<7x7x16xf32>
    %136 = tpu.matmul %131, %135, %cst_104 {dimension_numbers = #tpu.dot_dimension_numbers<[2], [1], [1], [2], [0, 0, 0, 1, 1, 2], [0], [0]>} : vector<7x7x16xf32>, vector<7x16x16xf32>, vector<7x7x16xf32> -> vector<7x7x16xf32>
    "tpu.trace_stop"() : () -> ()
    %137 = arith.addf %130, %136 : vector<7x7x16xf32>
    %138 = vector.extract_strided_slice %99 {offsets = [1, 0, 0], sizes = [14, 16, 16], strides = [1, 1, 1]} : vector<16x16x16xf32> to vector<14x16x16xf32>
    %139 = vector.shape_cast %138 : vector<14x16x16xf32> to vector<7x2x16x16xf32>
    %140 = vector.extract_strided_slice %139 {offsets = [0, 0, 0, 0], sizes = [7, 1, 16, 16], strides = [1, 1, 1, 1]} : vector<7x2x16x16xf32> to vector<7x1x16x16xf32>
    %141 = vector.shape_cast %140 : vector<7x1x16x16xf32> to vector<7x16x16xf32>
    "tpu.trace_start"() <{level = 10 : i32, message = "hvw,hwc->hvc"}> : () -> ()
    %cst_105 = arith.constant dense<0.000000e+00> : vector<7x7x16xf32>
    %142 = tpu.matmul %103, %141, %cst_105 {dimension_numbers = #tpu.dot_dimension_numbers<[2], [1], [1], [2], [0, 0, 0, 1, 1, 2], [0], [0]>} : vector<7x7x16xf32>, vector<7x16x16xf32>, vector<7x7x16xf32> -> vector<7x7x16xf32>
    "tpu.trace_stop"() : () -> ()
    %c1_106 = arith.constant 1 : index
    %c0_107 = arith.constant 0 : index
    %c0_108 = arith.constant 0 : index
    %c0_109 = arith.constant 0 : index
    %143 = vector.load %arg7[%c1_106, %c0_107, %c0_108, %c0_109] : memref<3x3x16x16xf32, #tpu.memory_space<vmem>>, vector<1x1x16x16xf32>
    %144 = vector.shape_cast %143 : vector<1x1x16x16xf32> to vector<16x16xf32>
    %145 = vector.shape_cast %144 : vector<16x16xf32> to vector<1x16x16xf32>
    %146 = vector.broadcast %145 : vector<1x16x16xf32> to vector<7x16x16xf32>
    "tpu.trace_start"() <{level = 10 : i32, message = "hvc,hco->hvo"}> : () -> ()
    %cst_110 = arith.constant dense<0.000000e+00> : vector<7x7x16xf32>
    %147 = tpu.matmul %142, %146, %cst_110 {dimension_numbers = #tpu.dot_dimension_numbers<[2], [1], [1], [2], [0, 0, 0, 1, 1, 2], [0], [0]>} : vector<7x7x16xf32>, vector<7x16x16xf32>, vector<7x7x16xf32> -> vector<7x7x16xf32>
    "tpu.trace_stop"() : () -> ()
    %148 = arith.addf %137, %147 : vector<7x7x16xf32>
    "tpu.trace_start"() <{level = 10 : i32, message = "hvw,hwc->hvc"}> : () -> ()
    %cst_111 = arith.constant dense<0.000000e+00> : vector<7x7x16xf32>
    %149 = tpu.matmul %107, %141, %cst_111 {dimension_numbers = #tpu.dot_dimension_numbers<[2], [1], [1], [2], [0, 0, 0, 1, 1, 2], [0], [0]>} : vector<7x7x16xf32>, vector<7x16x16xf32>, vector<7x7x16xf32> -> vector<7x7x16xf32>
    "tpu.trace_stop"() : () -> ()
    %c1_112 = arith.constant 1 : index
    %c1_113 = arith.constant 1 : index
    %c0_114 = arith.constant 0 : index
    %c0_115 = arith.constant 0 : index
    %150 = vector.load %arg7[%c1_112, %c1_113, %c0_114, %c0_115] : memref<3x3x16x16xf32, #tpu.memory_space<vmem>>, vector<1x1x16x16xf32>
    %151 = vector.shape_cast %150 : vector<1x1x16x16xf32> to vector<16x16xf32>
    %152 = vector.shape_cast %151 : vector<16x16xf32> to vector<1x16x16xf32>
    %153 = vector.broadcast %152 : vector<1x16x16xf32> to vector<7x16x16xf32>
    "tpu.trace_start"() <{level = 10 : i32, message = "hvc,hco->hvo"}> : () -> ()
    %cst_116 = arith.constant dense<0.000000e+00> : vector<7x7x16xf32>
    %154 = tpu.matmul %149, %153, %cst_116 {dimension_numbers = #tpu.dot_dimension_numbers<[2], [1], [1], [2], [0, 0, 0, 1, 1, 2], [0], [0]>} : vector<7x7x16xf32>, vector<7x16x16xf32>, vector<7x7x16xf32> -> vector<7x7x16xf32>
    "tpu.trace_stop"() : () -> ()
    %155 = arith.addf %148, %154 : vector<7x7x16xf32>
    "tpu.trace_start"() <{level = 10 : i32, message = "hvw,hwc->hvc"}> : () -> ()
    %cst_117 = arith.constant dense<0.000000e+00> : vector<7x7x16xf32>
    %156 = tpu.matmul %111, %141, %cst_117 {dimension_numbers = #tpu.dot_dimension_numbers<[2], [1], [1], [2], [0, 0, 0, 1, 1, 2], [0], [0]>} : vector<7x7x16xf32>, vector<7x16x16xf32>, vector<7x7x16xf32> -> vector<7x7x16xf32>
    "tpu.trace_stop"() : () -> ()
    %c1_118 = arith.constant 1 : index
    %c2_119 = arith.constant 2 : index
    %c0_120 = arith.constant 0 : index
    %c0_121 = arith.constant 0 : index
    %157 = vector.load %arg7[%c1_118, %c2_119, %c0_120, %c0_121] : memref<3x3x16x16xf32, #tpu.memory_space<vmem>>, vector<1x1x16x16xf32>
    %158 = vector.shape_cast %157 : vector<1x1x16x16xf32> to vector<16x16xf32>
    %159 = vector.shape_cast %158 : vector<16x16xf32> to vector<1x16x16xf32>
    %160 = vector.broadcast %159 : vector<1x16x16xf32> to vector<7x16x16xf32>
    "tpu.trace_start"() <{level = 10 : i32, message = "hvc,hco->hvo"}> : () -> ()
    %cst_122 = arith.constant dense<0.000000e+00> : vector<7x7x16xf32>
    %161 = tpu.matmul %156, %160, %cst_122 {dimension_numbers = #tpu.dot_dimension_numbers<[2], [1], [1], [2], [0, 0, 0, 1, 1, 2], [0], [0]>} : vector<7x7x16xf32>, vector<7x16x16xf32>, vector<7x7x16xf32> -> vector<7x7x16xf32>
    "tpu.trace_stop"() : () -> ()
    %162 = arith.addf %155, %161 : vector<7x7x16xf32>
    %163 = vector.extract_strided_slice %99 {offsets = [2, 0, 0], sizes = [14, 16, 16], strides = [1, 1, 1]} : vector<16x16x16xf32> to vector<14x16x16xf32>
    %164 = vector.shape_cast %163 : vector<14x16x16xf32> to vector<7x2x16x16xf32>
    %165 = vector.extract_strided_slice %164 {offsets = [0, 0, 0, 0], sizes = [7, 1, 16, 16], strides = [1, 1, 1, 1]} : vector<7x2x16x16xf32> to vector<7x1x16x16xf32>
    %166 = vector.shape_cast %165 : vector<7x1x16x16xf32> to vector<7x16x16xf32>
    "tpu.trace_start"() <{level = 10 : i32, message = "hvw,hwc->hvc"}> : () -> ()
    %cst_123 = arith.constant dense<0.000000e+00> : vector<7x7x16xf32>
    %167 = tpu.matmul %103, %166, %cst_123 {dimension_numbers = #tpu.dot_dimension_numbers<[2], [1], [1], [2], [0, 0, 0, 1, 1, 2], [0], [0]>} : vector<7x7x16xf32>, vector<7x16x16xf32>, vector<7x7x16xf32> -> vector<7x7x16xf32>
    "tpu.trace_stop"() : () -> ()
    %c2_124 = arith.constant 2 : index
    %c0_125 = arith.constant 0 : index
    %c0_126 = arith.constant 0 : index
    %c0_127 = arith.constant 0 : index
    %168 = vector.load %arg7[%c2_124, %c0_125, %c0_126, %c0_127] : memref<3x3x16x16xf32, #tpu.memory_space<vmem>>, vector<1x1x16x16xf32>
    %169 = vector.shape_cast %168 : vector<1x1x16x16xf32> to vector<16x16xf32>
    %170 = vector.shape_cast %169 : vector<16x16xf32> to vector<1x16x16xf32>
    %171 = vector.broadcast %170 : vector<1x16x16xf32> to vector<7x16x16xf32>
    "tpu.trace_start"() <{level = 10 : i32, message = "hvc,hco->hvo"}> : () -> ()
    %cst_128 = arith.constant dense<0.000000e+00> : vector<7x7x16xf32>
    %172 = tpu.matmul %167, %171, %cst_128 {dimension_numbers = #tpu.dot_dimension_numbers<[2], [1], [1], [2], [0, 0, 0, 1, 1, 2], [0], [0]>} : vector<7x7x16xf32>, vector<7x16x16xf32>, vector<7x7x16xf32> -> vector<7x7x16xf32>
    "tpu.trace_stop"() : () -> ()
    %173 = arith.addf %162, %172 : vector<7x7x16xf32>
    "tpu.trace_start"() <{level = 10 : i32, message = "hvw,hwc->hvc"}> : () -> ()
    %cst_129 = arith.constant dense<0.000000e+00> : vector<7x7x16xf32>
    %174 = tpu.matmul %107, %166, %cst_129 {dimension_numbers = #tpu.dot_dimension_numbers<[2], [1], [1], [2], [0, 0, 0, 1, 1, 2], [0], [0]>} : vector<7x7x16xf32>, vector<7x16x16xf32>, vector<7x7x16xf32> -> vector<7x7x16xf32>
    "tpu.trace_stop"() : () -> ()
    %c2_130 = arith.constant 2 : index
    %c1_131 = arith.constant 1 : index
    %c0_132 = arith.constant 0 : index
    %c0_133 = arith.constant 0 : index
    %175 = vector.load %arg7[%c2_130, %c1_131, %c0_132, %c0_133] : memref<3x3x16x16xf32, #tpu.memory_space<vmem>>, vector<1x1x16x16xf32>
    %176 = vector.shape_cast %175 : vector<1x1x16x16xf32> to vector<16x16xf32>
    %177 = vector.shape_cast %176 : vector<16x16xf32> to vector<1x16x16xf32>
    %178 = vector.broadcast %177 : vector<1x16x16xf32> to vector<7x16x16xf32>
    "tpu.trace_start"() <{level = 10 : i32, message = "hvc,hco->hvo"}> : () -> ()
    %cst_134 = arith.constant dense<0.000000e+00> : vector<7x7x16xf32>
    %179 = tpu.matmul %174, %178, %cst_134 {dimension_numbers = #tpu.dot_dimension_numbers<[2], [1], [1], [2], [0, 0, 0, 1, 1, 2], [0], [0]>} : vector<7x7x16xf32>, vector<7x16x16xf32>, vector<7x7x16xf32> -> vector<7x7x16xf32>
    "tpu.trace_stop"() : () -> ()
    %180 = arith.addf %173, %179 : vector<7x7x16xf32>
    "tpu.trace_start"() <{level = 10 : i32, message = "hvw,hwc->hvc"}> : () -> ()
    %cst_135 = arith.constant dense<0.000000e+00> : vector<7x7x16xf32>
    %181 = tpu.matmul %111, %166, %cst_135 {dimension_numbers = #tpu.dot_dimension_numbers<[2], [1], [1], [2], [0, 0, 0, 1, 1, 2], [0], [0]>} : vector<7x7x16xf32>, vector<7x16x16xf32>, vector<7x7x16xf32> -> vector<7x7x16xf32>
    "tpu.trace_stop"() : () -> ()
    %c2_136 = arith.constant 2 : index
    %c2_137 = arith.constant 2 : index
    %c0_138 = arith.constant 0 : index
    %c0_139 = arith.constant 0 : index
    %182 = vector.load %arg7[%c2_136, %c2_137, %c0_138, %c0_139] : memref<3x3x16x16xf32, #tpu.memory_space<vmem>>, vector<1x1x16x16xf32>
    %183 = vector.shape_cast %182 : vector<1x1x16x16xf32> to vector<16x16xf32>
    %184 = vector.shape_cast %183 : vector<16x16xf32> to vector<1x16x16xf32>
    %185 = vector.broadcast %184 : vector<1x16x16xf32> to vector<7x16x16xf32>
    "tpu.trace_start"() <{level = 10 : i32, message = "hvc,hco->hvo"}> : () -> ()
    %cst_140 = arith.constant dense<0.000000e+00> : vector<7x7x16xf32>
    %186 = tpu.matmul %181, %185, %cst_140 {dimension_numbers = #tpu.dot_dimension_numbers<[2], [1], [1], [2], [0, 0, 0, 1, 1, 2], [0], [0]>} : vector<7x7x16xf32>, vector<7x16x16xf32>, vector<7x7x16xf32> -> vector<7x7x16xf32>
    "tpu.trace_stop"() : () -> ()
    %187 = arith.addf %180, %186 : vector<7x7x16xf32>
    %c0_141 = arith.constant 0 : index
    %c0_142 = arith.constant 0 : index
    %188 = vector.load %arg8[%c0_141, %c0_142] : memref<1x16xf32, #tpu.memory_space<vmem>>, vector<1x16xf32>
    %189 = vector.shape_cast %188 : vector<1x16xf32> to vector<1x1x16xf32>
    %190 = vector.broadcast %189 : vector<1x1x16xf32> to vector<7x7x16xf32>
    %191 = arith.addf %187, %190 : vector<7x7x16xf32>
    %cst_143 = arith.constant 0.000000e+00 : f32
    %192 = vector.broadcast %cst_143 : f32 to vector<7x7x16xf32>
    %193 = arith.maximumf %191, %192 : vector<7x7x16xf32>
    %cst_144 = arith.constant 0.000000e+00 : f32
    %194 = vector.broadcast %cst_144 : f32 to vector<10x10x16xf32>
    %c0_145 = arith.constant 0 : index
    %c0_146 = arith.constant 0 : index
    %c0_147 = arith.constant 0 : index
    %195 = vector.load %arg13[%c0_145, %c0_146, %c0_147] : memref<10x10x16xf32, #tpu.memory_space<vmem>>, vector<10x10x16xf32>
    tpu.vector_store %arg13[%c0_145, %c0_146, %c0_147], %194 {strides = array<i32>} : memref<10x10x16xf32, #tpu.memory_space<vmem>>, vector<10x10x16xf32>,
    %c1_148 = arith.constant 1 : index
    %c1_149 = arith.constant 1 : index
    %c0_150 = arith.constant 0 : index
    %196 = vector.load %arg13[%c1_148, %c1_149, %c0_150] : memref<10x10x16xf32, #tpu.memory_space<vmem>>, vector<7x7x16xf32>
    tpu.vector_store %arg13[%c1_148, %c1_149, %c0_150], %193 {strides = array<i32>} : memref<10x10x16xf32, #tpu.memory_space<vmem>>, vector<7x7x16xf32>,
    %c0_151 = arith.constant 0 : index
    %c0_152 = arith.constant 0 : index
    %c0_153 = arith.constant 0 : index
    %197 = vector.load %arg13[%c0_151, %c0_152, %c0_153] : memref<10x10x16xf32, #tpu.memory_space<vmem>>, vector<10x10x16xf32>
    %c0_154 = arith.constant 0 : index
    %c0_155 = arith.constant 0 : index
    %c0_156 = arith.constant 0 : index
    %198 = vector.load %arg4[%c0_154, %c0_155, %c0_156] : memref<3x4x10xf32, #tpu.memory_space<vmem>>, vector<1x4x10xf32>
    %199 = vector.shape_cast %198 : vector<1x4x10xf32> to vector<4x10xf32>
    %200 = vector.shape_cast %199 : vector<4x10xf32> to vector<1x4x10xf32>
    %201 = vector.broadcast %200 : vector<1x4x10xf32> to vector<4x4x10xf32>
    %c1_157 = arith.constant 1 : index
    %c0_158 = arith.constant 0 : index
    %c0_159 = arith.constant 0 : index
    %202 = vector.load %arg4[%c1_157, %c0_158, %c0_159] : memref<3x4x10xf32, #tpu.memory_space<vmem>>, vector<1x4x10xf32>
    %203 = vector.shape_cast %202 : vector<1x4x10xf32> to vector<4x10xf32>
    %204 = vector.shape_cast %203 : vector<4x10xf32> to vector<1x4x10xf32>
    %205 = vector.broadcast %204 : vector<1x4x10xf32> to vector<4x4x10xf32>
    %c2_160 = arith.constant 2 : index
    %c0_161 = arith.constant 0 : index
    %c0_162 = arith.constant 0 : index
    %206 = vector.load %arg4[%c2_160, %c0_161, %c0_162] : memref<3x4x10xf32, #tpu.memory_space<vmem>>, vector<1x4x10xf32>
    %207 = vector.shape_cast %206 : vector<1x4x10xf32> to vector<4x10xf32>
    %208 = vector.shape_cast %207 : vector<4x10xf32> to vector<1x4x10xf32>
    %209 = vector.broadcast %208 : vector<1x4x10xf32> to vector<4x4x10xf32>
    %cst_163 = arith.constant 0.000000e+00 : f32
    %210 = vector.broadcast %cst_163 : f32 to vector<4x4x10xf32>
    %211 = vector.extract_strided_slice %197 {offsets = [0, 0, 0], sizes = [8, 10, 16], strides = [1, 1, 1]} : vector<10x10x16xf32> to vector<8x10x16xf32>
    %212 = vector.shape_cast %211 : vector<8x10x16xf32> to vector<4x2x10x16xf32>
    %213 = vector.extract_strided_slice %212 {offsets = [0, 0, 0, 0], sizes = [4, 1, 10, 16], strides = [1, 1, 1, 1]} : vector<4x2x10x16xf32> to vector<4x1x10x16xf32>
    %214 = vector.shape_cast %213 : vector<4x1x10x16xf32> to vector<4x10x16xf32>
    "tpu.trace_start"() <{level = 10 : i32, message = "hvw,hwc->hvc"}> : () -> ()
    %cst_164 = arith.constant dense<0.000000e+00> : vector<4x4x16xf32>
    %215 = tpu.matmul %201, %214, %cst_164 {dimension_numbers = #tpu.dot_dimension_numbers<[2], [1], [1], [2], [0, 0, 0, 1, 1, 2], [0], [0]>} : vector<4x4x10xf32>, vector<4x10x16xf32>, vector<4x4x16xf32> -> vector<4x4x16xf32>
    "tpu.trace_stop"() : () -> ()
    %c0_165 = arith.constant 0 : index
    %c0_166 = arith.constant 0 : index
    %c0_167 = arith.constant 0 : index
    %c0_168 = arith.constant 0 : index
    %216 = vector.load %arg9[%c0_165, %c0_166, %c0_167, %c0_168] : memref<3x3x16x10xf32, #tpu.memory_space<vmem>>, vector<1x1x16x10xf32>
    %217 = vector.shape_cast %216 : vector<1x1x16x10xf32> to vector<16x10xf32>
    %218 = vector.shape_cast %217 : vector<16x10xf32> to vector<1x16x10xf32>
    %219 = vector.broadcast %218 : vector<1x16x10xf32> to vector<4x16x10xf32>
    "tpu.trace_start"() <{level = 10 : i32, message = "hvc,hco->hvo"}> : () -> ()
    %cst_169 = arith.constant dense<0.000000e+00> : vector<4x4x10xf32>
    %220 = tpu.matmul %215, %219, %cst_169 {dimension_numbers = #tpu.dot_dimension_numbers<[2], [1], [1], [2], [0, 0, 0, 1, 1, 2], [0], [0]>} : vector<4x4x16xf32>, vector<4x16x10xf32>, vector<4x4x10xf32> -> vector<4x4x10xf32>
    "tpu.trace_stop"() : () -> ()
    %221 = arith.addf %210, %220 : vector<4x4x10xf32>
    "tpu.trace_start"() <{level = 10 : i32, message = "hvw,hwc->hvc"}> : () -> ()
    %cst_170 = arith.constant dense<0.000000e+00> : vector<4x4x16xf32>
    %222 = tpu.matmul %205, %214, %cst_170 {dimension_numbers = #tpu.dot_dimension_numbers<[2], [1], [1], [2], [0, 0, 0, 1, 1, 2], [0], [0]>} : vector<4x4x10xf32>, vector<4x10x16xf32>, vector<4x4x16xf32> -> vector<4x4x16xf32>
    "tpu.trace_stop"() : () -> ()
    %c0_171 = arith.constant 0 : index
    %c1_172 = arith.constant 1 : index
    %c0_173 = arith.constant 0 : index
    %c0_174 = arith.constant 0 : index
    %223 = vector.load %arg9[%c0_171, %c1_172, %c0_173, %c0_174] : memref<3x3x16x10xf32, #tpu.memory_space<vmem>>, vector<1x1x16x10xf32>
    %224 = vector.shape_cast %223 : vector<1x1x16x10xf32> to vector<16x10xf32>
    %225 = vector.shape_cast %224 : vector<16x10xf32> to vector<1x16x10xf32>
    %226 = vector.broadcast %225 : vector<1x16x10xf32> to vector<4x16x10xf32>
    "tpu.trace_start"() <{level = 10 : i32, message = "hvc,hco->hvo"}> : () -> ()
    %cst_175 = arith.constant dense<0.000000e+00> : vector<4x4x10xf32>
    %227 = tpu.matmul %222, %226, %cst_175 {dimension_numbers = #tpu.dot_dimension_numbers<[2], [1], [1], [2], [0, 0, 0, 1, 1, 2], [0], [0]>} : vector<4x4x16xf32>, vector<4x16x10xf32>, vector<4x4x10xf32> -> vector<4x4x10xf32>
    "tpu.trace_stop"() : () -> ()
    %228 = arith.addf %221, %227 : vector<4x4x10xf32>
    "tpu.trace_start"() <{level = 10 : i32, message = "hvw,hwc->hvc"}> : () -> ()
    %cst_176 = arith.constant dense<0.000000e+00> : vector<4x4x16xf32>
    %229 = tpu.matmul %209, %214, %cst_176 {dimension_numbers = #tpu.dot_dimension_numbers<[2], [1], [1], [2], [0, 0, 0, 1, 1, 2], [0], [0]>} : vector<4x4x10xf32>, vector<4x10x16xf32>, vector<4x4x16xf32> -> vector<4x4x16xf32>
    "tpu.trace_stop"() : () -> ()
    %c0_177 = arith.constant 0 : index
    %c2_178 = arith.constant 2 : index
    %c0_179 = arith.constant 0 : index
    %c0_180 = arith.constant 0 : index
    %230 = vector.load %arg9[%c0_177, %c2_178, %c0_179, %c0_180] : memref<3x3x16x10xf32, #tpu.memory_space<vmem>>, vector<1x1x16x10xf32>
    %231 = vector.shape_cast %230 : vector<1x1x16x10xf32> to vector<16x10xf32>
    %232 = vector.shape_cast %231 : vector<16x10xf32> to vector<1x16x10xf32>
    %233 = vector.broadcast %232 : vector<1x16x10xf32> to vector<4x16x10xf32>
    "tpu.trace_start"() <{level = 10 : i32, message = "hvc,hco->hvo"}> : () -> ()
    %cst_181 = arith.constant dense<0.000000e+00> : vector<4x4x10xf32>
    %234 = tpu.matmul %229, %233, %cst_181 {dimension_numbers = #tpu.dot_dimension_numbers<[2], [1], [1], [2], [0, 0, 0, 1, 1, 2], [0], [0]>} : vector<4x4x16xf32>, vector<4x16x10xf32>, vector<4x4x10xf32> -> vector<4x4x10xf32>
    "tpu.trace_stop"() : () -> ()
    %235 = arith.addf %228, %234 : vector<4x4x10xf32>
    %236 = vector.extract_strided_slice %197 {offsets = [1, 0, 0], sizes = [8, 10, 16], strides = [1, 1, 1]} : vector<10x10x16xf32> to vector<8x10x16xf32>
    %237 = vector.shape_cast %236 : vector<8x10x16xf32> to vector<4x2x10x16xf32>
    %238 = vector.extract_strided_slice %237 {offsets = [0, 0, 0, 0], sizes = [4, 1, 10, 16], strides = [1, 1, 1, 1]} : vector<4x2x10x16xf32> to vector<4x1x10x16xf32>
    %239 = vector.shape_cast %238 : vector<4x1x10x16xf32> to vector<4x10x16xf32>
    "tpu.trace_start"() <{level = 10 : i32, message = "hvw,hwc->hvc"}> : () -> ()
    %cst_182 = arith.constant dense<0.000000e+00> : vector<4x4x16xf32>
    %240 = tpu.matmul %201, %239, %cst_182 {dimension_numbers = #tpu.dot_dimension_numbers<[2], [1], [1], [2], [0, 0, 0, 1, 1, 2], [0], [0]>} : vector<4x4x10xf32>, vector<4x10x16xf32>, vector<4x4x16xf32> -> vector<4x4x16xf32>
    "tpu.trace_stop"() : () -> ()
    %c1_183 = arith.constant 1 : index
    %c0_184 = arith.constant 0 : index
    %c0_185 = arith.constant 0 : index
    %c0_186 = arith.constant 0 : index
    %241 = vector.load %arg9[%c1_183, %c0_184, %c0_185, %c0_186] : memref<3x3x16x10xf32, #tpu.memory_space<vmem>>, vector<1x1x16x10xf32>
    %242 = vector.shape_cast %241 : vector<1x1x16x10xf32> to vector<16x10xf32>
    %243 = vector.shape_cast %242 : vector<16x10xf32> to vector<1x16x10xf32>
    %244 = vector.broadcast %243 : vector<1x16x10xf32> to vector<4x16x10xf32>
    "tpu.trace_start"() <{level = 10 : i32, message = "hvc,hco->hvo"}> : () -> ()
    %cst_187 = arith.constant dense<0.000000e+00> : vector<4x4x10xf32>
    %245 = tpu.matmul %240, %244, %cst_187 {dimension_numbers = #tpu.dot_dimension_numbers<[2], [1], [1], [2], [0, 0, 0, 1, 1, 2], [0], [0]>} : vector<4x4x16xf32>, vector<4x16x10xf32>, vector<4x4x10xf32> -> vector<4x4x10xf32>
    "tpu.trace_stop"() : () -> ()
    %246 = arith.addf %235, %245 : vector<4x4x10xf32>
    "tpu.trace_start"() <{level = 10 : i32, message = "hvw,hwc->hvc"}> : () -> ()
    %cst_188 = arith.constant dense<0.000000e+00> : vector<4x4x16xf32>
    %247 = tpu.matmul %205, %239, %cst_188 {dimension_numbers = #tpu.dot_dimension_numbers<[2], [1], [1], [2], [0, 0, 0, 1, 1, 2], [0], [0]>} : vector<4x4x10xf32>, vector<4x10x16xf32>, vector<4x4x16xf32> -> vector<4x4x16xf32>
    "tpu.trace_stop"() : () -> ()
    %c1_189 = arith.constant 1 : index
    %c1_190 = arith.constant 1 : index
    %c0_191 = arith.constant 0 : index
    %c0_192 = arith.constant 0 : index
    %248 = vector.load %arg9[%c1_189, %c1_190, %c0_191, %c0_192] : memref<3x3x16x10xf32, #tpu.memory_space<vmem>>, vector<1x1x16x10xf32>
    %249 = vector.shape_cast %248 : vector<1x1x16x10xf32> to vector<16x10xf32>
    %250 = vector.shape_cast %249 : vector<16x10xf32> to vector<1x16x10xf32>
    %251 = vector.broadcast %250 : vector<1x16x10xf32> to vector<4x16x10xf32>
    "tpu.trace_start"() <{level = 10 : i32, message = "hvc,hco->hvo"}> : () -> ()
    %cst_193 = arith.constant dense<0.000000e+00> : vector<4x4x10xf32>
    %252 = tpu.matmul %247, %251, %cst_193 {dimension_numbers = #tpu.dot_dimension_numbers<[2], [1], [1], [2], [0, 0, 0, 1, 1, 2], [0], [0]>} : vector<4x4x16xf32>, vector<4x16x10xf32>, vector<4x4x10xf32> -> vector<4x4x10xf32>
    "tpu.trace_stop"() : () -> ()
    %253 = arith.addf %246, %252 : vector<4x4x10xf32>
    "tpu.trace_start"() <{level = 10 : i32, message = "hvw,hwc->hvc"}> : () -> ()
    %cst_194 = arith.constant dense<0.000000e+00> : vector<4x4x16xf32>
    %254 = tpu.matmul %209, %239, %cst_194 {dimension_numbers = #tpu.dot_dimension_numbers<[2], [1], [1], [2], [0, 0, 0, 1, 1, 2], [0], [0]>} : vector<4x4x10xf32>, vector<4x10x16xf32>, vector<4x4x16xf32> -> vector<4x4x16xf32>
    "tpu.trace_stop"() : () -> ()
    %c1_195 = arith.constant 1 : index
    %c2_196 = arith.constant 2 : index
    %c0_197 = arith.constant 0 : index
    %c0_198 = arith.constant 0 : index
    %255 = vector.load %arg9[%c1_195, %c2_196, %c0_197, %c0_198] : memref<3x3x16x10xf32, #tpu.memory_space<vmem>>, vector<1x1x16x10xf32>
    %256 = vector.shape_cast %255 : vector<1x1x16x10xf32> to vector<16x10xf32>
    %257 = vector.shape_cast %256 : vector<16x10xf32> to vector<1x16x10xf32>
    %258 = vector.broadcast %257 : vector<1x16x10xf32> to vector<4x16x10xf32>
    "tpu.trace_start"() <{level = 10 : i32, message = "hvc,hco->hvo"}> : () -> ()
    %cst_199 = arith.constant dense<0.000000e+00> : vector<4x4x10xf32>
    %259 = tpu.matmul %254, %258, %cst_199 {dimension_numbers = #tpu.dot_dimension_numbers<[2], [1], [1], [2], [0, 0, 0, 1, 1, 2], [0], [0]>} : vector<4x4x16xf32>, vector<4x16x10xf32>, vector<4x4x10xf32> -> vector<4x4x10xf32>
    "tpu.trace_stop"() : () -> ()
    %260 = arith.addf %253, %259 : vector<4x4x10xf32>
    %261 = vector.extract_strided_slice %197 {offsets = [2, 0, 0], sizes = [8, 10, 16], strides = [1, 1, 1]} : vector<10x10x16xf32> to vector<8x10x16xf32>
    %262 = vector.shape_cast %261 : vector<8x10x16xf32> to vector<4x2x10x16xf32>
    %263 = vector.extract_strided_slice %262 {offsets = [0, 0, 0, 0], sizes = [4, 1, 10, 16], strides = [1, 1, 1, 1]} : vector<4x2x10x16xf32> to vector<4x1x10x16xf32>
    %264 = vector.shape_cast %263 : vector<4x1x10x16xf32> to vector<4x10x16xf32>
    "tpu.trace_start"() <{level = 10 : i32, message = "hvw,hwc->hvc"}> : () -> ()
    %cst_200 = arith.constant dense<0.000000e+00> : vector<4x4x16xf32>
    %265 = tpu.matmul %201, %264, %cst_200 {dimension_numbers = #tpu.dot_dimension_numbers<[2], [1], [1], [2], [0, 0, 0, 1, 1, 2], [0], [0]>} : vector<4x4x10xf32>, vector<4x10x16xf32>, vector<4x4x16xf32> -> vector<4x4x16xf32>
    "tpu.trace_stop"() : () -> ()
    %c2_201 = arith.constant 2 : index
    %c0_202 = arith.constant 0 : index
    %c0_203 = arith.constant 0 : index
    %c0_204 = arith.constant 0 : index
    %266 = vector.load %arg9[%c2_201, %c0_202, %c0_203, %c0_204] : memref<3x3x16x10xf32, #tpu.memory_space<vmem>>, vector<1x1x16x10xf32>
    %267 = vector.shape_cast %266 : vector<1x1x16x10xf32> to vector<16x10xf32>
    %268 = vector.shape_cast %267 : vector<16x10xf32> to vector<1x16x10xf32>
    %269 = vector.broadcast %268 : vector<1x16x10xf32> to vector<4x16x10xf32>
    "tpu.trace_start"() <{level = 10 : i32, message = "hvc,hco->hvo"}> : () -> ()
    %cst_205 = arith.constant dense<0.000000e+00> : vector<4x4x10xf32>
    %270 = tpu.matmul %265, %269, %cst_205 {dimension_numbers = #tpu.dot_dimension_numbers<[2], [1], [1], [2], [0, 0, 0, 1, 1, 2], [0], [0]>} : vector<4x4x16xf32>, vector<4x16x10xf32>, vector<4x4x10xf32> -> vector<4x4x10xf32>
    "tpu.trace_stop"() : () -> ()
    %271 = arith.addf %260, %270 : vector<4x4x10xf32>
    "tpu.trace_start"() <{level = 10 : i32, message = "hvw,hwc->hvc"}> : () -> ()
    %cst_206 = arith.constant dense<0.000000e+00> : vector<4x4x16xf32>
    %272 = tpu.matmul %205, %264, %cst_206 {dimension_numbers = #tpu.dot_dimension_numbers<[2], [1], [1], [2], [0, 0, 0, 1, 1, 2], [0], [0]>} : vector<4x4x10xf32>, vector<4x10x16xf32>, vector<4x4x16xf32> -> vector<4x4x16xf32>
    "tpu.trace_stop"() : () -> ()
    %c2_207 = arith.constant 2 : index
    %c1_208 = arith.constant 1 : index
    %c0_209 = arith.constant 0 : index
    %c0_210 = arith.constant 0 : index
    %273 = vector.load %arg9[%c2_207, %c1_208, %c0_209, %c0_210] : memref<3x3x16x10xf32, #tpu.memory_space<vmem>>, vector<1x1x16x10xf32>
    %274 = vector.shape_cast %273 : vector<1x1x16x10xf32> to vector<16x10xf32>
    %275 = vector.shape_cast %274 : vector<16x10xf32> to vector<1x16x10xf32>
    %276 = vector.broadcast %275 : vector<1x16x10xf32> to vector<4x16x10xf32>
    "tpu.trace_start"() <{level = 10 : i32, message = "hvc,hco->hvo"}> : () -> ()
    %cst_211 = arith.constant dense<0.000000e+00> : vector<4x4x10xf32>
    %277 = tpu.matmul %272, %276, %cst_211 {dimension_numbers = #tpu.dot_dimension_numbers<[2], [1], [1], [2], [0, 0, 0, 1, 1, 2], [0], [0]>} : vector<4x4x16xf32>, vector<4x16x10xf32>, vector<4x4x10xf32> -> vector<4x4x10xf32>
    "tpu.trace_stop"() : () -> ()
    %278 = arith.addf %271, %277 : vector<4x4x10xf32>
    "tpu.trace_start"() <{level = 10 : i32, message = "hvw,hwc->hvc"}> : () -> ()
    %cst_212 = arith.constant dense<0.000000e+00> : vector<4x4x16xf32>
    %279 = tpu.matmul %209, %264, %cst_212 {dimension_numbers = #tpu.dot_dimension_numbers<[2], [1], [1], [2], [0, 0, 0, 1, 1, 2], [0], [0]>} : vector<4x4x10xf32>, vector<4x10x16xf32>, vector<4x4x16xf32> -> vector<4x4x16xf32>
    "tpu.trace_stop"() : () -> ()
    %c2_213 = arith.constant 2 : index
    %c2_214 = arith.constant 2 : index
    %c0_215 = arith.constant 0 : index
    %c0_216 = arith.constant 0 : index
    %280 = vector.load %arg9[%c2_213, %c2_214, %c0_215, %c0_216] : memref<3x3x16x10xf32, #tpu.memory_space<vmem>>, vector<1x1x16x10xf32>
    %281 = vector.shape_cast %280 : vector<1x1x16x10xf32> to vector<16x10xf32>
    %282 = vector.shape_cast %281 : vector<16x10xf32> to vector<1x16x10xf32>
    %283 = vector.broadcast %282 : vector<1x16x10xf32> to vector<4x16x10xf32>
    "tpu.trace_start"() <{level = 10 : i32, message = "hvc,hco->hvo"}> : () -> ()
    %cst_217 = arith.constant dense<0.000000e+00> : vector<4x4x10xf32>
    %284 = tpu.matmul %279, %283, %cst_217 {dimension_numbers = #tpu.dot_dimension_numbers<[2], [1], [1], [2], [0, 0, 0, 1, 1, 2], [0], [0]>} : vector<4x4x16xf32>, vector<4x16x10xf32>, vector<4x4x10xf32> -> vector<4x4x10xf32>
    "tpu.trace_stop"() : () -> ()
    %285 = arith.addf %278, %284 : vector<4x4x10xf32>
    %c0_218 = arith.constant 0 : index
    %c0_219 = arith.constant 0 : index
    %286 = vector.load %arg10[%c0_218, %c0_219] : memref<1x10xf32, #tpu.memory_space<vmem>>, vector<1x10xf32>
    %287 = vector.shape_cast %286 : vector<1x10xf32> to vector<1x1x10xf32>
    %288 = vector.broadcast %287 : vector<1x1x10xf32> to vector<4x4x10xf32>
    %289 = arith.addf %285, %288 : vector<4x4x10xf32>
    %cst_220 = arith.constant 0.000000e+00 : f32
    %290 = vector.broadcast %cst_220 : f32 to vector<4x4x10xf32>
    %291 = arith.maximumf %289, %290 : vector<4x4x10xf32>
    %cst_221 = arith.constant dense<0.000000e+00> : vector<4x10xf32>
    %292 = vector.multi_reduction <add>, %291, %cst_221 [0] : vector<4x4x10xf32> to vector<4x10xf32>
    %cst_222 = arith.constant 4.000000e+00 : f32
    %293 = vector.broadcast %cst_222 : f32 to vector<4x10xf32>
    %294 = arith.divf %292, %293 : vector<4x10xf32>
    %cst_223 = arith.constant dense<0.000000e+00> : vector<10xf32>
    %295 = vector.multi_reduction <add>, %294, %cst_223 [0] : vector<4x10xf32> to vector<10xf32>
    %296 = vector.shape_cast %295 : vector<10xf32> to vector<1x10xf32>
    %cst_224 = arith.constant 4.000000e+00 : f32
    %297 = vector.broadcast %cst_224 : f32 to vector<1x10xf32>
    %298 = arith.divf %296, %297 : vector<1x10xf32>
    %c0_225 = arith.constant 0 : index
    %c0_226 = arith.constant 0 : index
    %c0_227 = arith.constant 0 : index
    %299 = vector.load %arg11[%c0_225, %c0_226, %c0_227] : memref<1x1x10xf32, #tpu.memory_space<vmem>>, vector<1x1x10xf32>
    %300 = vector.shape_cast %299 : vector<1x1x10xf32> to vector<1x10xf32>
    %301 = vector.shape_cast %298 : vector<1x10xf32> to vector<1x1x10xf32>
    tpu.vector_store %arg11[%c0_225, %c0_226, %c0_227], %301 {strides = array<i32>} : memref<1x1x10xf32, #tpu.memory_space<vmem>>, vector<1x1x10xf32>,
    return
  }
  func.func @transform_0(%arg0: i32) -> (i32, i32, i32, i32) {
    %c0_i32 = arith.constant 0 : i32
    %c0_i32_0 = arith.constant 0 : i32
    %c0_i32_1 = arith.constant 0 : i32
    %c0_i32_2 = arith.constant 0 : i32
    return %arg0, %c0_i32, %c0_i32_0, %c0_i32_1 : i32, i32, i32, i32
  }
  func.func @transform_1(%arg0: i32) -> (i32, i32, i32) {
    %c0_i32 = arith.constant 0 : i32
    %c0_i32_0 = arith.constant 0 : i32
    %c0_i32_1 = arith.constant 0 : i32
    %c0_i32_2 = arith.constant 0 : i32
    return %c0_i32, %c0_i32_0, %c0_i32_1 : i32, i32, i32
  }
  func.func @transform_2(%arg0: i32) -> (i32, i32, i32) {
    %c0_i32 = arith.constant 0 : i32
    %c0_i32_0 = arith.constant 0 : i32
    %c0_i32_1 = arith.constant 0 : i32
    %c0_i32_2 = arith.constant 0 : i32
    return %c0_i32, %c0_i32_0, %c0_i32_1 : i32, i32, i32
  }
  func.func @transform_3(%arg0: i32) -> (i32, i32, i32) {
    %c0_i32 = arith.constant 0 : i32
    %c0_i32_0 = arith.constant 0 : i32
    %c0_i32_1 = arith.constant 0 : i32
    %c0_i32_2 = arith.constant 0 : i32
    return %c0_i32, %c0_i32_0, %c0_i32_1 : i32, i32, i32
  }
  func.func @transform_4(%arg0: i32) -> (i32, i32, i32, i32) {
    %c0_i32 = arith.constant 0 : i32
    %c0_i32_0 = arith.constant 0 : i32
    %c0_i32_1 = arith.constant 0 : i32
    %c0_i32_2 = arith.constant 0 : i32
    %c0_i32_3 = arith.constant 0 : i32
    return %c0_i32, %c0_i32_0, %c0_i32_1, %c0_i32_2 : i32, i32, i32, i32
  }
  func.func @transform_5(%arg0: i32) -> (i32, i32) {
    %c0_i32 = arith.constant 0 : i32
    %c0_i32_0 = arith.constant 0 : i32
    %c0_i32_1 = arith.constant 0 : i32
    return %c0_i32, %c0_i32_0 : i32, i32
  }
  func.func @transform_6(%arg0: i32) -> (i32, i32, i32, i32) {
    %c0_i32 = arith.constant 0 : i32
    %c0_i32_0 = arith.constant 0 : i32
    %c0_i32_1 = arith.constant 0 : i32
    %c0_i32_2 = arith.constant 0 : i32
    %c0_i32_3 = arith.constant 0 : i32
    return %c0_i32, %c0_i32_0, %c0_i32_1, %c0_i32_2 : i32, i32, i32, i32
  }
  func.func @transform_7(%arg0: i32) -> (i32, i32) {
    %c0_i32 = arith.constant 0 : i32
    %c0_i32_0 = arith.constant 0 : i32
    %c0_i32_1 = arith.constant 0 : i32
    return %c0_i32, %c0_i32_0 : i32, i32
  }
  func.func @transform_8(%arg0: i32) -> (i32, i32, i32, i32) {
    %c0_i32 = arith.constant 0 : i32
    %c0_i32_0 = arith.constant 0 : i32
    %c0_i32_1 = arith.constant 0 : i32
    %c0_i32_2 = arith.constant 0 : i32
    %c0_i32_3 = arith.constant 0 : i32
    return %c0_i32, %c0_i32_0, %c0_i32_1, %c0_i32_2 : i32, i32, i32, i32
  }
  func.func @transform_9(%arg0: i32) -> (i32, i32) {
    %c0_i32 = arith.constant 0 : i32
    %c0_i32_0 = arith.constant 0 : i32
    %c0_i32_1 = arith.constant 0 : i32
    return %c0_i32, %c0_i32_0 : i32, i32
  }
  func.func @transform_10(%arg0: i32) -> (i32, i32, i32) {
    %c0_i32 = arith.constant 0 : i32
    %c0_i32_0 = arith.constant 0 : i32
    %c0_i32_1 = arith.constant 0 : i32
    return %arg0, %c0_i32, %c0_i32_0 : i32, i32, i32
  }
}

</mosaic_0001>

<bundles_post_ra>
// kernel: mnist_cnn_forward.1
= control target key start
LH: loop header
LB: loop body
LE: loop exit
PB: predicated region body
PF: predicated region fallthrough
CT: control target
= control target key end

     0   :  { %15 = vsyncpa [#allocation5], 0  ;;  %s40620_s0 = inlined_call_operand.vmem [shape: f32[2,30,30,8], index: 0, kind: input, shape index: {}]   ;;  %s40621_s1 = inlined_call_operand.vmem [shape: f32[3,14,30], index: 1, kind: input, shape index: {}]   ;;  %s40622_s2 = inlined_call_operand.vmem [shape: f32[3,7,16], index: 2, kind: input, shape index: {}]   ;;  %s40623_s3 = inlined_call_operand.vmem [shape: f32[3,4,10], index: 3, kind: input, shape index: {}]   ;;  %s40624_s4 = inlined_call_operand.vmem [shape: f32[3,3,8,16], index: 4, kind: input, shape index: {}]   ;;  %s40625_s5 = inlined_call_operand.vmem [shape: f32[1,16], index: 5, kind: input, shape index: {}]   ;;  %s40626_s6 = inlined_call_operand.vmem [shape: f32[3,3,16,16], index: 6, kind: input, shape index: {}]   ;;  %s40627_s7 = inlined_call_operand.vmem [shape: f32[1,16], index: 7, kind: input, shape index: {}]   ;;  %s40628_s8 = inlined_call_operand.vmem [shape: f32[3,3,16,10], index: 8, kind: input, shape index: {}]   ;;  %s40629_s9 = inlined_call_operand.vmem [shape: f32[1,10], index: 9, kind: input, shape index: {}]   ;;  %s40630_s10 = inlined_call_operand.hbm [shape: f32[2,1,10], index: 10, kind: output, shape index: {}]  }
   0x1   :  { %17 = vsyncpa [#allocation5 + $0x1], 0  ;;  %s36779_s13 = smov 0   ;;  %s36781_s14 = smov 0  }
   0x2   :  { %s36783_s15 = smov 0   ;;  %s36785_s16 = smov 0  }
   0x3 LB: > { %s36800_s17 = sadd.s32 4294967295, %s36717_s16   ;;  %s29999_s18 = sadd.s32 4294967294, %s36717_s16   ;;  %s36717_s16 = sphi %s36785_s16, %s40803_s16   ;;  %s36713_s15 = sphi %s36783_s15, %s40802_s15   ;;  %s36709_s14 = sphi %s36781_s14, %s40801_s14   ;;  %s36705_s13 = sphi %s36779_s13, %s40800_s13  }
   0x4   : > { %s36804_s19 = sadd.s32 1, %s36717_s16   ;;  %s245_s20 = sadd.s32 1, %s36713_s15 }
   0x5   : > { %s242_s21 = ssub.s32 %s36717_s16, %s36804_s19  ;;  %p255_p0 = scmp.ne.s32.totalorder %s36713_s15, %s36709_s14 }
   0x6   : > { %p243_p1 = scmp.eq.s32.totalorder %s242_s21, 0  ;;  %p256_p2 = scmp.eq.s32.totalorder %s36800_s17, 1 }
   0x7   : > { %p261_p3 = scmp.ne.s32.totalorder %s36709_s14, %s36705_s13  ;;  %p262_p4 = scmp.eq.s32.totalorder %s29999_s18, 1 }
   0x8   : > { %s36815_s22 = scalar_select %p243_p1, %s36713_s15, %s245_s20  }
   0x9   : > { %p36817_p5 = por %p256_p2, %p255_p0  ;;  %p36821_p6 = por %p262_p4, %p261_p3 }
   0xa   : > { %p30002_p7 = scmp.ge.s32.totalorder %s36717_s16, 1  ;;  %p315_p8 = scmp.lt.s32.totalorder %s36717_s16, 3 }
   0xc   : > { %p316_p9 = pnand %p30002_p7, %p315_p8 }
   0xe   : > { %319 = sbr.rel (%p316_p9) target bundleno = 5378 (0x1502), region = 60 }
  0x15   : > { %p352_p10 = scmp.lt.s32.totalorder %s36800_s17, 1  ;;  %v36831_v0 = vld [vmem:[%s40621_s1] sm:$0xff]  ;;  %vm481_vm0 = vcmask 244736   ;;  %vm488_vm1 = vcmask 1045504   ;;  %vm36719_vm2 = vmmov 1   ;;  %vm2640_vm4 = vcmask 64512  }
  0x16   : > { %32190 = vmatprep.mubr.msk.f32.mxu0 %vm481_vm0, %v36831_v0  ;;  %32201 = vmatprep.mubr.msk.f32.mxu1 %vm481_vm0, %v36831_v0  ;;  %vm36844_vm3 = vmpackc.low %vm488_vm1, %vm36719_vm2  ;;  %v36892_v24 = vld [vmem:[%s40621_s1 + $0x8] sm:$0x3f]  ;;  %vm17362_vm5 = vcmask 130048   ;;  %vm17397_vm6 = vcmask 128000   ;;  %vm36722_vm7 = vmmov 0   ;;  %vm25261_vm8 = vcmask 123904  }
  0x17   : > { %s353_s27 = scalar_select %p352_p10, %s36800_s17, 1  ;;  %vm25317_vm9 = vcmask 1041408   ;;  %vm25313_vm11 = vcmask 80896   ;;  %vm25282_vm12 = vcmask 129024   ;;  %vm29911_vm13 = vcmask 76800  }
  0x18   : > { %vm39966_vm10 = vmpackc.low %vm25317_vm9, %vm36719_vm2  ;;  %s350_s12 = sand.u32 1, %s36709_s14   ;;  %s30766_s18 = sshll.u32 %s36800_s17, 4  ;;  %vm29929_vm14 = vcmask 73728  }
  0x19   : > { %s36600_s28 = smul.u32 960, %s353_s27  ;;  %s351_s20 = scalar_lea.vmem [#allocation4], %s350_s12 }
  0x1a   : > { %s29944_s21 = sshll.u32 %s351_s20, 4  ;;  %s29932_s27 = scalar_lea.sflag [#allocation5], %s350_s12  ;;  %s40580_s21 = int_to_ptr.vmem [resolvable:$true] %s29944_s21 }
  0x1b   : > { %s36841_s11 = scalar_lea.vmem %s40620_s0, %s36600_s28  ;;  %s36655_s28 = scalar_lea.vmem %s40580_s21, 16 }
  0x1c   : > { %v357_v2 = vld [vmem:[%s36841_s11] sm:$0xff]  ;;  %v358_v3 = vld [vmem:[%s36841_s11 + $0x8] sm:$0xff]  ;;  %v359_v7 = vld [vmem:[%s36841_s11 + $0x10] sm:$0xff]  ;;  %p36656_p11 = scmp.ne.s32.totalorder %s40580_s21, %s36655_s28  ;;  %s36723_s17 = smov [#allocation4]  }
  0x1d   : > { %v365_v4 = vld [vmem:[%s36841_s11 + $0x40] sm:$0xff]  ;;  %v36851_v5 = vpack.c.bf16 %v358_v3, %v357_v2  ;;  %v366_v6 = vld [vmem:[%s36841_s11 + $0x48] sm:$0xff]  ;;  %v360_v8 = vld [vmem:[%s36841_s11 + $0x18] sm:$0x3f]  ;;  %s36659_s29 = sshll.u32 %s36723_s17, 4  ;;  %s36660_s29 = int_to_ptr.vmem [resolvable:$false] %s36659_s29 }
  0x1e   : > { %v36856_v9 = vpack.c.bf16 %v366_v6, %v365_v4  ;;  %v36858_v10 = vpack.c.bf16 %v360_v8, %v359_v7  ;;  %v367_v11 = vld [vmem:[%s36841_s11 + $0x50] sm:$0xff]  ;;  %v368_v12 = vld [vmem:[%s36841_s11 + $0x58] sm:$0x3f]  ;;  %v373_v13 = vld [vmem:[%s36841_s11 + $0x80] sm:$0xff]  ;;  %p36657_p12 = pnand %p36656_p11, %p36817_p5  ;;  %s36661_s30 = scalar_lea.vmem %s36660_s29, 32 }
  0x1f   : > { %34967 = vmatprep.subr.bf16.mxu0 %v36851_v5  ;;  %v36864_v14 = vpack.c.bf16 %v368_v12, %v367_v11  ;;  %v374_v15 = vld [vmem:[%s36841_s11 + $0x88] sm:$0xff]  ;;  %v381_v16 = vld [vmem:[%s36841_s11 + $0xc0] sm:$0xff]  ;;  %v375_v20 = vld [vmem:[%s36841_s11 + $0x90] sm:$0xff]  ;;  %p36662_p0 = scmp.lt.s32.totalorder %s40580_s21, %s36660_s29  ;;  %p36663_p1 = scmp.lt.s32.totalorder %s36661_s30, %s36655_s28 }
  0x20   : > { %v382_v17 = vld [vmem:[%s36841_s11 + $0xc8] sm:$0xff]  ;;  %34977 = vmatprep.subr.bf16.mxu1 %v36856_v9  ;;  %34969 = vmatpush3.bf16.msra.mxu0 %v36851_v5  ;;  %v36875_v18 = vpack.c.bf16 %v374_v15, %v373_v13  ;;  %v376_v21 = vld [vmem:[%s36841_s11 + $0x98] sm:$0x3f]  ;;  %v383_v22 = vld [vmem:[%s36841_s11 + $0xd0] sm:$0xff]  ;;  %p36658_p13 = pneg %p36657_p12 }
  0x21   : > { %34979 = vmatpush3.bf16.msra.mxu1 %v36856_v9  ;;  %34972 = vmatprep.subr.msk.bf16.mxu0 %vm36844_vm3, %v36858_v10  ;;  %v36880_v19 = vpack.c.bf16 %v382_v17, %v381_v16  ;;  %v384_v23 = vld [vmem:[%s36841_s11 + $0xd8] sm:$0x3f]  ;;  %v36898_v25 = vpack.c.bf16 %v376_v21, %v375_v20  ;;  %v389_v27 = vld [vmem:[%s36841_s11 + $0x100] sm:$0xff]  ;;  %v390_v28 = vld [vmem:[%s36841_s11 + $0x108] sm:$0xff]  ;;  %p36664_p2 = por %p36663_p1, %p36662_p0 }
  0x22   : > { %34982 = vmatprep.subr.msk.bf16.mxu1 %vm36844_vm3, %v36864_v14  ;;  %v36901_v26 = vpack.c.bf16 %v384_v23, %v383_v22  ;;  %v397_v29 = vld [vmem:[%s36841_s11 + $0x140] sm:$0xff]  ;;  %v398_v30 = vld [vmem:[%s36841_s11 + $0x148] sm:$0xff]  ;;  %v36916_v31 = vpack.c.bf16 %v390_v28, %v389_v27  ;;  %v391_v33 = vld [vmem:[%s36841_s11 + $0x110] sm:$0xff] }
  0x23   : > { %v36923_v32 = vpack.c.bf16 %v398_v30, %v397_v29  ;;  %v392_v34 = vld [vmem:[%s36841_s11 + $0x118] sm:$0x3f]  ;;  %v399_v35 = vld [vmem:[%s36841_s11 + $0x150] sm:$0xff]  ;;  %v405_v39 = vld [vmem:[%s36841_s11 + $0x180] sm:$0xff]  ;;  %p36665_p3 = pnand %p36664_p2, %p36658_p13 }
  0x24   : > { %34975 = vmatpush3.bf16.msk.msra.mxu0 %vm36844_vm3, %v36858_v10  ;;  %v400_v36 = vld [vmem:[%s36841_s11 + $0x158] sm:$0x3f]  ;;  %v36938_v37 = vpack.c.bf16 %v392_v34, %v391_v33  ;;  %v406_v40 = vld [vmem:[%s36841_s11 + $0x188] sm:$0xff]  ;;  %v413_v41 = vld [vmem:[%s36841_s11 + $0x1c0] sm:$0xff] }
  0x25   : > { %34985 = vmatpush3.bf16.msk.msra.mxu1 %vm36844_vm3, %v36864_v14  ;;  %34987 = vmatprep.subr.bf16.mxu0 %v36875_v18  ;;  %v36941_v38 = vpack.c.bf16 %v400_v36, %v399_v35  ;;  %v414_v42 = vld [vmem:[%s36841_s11 + $0x1c8] sm:$0xff]  ;;  %v36956_v43 = vpack.c.bf16 %v406_v40, %v405_v39  ;;  %v407_v45 = vld [vmem:[%s36841_s11 + $0x190] sm:$0xff]  ;;  %v408_v46 = vld [vmem:[%s36841_s11 + $0x198] sm:$0x3f] }
  0x26   : > { %34997 = vmatprep.subr.bf16.mxu1 %v36880_v19  ;;  %v36963_v44 = vpack.c.bf16 %v414_v42, %v413_v41  ;;  %v415_v47 = vld [vmem:[%s36841_s11 + $0x1d0] sm:$0xff]  ;;  %v416_v48 = vld [vmem:[%s36841_s11 + $0x1d8] sm:$0x3f]  ;;  %v36978_v49 = vpack.c.bf16 %v408_v46, %v407_v45  ;;  %v421_v51 = vld [vmem:[%s36841_s11 + $0x200] sm:$0xff] }
  0x27   : > { %32191 = vmatmul.mubr.msk.f32.vlgmr.msra.gmra.mrb[0].mxu0 %vm481_vm0, %v36892_v24  ;;  %v36981_v50 = vpack.c.bf16 %v416_v48, %v415_v47  ;;  %v422_v52 = vld [vmem:[%s36841_s11 + $0x208] sm:$0xff]  ;;  %v429_v53 = vld [vmem:[%s36841_s11 + $0x240] sm:$0xff]  ;;  %v423_v57 = vld [vmem:[%s36841_s11 + $0x210] sm:$0xff] }
  0x28   : > { %32202 = vmatmul.mubr.msk.f32.vlgmr.msra.gmra.mrb[0].mxu1 %vm481_vm0, %v36892_v24  ;;  %34989 = vmatpush3.bf16.msra.mxu0 %v36875_v18  ;;  %v430_v54 = vld [vmem:[%s36841_s11 + $0x248] sm:$0xff]  ;;  %v36996_v55 = vpack.c.bf16 %v422_v52, %v421_v51  ;;  %v424_v58 = vld [vmem:[%s36841_s11 + $0x218] sm:$0x3f]  ;;  %v431_v59 = vld [vmem:[%s36841_s11 + $0x250] sm:$0xff] }
  0x29   : > { %34999 = vmatpush3.bf16.msra.mxu1 %v36880_v19  ;;  %34992 = vmatprep.subr.msk.bf16.mxu0 %vm36844_vm3, %v36898_v25  ;;  %v37003_v56 = vpack.c.bf16 %v430_v54, %v429_v53  ;;  %v432_v60 = vld [vmem:[%s36841_s11 + $0x258] sm:$0x3f]  ;;  %v37018_v61 = vpack.c.bf16 %v424_v58, %v423_v57  ;;  %v437_v63 = vld [vmem:[%s36841_s11 + $0x280] sm:$0xff]  ;;  %v438_v2 = vld [vmem:[%s36841_s11 + $0x288] sm:$0xff] }
  0x2a   : > { %35002 = vmatprep.subr.msk.bf16.mxu1 %vm36844_vm3, %v36901_v26  ;;  %32212 = vmatprep.mubr.msk.f32.mxu0 %vm481_vm0, %v36831_v0  ;;  %v37021_v62 = vpack.c.bf16 %v432_v60, %v431_v59  ;;  %v445_v3 = vld [vmem:[%s36841_s11 + $0x2c0] sm:$0xff]  ;;  %v446_v4 = vld [vmem:[%s36841_s11 + $0x2c8] sm:$0xff]  ;;  %v37036_v6 = vpack.c.bf16 %v438_v2, %v437_v63  ;;  %v439_v8 = vld [vmem:[%s36841_s11 + $0x290] sm:$0xff] }
  0x2b   : > { %32223 = vmatprep.mubr.msk.f32.mxu1 %vm481_vm0, %v36831_v0  ;;  %v37043_v7 = vpack.c.bf16 %v446_v4, %v445_v3  ;;  %v440_v11 = vld [vmem:[%s36841_s11 + $0x298] sm:$0x3f]  ;;  %v447_v12 = vld [vmem:[%s36841_s11 + $0x2d0] sm:$0xff]  ;;  %v453_v17 = vld [vmem:[%s36841_s11 + $0x300] sm:$0xff] }
  0x2c   : > { %34995 = vmatpush3.bf16.msk.msra.mxu0 %vm36844_vm3, %v36898_v25  ;;  %v448_v13 = vld [vmem:[%s36841_s11 + $0x2d8] sm:$0x3f]  ;;  %v37058_v15 = vpack.c.bf16 %v440_v11, %v439_v8  ;;  %v454_v20 = vld [vmem:[%s36841_s11 + $0x308] sm:$0xff]  ;;  %v461_v21 = vld [vmem:[%s36841_s11 + $0x340] sm:$0xff] }
  0x2d   : > { %35005 = vmatpush3.bf16.msk.msra.mxu1 %vm36844_vm3, %v36901_v26  ;;  %35007 = vmatprep.subr.bf16.mxu0 %v36916_v31  ;;  %v37061_v16 = vpack.c.bf16 %v448_v13, %v447_v12  ;;  %v462_v22 = vld [vmem:[%s36841_s11 + $0x348] sm:$0xff]  ;;  %v37076_v23 = vpack.c.bf16 %v454_v20, %v453_v17  ;;  %v455_v28 = vld [vmem:[%s36841_s11 + $0x310] sm:$0xff]  ;;  %v456_v29 = vld [vmem:[%s36841_s11 + $0x318] sm:$0x3f] }
  0x2e   : > { %35017 = vmatprep.subr.bf16.mxu1 %v36923_v32  ;;  %v37083_v27 = vpack.c.bf16 %v462_v22, %v461_v21  ;;  %v463_v30 = vld [vmem:[%s36841_s11 + $0x350] sm:$0xff]  ;;  %v464_v33 = vld [vmem:[%s36841_s11 + $0x358] sm:$0x3f]  ;;  %v37098_v34 = vpack.c.bf16 %v456_v29, %v455_v28 }
  0x2f   : > { %32213 = vmatmul.mubr.msk.f32.vlgmr.msra.gmra.mrb[2].mxu0 %vm481_vm0, %v36892_v24  ;;  %v37101_v35 = vpack.c.bf16 %v464_v33, %v463_v30  ;;  %v37132_v36 = vld [vmem:[%s40621_s1 + $0x10] sm:$0xff] }
  0x30   : > { %32224 = vmatmul.mubr.msk.f32.vlgmr.msra.gmra.mrb[2].mxu1 %vm481_vm0, %v36892_v24  ;;  %35009 = vmatpush3.bf16.msra.mxu0 %v36916_v31 }
  0x31   : > { %35019 = vmatpush3.bf16.msra.mxu1 %v36923_v32  ;;  %35012 = vmatprep.subr.msk.bf16.mxu0 %vm36844_vm3, %v36938_v37  ;;  %40690 = vst [vmem:[#allocation7_spill] sm:$0xff] %v37101_v35 }
  0x32   : > { %35022 = vmatprep.subr.msk.bf16.mxu1 %vm36844_vm3, %v36941_v38  ;;  %32234 = vmatprep.mubr.msk.f32.mxu0 %vm481_vm0, %v36831_v0 }
  0x33   : > { %32245 = vmatprep.mubr.msk.f32.mxu1 %vm481_vm0, %v36831_v0 }
  0x34   : > { %35015 = vmatpush3.bf16.msk.msra.mxu0 %vm36844_vm3, %v36938_v37 }
  0x35   : > { %35025 = vmatpush3.bf16.msk.msra.mxu1 %vm36844_vm3, %v36941_v38  ;;  %35027 = vmatprep.subr.bf16.mxu0 %v36956_v43 }
  0x36   : > { %35037 = vmatprep.subr.bf16.mxu1 %v36963_v44 }
  0x37   : > { %32235 = vmatmul.mubr.msk.f32.vlgmr.msra.gmra.mrb[4].mxu0 %vm481_vm0, %v36892_v24 }
  0x38   : > { %32246 = vmatmul.mubr.msk.f32.vlgmr.msra.gmra.mrb[4].mxu1 %vm481_vm0, %v36892_v24  ;;  %35029 = vmatpush3.bf16.msra.mxu0 %v36956_v43 }
  0x39   : > { %35039 = vmatpush3.bf16.msra.mxu1 %v36963_v44  ;;  %35032 = vmatprep.subr.msk.bf16.mxu0 %vm36844_vm3, %v36978_v49 }
  0x3a   : > { %35042 = vmatprep.subr.msk.bf16.mxu1 %vm36844_vm3, %v36981_v50  ;;  %32256 = vmatprep.mubr.msk.f32.mxu0 %vm481_vm0, %v36831_v0 }
  0x3b   : > { %32267 = vmatprep.mubr.msk.f32.mxu1 %vm481_vm0, %v36831_v0 }
  0x3c   : > { %35035 = vmatpush3.bf16.msk.msra.mxu0 %vm36844_vm3, %v36978_v49 }
  0x3d   : > { %35045 = vmatpush3.bf16.msk.msra.mxu1 %vm36844_vm3, %v36981_v50  ;;  %35047 = vmatprep.subr.bf16.mxu0 %v36996_v55 }
  0x3e   : > { %35057 = vmatprep.subr.bf16.mxu1 %v37003_v56 }
  0x3f   : > { %32257 = vmatmul.mubr.msk.f32.vlgmr.msra.gmra.mrb[6].mxu0 %vm481_vm0, %v36892_v24 }
  0x40   : > { %32268 = vmatmul.mubr.msk.f32.vlgmr.msra.gmra.mrb[6].mxu1 %vm481_vm0, %v36892_v24  ;;  %35049 = vmatpush3.bf16.msra.mxu0 %v36996_v55 }
  0x41   : > { %35059 = vmatpush3.bf16.msra.mxu1 %v37003_v56  ;;  %35052 = vmatprep.subr.msk.bf16.mxu0 %vm36844_vm3, %v37018_v61 }
  0x42   : > { %35062 = vmatprep.subr.msk.bf16.mxu1 %vm36844_vm3, %v37021_v62  ;;  %32278 = vmatprep.mubr.msk.f32.mxu0 %vm481_vm0, %v36831_v0 }
  0x43   : > { %32289 = vmatprep.mubr.msk.f32.mxu1 %vm481_vm0, %v36831_v0 }
  0x44   : > { %35055 = vmatpush3.bf16.msk.msra.mxu0 %vm36844_vm3, %v37018_v61 }
  0x45   : > { %35065 = vmatpush3.bf16.msk.msra.mxu1 %vm36844_vm3, %v37021_v62  ;;  %35067 = vmatprep.subr.bf16.mxu0 %v37036_v6 }
  0x46   : > { %35077 = vmatprep.subr.bf16.mxu1 %v37043_v7 }
  0x47   : > { %32279 = vmatmul.mubr.msk.f32.vlgmr.msra.gmra.mrb[8].mxu0 %vm481_vm0, %v36892_v24 }
  0x48   : > { %32290 = vmatmul.mubr.msk.f32.vlgmr.msra.gmra.mrb[8].mxu1 %vm481_vm0, %v36892_v24  ;;  %35069 = vmatpush3.bf16.msra.mxu0 %v37036_v6 }
  0x49   : > { %35079 = vmatpush3.bf16.msra.mxu1 %v37043_v7  ;;  %35072 = vmatprep.subr.msk.bf16.mxu0 %vm36844_vm3, %v37058_v15 }
  0x4a   : > { %35082 = vmatprep.subr.msk.bf16.mxu1 %vm36844_vm3, %v37061_v16  ;;  %32300 = vmatprep.mubr.msk.f32.mxu0 %vm481_vm0, %v36831_v0 }
  0x4b   : > { %32311 = vmatprep.mubr.msk.f32.mxu1 %vm481_vm0, %v36831_v0 }
  0x4c   : > { %35075 = vmatpush3.bf16.msk.msra.mxu0 %vm36844_vm3, %v37058_v15 }
  0x4d   : > { %35085 = vmatpush3.bf16.msk.msra.mxu1 %vm36844_vm3, %v37061_v16  ;;  %35087 = vmatprep.subr.bf16.mxu0 %v37076_v23 }
  0x4e   : > { %35097 = vmatprep.subr.bf16.mxu1 %v37083_v27 }
  0x4f   : > { %32301 = vmatmul.mubr.msk.f32.vlgmr.msra.gmra.mrb[10].mxu0 %vm481_vm0, %v36892_v24 }
  0x50   : > { %32312 = vmatmul.mubr.msk.f32.vlgmr.msra.gmra.mrb[10].mxu1 %vm481_vm0, %v36892_v24  ;;  %35089 = vmatpush3.bf16.msra.mxu0 %v37076_v23 }
  0x51   : > { %35099 = vmatpush3.bf16.msra.mxu1 %v37083_v27  ;;  %35092 = vmatprep.subr.msk.bf16.mxu0 %vm36844_vm3, %v37098_v34 }
  0x52   : > { %35102 = vmatprep.subr.msk.bf16.mxu1 %vm36844_vm3, %v37101_v35  ;;  %32322 = vmatprep.mubr.msk.f32.mxu0 %vm481_vm0, %v36831_v0 }
  0x53   : > { %32333 = vmatprep.mubr.msk.f32.mxu1 %vm481_vm0, %v36831_v0  ;;  %v37154_v0 = vld [vmem:[%s40621_s1 + $0x18] sm:$0x3f] }
  0x54   : > { %35095 = vmatpush3.bf16.msk.msra.mxu0 %vm36844_vm3, %v37098_v34 }
  0x55   : > { %35105 = vmatpush3.bf16.msk.msra.mxu1 %vm36844_vm3, %v37101_v35  ;;  %35107 = vmatprep.subr.bf16.mxu0 %v36851_v5 }
  0x56   : > { %35117 = vmatprep.subr.bf16.mxu1 %v36856_v9 }
  0x57   : > { %32323 = vmatmul.mubr.msk.f32.vlgmr.msra.gmra.mrb[12].mxu0 %vm481_vm0, %v36892_v24 }
  0x58   : > { %32334 = vmatmul.mubr.msk.f32.vlgmr.msra.gmra.mrb[12].mxu1 %vm481_vm0, %v36892_v24  ;;  %35109 = vmatpush3.bf16.msra.mxu0 %v36851_v5  ;;  %v37310_v24 = vld [vmem:[%s40624_s4 + $0x8] sm:$0xff] }
  0x59   : > { %35119 = vmatpush3.bf16.msra.mxu1 %v36856_v9  ;;  %35112 = vmatprep.subr.msk.bf16.mxu0 %vm36844_vm3, %v36858_v10 }
  0x5a   : > { %35122 = vmatprep.subr.msk.bf16.mxu1 %vm36844_vm3, %v36864_v14  ;;  %32344 = vmatprep.mubr.msk.f32.mxu0 %vm481_vm0, %v37132_v36 }
  0x5b   : > { %32355 = vmatprep.mubr.msk.f32.mxu1 %vm481_vm0, %v37132_v36 }
  0x5c   : > { %35115 = vmatpush3.bf16.msk.msra.mxu0 %vm36844_vm3, %v36858_v10 }
  0x5d   : > { %35125 = vmatpush3.bf16.msk.msra.mxu1 %vm36844_vm3, %v36864_v14  ;;  %35127 = vmatprep.subr.bf16.mxu0 %v36875_v18 }
  0x5e   : > { %35137 = vmatprep.subr.bf16.mxu1 %v36880_v19 }
  0x5f   : > { %32345 = vmatmul.mubr.msk.f32.vlgmr.msra.gmra.mrb[14].mxu0 %vm481_vm0, %v37154_v0 }
  0x60   : > { %32356 = vmatmul.mubr.msk.f32.vlgmr.msra.gmra.mrb[14].mxu1 %vm481_vm0, %v37154_v0  ;;  %35129 = vmatpush3.bf16.msra.mxu0 %v36875_v18 }
  0x61   : > { %35139 = vmatpush3.bf16.msra.mxu1 %v36880_v19  ;;  %35132 = vmatprep.subr.msk.bf16.mxu0 %vm36844_vm3, %v36898_v25 }
  0x62   : > { %35142 = vmatprep.subr.msk.bf16.mxu1 %vm36844_vm3, %v36901_v26  ;;  %32366 = vmatprep.mubr.msk.f32.mxu0 %vm481_vm0, %v37132_v36 }
  0x63   : > { %32377 = vmatprep.mubr.msk.f32.mxu1 %vm481_vm0, %v37132_v36 }
  0x64   : > { %35135 = vmatpush3.bf16.msk.msra.mxu0 %vm36844_vm3, %v36898_v25 }
  0x65   : > { %35145 = vmatpush3.bf16.msk.msra.mxu1 %vm36844_vm3, %v36901_v26  ;;  %35147 = vmatprep.subr.bf16.mxu0 %v36916_v31 }
  0x66   : > { %35157 = vmatprep.subr.bf16.mxu1 %v36923_v32 }
  0x67   : > { %32367 = vmatmul.mubr.msk.f32.vlgmr.msra.gmra.mrb[16].mxu0 %vm481_vm0, %v37154_v0 }
  0x68   : > { %32378 = vmatmul.mubr.msk.f32.vlgmr.msra.gmra.mrb[16].mxu1 %vm481_vm0, %v37154_v0  ;;  %35149 = vmatpush3.bf16.msra.mxu0 %v36916_v31 }
  0x69   : > { %35159 = vmatpush3.bf16.msra.mxu1 %v36923_v32  ;;  %35152 = vmatprep.subr.msk.bf16.mxu0 %vm36844_vm3, %v36938_v37 }
  0x6a   : > { %35162 = vmatprep.subr.msk.bf16.mxu1 %vm36844_vm3, %v36941_v38  ;;  %32388 = vmatprep.mubr.msk.f32.mxu0 %vm481_vm0, %v37132_v36 }
  0x6b   : > { %32399 = vmatprep.mubr.msk.f32.mxu1 %vm481_vm0, %v37132_v36 }
  0x6c   : > { %35155 = vmatpush3.bf16.msk.msra.mxu0 %vm36844_vm3, %v36938_v37 }
  0x6d   : > { %35165 = vmatpush3.bf16.msk.msra.mxu1 %vm36844_vm3, %v36941_v38  ;;  %35167 = vmatprep.subr.bf16.mxu0 %v36956_v43 }
  0x6e   : > { %35177 = vmatprep.subr.bf16.mxu1 %v36963_v44 }
  0x6f   : > { %32389 = vmatmul.mubr.msk.f32.vlgmr.msra.gmra.mrb[18].mxu0 %vm481_vm0, %v37154_v0 }
  0x70   : > { %32400 = vmatmul.mubr.msk.f32.vlgmr.msra.gmra.mrb[18].mxu1 %vm481_vm0, %v37154_v0  ;;  %35169 = vmatpush3.bf16.msra.mxu0 %v36956_v43 }
  0x71   : > { %35179 = vmatpush3.bf16.msra.mxu1 %v36963_v44  ;;  %35172 = vmatprep.subr.msk.bf16.mxu0 %vm36844_vm3, %v36978_v49 }
  0x72   : > { %35182 = vmatprep.subr.msk.bf16.mxu1 %vm36844_vm3, %v36981_v50  ;;  %32410 = vmatprep.mubr.msk.f32.mxu0 %vm481_vm0, %v37132_v36 }
  0x73   : > { %32421 = vmatprep.mubr.msk.f32.mxu1 %vm481_vm0, %v37132_v36 }
  0x74   : > { %35175 = vmatpush3.bf16.msk.msra.mxu0 %vm36844_vm3, %v36978_v49 }
  0x75   : > { %35185 = vmatpush3.bf16.msk.msra.mxu1 %vm36844_vm3, %v36981_v50  ;;  %35187 = vmatprep.subr.bf16.mxu0 %v36996_v55 }
  0x76   : > { %35197 = vmatprep.subr.bf16.mxu1 %v37003_v56 }
  0x77   : > { %32411 = vmatmul.mubr.msk.f32.vlgmr.msra.gmra.mrb[20].mxu0 %vm481_vm0, %v37154_v0 }
  0x78   : > { %32422 = vmatmul.mubr.msk.f32.vlgmr.msra.gmra.mrb[20].mxu1 %vm481_vm0, %v37154_v0  ;;  %35189 = vmatpush3.bf16.msra.mxu0 %v36996_v55 }
  0x79   : > { %35199 = vmatpush3.bf16.msra.mxu1 %v37003_v56  ;;  %35192 = vmatprep.subr.msk.bf16.mxu0 %vm36844_vm3, %v37018_v61 }
  0x7a   : > { %35202 = vmatprep.subr.msk.bf16.mxu1 %vm36844_vm3, %v37021_v62  ;;  %32432 = vmatprep.mubr.msk.f32.mxu0 %vm481_vm0, %v37132_v36 }
  0x7b   : > { %32443 = vmatprep.mubr.msk.f32.mxu1 %vm481_vm0, %v37132_v36 }
  0x7c   : > { %35195 = vmatpush3.bf16.msk.msra.mxu0 %vm36844_vm3, %v37018_v61 }
  0x7d   : > { %35205 = vmatpush3.bf16.msk.msra.mxu1 %vm36844_vm3, %v37021_v62  ;;  %35207 = vmatprep.subr.bf16.mxu0 %v37036_v6 }
  0x7e   : > { %35217 = vmatprep.subr.bf16.mxu1 %v37043_v7 }
  0x7f   : > { %32433 = vmatmul.mubr.msk.f32.vlgmr.msra.gmra.mrb[22].mxu0 %vm481_vm0, %v37154_v0 }
  0x80   : > { %32444 = vmatmul.mubr.msk.f32.vlgmr.msra.gmra.mrb[22].mxu1 %vm481_vm0, %v37154_v0  ;;  %35209 = vmatpush3.bf16.msra.mxu0 %v37036_v6 }
  0x81   : > { %35219 = vmatpush3.bf16.msra.mxu1 %v37043_v7  ;;  %35212 = vmatprep.subr.msk.bf16.mxu0 %vm36844_vm3, %v37058_v15 }
  0x82   : > { %35222 = vmatprep.subr.msk.bf16.mxu1 %vm36844_vm3, %v37061_v16  ;;  %32454 = vmatprep.mubr.msk.f32.mxu0 %vm481_vm0, %v37132_v36 }
  0x83   : > { %32465 = vmatprep.mubr.msk.f32.mxu1 %vm481_vm0, %v37132_v36 }
  0x84   : > { %35215 = vmatpush3.bf16.msk.msra.mxu0 %vm36844_vm3, %v37058_v15 }
  0x85   : > { %35225 = vmatpush3.bf16.msk.msra.mxu1 %vm36844_vm3, %v37061_v16  ;;  %35227 = vmatprep.subr.bf16.mxu0 %v37076_v23 }
  0x86   : > { %35237 = vmatprep.subr.bf16.mxu1 %v37083_v27 }
  0x87   : > { %32455 = vmatmul.mubr.msk.f32.vlgmr.msra.gmra.mrb[24].mxu0 %vm481_vm0, %v37154_v0 }
  0x88   : > { %32466 = vmatmul.mubr.msk.f32.vlgmr.msra.gmra.mrb[24].mxu1 %vm481_vm0, %v37154_v0  ;;  %35229 = vmatpush3.bf16.msra.mxu0 %v37076_v23 }
  0x89   : > { %35239 = vmatpush3.bf16.msra.mxu1 %v37083_v27  ;;  %35232 = vmatprep.subr.msk.bf16.mxu0 %vm36844_vm3, %v37098_v34 }
  0x8a   : > { %35242 = vmatprep.subr.msk.bf16.mxu1 %vm36844_vm3, %v37101_v35  ;;  %32476 = vmatprep.mubr.msk.f32.mxu0 %vm481_vm0, %v37132_v36 }
  0x8b   : > { %32487 = vmatprep.mubr.msk.f32.mxu1 %vm481_vm0, %v37132_v36 }
  0x8c   : > { %35235 = vmatpush3.bf16.msk.msra.mxu0 %vm36844_vm3, %v37098_v34 }
  0x8d   : > { %35245 = vmatpush3.bf16.msk.msra.mxu1 %vm36844_vm3, %v37101_v35  ;;  %32490 = vmatprep.subr.mxu0 %v37310_v24 }
  0x8e   : > { %32495 = vmatprep.subr.mxu1 %v37310_v24 }
  0x8f   : > { %32477 = vmatmul.mubr.msk.f32.vlgmr.msra.gmra.mrb[26].mxu0 %vm481_vm0, %v37154_v0 }
  0x90   : > { %32488 = vmatmul.mubr.msk.f32.vlgmr.msra.gmra.mrb[26].mxu1 %vm481_vm0, %v37154_v0  ;;  %32491 = vmatpush3.msra.mxu0 %v37310_v24 }
  0x91   : > { %32496 = vmatpush3.msra.mxu1 %v37310_v24  ;;  %32500 = vmatprep.subr.mxu0 %v37310_v24 }
  0x92   : > { %32505 = vmatprep.subr.mxu1 %v37310_v24 }
  0xfa   : > { %v37318_v39 = vpop.f32.mrb[0].mxu0 }
  0xfb   : > { %v37320_v40 = vpop.f32.mrb[1].mxu0  ;;  %v37322_v41 = vpop.f32.mrb[0].mxu1 }
  0xfc   : > { %v37324_v42 = vpop.f32.mrb[1].mxu1 }
 0x102   : > { %v37326_v45 = vpop.f32.mrb[2].mxu0 }
 0x103   : > { %v37328_v46 = vpop.f32.mrb[3].mxu0  ;;  %v37330_v47 = vpop.f32.mrb[2].mxu1 }
 0x104   : > { %v37332_v48 = vpop.f32.mrb[3].mxu1 }
 0x10a   : > { %v37334_v51 = vpop.f32.mrb[4].mxu0 }
 0x10b   : > { %v37336_v52 = vpop.f32.mrb[5].mxu0  ;;  %v37338_v53 = vpop.f32.mrb[4].mxu1 }
 0x10c   : > { %v37340_v54 = vpop.f32.mrb[5].mxu1 }
 0x112   : > { %v37342_v57 = vpop.f32.mrb[6].mxu0 }
 0x113   : > { %v37344_v58 = vpop.f32.mrb[7].mxu0  ;;  %v37346_v59 = vpop.f32.mrb[6].mxu1 }
 0x114   : > { %v37348_v60 = vpop.f32.mrb[7].mxu1 }
 0x11a   : > { %v37350_v63 = vpop.f32.mrb[8].mxu0 }
 0x11b   : > { %v37352_v2 = vpop.f32.mrb[9].mxu0  ;;  %v37354_v3 = vpop.f32.mrb[8].mxu1 }
 0x11c   : > { %v37356_v4 = vpop.f32.mrb[9].mxu1 }
 0x122   : > { %v37358_v8 = vpop.f32.mrb[10].mxu0 }
 0x123   : > { %v37360_v11 = vpop.f32.mrb[11].mxu0  ;;  %v37362_v12 = vpop.f32.mrb[10].mxu1 }
 0x124   : > { %v37364_v13 = vpop.f32.mrb[11].mxu1 }
 0x12a   : > { %v37366_v17 = vpop.f32.mrb[12].mxu0 }
 0x12b   : > { %v37368_v20 = vpop.f32.mrb[13].mxu0  ;;  %v37370_v21 = vpop.f32.mrb[12].mxu1 }
 0x12c   : > { %v37372_v22 = vpop.f32.mrb[13].mxu1 }
 0x132   : > { %v32346_v28 = vpop.f32.mrb[14].mxu0 }
 0x133   : > { %v1654_v29 = vpop.f32.mrb[15].mxu0  ;;  %v37374_v30 = vpop.f32.mrb[14].mxu1 }
 0x134   : > { %40691 = vst [vmem:[#allocation8_spill] sm:$0xff] %v37374_v30  ;;  %32492 = vmatprep.mubr.msk.f32.mxu0 %vm2640_vm4, %v1654_v29  ;;  %v37377_v33 = vpop.f32.mrb[15].mxu1 }
 0x135   : > { %40692 = vst [vmem:[#allocation9_spill] sm:$0xff] %v37377_v33  ;;  %32493 = vmatmul.mubr.msk.f32.vlgmr.msra.gmra.mrb[28].mxu0 %vm2640_vm4, %v32346_v28  ;;  %32497 = vmatprep.mubr.msk.f32.mxu1 %vm2640_vm4, %v37377_v33 }
 0x136   : > { %32501 = vmatpush3.msra.mxu0 %v37310_v24  ;;  %32498 = vmatmul.mubr.msk.f32.vlgmr.msra.gmra.mrb[28].mxu1 %vm2640_vm4, %v37374_v30 }
 0x137   : > { %32510 = vmatprep.subr.mxu0 %v37310_v24  ;;  %32506 = vmatpush3.msra.mxu1 %v37310_v24 }
 0x138   : > { %32515 = vmatprep.subr.mxu1 %v37310_v24 }
 0x13a   : > { %v37388_v36 = vpop.f32.mrb[16].mxu0 }
 0x13b   : > { %40693 = vst [vmem:[#allocation10_spill] sm:$0xff] %v37388_v36  ;;  %v37390_v0 = vpop.f32.mrb[17].mxu0  ;;  %v37392_v29 = vpop.f32.mrb[16].mxu1 }
 0x13c   : > { %40694 = vst [vmem:[#allocation11_spill] sm:$0xff] %v37390_v0  ;;  %40695 = vst [vmem:[#allocation12_spill] sm:$0xff] %v37392_v29  ;;  %32502 = vmatprep.mubr.msk.f32.mxu0 %vm2640_vm4, %v37390_v0  ;;  %v37396_v28 = vpop.f32.mrb[17].mxu1 }
 0x13d   : > { %40696 = vst [vmem:[#allocation13_spill] sm:$0xff] %v37396_v28  ;;  %32503 = vmatmul.mubr.msk.f32.vlgmr.msra.gmra.mrb[30].mxu0 %vm2640_vm4, %v37388_v36  ;;  %32507 = vmatprep.mubr.msk.f32.mxu1 %vm2640_vm4, %v37396_v28 }
 0x13e   : > { %32511 = vmatpush3.msra.mxu0 %v37310_v24  ;;  %32508 = vmatmul.mubr.msk.f32.vlgmr.msra.gmra.mrb[30].mxu1 %vm2640_vm4, %v37392_v29 }
 0x13f   : > { %32520 = vmatprep.subr.mxu0 %v37310_v24  ;;  %32516 = vmatpush3.msra.mxu1 %v37310_v24 }
 0x140   : > { %32525 = vmatprep.subr.mxu1 %v37310_v24 }
 0x142   : > { %v37408_v0 = vpop.f32.mrb[18].mxu0 }
 0x143   : > { %40697 = vst [vmem:[#allocation14_spill] sm:$0xff] %v37408_v0  ;;  %v37410_v30 = vpop.f32.mrb[19].mxu0  ;;  %v37412_v33 = vpop.f32.mrb[18].mxu1 }
 0x144   : > { %40698 = vst [vmem:[#allocation15_spill] sm:$0xff] %v37410_v30  ;;  %40699 = vst [vmem:[#allocation16_spill] sm:$0xff] %v37412_v33  ;;  %32512 = vmatprep.mubr.msk.f32.mxu0 %vm2640_vm4, %v37410_v30  ;;  %v37416_v36 = vpop.f32.mrb[19].mxu1 }
 0x145   : > { %40700 = vst [vmem:[#allocation17_spill] sm:$0xff] %v37416_v36  ;;  %32513 = vmatmul.mubr.msk.f32.vlgmr.msra.gmra.mrb[32].mxu0 %vm2640_vm4, %v37408_v0  ;;  %32517 = vmatprep.mubr.msk.f32.mxu1 %vm2640_vm4, %v37416_v36 }
 0x146   : > { %32521 = vmatpush3.msra.mxu0 %v37310_v24  ;;  %32518 = vmatmul.mubr.msk.f32.vlgmr.msra.gmra.mrb[32].mxu1 %vm2640_vm4, %v37412_v33 }
 0x147   : > { %32530 = vmatprep.subr.mxu0 %v37310_v24  ;;  %32526 = vmatpush3.msra.mxu1 %v37310_v24 }
 0x148   : > { %32535 = vmatprep.subr.mxu1 %v37310_v24 }
 0x14a   : > { %v37428_v30 = vpop.f32.mrb[20].mxu0  ;;  %v40777_v1 = vld [vmem:[#allocation14_spill] sm:$0xff] }
 0x14b   : > { %40701 = vst [vmem:[#allocation18_spill] sm:$0xff] %v37428_v30  ;;  %v37430_v29 = vpop.f32.mrb[21].mxu0  ;;  %v37432_v28 = vpop.f32.mrb[20].mxu1 }
 0x14c   : > { %40702 = vst [vmem:[#allocation19_spill] sm:$0xff] %v37430_v29  ;;  %40703 = vst [vmem:[#allocation20_spill] sm:$0xff] %v37432_v28  ;;  %32522 = vmatprep.mubr.msk.f32.mxu0 %vm2640_vm4, %v37430_v29  ;;  %v37436_v0 = vpop.f32.mrb[21].mxu1 }
 0x14d   : > { %40704 = vst [vmem:[#allocation21_spill] sm:$0xff] %v37436_v0  ;;  %32523 = vmatmul.mubr.msk.f32.vlgmr.msra.gmra.mrb[34].mxu0 %vm2640_vm4, %v37428_v30  ;;  %32527 = vmatprep.mubr.msk.f32.mxu1 %vm2640_vm4, %v37436_v0 }
 0x14e   : > { %32531 = vmatpush3.msra.mxu0 %v37310_v24  ;;  %32528 = vmatmul.mubr.msk.f32.vlgmr.msra.gmra.mrb[34].mxu1 %vm2640_vm4, %v37432_v28 }
 0x14f   : > { %32540 = vmatprep.subr.mxu0 %v37310_v24  ;;  %32536 = vmatpush3.msra.mxu1 %v37310_v24 }
 0x150   : > { %32545 = vmatprep.subr.mxu1 %v37310_v24 }
 0x152   : > { %v37448_v29 = vpop.f32.mrb[22].mxu0 }
 0x153   : > { %40705 = vst [vmem:[#allocation22_spill] sm:$0xff] %v37448_v29  ;;  %v37450_v33 = vpop.f32.mrb[23].mxu0  ;;  %v37452_v36 = vpop.f32.mrb[22].mxu1 }
 0x154   : > { %40706 = vst [vmem:[#allocation23_spill] sm:$0xff] %v37450_v33  ;;  %40707 = vst [vmem:[#allocation24_spill] sm:$0xff] %v37452_v36  ;;  %32532 = vmatprep.mubr.msk.f32.mxu0 %vm2640_vm4, %v37450_v33  ;;  %v37456_v30 = vpop.f32.mrb[23].mxu1 }
 0x155   : > { %40708 = vst [vmem:[#allocation25_spill] sm:$0xff] %v37456_v30  ;;  %32533 = vmatmul.mubr.msk.f32.vlgmr.msra.gmra.mrb[36].mxu0 %vm2640_vm4, %v37448_v29  ;;  %32537 = vmatprep.mubr.msk.f32.mxu1 %vm2640_vm4, %v37456_v30 }
 0x156   : > { %32541 = vmatpush3.msra.mxu0 %v37310_v24  ;;  %32538 = vmatmul.mubr.msk.f32.vlgmr.msra.gmra.mrb[36].mxu1 %vm2640_vm4, %v37452_v36  ;;  %v37481_v36 = vld [vmem:[%s40624_s4] sm:$0xff] }
 0x157   : > { %32546 = vmatpush3.msra.mxu1 %v37310_v24  ;;  %32550 = vmatprep.subr.mxu0 %v37310_v24 }
 0x158   : > { %32555 = vmatprep.subr.mxu1 %v37310_v24 }
 0x15a   : > { %v37468_v33 = vpop.f32.mrb[24].mxu0 }
 0x15b   : > { %40709 = vst [vmem:[#allocation26_spill] sm:$0xff] %v37468_v33  ;;  %v37470_v28 = vpop.f32.mrb[25].mxu0  ;;  %v37472_v0 = vpop.f32.mrb[24].mxu1 }
 0x15c   : > { %40710 = vst [vmem:[#allocation27_spill] sm:$0xff] %v37470_v28  ;;  %40711 = vst [vmem:[#allocation28_spill] sm:$0xff] %v37472_v0  ;;  %32542 = vmatprep.mubr.msk.f32.mxu0 %vm2640_vm4, %v37470_v28  ;;  %v37476_v29 = vpop.f32.mrb[25].mxu1 }
 0x15d   : > { %40712 = vst [vmem:[#allocation29_spill] sm:$0xff] %v37476_v29  ;;  %32543 = vmatmul.mubr.msk.f32.vlgmr.msra.gmra.mrb[38].mxu0 %vm2640_vm4, %v37468_v33  ;;  %32547 = vmatprep.mubr.msk.f32.mxu1 %vm2640_vm4, %v37476_v29 }
 0x15e   : > { %32548 = vmatmul.mubr.msk.f32.vlgmr.msra.gmra.mrb[38].mxu1 %vm2640_vm4, %v37472_v0  ;;  %32551 = vmatpush3.msra.mxu0 %v37310_v24  ;;  %v468_v0 = vld [vmem:[%s36841_s11 + $0x378] sm:$0x3f] }
 0x15f   : > { %32556 = vmatpush3.msra.mxu1 %v37310_v24  ;;  %32560 = vmatprep.subr.mxu0 %v37481_v36  ;;  %v37594_v24 = vld [vmem:[%s40621_s1 + $0x20] sm:$0xff] }
 0x160   : > { %32565 = vmatprep.subr.mxu1 %v37481_v36 }
 0x162   : > { %v37493_v28 = vpop.f32.mrb[26].mxu0 }
 0x163   : > { %40713 = vst [vmem:[#allocation30_spill] sm:$0xff] %v37493_v28  ;;  %v37495_v30 = vpop.f32.mrb[26].mxu1  ;;  %v37497_v35 = vpop.f32.mrb[27].mxu0 }
 0x164   : > { %40714 = vst [vmem:[#allocation31_spill] sm:$0xff] %v37495_v30  ;;  %40715 = vst [vmem:[#allocation32_spill] sm:$0xff] %v37497_v35  ;;  %v37499_v33 = vpop.f32.mrb[27].mxu1  ;;  %32552 = vmatprep.mubr.msk.f32.mxu0 %vm2640_vm4, %v37497_v35  ;;  %v403_v35 = vld [vmem:[%s36841_s11 + $0x170] sm:$0xff] }
 0x165   : > { %40716 = vst [vmem:[#allocation33_spill] sm:$0xff] %v37499_v33  ;;  %32557 = vmatprep.mubr.msk.f32.mxu1 %vm2640_vm4, %v37499_v33  ;;  %32553 = vmatmul.mubr.msk.f32.vlgmr.msra.gmra.mrb[40].mxu0 %vm2640_vm4, %v37493_v28  ;;  %v396_v28 = vld [vmem:[%s36841_s11 + $0x138] sm:$0x3f]  ;;  %v467_v33 = vld [vmem:[%s36841_s11 + $0x370] sm:$0xff] }
 0x166   : > { %32558 = vmatmul.mubr.msk.f32.vlgmr.msra.gmra.mrb[40].mxu1 %vm2640_vm4, %v37495_v30  ;;  %32561 = vmatpush3.msra.mxu0 %v37481_v36  ;;  %v466_v30 = vld [vmem:[%s36841_s11 + $0x368] sm:$0xff] }
 0x167   : > { %32562 = vmatprep.mubr.msk.f32.mxu0 %vm2640_vm4, %v37320_v40  ;;  %32566 = vmatpush3.msra.mxu1 %v37481_v36 }
 0x168   : > { %32567 = vmatprep.mubr.msk.f32.mxu1 %vm2640_vm4, %v37324_v42  ;;  %32570 = vmatprep.subr.mxu0 %v37481_v36 }
 0x169   : > { %32563 = vmatmul.mubr.msk.f32.vlgmr.msra.gmra.mrb[28].mxu0 %vm2640_vm4, %v37318_v39  ;;  %32575 = vmatprep.subr.mxu1 %v37481_v36 }
 0x16a   : > { %32568 = vmatmul.mubr.msk.f32.vlgmr.msra.gmra.mrb[28].mxu1 %vm2640_vm4, %v37322_v41  ;;  %32571 = vmatpush3.msra.mxu0 %v37481_v36 }
 0x16b   : > { %32572 = vmatprep.mubr.msk.f32.mxu0 %vm2640_vm4, %v37328_v46  ;;  %32576 = vmatpush3.msra.mxu1 %v37481_v36 }
 0x16c   : > { %32577 = vmatprep.mubr.msk.f32.mxu1 %vm2640_vm4, %v37332_v48  ;;  %32580 = vmatprep.subr.mxu0 %v37481_v36 }
 0x16d   : > { %32573 = vmatmul.mubr.msk.f32.vlgmr.msra.gmra.mrb[30].mxu0 %vm2640_vm4, %v37326_v45  ;;  %32585 = vmatprep.subr.mxu1 %v37481_v36 }
 0x16e   : > { %32578 = vmatmul.mubr.msk.f32.vlgmr.msra.gmra.mrb[30].mxu1 %vm2640_vm4, %v37330_v47  ;;  %32581 = vmatpush3.msra.mxu0 %v37481_v36 }
 0x16f   : > { %32582 = vmatprep.mubr.msk.f32.mxu0 %vm2640_vm4, %v37336_v52  ;;  %32586 = vmatpush3.msra.mxu1 %v37481_v36 }
 0x170   : > { %32587 = vmatprep.mubr.msk.f32.mxu1 %vm2640_vm4, %v37340_v54  ;;  %32590 = vmatprep.subr.mxu0 %v37481_v36 }
 0x171   : > { %32583 = vmatmul.mubr.msk.f32.vlgmr.msra.gmra.mrb[32].mxu0 %vm2640_vm4, %v37334_v51  ;;  %32595 = vmatprep.subr.mxu1 %v37481_v36 }
 0x172   : > { %32588 = vmatmul.mubr.msk.f32.vlgmr.msra.gmra.mrb[32].mxu1 %vm2640_vm4, %v37338_v53  ;;  %32591 = vmatpush3.msra.mxu0 %v37481_v36 }
 0x173   : > { %32592 = vmatprep.mubr.msk.f32.mxu0 %vm2640_vm4, %v37344_v58  ;;  %32596 = vmatpush3.msra.mxu1 %v37481_v36 }
 0x174   : > { %32597 = vmatprep.mubr.msk.f32.mxu1 %vm2640_vm4, %v37348_v60  ;;  %32600 = vmatprep.subr.mxu0 %v37481_v36 }
 0x175   : > { %32593 = vmatmul.mubr.msk.f32.vlgmr.msra.gmra.mrb[34].mxu0 %vm2640_vm4, %v37342_v57  ;;  %32605 = vmatprep.subr.mxu1 %v37481_v36 }
 0x176   : > { %32598 = vmatmul.mubr.msk.f32.vlgmr.msra.gmra.mrb[34].mxu1 %vm2640_vm4, %v37346_v59  ;;  %32601 = vmatpush3.msra.mxu0 %v37481_v36 }
 0x177   : > { %32602 = vmatprep.mubr.msk.f32.mxu0 %vm2640_vm4, %v37352_v2  ;;  %32606 = vmatpush3.msra.mxu1 %v37481_v36 }
 0x178   : > { %32607 = vmatprep.mubr.msk.f32.mxu1 %vm2640_vm4, %v37356_v4  ;;  %32610 = vmatprep.subr.mxu0 %v37481_v36 }
 0x179   : > { %32603 = vmatmul.mubr.msk.f32.vlgmr.msra.gmra.mrb[36].mxu0 %vm2640_vm4, %v37350_v63  ;;  %32615 = vmatprep.subr.mxu1 %v37481_v36 }
 0x17a   : > { %32608 = vmatmul.mubr.msk.f32.vlgmr.msra.gmra.mrb[36].mxu1 %vm2640_vm4, %v37354_v3  ;;  %32611 = vmatpush3.msra.mxu0 %v37481_v36 }
 0x17b   : > { %32612 = vmatprep.mubr.msk.f32.mxu0 %vm2640_vm4, %v37360_v11  ;;  %32616 = vmatpush3.msra.mxu1 %v37481_v36 }
 0x17c   : > { %32617 = vmatprep.mubr.msk.f32.mxu1 %vm2640_vm4, %v37364_v13  ;;  %32620 = vmatprep.subr.mxu0 %v37481_v36 }
 0x17d   : > { %32613 = vmatmul.mubr.msk.f32.vlgmr.msra.gmra.mrb[38].mxu0 %vm2640_vm4, %v37358_v8  ;;  %32625 = vmatprep.subr.mxu1 %v37481_v36 }
 0x17e   : > { %32618 = vmatmul.mubr.msk.f32.vlgmr.msra.gmra.mrb[38].mxu1 %vm2640_vm4, %v37362_v12  ;;  %32621 = vmatpush3.msra.mxu0 %v37481_v36 }
 0x17f   : > { %32622 = vmatprep.mubr.msk.f32.mxu0 %vm2640_vm4, %v37368_v20  ;;  %32626 = vmatpush3.msra.mxu1 %v37481_v36 }
 0x180   : > { %32627 = vmatprep.mubr.msk.f32.mxu1 %vm2640_vm4, %v37372_v22  ;;  %35247 = vmatprep.subr.bf16.mxu0 %v36851_v5 }
 0x181   : > { %35257 = vmatprep.subr.bf16.mxu1 %v36856_v9  ;;  %32623 = vmatmul.mubr.msk.f32.vlgmr.msra.gmra.mrb[40].mxu0 %vm2640_vm4, %v37366_v17 }
 0x182   : > { %32628 = vmatmul.mubr.msk.f32.vlgmr.msra.gmra.mrb[40].mxu1 %vm2640_vm4, %v37370_v21  ;;  %35249 = vmatpush3.bf16.msra.mxu0 %v36851_v5  ;;  %v37616_v5 = vld [vmem:[%s40621_s1 + $0x28] sm:$0x3f] }
 0x183   : > { %35259 = vmatpush3.bf16.msra.mxu1 %v36856_v9  ;;  %35252 = vmatprep.subr.msk.bf16.mxu0 %vm36844_vm3, %v36858_v10  ;;  %v40717_v9 = vld [vmem:[#allocation7_spill] sm:$0xff] }
 0x184   : > { %35262 = vmatprep.subr.msk.bf16.mxu1 %vm36844_vm3, %v36864_v14  ;;  %32638 = vmatprep.mubr.msk.f32.mxu0 %vm481_vm0, %v37594_v24 }
 0x185   : > { %32649 = vmatprep.mubr.msk.f32.mxu1 %vm481_vm0, %v37594_v24 }
 0x186   : > { %35255 = vmatpush3.bf16.msk.msra.mxu0 %vm36844_vm3, %v36858_v10  ;;  %v37772_v10 = vld [vmem:[%s40624_s4 + $0x10] sm:$0xff] }
 0x187   : > { %35265 = vmatpush3.bf16.msk.msra.mxu1 %vm36844_vm3, %v36864_v14  ;;  %35267 = vmatprep.subr.bf16.mxu0 %v36875_v18 }
 0x188   : > { %35277 = vmatprep.subr.bf16.mxu1 %v36880_v19 }
 0x189   : > { %32639 = vmatmul.mubr.msk.f32.vlgmr.msra.gmra.mrb[42].mxu0 %vm481_vm0, %v37616_v5 }
 0x18a   : > { %32650 = vmatmul.mubr.msk.f32.vlgmr.msra.gmra.mrb[42].mxu1 %vm481_vm0, %v37616_v5  ;;  %35269 = vmatpush3.bf16.msra.mxu0 %v36875_v18 }
 0x18b   : > { %35279 = vmatpush3.bf16.msra.mxu1 %v36880_v19  ;;  %35272 = vmatprep.subr.msk.bf16.mxu0 %vm36844_vm3, %v36898_v25 }
 0x18c   : > { %35282 = vmatprep.subr.msk.bf16.mxu1 %vm36844_vm3, %v36901_v26  ;;  %32660 = vmatprep.mubr.msk.f32.mxu0 %vm481_vm0, %v37594_v24 }
 0x18d   : > { %32671 = vmatprep.mubr.msk.f32.mxu1 %vm481_vm0, %v37594_v24 }
 0x18e   : > { %35275 = vmatpush3.bf16.msk.msra.mxu0 %vm36844_vm3, %v36898_v25 }
 0x18f   : > { %35285 = vmatpush3.bf16.msk.msra.mxu1 %vm36844_vm3, %v36901_v26  ;;  %35287 = vmatprep.subr.bf16.mxu0 %v36916_v31 }
 0x190   : > { %35297 = vmatprep.subr.bf16.mxu1 %v36923_v32 }
 0x191   : > { %32661 = vmatmul.mubr.msk.f32.vlgmr.msra.gmra.mrb[44].mxu0 %vm481_vm0, %v37616_v5 }
 0x192   : > { %32672 = vmatmul.mubr.msk.f32.vlgmr.msra.gmra.mrb[44].mxu1 %vm481_vm0, %v37616_v5  ;;  %35289 = vmatpush3.bf16.msra.mxu0 %v36916_v31 }
 0x193   : > { %35299 = vmatpush3.bf16.msra.mxu1 %v36923_v32  ;;  %35292 = vmatprep.subr.msk.bf16.mxu0 %vm36844_vm3, %v36938_v37 }
 0x194   : > { %35302 = vmatprep.subr.msk.bf16.mxu1 %vm36844_vm3, %v36941_v38  ;;  %32682 = vmatprep.mubr.msk.f32.mxu0 %vm481_vm0, %v37594_v24 }
 0x195   : > { %32693 = vmatprep.mubr.msk.f32.mxu1 %vm481_vm0, %v37594_v24 }
 0x196   : > { %35295 = vmatpush3.bf16.msk.msra.mxu0 %vm36844_vm3, %v36938_v37 }
 0x197   : > { %35305 = vmatpush3.bf16.msk.msra.mxu1 %vm36844_vm3, %v36941_v38  ;;  %35307 = vmatprep.subr.bf16.mxu0 %v36956_v43 }
 0x198   : > { %35317 = vmatprep.subr.bf16.mxu1 %v36963_v44 }
 0x199   : > { %32683 = vmatmul.mubr.msk.f32.vlgmr.msra.gmra.mrb[46].mxu0 %vm481_vm0, %v37616_v5 }
 0x19a   : > { %32694 = vmatmul.mubr.msk.f32.vlgmr.msra.gmra.mrb[46].mxu1 %vm481_vm0, %v37616_v5  ;;  %35309 = vmatpush3.bf16.msra.mxu0 %v36956_v43 }
 0x19b   : > { %35319 = vmatpush3.bf16.msra.mxu1 %v36963_v44  ;;  %35312 = vmatprep.subr.msk.bf16.mxu0 %vm36844_vm3, %v36978_v49 }
 0x19c   : > { %35322 = vmatprep.subr.msk.bf16.mxu1 %vm36844_vm3, %v36981_v50  ;;  %32704 = vmatprep.mubr.msk.f32.mxu0 %vm481_vm0, %v37594_v24 }
 0x19d   : > { %32715 = vmatprep.mubr.msk.f32.mxu1 %vm481_vm0, %v37594_v24 }
 0x19e   : > { %35315 = vmatpush3.bf16.msk.msra.mxu0 %vm36844_vm3, %v36978_v49 }
 0x19f   : > { %35325 = vmatpush3.bf16.msk.msra.mxu1 %vm36844_vm3, %v36981_v50  ;;  %35327 = vmatprep.subr.bf16.mxu0 %v36996_v55 }
 0x1a0   : > { %35337 = vmatprep.subr.bf16.mxu1 %v37003_v56 }
 0x1a1   : > { %32705 = vmatmul.mubr.msk.f32.vlgmr.msra.gmra.mrb[48].mxu0 %vm481_vm0, %v37616_v5 }
 0x1a2   : > { %32716 = vmatmul.mubr.msk.f32.vlgmr.msra.gmra.mrb[48].mxu1 %vm481_vm0, %v37616_v5  ;;  %35329 = vmatpush3.bf16.msra.mxu0 %v36996_v55 }
 0x1a3   : > { %35339 = vmatpush3.bf16.msra.mxu1 %v37003_v56  ;;  %35332 = vmatprep.subr.msk.bf16.mxu0 %vm36844_vm3, %v37018_v61 }
 0x1a4   : > { %35342 = vmatprep.subr.msk.bf16.mxu1 %vm36844_vm3, %v37021_v62  ;;  %32726 = vmatprep.mubr.msk.f32.mxu0 %vm481_vm0, %v37594_v24 }
 0x1a5   : > { %32737 = vmatprep.mubr.msk.f32.mxu1 %vm481_vm0, %v37594_v24 }
 0x1a6   : > { %35335 = vmatpush3.bf16.msk.msra.mxu0 %vm36844_vm3, %v37018_v61 }
 0x1a7   : > { %35345 = vmatpush3.bf16.msk.msra.mxu1 %vm36844_vm3, %v37021_v62  ;;  %35347 = vmatprep.subr.bf16.mxu0 %v37036_v6 }
 0x1a8   : > { %35357 = vmatprep.subr.bf16.mxu1 %v37043_v7 }
 0x1a9   : > { %32727 = vmatmul.mubr.msk.f32.vlgmr.msra.gmra.mrb[50].mxu0 %vm481_vm0, %v37616_v5 }
 0x1aa   : > { %32738 = vmatmul.mubr.msk.f32.vlgmr.msra.gmra.mrb[50].mxu1 %vm481_vm0, %v37616_v5  ;;  %35349 = vmatpush3.bf16.msra.mxu0 %v37036_v6 }
 0x1ab   : > { %35359 = vmatpush3.bf16.msra.mxu1 %v37043_v7  ;;  %35352 = vmatprep.subr.msk.bf16.mxu0 %vm36844_vm3, %v37058_v15 }
 0x1ac   : > { %35362 = vmatprep.subr.msk.bf16.mxu1 %vm36844_vm3, %v37061_v16  ;;  %32748 = vmatprep.mubr.msk.f32.mxu0 %vm481_vm0, %v37594_v24 }
 0x1ad   : > { %32759 = vmatprep.mubr.msk.f32.mxu1 %vm481_vm0, %v37594_v24 }
 0x1ae   : > { %35355 = vmatpush3.bf16.msk.msra.mxu0 %vm36844_vm3, %v37058_v15 }
 0x1af   : > { %35365 = vmatpush3.bf16.msk.msra.mxu1 %vm36844_vm3, %v37061_v16  ;;  %35367 = vmatprep.subr.bf16.mxu0 %v37076_v23  ;;  %v361_v16 = vld [vmem:[%s36841_s11 + $0x20] sm:$0xff] }
 0x1b0   : > { %35377 = vmatprep.subr.bf16.mxu1 %v37083_v27 }
 0x1b1   : > { %32749 = vmatmul.mubr.msk.f32.vlgmr.msra.gmra.mrb[52].mxu0 %vm481_vm0, %v37616_v5 }
 0x1b2   : > { %32760 = vmatmul.mubr.msk.f32.vlgmr.msra.gmra.mrb[52].mxu1 %vm481_vm0, %v37616_v5  ;;  %35369 = vmatpush3.bf16.msra.mxu0 %v37076_v23  ;;  %v362_v23 = vld [vmem:[%s36841_s11 + $0x28] sm:$0xff] }
 0x1b3   : > { %35379 = vmatpush3.bf16.msra.mxu1 %v37083_v27  ;;  %35372 = vmatprep.subr.msk.bf16.mxu0 %vm36844_vm3, %v37098_v34  ;;  %v369_v27 = vld [vmem:[%s36841_s11 + $0x60] sm:$0xff] }
 0x1b4   : > { %35382 = vmatprep.subr.msk.bf16.mxu1 %vm36844_vm3, %v40717_v9  ;;  %32770 = vmatprep.mubr.msk.f32.mxu0 %vm481_vm0, %v37594_v24 }
 0x1b5   : > { %32781 = vmatprep.mubr.msk.f32.mxu1 %vm481_vm0, %v37594_v24  ;;  %v37884_v24 = vpack.c.bf16 %v362_v23, %v361_v16  ;;  %v371_v16 = vld [vmem:[%s36841_s11 + $0x70] sm:$0xff]  ;;  %v372_v23 = vld [vmem:[%s36841_s11 + $0x78] sm:$0x3f] }
 0x1b6   : > { %35375 = vmatpush3.bf16.msk.msra.mxu0 %vm36844_vm3, %v37098_v34  ;;  %v370_v34 = vld [vmem:[%s36841_s11 + $0x68] sm:$0xff] }
 0x1b7   : > { %35385 = vmatpush3.bf16.msk.msra.mxu1 %vm36844_vm3, %v40717_v9  ;;  %32784 = vmatprep.subr.mxu0 %v37772_v10  ;;  %v37890_v9 = vpack.c.bf16 %v370_v34, %v369_v27 }
 0x1b8   : > { %32789 = vmatprep.subr.mxu1 %v37772_v10 }
 0x1b9   : > { %32771 = vmatmul.mubr.msk.f32.vlgmr.msra.gmra.mrb[54].mxu0 %vm481_vm0, %v37616_v5 }
 0x1ba   : > { %32782 = vmatmul.mubr.msk.f32.vlgmr.msra.gmra.mrb[54].mxu1 %vm481_vm0, %v37616_v5  ;;  %32785 = vmatpush3.msra.mxu0 %v37772_v10 }
 0x1bb   : > { %32790 = vmatpush3.msra.mxu1 %v37772_v10  ;;  %32794 = vmatprep.subr.mxu0 %v37772_v10 }
 0x1bc   : > { %32799 = vmatprep.subr.mxu1 %v37772_v10 }
 0x25c   : > { %v32640_v14 = vpop.f32.mrb[42].mxu0 }
 0x25d   : > { %v4981_v18 = vpop.f32.mrb[43].mxu0  ;;  %v37780_v19 = vpop.f32.mrb[42].mxu1 }
 0x25e   : > { %40718 = vst [vmem:[#allocation7_spill] sm:$0xff] %v37780_v19  ;;  %32786 = vmatprep.mubr.msk.f32.mxu0 %vm2640_vm4, %v4981_v18  ;;  %v37783_v25 = vpop.f32.mrb[43].mxu1  ;;  %v364_v18 = vld [vmem:[%s36841_s11 + $0x38] sm:$0x3f] }
 0x25f   : > { %40719 = vst [vmem:[#allocation34_spill] sm:$0xff] %v37783_v25  ;;  %32787 = vmatmul.mubr.msk.f32.vlgmr.msra.gmra.mrb[28].mxu0 %vm2640_vm4, %v32640_v14  ;;  %32791 = vmatprep.mubr.msk.f32.mxu1 %vm2640_vm4, %v37783_v25  ;;  %v363_v14 = vld [vmem:[%s36841_s11 + $0x30] sm:$0xff]  ;;  %v465_v25 = vld [vmem:[%s36841_s11 + $0x360] sm:$0xff] }
 0x260   : > { %32795 = vmatpush3.msra.mxu0 %v37772_v10  ;;  %32792 = vmatmul.mubr.msk.f32.vlgmr.msra.gmra.mrb[28].mxu1 %vm2640_vm4, %v37780_v19  ;;  %v458_v19 = vld [vmem:[%s36841_s11 + $0x328] sm:$0xff] }
 0x261   : > { %32804 = vmatprep.subr.mxu0 %v37772_v10  ;;  %32800 = vmatpush3.msra.mxu1 %v37772_v10 }
 0x262   : > { %32809 = vmatprep.subr.mxu1 %v37772_v10 }
 0x264   : > { %v37794_v26 = vpop.f32.mrb[44].mxu0 }
 0x265   : > { %40720 = vst [vmem:[#allocation35_spill] sm:$0xff] %v37794_v26  ;;  %v37796_v31 = vpop.f32.mrb[45].mxu0  ;;  %v37798_v32 = vpop.f32.mrb[44].mxu1 }
 0x266   : > { %40721 = vst [vmem:[#allocation36_spill] sm:$0xff] %v37796_v31  ;;  %40722 = vst [vmem:[#allocation37_spill] sm:$0xff] %v37798_v32  ;;  %32796 = vmatprep.mubr.msk.f32.mxu0 %vm2640_vm4, %v37796_v31  ;;  %v37802_v37 = vpop.f32.mrb[45].mxu1  ;;  %v395_v31 = vld [vmem:[%s36841_s11 + $0x130] sm:$0xff] }
 0x267   : > { %40723 = vst [vmem:[#allocation38_spill] sm:$0xff] %v37802_v37  ;;  %32797 = vmatmul.mubr.msk.f32.vlgmr.msra.gmra.mrb[30].mxu0 %vm2640_vm4, %v37794_v26  ;;  %32801 = vmatprep.mubr.msk.f32.mxu1 %vm2640_vm4, %v37802_v37  ;;  %v37972_v26 = vld [vmem:[%s40621_s1 + $0x8] sm:$0x3f]  ;;  %v451_v37 = vld [vmem:[%s36841_s11 + $0x2f0] sm:$0xff] }
 0x268   : > { %32805 = vmatpush3.msra.mxu0 %v37772_v10  ;;  %32802 = vmatmul.mubr.msk.f32.vlgmr.msra.gmra.mrb[30].mxu1 %vm2640_vm4, %v37798_v32  ;;  %v450_v32 = vld [vmem:[%s36841_s11 + $0x2e8] sm:$0xff] }
 0x269   : > { %32814 = vmatprep.subr.mxu0 %v37772_v10  ;;  %32810 = vmatpush3.msra.mxu1 %v37772_v10 }
 0x26a   : > { %32819 = vmatprep.subr.mxu1 %v37772_v10 }
 0x26c   : > { %v37814_v38 = vpop.f32.mrb[46].mxu0 }
 0x26d   : > { %40724 = vst [vmem:[#allocation39_spill] sm:$0xff] %v37814_v38  ;;  %v37816_v43 = vpop.f32.mrb[47].mxu0  ;;  %v37818_v44 = vpop.f32.mrb[46].mxu1 }
 0x26e   : > { %40725 = vst [vmem:[#allocation40_spill] sm:$0xff] %v37816_v43  ;;  %40726 = vst [vmem:[#allocation41_spill] sm:$0xff] %v37818_v44  ;;  %32806 = vmatprep.mubr.msk.f32.mxu0 %vm2640_vm4, %v37816_v43  ;;  %v37822_v49 = vpop.f32.mrb[47].mxu1  ;;  %v394_v43 = vld [vmem:[%s36841_s11 + $0x128] sm:$0xff] }
 0x26f   : > { %40727 = vst [vmem:[#allocation42_spill] sm:$0xff] %v37822_v49  ;;  %32807 = vmatmul.mubr.msk.f32.vlgmr.msra.gmra.mrb[32].mxu0 %vm2640_vm4, %v37814_v38  ;;  %32811 = vmatprep.mubr.msk.f32.mxu1 %vm2640_vm4, %v37822_v49  ;;  %v393_v38 = vld [vmem:[%s36841_s11 + $0x120] sm:$0xff] }
 0x270   : > { %32815 = vmatpush3.msra.mxu0 %v37772_v10  ;;  %32812 = vmatmul.mubr.msk.f32.vlgmr.msra.gmra.mrb[32].mxu1 %vm2640_vm4, %v37818_v44  ;;  %v442_v44 = vld [vmem:[%s36841_s11 + $0x2a8] sm:$0xff]  ;;  %v449_v49 = vld [vmem:[%s36841_s11 + $0x2e0] sm:$0xff] }
 0x271   : > { %32824 = vmatprep.subr.mxu0 %v37772_v10  ;;  %32820 = vmatpush3.msra.mxu1 %v37772_v10 }
 0x272   : > { %32829 = vmatprep.subr.mxu1 %v37772_v10 }
 0x274   : > { %v37834_v50 = vpop.f32.mrb[48].mxu0 }
 0x275   : > { %40728 = vst [vmem:[#allocation43_spill] sm:$0xff] %v37834_v50  ;;  %v37836_v55 = vpop.f32.mrb[49].mxu0  ;;  %v37838_v56 = vpop.f32.mrb[48].mxu1 }
 0x276   : > { %40729 = vst [vmem:[#allocation44_spill] sm:$0xff] %v37836_v55  ;;  %40730 = vst [vmem:[#allocation45_spill] sm:$0xff] %v37838_v56  ;;  %32816 = vmatprep.mubr.msk.f32.mxu0 %vm2640_vm4, %v37836_v55  ;;  %v37842_v61 = vpop.f32.mrb[49].mxu1  ;;  %v388_v55 = vld [vmem:[%s36841_s11 + $0xf8] sm:$0x3f] }
 0x277   : > { %40731 = vst [vmem:[#allocation46_spill] sm:$0xff] %v37842_v61  ;;  %32817 = vmatmul.mubr.msk.f32.vlgmr.msra.gmra.mrb[34].mxu0 %vm2640_vm4, %v37834_v50  ;;  %32821 = vmatprep.mubr.msk.f32.mxu1 %vm2640_vm4, %v37842_v61  ;;  %v378_v50 = vld [vmem:[%s36841_s11 + $0xa8] sm:$0xff]  ;;  %v435_v61 = vld [vmem:[%s36841_s11 + $0x270] sm:$0xff] }
 0x278   : > { %32825 = vmatpush3.msra.mxu0 %v37772_v10  ;;  %32822 = vmatmul.mubr.msk.f32.vlgmr.msra.gmra.mrb[34].mxu1 %vm2640_vm4, %v37838_v56  ;;  %v434_v56 = vld [vmem:[%s36841_s11 + $0x268] sm:$0xff] }
 0x279   : > { %32834 = vmatprep.subr.mxu0 %v37772_v10  ;;  %32830 = vmatpush3.msra.mxu1 %v37772_v10 }
 0x27a   : > { %32839 = vmatprep.subr.mxu1 %v37772_v10 }
 0x27c   : > { %v37854_v62 = vpop.f32.mrb[50].mxu0 }
 0x27d   : > { %40732 = vst [vmem:[#allocation47_spill] sm:$0xff] %v37854_v62  ;;  %v37856_v6 = vpop.f32.mrb[51].mxu0  ;;  %v37858_v7 = vpop.f32.mrb[50].mxu1 }
 0x27e   : > { %40733 = vst [vmem:[#allocation48_spill] sm:$0xff] %v37856_v6  ;;  %40734 = vst [vmem:[#allocation49_spill] sm:$0xff] %v37858_v7  ;;  %32826 = vmatprep.mubr.msk.f32.mxu0 %vm2640_vm4, %v37856_v6  ;;  %v37862_v15 = vpop.f32.mrb[51].mxu1  ;;  %v377_v6 = vld [vmem:[%s36841_s11 + $0xa0] sm:$0xff] }
 0x27f   : > { %40735 = vst [vmem:[#allocation50_spill] sm:$0xff] %v37862_v15  ;;  %32827 = vmatmul.mubr.msk.f32.vlgmr.msra.gmra.mrb[36].mxu0 %vm2640_vm4, %v37854_v62  ;;  %32831 = vmatprep.mubr.msk.f32.mxu1 %vm2640_vm4, %v37862_v15  ;;  %v433_v15 = vld [vmem:[%s36841_s11 + $0x260] sm:$0xff] }
 0x280   : > { %32835 = vmatpush3.msra.mxu0 %v37772_v10  ;;  %32832 = vmatmul.mubr.msk.f32.vlgmr.msra.gmra.mrb[36].mxu1 %vm2640_vm4, %v37858_v7  ;;  %v426_v7 = vld [vmem:[%s36841_s11 + $0x228] sm:$0xff] }
 0x281   : > { %32840 = vmatpush3.msra.mxu1 %v37772_v10  ;;  %32844 = vmatprep.subr.mxu0 %v37772_v10 }
 0x282   : > { %32849 = vmatprep.subr.mxu1 %v37772_v10 }
 0x284   : > { %v37878_v39 = vpop.f32.mrb[52].mxu0 }
 0x285   : > { %40736 = vst [vmem:[#allocation51_spill] sm:$0xff] %v37878_v39  ;;  %v37880_v40 = vpop.f32.mrb[53].mxu0  ;;  %v37882_v36 = vpop.f32.mrb[52].mxu1 }
 0x286   : > { %40737 = vst [vmem:[#allocation52_spill] sm:$0xff] %v37880_v40  ;;  %40738 = vst [vmem:[#allocation53_spill] sm:$0xff] %v37882_v36  ;;  %32836 = vmatprep.mubr.msk.f32.mxu0 %vm2640_vm4, %v37880_v40  ;;  %v37888_v5 = vpop.f32.mrb[53].mxu1  ;;  %v37912_v40 = vpack.c.bf16 %v364_v18, %v363_v14  ;;  %v385_v14 = vld [vmem:[%s36841_s11 + $0xe0] sm:$0xff]  ;;  %v386_v18 = vld [vmem:[%s36841_s11 + $0xe8] sm:$0xff] }
 0x287   : > { %40739 = vst [vmem:[#allocation54_spill] sm:$0xff] %v37888_v5  ;;  %32837 = vmatmul.mubr.msk.f32.vlgmr.msra.gmra.mrb[38].mxu0 %vm2640_vm4, %v37878_v39  ;;  %32841 = vmatprep.mubr.msk.f32.mxu1 %vm2640_vm4, %v37888_v5  ;;  %v419_v5 = vld [vmem:[%s36841_s11 + $0x1f0] sm:$0xff] }
 0x288   : > { %32842 = vmatmul.mubr.msk.f32.vlgmr.msra.gmra.mrb[38].mxu1 %vm2640_vm4, %v37882_v36  ;;  %32845 = vmatpush3.msra.mxu0 %v37772_v10  ;;  %v418_v36 = vld [vmem:[%s36841_s11 + $0x1e8] sm:$0xff] }
 0x289   : > { %32850 = vmatpush3.msra.mxu1 %v37772_v10  ;;  %35387 = vmatprep.subr.bf16.mxu0 %v37884_v24  ;;  %v37918_v10 = vpack.c.bf16 %v372_v23, %v371_v16  ;;  %v37935_v16 = vpack.c.bf16 %v378_v50, %v377_v6  ;;  %v37943_v23 = vld [vmem:[%s40621_s1] sm:$0xff]  ;;  %v380_v50 = vld [vmem:[%s36841_s11 + $0xb8] sm:$0x3f]  ;;  %v387_v6 = vld [vmem:[%s36841_s11 + $0xf0] sm:$0xff] }
 0x28a   : > { %35397 = vmatprep.subr.bf16.mxu1 %v37890_v9 }
 0x28c   : > { %v37906_v27 = vpop.f32.mrb[54].mxu0 }
 0x28d   : > { %40740 = vst [vmem:[#allocation55_spill] sm:$0xff] %v37906_v27  ;;  %v37908_v34 = vpop.f32.mrb[54].mxu1  ;;  %v37910_v39 = vpop.f32.mrb[55].mxu0 }
 0x28e   : > { %40741 = vst [vmem:[#allocation56_spill] sm:$0xff] %v37908_v34  ;;  %40742 = vst [vmem:[#allocation57_spill] sm:$0xff] %v37910_v39  ;;  %v37914_v62 = vpop.f32.mrb[55].mxu1  ;;  %32846 = vmatprep.mubr.msk.f32.mxu0 %vm2640_vm4, %v37910_v39  ;;  %v379_v39 = vld [vmem:[%s36841_s11 + $0xb0] sm:$0xff] }
 0x28f   : > { %40743 = vst [vmem:[#allocation58_spill] sm:$0xff] %v37914_v62  ;;  %32851 = vmatprep.mubr.msk.f32.mxu1 %vm2640_vm4, %v37914_v62  ;;  %32847 = vmatmul.mubr.msk.f32.vlgmr.msra.gmra.mrb[40].mxu0 %vm2640_vm4, %v37906_v27  ;;  %v37947_v27 = vpack.c.bf16 %v386_v18, %v385_v14  ;;  %v37962_v14 = vpack.c.bf16 %v380_v50, %v379_v39  ;;  %v401_v39 = vld [vmem:[%s36841_s11 + $0x160] sm:$0xff]  ;;  %v402_v50 = vld [vmem:[%s36841_s11 + $0x168] sm:$0xff] }
 0x290   : > { %32852 = vmatmul.mubr.msk.f32.vlgmr.msra.gmra.mrb[40].mxu1 %vm2640_vm4, %v37908_v34  ;;  %35389 = vmatpush3.bf16.msra.mxu0 %v37884_v24  ;;  %v37965_v18 = vpack.c.bf16 %v388_v55, %v387_v6  ;;  %v37985_v55 = vpack.c.bf16 %v394_v43, %v393_v38  ;;  %v37992_v6 = vpack.c.bf16 %v402_v50, %v401_v39  ;;  %v404_v38 = vld [vmem:[%s36841_s11 + $0x178] sm:$0x3f]  ;;  %v409_v50 = vld [vmem:[%s36841_s11 + $0x1a0] sm:$0xff]  ;;  %v410_v34 = vld [vmem:[%s36841_s11 + $0x1a8] sm:$0xff] }
 0x291   : > { %35399 = vmatpush3.bf16.msra.mxu1 %v37890_v9  ;;  %35392 = vmatprep.subr.msk.bf16.mxu0 %vm36844_vm3, %v37912_v40  ;;  %v38007_v43 = vpack.c.bf16 %v396_v28, %v395_v31  ;;  %v38010_v39 = vpack.c.bf16 %v404_v38, %v403_v35  ;;  %v417_v62 = vld [vmem:[%s36841_s11 + $0x1e0] sm:$0xff]  ;;  %v38025_v35 = vpack.c.bf16 %v410_v34, %v409_v50  ;;  %v411_v31 = vld [vmem:[%s36841_s11 + $0x1b0] sm:$0xff]  ;;  %v412_v38 = vld [vmem:[%s36841_s11 + $0x1b8] sm:$0x3f] }
 0x292   : > { %35402 = vmatprep.subr.msk.bf16.mxu1 %vm36844_vm3, %v37918_v10  ;;  %32862 = vmatprep.mubr.msk.f32.mxu0 %vm481_vm0, %v37943_v23  ;;  %v38032_v28 = vpack.c.bf16 %v418_v36, %v417_v62  ;;  %v420_v34 = vld [vmem:[%s36841_s11 + $0x1f8] sm:$0x3f]  ;;  %v38047_v62 = vpack.c.bf16 %v412_v38, %v411_v31  ;;  %v425_v50 = vld [vmem:[%s36841_s11 + $0x220] sm:$0xff]  ;;  %v38072_v31 = vpack.c.bf16 %v434_v56, %v433_v15  ;;  %v427_v38 = vld [vmem:[%s36841_s11 + $0x230] sm:$0xff] }
 0x293   : > { %32873 = vmatprep.mubr.msk.f32.mxu1 %vm481_vm0, %v37943_v23  ;;  %v38050_v36 = vpack.c.bf16 %v420_v34, %v419_v5  ;;  %v38065_v5 = vpack.c.bf16 %v426_v7, %v425_v50  ;;  %v428_v34 = vld [vmem:[%s36841_s11 + $0x238] sm:$0x3f]  ;;  %v441_v50 = vld [vmem:[%s36841_s11 + $0x2a0] sm:$0xff] }
 0x294   : > { %35395 = vmatpush3.bf16.msk.msra.mxu0 %vm36844_vm3, %v37912_v40  ;;  %v436_v7 = vld [vmem:[%s36841_s11 + $0x278] sm:$0x3f]  ;;  %v38087_v56 = vpack.c.bf16 %v428_v34, %v427_v38  ;;  %v38112_v38 = vpack.c.bf16 %v450_v32, %v449_v49  ;;  %v443_v34 = vld [vmem:[%s36841_s11 + $0x2b0] sm:$0xff] }
 0x295   : > { %35405 = vmatpush3.bf16.msk.msra.mxu1 %vm36844_vm3, %v37918_v10  ;;  %35407 = vmatprep.subr.bf16.mxu0 %v37935_v16  ;;  %v38090_v15 = vpack.c.bf16 %v436_v7, %v435_v61  ;;  %v38105_v61 = vpack.c.bf16 %v442_v44, %v441_v50  ;;  %v444_v7 = vld [vmem:[%s36841_s11 + $0x2b8] sm:$0x3f]  ;;  %v457_v50 = vld [vmem:[%s36841_s11 + $0x320] sm:$0xff] }
 0x296   : > { %35417 = vmatprep.subr.bf16.mxu1 %v37947_v27  ;;  %v452_v44 = vld [vmem:[%s36841_s11 + $0x2f8] sm:$0x3f]  ;;  %v38127_v32 = vpack.c.bf16 %v444_v7, %v443_v34  ;;  %v38152_v34 = vpack.c.bf16 %v466_v30, %v465_v25  ;;  %v459_v7 = vld [vmem:[%s36841_s11 + $0x330] sm:$0xff]  ;;  %v38170_v30 = vpack.c.bf16 %v468_v0, %v467_v33 }
 0x297   : > { %32863 = vmatmul.mubr.msk.f32.vlgmr.msra.gmra.mrb[56].mxu0 %vm481_vm0, %v37972_v26  ;;  %v38130_v49 = vpack.c.bf16 %v452_v44, %v451_v37  ;;  %v38145_v37 = vpack.c.bf16 %v458_v19, %v457_v50  ;;  %v460_v44 = vld [vmem:[%s36841_s11 + $0x338] sm:$0x3f] }
 0x298   : > { %32874 = vmatmul.mubr.msk.f32.vlgmr.msra.gmra.mrb[56].mxu1 %vm481_vm0, %v37972_v26  ;;  %35409 = vmatpush3.bf16.msra.mxu0 %v37935_v16  ;;  %v38167_v19 = vpack.c.bf16 %v460_v44, %v459_v7  ;;  %v38201_v33 = vld [vmem:[%s40624_s4 + $0x18] sm:$0xff] }
 0x299   : > { %35419 = vmatpush3.bf16.msra.mxu1 %v37947_v27  ;;  %35412 = vmatprep.subr.msk.bf16.mxu0 %vm36844_vm3, %v37962_v14 }
 0x29a   : > { %35422 = vmatprep.subr.msk.bf16.mxu1 %vm36844_vm3, %v37965_v18  ;;  %32884 = vmatprep.mubr.msk.f32.mxu0 %vm481_vm0, %v37943_v23 }
 0x29b   : > { %32895 = vmatprep.mubr.msk.f32.mxu1 %vm481_vm0, %v37943_v23 }
 0x29c   : > { %35415 = vmatpush3.bf16.msk.msra.mxu0 %vm36844_vm3, %v37962_v14 }
 0x29d   : > { %35425 = vmatpush3.bf16.msk.msra.mxu1 %vm36844_vm3, %v37965_v18  ;;  %35427 = vmatprep.subr.bf16.mxu0 %v37985_v55 }
 0x29e   : > { %35437 = vmatprep.subr.bf16.mxu1 %v37992_v6 }
 0x29f   : > { %32885 = vmatmul.mubr.msk.f32.vlgmr.msra.gmra.mrb[58].mxu0 %vm481_vm0, %v37972_v26 }
 0x2a0   : > { %32896 = vmatmul.mubr.msk.f32.vlgmr.msra.gmra.mrb[58].mxu1 %vm481_vm0, %v37972_v26  ;;  %35429 = vmatpush3.bf16.msra.mxu0 %v37985_v55 }
 0x2a1   : > { %35439 = vmatpush3.bf16.msra.mxu1 %v37992_v6  ;;  %35432 = vmatprep.subr.msk.bf16.mxu0 %vm36844_vm3, %v38007_v43 }
 0x2a2   : > { %35442 = vmatprep.subr.msk.bf16.mxu1 %vm36844_vm3, %v38010_v39  ;;  %32906 = vmatprep.mubr.msk.f32.mxu0 %vm481_vm0, %v37943_v23 }
 0x2a3   : > { %32917 = vmatprep.mubr.msk.f32.mxu1 %vm481_vm0, %v37943_v23 }
 0x2a4   : > { %35435 = vmatpush3.bf16.msk.msra.mxu0 %vm36844_vm3, %v38007_v43 }
 0x2a5   : > { %35445 = vmatpush3.bf16.msk.msra.mxu1 %vm36844_vm3, %v38010_v39  ;;  %35447 = vmatprep.subr.bf16.mxu0 %v38025_v35 }
 0x2a6   : > { %35457 = vmatprep.subr.bf16.mxu1 %v38032_v28 }
 0x2a7   : > { %32907 = vmatmul.mubr.msk.f32.vlgmr.msra.gmra.mrb[60].mxu0 %vm481_vm0, %v37972_v26 }
 0x2a8   : > { %32918 = vmatmul.mubr.msk.f32.vlgmr.msra.gmra.mrb[60].mxu1 %vm481_vm0, %v37972_v26  ;;  %35449 = vmatpush3.bf16.msra.mxu0 %v38025_v35 }
 0x2a9   : > { %35459 = vmatpush3.bf16.msra.mxu1 %v38032_v28  ;;  %35452 = vmatprep.subr.msk.bf16.mxu0 %vm36844_vm3, %v38047_v62 }
 0x2aa   : > { %35462 = vmatprep.subr.msk.bf16.mxu1 %vm36844_vm3, %v38050_v36  ;;  %32928 = vmatprep.mubr.msk.f32.mxu0 %vm481_vm0, %v37943_v23 }
 0x2ab   : > { %32939 = vmatprep.mubr.msk.f32.mxu1 %vm481_vm0, %v37943_v23 }
 0x2ac   : > { %35455 = vmatpush3.bf16.msk.msra.mxu0 %vm36844_vm3, %v38047_v62 }
 0x2ad   : > { %35465 = vmatpush3.bf16.msk.msra.mxu1 %vm36844_vm3, %v38050_v36  ;;  %35467 = vmatprep.subr.bf16.mxu0 %v38065_v5 }
 0x2ae   : > { %35477 = vmatprep.subr.bf16.mxu1 %v38072_v31 }
 0x2af   : > { %32929 = vmatmul.mubr.msk.f32.vlgmr.msra.gmra.mrb[62].mxu0 %vm481_vm0, %v37972_v26 }
 0x2b0   : > { %32940 = vmatmul.mubr.msk.f32.vlgmr.msra.gmra.mrb[62].mxu1 %vm481_vm0, %v37972_v26  ;;  %35469 = vmatpush3.bf16.msra.mxu0 %v38065_v5 }
 0x2b1   : > { %35479 = vmatpush3.bf16.msra.mxu1 %v38072_v31  ;;  %35472 = vmatprep.subr.msk.bf16.mxu0 %vm36844_vm3, %v38087_v56 }
 0x2b2   : > { %35482 = vmatprep.subr.msk.bf16.mxu1 %vm36844_vm3, %v38090_v15  ;;  %32950 = vmatprep.mubr.msk.f32.mxu0 %vm481_vm0, %v37943_v23 }
 0x2b3   : > { %32961 = vmatprep.mubr.msk.f32.mxu1 %vm481_vm0, %v37943_v23 }
 0x2b4   : > { %35475 = vmatpush3.bf16.msk.msra.mxu0 %vm36844_vm3, %v38087_v56 }
 0x2b5   : > { %35485 = vmatpush3.bf16.msk.msra.mxu1 %vm36844_vm3, %v38090_v15  ;;  %35487 = vmatprep.subr.bf16.mxu0 %v38105_v61 }
 0x2b6   : > { %35497 = vmatprep.subr.bf16.mxu1 %v38112_v38 }
 0x2b7   : > { %32951 = vmatmul.mubr.msk.f32.vlgmr.msra.gmra.mrb[64].mxu0 %vm481_vm0, %v37972_v26 }
 0x2b8   : > { %32962 = vmatmul.mubr.msk.f32.vlgmr.msra.gmra.mrb[64].mxu1 %vm481_vm0, %v37972_v26  ;;  %35489 = vmatpush3.bf16.msra.mxu0 %v38105_v61 }
 0x2b9   : > { %35499 = vmatpush3.bf16.msra.mxu1 %v38112_v38  ;;  %35492 = vmatprep.subr.msk.bf16.mxu0 %vm36844_vm3, %v38127_v32 }
 0x2ba   : > { %35502 = vmatprep.subr.msk.bf16.mxu1 %vm36844_vm3, %v38130_v49  ;;  %32972 = vmatprep.mubr.msk.f32.mxu0 %vm481_vm0, %v37943_v23 }
 0x2bb   : > { %32983 = vmatprep.mubr.msk.f32.mxu1 %vm481_vm0, %v37943_v23 }
 0x2bc   : > { %35495 = vmatpush3.bf16.msk.msra.mxu0 %vm36844_vm3, %v38127_v32 }
 0x2bd   : > { %35505 = vmatpush3.bf16.msk.msra.mxu1 %vm36844_vm3, %v38130_v49  ;;  %35507 = vmatprep.subr.bf16.mxu0 %v38145_v37 }
 0x2be   : > { %35517 = vmatprep.subr.bf16.mxu1 %v38152_v34 }
 0x2bf   : > { %32973 = vmatmul.mubr.msk.f32.vlgmr.msra.gmra.mrb[66].mxu0 %vm481_vm0, %v37972_v26 }
 0x2c0   : > { %32984 = vmatmul.mubr.msk.f32.vlgmr.msra.gmra.mrb[66].mxu1 %vm481_vm0, %v37972_v26  ;;  %35509 = vmatpush3.bf16.msra.mxu0 %v38145_v37 }
 0x2c1   : > { %35519 = vmatpush3.bf16.msra.mxu1 %v38152_v34  ;;  %35512 = vmatprep.subr.msk.bf16.mxu0 %vm36844_vm3, %v38167_v19 }
 0x2c2   : > { %35522 = vmatprep.subr.msk.bf16.mxu1 %vm36844_vm3, %v38170_v30  ;;  %32994 = vmatprep.mubr.msk.f32.mxu0 %vm481_vm0, %v37943_v23 }
 0x2c3   : > { %33005 = vmatprep.mubr.msk.f32.mxu1 %vm481_vm0, %v37943_v23 }
 0x2c4   : > { %35515 = vmatpush3.bf16.msk.msra.mxu0 %vm36844_vm3, %v38167_v19 }
 0x2c5   : > { %35525 = vmatpush3.bf16.msk.msra.mxu1 %vm36844_vm3, %v38170_v30  ;;  %33008 = vmatprep.subr.mxu0 %v38201_v33 }
 0x2c6   : > { %33013 = vmatprep.subr.mxu1 %v38201_v33 }
 0x2c7   : > { %32995 = vmatmul.mubr.msk.f32.vlgmr.msra.gmra.mrb[68].mxu0 %vm481_vm0, %v37972_v26 }
 0x2c8   : > { %33006 = vmatmul.mubr.msk.f32.vlgmr.msra.gmra.mrb[68].mxu1 %vm481_vm0, %v37972_v26  ;;  %33009 = vmatpush3.msra.mxu0 %v38201_v33 }
 0x2c9   : > { %33014 = vmatpush3.msra.mxu1 %v38201_v33  ;;  %33018 = vmatprep.subr.mxu0 %v38201_v33 }
 0x2ca   : > { %33023 = vmatprep.subr.mxu1 %v38201_v33 }
 0x36a   : > { %v32864_v0 = vpop.f32.mrb[56].mxu0 }
 0x36b   : > { %v7198_v25 = vpop.f32.mrb[57].mxu0  ;;  %v32875_v26 = vpop.f32.mrb[56].mxu1 }
 0x36c   : > { %33010 = vmatprep.mubr.msk.f32.mxu0 %vm2640_vm4, %v7198_v25  ;;  %v7276_v23 = vpop.f32.mrb[57].mxu1 }
 0x36d   : > { %33011 = vmatmul.mubr.msk.f32.vlgmr.msra.gmra.mrb[28].mxu0 %vm2640_vm4, %v32864_v0  ;;  %33015 = vmatprep.mubr.msk.f32.mxu1 %vm2640_vm4, %v7276_v23 }
 0x36e   : > { %33019 = vmatpush3.msra.mxu0 %v38201_v33  ;;  %33016 = vmatmul.mubr.msk.f32.vlgmr.msra.gmra.mrb[28].mxu1 %vm2640_vm4, %v32875_v26 }
 0x36f   : > { %33028 = vmatprep.subr.mxu0 %v38201_v33  ;;  %33024 = vmatpush3.msra.mxu1 %v38201_v33 }
 0x370   : > { %33033 = vmatprep.subr.mxu1 %v38201_v33 }
 0x372   : > { %v32886_v50 = vpop.f32.mrb[58].mxu0 }
 0x373   : > { %v7354_v7 = vpop.f32.mrb[59].mxu0  ;;  %v32897_v44 = vpop.f32.mrb[58].mxu1 }
 0x374   : > { %33020 = vmatprep.mubr.msk.f32.mxu0 %vm2640_vm4, %v7354_v7  ;;  %v7432_v25 = vpop.f32.mrb[59].mxu1 }
 0x375   : > { %33021 = vmatmul.mubr.msk.f32.vlgmr.msra.gmra.mrb[30].mxu0 %vm2640_vm4, %v32886_v50  ;;  %33025 = vmatprep.mubr.msk.f32.mxu1 %vm2640_vm4, %v7432_v25 }
 0x376   : > { %33029 = vmatpush3.msra.mxu0 %v38201_v33  ;;  %33026 = vmatmul.mubr.msk.f32.vlgmr.msra.gmra.mrb[30].mxu1 %vm2640_vm4, %v32897_v44 }
 0x377   : > { %33038 = vmatprep.subr.mxu0 %v38201_v33  ;;  %33034 = vmatpush3.msra.mxu1 %v38201_v33 }
 0x378   : > { %33043 = vmatprep.subr.mxu1 %v38201_v33 }
 0x37a   : > { %v32908_v0 = vpop.f32.mrb[60].mxu0 }
 0x37b   : > { %v7510_v26 = vpop.f32.mrb[61].mxu0  ;;  %v32919_v23 = vpop.f32.mrb[60].mxu1 }
 0x37c   : > { %33030 = vmatprep.mubr.msk.f32.mxu0 %vm2640_vm4, %v7510_v26  ;;  %v7588_v7 = vpop.f32.mrb[61].mxu1 }
 0x37d   : > { %33031 = vmatmul.mubr.msk.f32.vlgmr.msra.gmra.mrb[32].mxu0 %vm2640_vm4, %v32908_v0  ;;  %33035 = vmatprep.mubr.msk.f32.mxu1 %vm2640_vm4, %v7588_v7 }
 0x37e   : > { %33039 = vmatpush3.msra.mxu0 %v38201_v33  ;;  %33036 = vmatmul.mubr.msk.f32.vlgmr.msra.gmra.mrb[32].mxu1 %vm2640_vm4, %v32919_v23 }
 0x37f   : > { %33048 = vmatprep.subr.mxu0 %v38201_v33  ;;  %33044 = vmatpush3.msra.mxu1 %v38201_v33 }
 0x380   : > { %33053 = vmatprep.subr.mxu1 %v38201_v33 }
 0x382   : > { %v32930_v50 = vpop.f32.mrb[62].mxu0 }
 0x383   : > { %v7666_v44 = vpop.f32.mrb[63].mxu0  ;;  %v32941_v25 = vpop.f32.mrb[62].mxu1 }
 0x384   : > { %33040 = vmatprep.mubr.msk.f32.mxu0 %vm2640_vm4, %v7666_v44  ;;  %v7744_v26 = vpop.f32.mrb[63].mxu1 }
 0x385   : > { %33041 = vmatmul.mubr.msk.f32.vlgmr.msra.gmra.mrb[34].mxu0 %vm2640_vm4, %v32930_v50  ;;  %33045 = vmatprep.mubr.msk.f32.mxu1 %vm2640_vm4, %v7744_v26 }
 0x386   : > { %33049 = vmatpush3.msra.mxu0 %v38201_v33  ;;  %33046 = vmatmul.mubr.msk.f32.vlgmr.msra.gmra.mrb[34].mxu1 %vm2640_vm4, %v32941_v25 }
 0x387   : > { %33058 = vmatprep.subr.mxu0 %v38201_v33  ;;  %33054 = vmatpush3.msra.mxu1 %v38201_v33 }
 0x388   : > { %33063 = vmatprep.subr.mxu1 %v38201_v33 }
 0x38a   : > { %v32952_v0 = vpop.f32.mrb[64].mxu0 }
 0x38b   : > { %v7822_v23 = vpop.f32.mrb[65].mxu0  ;;  %v32963_v7 = vpop.f32.mrb[64].mxu1 }
 0x38c   : > { %33050 = vmatprep.mubr.msk.f32.mxu0 %vm2640_vm4, %v7822_v23  ;;  %v7900_v44 = vpop.f32.mrb[65].mxu1 }
 0x38d   : > { %33051 = vmatmul.mubr.msk.f32.vlgmr.msra.gmra.mrb[36].mxu0 %vm2640_vm4, %v32952_v0  ;;  %33055 = vmatprep.mubr.msk.f32.mxu1 %vm2640_vm4, %v7900_v44 }
 0x38e   : > { %33059 = vmatpush3.msra.mxu0 %v38201_v33  ;;  %33056 = vmatmul.mubr.msk.f32.vlgmr.msra.gmra.mrb[36].mxu1 %vm2640_vm4, %v32963_v7 }
 0x38f   : > { %33064 = vmatpush3.msra.mxu1 %v38201_v33  ;;  %33068 = vmatprep.subr.mxu0 %v38201_v33 }
 0x390   : > { %33073 = vmatprep.subr.mxu1 %v38201_v33 }
 0x392   : > { %v32974_v50 = vpop.f32.mrb[66].mxu0 }
 0x393   : > { %v7978_v25 = vpop.f32.mrb[67].mxu0  ;;  %v32985_v26 = vpop.f32.mrb[66].mxu1 }
 0x394   : > { %33060 = vmatprep.mubr.msk.f32.mxu0 %vm2640_vm4, %v7978_v25  ;;  %v8056_v23 = vpop.f32.mrb[67].mxu1 }
 0x395   : > { %33061 = vmatmul.mubr.msk.f32.vlgmr.msra.gmra.mrb[38].mxu0 %vm2640_vm4, %v32974_v50  ;;  %33065 = vmatprep.mubr.msk.f32.mxu1 %vm2640_vm4, %v8056_v23  ;;  %v38440_v50 = vld [vmem:[%s40624_s4 + $0x20] sm:$0xff] }
 0x396   : > { %33066 = vmatmul.mubr.msk.f32.vlgmr.msra.gmra.mrb[38].mxu1 %vm2640_vm4, %v32985_v26  ;;  %33069 = vmatpush3.msra.mxu0 %v38201_v33 }
 0x397   : > { %33074 = vmatpush3.msra.mxu1 %v38201_v33  ;;  %35527 = vmatprep.subr.bf16.mxu0 %v37884_v24  ;;  %v38289_v33 = vld [vmem:[%s40621_s1 + $0x18] sm:$0x3f] }
 0x398   : > { %35537 = vmatprep.subr.bf16.mxu1 %v37890_v9  ;;  %40744 = vst [vmem:[#allocation59_spill] sm:$0xff] %v38289_v33 }
 0x39a   : > { %v32996_v0 = vpop.f32.mrb[68].mxu0 }
 0x39b   : > { %v33007_v7 = vpop.f32.mrb[68].mxu1  ;;  %v8134_v44 = vpop.f32.mrb[69].mxu0 }
 0x39c   : > { %v8212_v29 = vpop.f32.mrb[69].mxu1  ;;  %33070 = vmatprep.mubr.msk.f32.mxu0 %vm2640_vm4, %v8134_v44 }
 0x39d   : > { %33075 = vmatprep.mubr.msk.f32.mxu1 %vm2640_vm4, %v8212_v29  ;;  %33071 = vmatmul.mubr.msk.f32.vlgmr.msra.gmra.mrb[40].mxu0 %vm2640_vm4, %v32996_v0  ;;  %v38272_v29 = vld [vmem:[%s40621_s1 + $0x10] sm:$0xff] }
 0x39e   : > { %33076 = vmatmul.mubr.msk.f32.vlgmr.msra.gmra.mrb[40].mxu1 %vm2640_vm4, %v33007_v7  ;;  %35529 = vmatpush3.bf16.msra.mxu0 %v37884_v24 }
 0x39f   : > { %35539 = vmatpush3.bf16.msra.mxu1 %v37890_v9  ;;  %35532 = vmatprep.subr.msk.bf16.mxu0 %vm36844_vm3, %v37912_v40 }
 0x3a0   : > { %35542 = vmatprep.subr.msk.bf16.mxu1 %vm36844_vm3, %v37918_v10  ;;  %33086 = vmatprep.mubr.msk.f32.mxu0 %vm481_vm0, %v38272_v29 }
 0x3a1   : > { %33097 = vmatprep.mubr.msk.f32.mxu1 %vm481_vm0, %v38272_v29 }
 0x3a2   : > { %35535 = vmatpush3.bf16.msk.msra.mxu0 %vm36844_vm3, %v37912_v40 }
 0x3a3   : > { %35545 = vmatpush3.bf16.msk.msra.mxu1 %vm36844_vm3, %v37918_v10  ;;  %35547 = vmatprep.subr.bf16.mxu0 %v37935_v16 }
 0x3a4   : > { %35557 = vmatprep.subr.bf16.mxu1 %v37947_v27 }
 0x3a5   : > { %33087 = vmatmul.mubr.msk.f32.vlgmr.msra.gmra.mrb[70].mxu0 %vm481_vm0, %v38289_v33 }
 0x3a6   : > { %33098 = vmatmul.mubr.msk.f32.vlgmr.msra.gmra.mrb[70].mxu1 %vm481_vm0, %v38289_v33  ;;  %35549 = vmatpush3.bf16.msra.mxu0 %v37935_v16 }
 0x3a7   : > { %35559 = vmatpush3.bf16.msra.mxu1 %v37947_v27  ;;  %35552 = vmatprep.subr.msk.bf16.mxu0 %vm36844_vm3, %v37962_v14 }
 0x3a8   : > { %35562 = vmatprep.subr.msk.bf16.mxu1 %vm36844_vm3, %v37965_v18  ;;  %33108 = vmatprep.mubr.msk.f32.mxu0 %vm481_vm0, %v38272_v29 }
 0x3a9   : > { %33119 = vmatprep.mubr.msk.f32.mxu1 %vm481_vm0, %v38272_v29 }
 0x3aa   : > { %35555 = vmatpush3.bf16.msk.msra.mxu0 %vm36844_vm3, %v37962_v14 }
 0x3ab   : > { %35565 = vmatpush3.bf16.msk.msra.mxu1 %vm36844_vm3, %v37965_v18  ;;  %35567 = vmatprep.subr.bf16.mxu0 %v37985_v55 }
 0x3ac   : > { %35577 = vmatprep.subr.bf16.mxu1 %v37992_v6 }
 0x3ad   : > { %33109 = vmatmul.mubr.msk.f32.vlgmr.msra.gmra.mrb[72].mxu0 %vm481_vm0, %v38289_v33 }
 0x3ae   : > { %33120 = vmatmul.mubr.msk.f32.vlgmr.msra.gmra.mrb[72].mxu1 %vm481_vm0, %v38289_v33  ;;  %35569 = vmatpush3.bf16.msra.mxu0 %v37985_v55 }
 0x3af   : > { %35579 = vmatpush3.bf16.msra.mxu1 %v37992_v6  ;;  %35572 = vmatprep.subr.msk.bf16.mxu0 %vm36844_vm3, %v38007_v43 }
 0x3b0   : > { %35582 = vmatprep.subr.msk.bf16.mxu1 %vm36844_vm3, %v38010_v39  ;;  %33130 = vmatprep.mubr.msk.f32.mxu0 %vm481_vm0, %v38272_v29 }
 0x3b1   : > { %33141 = vmatprep.mubr.msk.f32.mxu1 %vm481_vm0, %v38272_v29 }
 0x3b2   : > { %35575 = vmatpush3.bf16.msk.msra.mxu0 %vm36844_vm3, %v38007_v43 }
 0x3b3   : > { %35585 = vmatpush3.bf16.msk.msra.mxu1 %vm36844_vm3, %v38010_v39  ;;  %35587 = vmatprep.subr.bf16.mxu0 %v38025_v35 }
 0x3b4   : > { %35597 = vmatprep.subr.bf16.mxu1 %v38032_v28 }
 0x3b5   : > { %33131 = vmatmul.mubr.msk.f32.vlgmr.msra.gmra.mrb[74].mxu0 %vm481_vm0, %v38289_v33 }
 0x3b6   : > { %33142 = vmatmul.mubr.msk.f32.vlgmr.msra.gmra.mrb[74].mxu1 %vm481_vm0, %v38289_v33  ;;  %35589 = vmatpush3.bf16.msra.mxu0 %v38025_v35 }
 0x3b7   : > { %35599 = vmatpush3.bf16.msra.mxu1 %v38032_v28  ;;  %35592 = vmatprep.subr.msk.bf16.mxu0 %vm36844_vm3, %v38047_v62 }
 0x3b8   : > { %35602 = vmatprep.subr.msk.bf16.mxu1 %vm36844_vm3, %v38050_v36  ;;  %33152 = vmatprep.mubr.msk.f32.mxu0 %vm481_vm0, %v38272_v29 }
 0x3b9   : > { %33163 = vmatprep.mubr.msk.f32.mxu1 %vm481_vm0, %v38272_v29 }
 0x3ba   : > { %35595 = vmatpush3.bf16.msk.msra.mxu0 %vm36844_vm3, %v38047_v62 }
 0x3bb   : > { %35605 = vmatpush3.bf16.msk.msra.mxu1 %vm36844_vm3, %v38050_v36  ;;  %35607 = vmatprep.subr.bf16.mxu0 %v38065_v5 }
 0x3bc   : > { %35617 = vmatprep.subr.bf16.mxu1 %v38072_v31 }
 0x3bd   : > { %33153 = vmatmul.mubr.msk.f32.vlgmr.msra.gmra.mrb[76].mxu0 %vm481_vm0, %v38289_v33 }
 0x3be   : > { %33164 = vmatmul.mubr.msk.f32.vlgmr.msra.gmra.mrb[76].mxu1 %vm481_vm0, %v38289_v33  ;;  %35609 = vmatpush3.bf16.msra.mxu0 %v38065_v5 }
 0x3bf   : > { %35619 = vmatpush3.bf16.msra.mxu1 %v38072_v31  ;;  %35612 = vmatprep.subr.msk.bf16.mxu0 %vm36844_vm3, %v38087_v56 }
 0x3c0   : > { %35622 = vmatprep.subr.msk.bf16.mxu1 %vm36844_vm3, %v38090_v15  ;;  %33174 = vmatprep.mubr.msk.f32.mxu0 %vm481_vm0, %v38272_v29 }
 0x3c1   : > { %33185 = vmatprep.mubr.msk.f32.mxu1 %vm481_vm0, %v38272_v29 }
 0x3c2   : > { %35615 = vmatpush3.bf16.msk.msra.mxu0 %vm36844_vm3, %v38087_v56 }
 0x3c3   : > { %35625 = vmatpush3.bf16.msk.msra.mxu1 %vm36844_vm3, %v38090_v15  ;;  %35627 = vmatprep.subr.bf16.mxu0 %v38105_v61 }
 0x3c4   : > { %35637 = vmatprep.subr.bf16.mxu1 %v38112_v38 }
 0x3c5   : > { %33175 = vmatmul.mubr.msk.f32.vlgmr.msra.gmra.mrb[78].mxu0 %vm481_vm0, %v38289_v33 }
 0x3c6   : > { %33186 = vmatmul.mubr.msk.f32.vlgmr.msra.gmra.mrb[78].mxu1 %vm481_vm0, %v38289_v33  ;;  %35629 = vmatpush3.bf16.msra.mxu0 %v38105_v61 }
 0x3c7   : > { %35639 = vmatpush3.bf16.msra.mxu1 %v38112_v38  ;;  %35632 = vmatprep.subr.msk.bf16.mxu0 %vm36844_vm3, %v38127_v32 }
 0x3c8   : > { %35642 = vmatprep.subr.msk.bf16.mxu1 %vm36844_vm3, %v38130_v49  ;;  %33196 = vmatprep.mubr.msk.f32.mxu0 %vm481_vm0, %v38272_v29 }
 0x3c9   : > { %33207 = vmatprep.mubr.msk.f32.mxu1 %vm481_vm0, %v38272_v29 }
 0x3ca   : > { %35635 = vmatpush3.bf16.msk.msra.mxu0 %vm36844_vm3, %v38127_v32 }
 0x3cb   : > { %35645 = vmatpush3.bf16.msk.msra.mxu1 %vm36844_vm3, %v38130_v49  ;;  %35647 = vmatprep.subr.bf16.mxu0 %v38145_v37 }
 0x3cc   : > { %35657 = vmatprep.subr.bf16.mxu1 %v38152_v34 }
 0x3cd   : > { %33197 = vmatmul.mubr.msk.f32.vlgmr.msra.gmra.mrb[80].mxu0 %vm481_vm0, %v38289_v33 }
 0x3ce   : > { %33208 = vmatmul.mubr.msk.f32.vlgmr.msra.gmra.mrb[80].mxu1 %vm481_vm0, %v38289_v33  ;;  %35649 = vmatpush3.bf16.msra.mxu0 %v38145_v37 }
 0x3cf   : > { %35659 = vmatpush3.bf16.msra.mxu1 %v38152_v34  ;;  %35652 = vmatprep.subr.msk.bf16.mxu0 %vm36844_vm3, %v38167_v19 }
 0x3d0   : > { %35662 = vmatprep.subr.msk.bf16.mxu1 %vm36844_vm3, %v38170_v30  ;;  %33218 = vmatprep.mubr.msk.f32.mxu0 %vm481_vm0, %v38272_v29 }
 0x3d1   : > { %33229 = vmatprep.mubr.msk.f32.mxu1 %vm481_vm0, %v38272_v29 }
 0x3d2   : > { %35655 = vmatpush3.bf16.msk.msra.mxu0 %vm36844_vm3, %v38167_v19 }
 0x3d3   : > { %35665 = vmatpush3.bf16.msk.msra.mxu1 %vm36844_vm3, %v38170_v30  ;;  %33232 = vmatprep.subr.mxu0 %v38440_v50 }
 0x3d4   : > { %33237 = vmatprep.subr.mxu1 %v38440_v50 }
 0x3d5   : > { %33219 = vmatmul.mubr.msk.f32.vlgmr.msra.gmra.mrb[82].mxu0 %vm481_vm0, %v38289_v33 }
 0x3d6   : > { %33230 = vmatmul.mubr.msk.f32.vlgmr.msra.gmra.mrb[82].mxu1 %vm481_vm0, %v38289_v33  ;;  %33233 = vmatpush3.msra.mxu0 %v38440_v50 }
 0x3d7   : > { %33238 = vmatpush3.msra.mxu1 %v38440_v50  ;;  %33242 = vmatprep.subr.mxu0 %v38440_v50 }
 0x3d8   : > { %33247 = vmatprep.subr.mxu1 %v38440_v50 }
 0x478   : > { %v33088_v25 = vpop.f32.mrb[70].mxu0 }
 0x479   : > { %v9451_v26 = vpop.f32.mrb[71].mxu0  ;;  %v33099_v23 = vpop.f32.mrb[70].mxu1 }
 0x47a   : > { %33234 = vmatprep.mubr.msk.f32.mxu0 %vm2640_vm4, %v9451_v26  ;;  %v9526_v0 = vpop.f32.mrb[71].mxu1 }
 0x47b   : > { %33235 = vmatmul.mubr.msk.f32.vlgmr.msra.gmra.mrb[28].mxu0 %vm2640_vm4, %v33088_v25  ;;  %33239 = vmatprep.mubr.msk.f32.mxu1 %vm2640_vm4, %v9526_v0 }
 0x47c   : > { %33243 = vmatpush3.msra.mxu0 %v38440_v50  ;;  %33240 = vmatmul.mubr.msk.f32.vlgmr.msra.gmra.mrb[28].mxu1 %vm2640_vm4, %v33099_v23 }
 0x47d   : > { %33252 = vmatprep.subr.mxu0 %v38440_v50  ;;  %33248 = vmatpush3.msra.mxu1 %v38440_v50 }
 0x47e   : > { %33257 = vmatprep.subr.mxu1 %v38440_v50 }
 0x480   : > { %v33110_v7 = vpop.f32.mrb[72].mxu0 }
 0x481   : > { %v9601_v44 = vpop.f32.mrb[73].mxu0  ;;  %v33121_v29 = vpop.f32.mrb[72].mxu1 }
 0x482   : > { %33244 = vmatprep.mubr.msk.f32.mxu0 %vm2640_vm4, %v9601_v44  ;;  %v9676_v26 = vpop.f32.mrb[73].mxu1 }
 0x483   : > { %33245 = vmatmul.mubr.msk.f32.vlgmr.msra.gmra.mrb[30].mxu0 %vm2640_vm4, %v33110_v7  ;;  %33249 = vmatprep.mubr.msk.f32.mxu1 %vm2640_vm4, %v9676_v26 }
 0x484   : > { %33253 = vmatpush3.msra.mxu0 %v38440_v50  ;;  %33250 = vmatmul.mubr.msk.f32.vlgmr.msra.gmra.mrb[30].mxu1 %vm2640_vm4, %v33121_v29 }
 0x485   : > { %33262 = vmatprep.subr.mxu0 %v38440_v50  ;;  %33258 = vmatpush3.msra.mxu1 %v38440_v50 }
 0x486   : > { %33267 = vmatprep.subr.mxu1 %v38440_v50 }
 0x488   : > { %v33132_v25 = vpop.f32.mrb[74].mxu0 }
 0x489   : > { %v9751_v23 = vpop.f32.mrb[75].mxu0  ;;  %v33143_v0 = vpop.f32.mrb[74].mxu1 }
 0x48a   : > { %33254 = vmatprep.mubr.msk.f32.mxu0 %vm2640_vm4, %v9751_v23  ;;  %v9826_v44 = vpop.f32.mrb[75].mxu1 }
 0x48b   : > { %33255 = vmatmul.mubr.msk.f32.vlgmr.msra.gmra.mrb[32].mxu0 %vm2640_vm4, %v33132_v25  ;;  %33259 = vmatprep.mubr.msk.f32.mxu1 %vm2640_vm4, %v9826_v44 }
 0x48c   : > { %33263 = vmatpush3.msra.mxu0 %v38440_v50  ;;  %33260 = vmatmul.mubr.msk.f32.vlgmr.msra.gmra.mrb[32].mxu1 %vm2640_vm4, %v33143_v0 }
 0x48d   : > { %33272 = vmatprep.subr.mxu0 %v38440_v50  ;;  %33268 = vmatpush3.msra.mxu1 %v38440_v50 }
 0x48e   : > { %33277 = vmatprep.subr.mxu1 %v38440_v50 }
 0x490   : > { %v33154_v7 = vpop.f32.mrb[76].mxu0 }
 0x491   : > { %v9901_v29 = vpop.f32.mrb[77].mxu0  ;;  %v33165_v26 = vpop.f32.mrb[76].mxu1 }
 0x492   : > { %33264 = vmatprep.mubr.msk.f32.mxu0 %vm2640_vm4, %v9901_v29  ;;  %v9976_v23 = vpop.f32.mrb[77].mxu1 }
 0x493   : > { %33265 = vmatmul.mubr.msk.f32.vlgmr.msra.gmra.mrb[34].mxu0 %vm2640_vm4, %v33154_v7  ;;  %33269 = vmatprep.mubr.msk.f32.mxu1 %vm2640_vm4, %v9976_v23 }
 0x494   : > { %33273 = vmatpush3.msra.mxu0 %v38440_v50  ;;  %33270 = vmatmul.mubr.msk.f32.vlgmr.msra.gmra.mrb[34].mxu1 %vm2640_vm4, %v33165_v26 }
 0x495   : > { %33282 = vmatprep.subr.mxu0 %v38440_v50  ;;  %33278 = vmatpush3.msra.mxu1 %v38440_v50 }
 0x496   : > { %33287 = vmatprep.subr.mxu1 %v38440_v50 }
 0x498   : > { %v33176_v25 = vpop.f32.mrb[78].mxu0 }
 0x499   : > { %v10051_v0 = vpop.f32.mrb[79].mxu0  ;;  %v33187_v44 = vpop.f32.mrb[78].mxu1 }
 0x49a   : > { %33274 = vmatprep.mubr.msk.f32.mxu0 %vm2640_vm4, %v10051_v0  ;;  %v10126_v29 = vpop.f32.mrb[79].mxu1 }
 0x49b   : > { %33275 = vmatmul.mubr.msk.f32.vlgmr.msra.gmra.mrb[36].mxu0 %vm2640_vm4, %v33176_v25  ;;  %33279 = vmatprep.mubr.msk.f32.mxu1 %vm2640_vm4, %v10126_v29 }
 0x49c   : > { %33283 = vmatpush3.msra.mxu0 %v38440_v50  ;;  %33280 = vmatmul.mubr.msk.f32.vlgmr.msra.gmra.mrb[36].mxu1 %vm2640_vm4, %v33187_v44 }
 0x49d   : > { %33288 = vmatpush3.msra.mxu1 %v38440_v50  ;;  %33292 = vmatprep.subr.mxu0 %v38440_v50 }
 0x49e   : > { %33297 = vmatprep.subr.mxu1 %v38440_v50 }
 0x4a0   : > { %v33198_v7 = vpop.f32.mrb[80].mxu0 }
 0x4a1   : > { %v10201_v26 = vpop.f32.mrb[81].mxu0  ;;  %v33209_v23 = vpop.f32.mrb[80].mxu1 }
 0x4a2   : > { %33284 = vmatprep.mubr.msk.f32.mxu0 %vm2640_vm4, %v10201_v26  ;;  %v10276_v0 = vpop.f32.mrb[81].mxu1  ;;  %v471_v26 = vld [vmem:[%s36841_s11 + $0x390] sm:$0xff] }
 0x4a3   : > { %33285 = vmatmul.mubr.msk.f32.vlgmr.msra.gmra.mrb[38].mxu0 %vm2640_vm4, %v33198_v7  ;;  %33289 = vmatprep.mubr.msk.f32.mxu1 %vm2640_vm4, %v10276_v0  ;;  %v38737_v7 = vld [vmem:[%s40624_s4 + $0x30] sm:$0xff] }
 0x4a4   : > { %33290 = vmatmul.mubr.msk.f32.vlgmr.msra.gmra.mrb[38].mxu1 %vm2640_vm4, %v33209_v23  ;;  %33293 = vmatpush3.msra.mxu0 %v38440_v50  ;;  %v472_v23 = vld [vmem:[%s36841_s11 + $0x398] sm:$0x3f] }
 0x4a5   : > { %33298 = vmatpush3.msra.mxu1 %v38440_v50  ;;  %35667 = vmatprep.subr.bf16.mxu0 %v37884_v24 }
 0x4a6   : > { %35677 = vmatprep.subr.bf16.mxu1 %v37890_v9 }
 0x4a8   : > { %v33220_v25 = vpop.f32.mrb[82].mxu0 }
 0x4a9   : > { %v33231_v44 = vpop.f32.mrb[82].mxu1  ;;  %v10351_v29 = vpop.f32.mrb[83].mxu0 }
 0x4aa   : > { %v10426_v33 = vpop.f32.mrb[83].mxu1  ;;  %33294 = vmatprep.mubr.msk.f32.mxu0 %vm2640_vm4, %v10351_v29  ;;  %v38746_v29 = vpack.c.bf16 %v472_v23, %v471_v26 }
 0x4ab   : > { %33299 = vmatprep.mubr.msk.f32.mxu1 %vm2640_vm4, %v10426_v33  ;;  %33295 = vmatmul.mubr.msk.f32.vlgmr.msra.gmra.mrb[40].mxu0 %vm2640_vm4, %v33220_v25  ;;  %v38511_v33 = vld [vmem:[%s40621_s1 + $0x20] sm:$0xff] }
 0x4ac   : > { %33300 = vmatmul.mubr.msk.f32.vlgmr.msra.gmra.mrb[40].mxu1 %vm2640_vm4, %v33231_v44  ;;  %35669 = vmatpush3.bf16.msra.mxu0 %v37884_v24  ;;  %v38528_v24 = vld [vmem:[%s40621_s1 + $0x28] sm:$0x3f] }
 0x4ad   : > { %35679 = vmatpush3.bf16.msra.mxu1 %v37890_v9  ;;  %35672 = vmatprep.subr.msk.bf16.mxu0 %vm36844_vm3, %v37912_v40 }
 0x4ae   : > { %35682 = vmatprep.subr.msk.bf16.mxu1 %vm36844_vm3, %v37918_v10  ;;  %33310 = vmatprep.mubr.msk.f32.mxu0 %vm481_vm0, %v38511_v33 }
 0x4af   : > { %33321 = vmatprep.mubr.msk.f32.mxu1 %vm481_vm0, %v38511_v33 }
 0x4b0   : > { %35675 = vmatpush3.bf16.msk.msra.mxu0 %vm36844_vm3, %v37912_v40  ;;  %v38679_v40 = vld [vmem:[%s40624_s4 + $0x28] sm:$0xff] }
 0x4b1   : > { %35685 = vmatpush3.bf16.msk.msra.mxu1 %vm36844_vm3, %v37918_v10  ;;  %35687 = vmatprep.subr.bf16.mxu0 %v37935_v16 }
 0x4b2   : > { %35697 = vmatprep.subr.bf16.mxu1 %v37947_v27 }
 0x4b3   : > { %33311 = vmatmul.mubr.msk.f32.vlgmr.msra.gmra.mrb[84].mxu0 %vm481_vm0, %v38528_v24 }
 0x4b4   : > { %33322 = vmatmul.mubr.msk.f32.vlgmr.msra.gmra.mrb[84].mxu1 %vm481_vm0, %v38528_v24  ;;  %35689 = vmatpush3.bf16.msra.mxu0 %v37935_v16 }
 0x4b5   : > { %35699 = vmatpush3.bf16.msra.mxu1 %v37947_v27  ;;  %35692 = vmatprep.subr.msk.bf16.mxu0 %vm36844_vm3, %v37962_v14 }
 0x4b6   : > { %35702 = vmatprep.subr.msk.bf16.mxu1 %vm36844_vm3, %v37965_v18  ;;  %33332 = vmatprep.mubr.msk.f32.mxu0 %vm481_vm0, %v38511_v33 }
 0x4b7   : > { %33343 = vmatprep.mubr.msk.f32.mxu1 %vm481_vm0, %v38511_v33 }
 0x4b8   : > { %35695 = vmatpush3.bf16.msk.msra.mxu0 %vm36844_vm3, %v37962_v14 }
 0x4b9   : > { %35705 = vmatpush3.bf16.msk.msra.mxu1 %vm36844_vm3, %v37965_v18  ;;  %35707 = vmatprep.subr.bf16.mxu0 %v37985_v55 }
 0x4ba   : > { %35717 = vmatprep.subr.bf16.mxu1 %v37992_v6 }
 0x4bb   : > { %33333 = vmatmul.mubr.msk.f32.vlgmr.msra.gmra.mrb[86].mxu0 %vm481_vm0, %v38528_v24 }
 0x4bc   : > { %33344 = vmatmul.mubr.msk.f32.vlgmr.msra.gmra.mrb[86].mxu1 %vm481_vm0, %v38528_v24  ;;  %35709 = vmatpush3.bf16.msra.mxu0 %v37985_v55 }
 0x4bd   : > { %35719 = vmatpush3.bf16.msra.mxu1 %v37992_v6  ;;  %35712 = vmatprep.subr.msk.bf16.mxu0 %vm36844_vm3, %v38007_v43 }
 0x4be   : > { %35722 = vmatprep.subr.msk.bf16.mxu1 %vm36844_vm3, %v38010_v39  ;;  %33354 = vmatprep.mubr.msk.f32.mxu0 %vm481_vm0, %v38511_v33 }
 0x4bf   : > { %33365 = vmatprep.mubr.msk.f32.mxu1 %vm481_vm0, %v38511_v33 }
 0x4c0   : > { %35715 = vmatpush3.bf16.msk.msra.mxu0 %vm36844_vm3, %v38007_v43 }
 0x4c1   : > { %35725 = vmatpush3.bf16.msk.msra.mxu1 %vm36844_vm3, %v38010_v39  ;;  %35727 = vmatprep.subr.bf16.mxu0 %v38025_v35 }
 0x4c2   : > { %35737 = vmatprep.subr.bf16.mxu1 %v38032_v28 }
 0x4c3   : > { %33355 = vmatmul.mubr.msk.f32.vlgmr.msra.gmra.mrb[88].mxu0 %vm481_vm0, %v38528_v24 }
 0x4c4   : > { %33366 = vmatmul.mubr.msk.f32.vlgmr.msra.gmra.mrb[88].mxu1 %vm481_vm0, %v38528_v24  ;;  %35729 = vmatpush3.bf16.msra.mxu0 %v38025_v35 }
 0x4c5   : > { %35739 = vmatpush3.bf16.msra.mxu1 %v38032_v28  ;;  %35732 = vmatprep.subr.msk.bf16.mxu0 %vm36844_vm3, %v38047_v62 }
 0x4c6   : > { %35742 = vmatprep.subr.msk.bf16.mxu1 %vm36844_vm3, %v38050_v36  ;;  %33376 = vmatprep.mubr.msk.f32.mxu0 %vm481_vm0, %v38511_v33 }
 0x4c7   : > { %33387 = vmatprep.mubr.msk.f32.mxu1 %vm481_vm0, %v38511_v33 }
 0x4c8   : > { %35735 = vmatpush3.bf16.msk.msra.mxu0 %vm36844_vm3, %v38047_v62 }
 0x4c9   : > { %35745 = vmatpush3.bf16.msk.msra.mxu1 %vm36844_vm3, %v38050_v36  ;;  %35747 = vmatprep.subr.bf16.mxu0 %v38065_v5 }
 0x4ca   : > { %35757 = vmatprep.subr.bf16.mxu1 %v38072_v31 }
 0x4cb   : > { %33377 = vmatmul.mubr.msk.f32.vlgmr.msra.gmra.mrb[90].mxu0 %vm481_vm0, %v38528_v24 }
 0x4cc   : > { %33388 = vmatmul.mubr.msk.f32.vlgmr.msra.gmra.mrb[90].mxu1 %vm481_vm0, %v38528_v24  ;;  %35749 = vmatpush3.bf16.msra.mxu0 %v38065_v5 }
 0x4cd   : > { %35759 = vmatpush3.bf16.msra.mxu1 %v38072_v31  ;;  %35752 = vmatprep.subr.msk.bf16.mxu0 %vm36844_vm3, %v38087_v56 }
 0x4ce   : > { %35762 = vmatprep.subr.msk.bf16.mxu1 %vm36844_vm3, %v38090_v15  ;;  %33398 = vmatprep.mubr.msk.f32.mxu0 %vm481_vm0, %v38511_v33 }
 0x4cf   : > { %33409 = vmatprep.mubr.msk.f32.mxu1 %vm481_vm0, %v38511_v33 }
 0x4d0   : > { %35755 = vmatpush3.bf16.msk.msra.mxu0 %vm36844_vm3, %v38087_v56 }
 0x4d1   : > { %35765 = vmatpush3.bf16.msk.msra.mxu1 %vm36844_vm3, %v38090_v15  ;;  %35767 = vmatprep.subr.bf16.mxu0 %v38105_v61 }
 0x4d2   : > { %35777 = vmatprep.subr.bf16.mxu1 %v38112_v38 }
 0x4d3   : > { %33399 = vmatmul.mubr.msk.f32.vlgmr.msra.gmra.mrb[92].mxu0 %vm481_vm0, %v38528_v24 }
 0x4d4   : > { %33410 = vmatmul.mubr.msk.f32.vlgmr.msra.gmra.mrb[92].mxu1 %vm481_vm0, %v38528_v24  ;;  %35769 = vmatpush3.bf16.msra.mxu0 %v38105_v61 }
 0x4d5   : > { %35779 = vmatpush3.bf16.msra.mxu1 %v38112_v38  ;;  %35772 = vmatprep.subr.msk.bf16.mxu0 %vm36844_vm3, %v38127_v32 }
 0x4d6   : > { %35782 = vmatprep.subr.msk.bf16.mxu1 %vm36844_vm3, %v38130_v49  ;;  %33420 = vmatprep.mubr.msk.f32.mxu0 %vm481_vm0, %v38511_v33 }
 0x4d7   : > { %33431 = vmatprep.mubr.msk.f32.mxu1 %vm481_vm0, %v38511_v33 }
 0x4d8   : > { %35775 = vmatpush3.bf16.msk.msra.mxu0 %vm36844_vm3, %v38127_v32  ;;  %v469_v32 = vld [vmem:[%s36841_s11 + $0x380] sm:$0xff] }
 0x4d9   : > { %35785 = vmatpush3.bf16.msk.msra.mxu1 %vm36844_vm3, %v38130_v49  ;;  %35787 = vmatprep.subr.bf16.mxu0 %v38145_v37  ;;  %v470_v49 = vld [vmem:[%s36841_s11 + $0x388] sm:$0xff]  ;;  %s40578_s11 = scalar_lea.hbm %s40630_s10, %s30766_s18 }
 0x4da   : > { %35797 = vmatprep.subr.bf16.mxu1 %v38152_v34 }
 0x4db   : > { %33421 = vmatmul.mubr.msk.f32.vlgmr.msra.gmra.mrb[94].mxu0 %vm481_vm0, %v38528_v24 }
 0x4dc   : > { %33432 = vmatmul.mubr.msk.f32.vlgmr.msra.gmra.mrb[94].mxu1 %vm481_vm0, %v38528_v24  ;;  %35789 = vmatpush3.bf16.msra.mxu0 %v38145_v37 }
 0x4dd   : > { %35799 = vmatpush3.bf16.msra.mxu1 %v38152_v34  ;;  %35792 = vmatprep.subr.msk.bf16.mxu0 %vm36844_vm3, %v38167_v19 }
 0x4de   : > { %35802 = vmatprep.subr.msk.bf16.mxu1 %vm36844_vm3, %v38170_v30  ;;  %33442 = vmatprep.mubr.msk.f32.mxu0 %vm481_vm0, %v38511_v33 }
 0x4df   : > { %33453 = vmatprep.mubr.msk.f32.mxu1 %vm481_vm0, %v38511_v33 }
 0x4e0   : > { %35795 = vmatpush3.bf16.msk.msra.mxu0 %vm36844_vm3, %v38167_v19 }
 0x4e1   : > { %35805 = vmatpush3.bf16.msk.msra.mxu1 %vm36844_vm3, %v38170_v30  ;;  %33456 = vmatprep.subr.mxu0 %v38679_v40  ;;  %v38729_v30 = vpack.c.bf16 %v470_v49, %v469_v32 }
 0x4e2   : > { %33461 = vmatprep.subr.mxu1 %v38679_v40 }
 0x4e3   : > { %33443 = vmatmul.mubr.msk.f32.vlgmr.msra.gmra.mrb[96].mxu0 %vm481_vm0, %v38528_v24 }
 0x4e4   : > { %33454 = vmatmul.mubr.msk.f32.vlgmr.msra.gmra.mrb[96].mxu1 %vm481_vm0, %v38528_v24  ;;  %33457 = vmatpush3.msra.mxu0 %v38679_v40 }
 0x4e5   : > { %33462 = vmatpush3.msra.mxu1 %v38679_v40  ;;  %33466 = vmatprep.subr.mxu0 %v38679_v40 }
 0x4e6   : > { %33471 = vmatprep.subr.mxu1 %v38679_v40 }
 0x586   : > { %v33312_v9 = vpop.f32.mrb[84].mxu0 }
 0x587   : > { %v11665_v27 = vpop.f32.mrb[85].mxu0  ;;  %v33323_v10 = vpop.f32.mrb[84].mxu1 }
 0x588   : > { %33458 = vmatprep.mubr.msk.f32.mxu0 %vm2640_vm4, %v11665_v27  ;;  %v11740_v16 = vpop.f32.mrb[85].mxu1  ;;  %v40770_v27 = vld [vmem:[#allocation53_spill] sm:$0xff] }
 0x589   : > { %33459 = vmatmul.mubr.msk.f32.vlgmr.msra.gmra.mrb[28].mxu0 %vm2640_vm4, %v33312_v9  ;;  %33463 = vmatprep.mubr.msk.f32.mxu1 %vm2640_vm4, %v11740_v16  ;;  %v40772_v16 = vld [vmem:[#allocation56_spill] sm:$0xff] }
 0x58a   : > { %33467 = vmatpush3.msra.mxu0 %v38679_v40  ;;  %33464 = vmatmul.mubr.msk.f32.vlgmr.msra.gmra.mrb[28].mxu1 %vm2640_vm4, %v33323_v10  ;;  %v40771_v10 = vld [vmem:[#allocation58_spill] sm:$0xff] }
 0x58b   : > { %33476 = vmatprep.subr.mxu0 %v38679_v40  ;;  %33472 = vmatpush3.msra.mxu1 %v38679_v40 }
 0x58c   : > { %33481 = vmatprep.subr.mxu1 %v38679_v40 }
 0x58e   : > { %v33334_v14 = vpop.f32.mrb[86].mxu0 }
 0x58f   : > { %v11815_v18 = vpop.f32.mrb[87].mxu0  ;;  %v33345_v55 = vpop.f32.mrb[86].mxu1 }
 0x590   : > { %33468 = vmatprep.mubr.msk.f32.mxu0 %vm2640_vm4, %v11815_v18  ;;  %v11890_v6 = vpop.f32.mrb[87].mxu1 }
 0x591   : > { %33469 = vmatmul.mubr.msk.f32.vlgmr.msra.gmra.mrb[30].mxu0 %vm2640_vm4, %v33334_v14  ;;  %33473 = vmatprep.mubr.msk.f32.mxu1 %vm2640_vm4, %v11890_v6  ;;  %v36720_v14 = vmov 0.0   ;;  %v36652_v6 = vld [vmem:[%s40621_s1 + $0x10] sm:$0xff] }
 0x592   : > { %33477 = vmatpush3.msra.mxu0 %v38679_v40  ;;  %33474 = vmatmul.mubr.msk.f32.vlgmr.msra.gmra.mrb[30].mxu1 %vm2640_vm4, %v33345_v55  ;;  %17366 = vst.msk [vmem:[#allocation2 + $0x18] sm:$0xff] %vm17362_vm5, %v36720_v14  ;;  %17363 = vst.msk [vmem:[#allocation2] sm:$0xff] %vm17362_vm5, %v36720_v14 }
 0x593   : > { %33486 = vmatprep.subr.mxu0 %v38679_v40  ;;  %33482 = vmatpush3.msra.mxu1 %v38679_v40  ;;  %17364 = vst.msk [vmem:[#allocation2 + $0x8] sm:$0xff] %vm17362_vm5, %v36720_v14  ;;  %17365 = vst.msk [vmem:[#allocation2 + $0x10] sm:$0xff] %vm17362_vm5, %v36720_v14 }
 0x594   : > { %33491 = vmatprep.subr.mxu1 %v38679_v40  ;;  %17367 = vst.msk [vmem:[#allocation2 + $0x20] sm:$0xff] %vm17362_vm5, %v36720_v14  ;;  %17368 = vst.msk [vmem:[#allocation2 + $0x28] sm:$0xff] %vm17362_vm5, %v36720_v14 }
 0x595   : > { %17369 = vst.msk [vmem:[#allocation2 + $0x30] sm:$0xff] %vm17362_vm5, %v36720_v14  ;;  %17370 = vst.msk [vmem:[#allocation2 + $0x38] sm:$0xff] %vm17362_vm5, %v36720_v14 }
 0x596   : > { %v33356_v43 = vpop.f32.mrb[88].mxu0  ;;  %17371 = vst.msk [vmem:[#allocation2 + $0x40] sm:$0xff] %vm17362_vm5, %v36720_v14  ;;  %17372 = vst.msk [vmem:[#allocation2 + $0x48] sm:$0xff] %vm17362_vm5, %v36720_v14 }
 0x597   : > { %v11965_v39 = vpop.f32.mrb[89].mxu0  ;;  %v33367_v35 = vpop.f32.mrb[88].mxu1  ;;  %17373 = vst.msk [vmem:[#allocation2 + $0x50] sm:$0xff] %vm17362_vm5, %v36720_v14  ;;  %17374 = vst.msk [vmem:[#allocation2 + $0x58] sm:$0xff] %vm17362_vm5, %v36720_v14 }
 0x598   : > { %33478 = vmatprep.mubr.msk.f32.mxu0 %vm2640_vm4, %v11965_v39  ;;  %v12040_v28 = vpop.f32.mrb[89].mxu1  ;;  %17375 = vst.msk [vmem:[#allocation2 + $0x60] sm:$0xff] %vm17362_vm5, %v36720_v14  ;;  %17376 = vst.msk [vmem:[#allocation2 + $0x68] sm:$0xff] %vm17362_vm5, %v36720_v14  ;;  %v40774_v39 = vld [vmem:[#allocation11_spill] sm:$0xff] }
 0x599   : > { %33479 = vmatmul.mubr.msk.f32.vlgmr.msra.gmra.mrb[32].mxu0 %vm2640_vm4, %v33356_v43  ;;  %33483 = vmatprep.mubr.msk.f32.mxu1 %vm2640_vm4, %v12040_v28  ;;  %17377 = vst.msk [vmem:[#allocation2 + $0x70] sm:$0xff] %vm17362_vm5, %v36720_v14  ;;  %17378 = vst.msk [vmem:[#allocation2 + $0x78] sm:$0xff] %vm17362_vm5, %v36720_v14  ;;  %v40773_v43 = vld [vmem:[#allocation59_spill] sm:$0xff] }
 0x59a   : > { %33487 = vmatpush3.msra.mxu0 %v38679_v40  ;;  %33484 = vmatmul.mubr.msk.f32.vlgmr.msra.gmra.mrb[32].mxu1 %vm2640_vm4, %v33367_v35  ;;  %17379 = vst.msk [vmem:[#allocation2 + $0x80] sm:$0xff] %vm17362_vm5, %v36720_v14  ;;  %17380 = vst.msk [vmem:[#allocation2 + $0x88] sm:$0xff] %vm17362_vm5, %v36720_v14  ;;  %v40775_v35 = vld [vmem:[#allocation10_spill] sm:$0xff]  ;;  %v40776_v28 = vld [vmem:[#allocation15_spill] sm:$0xff] }
 0x59b   : > { %33496 = vmatprep.subr.mxu0 %v38679_v40  ;;  %33492 = vmatpush3.msra.mxu1 %v38679_v40  ;;  %17381 = vst.msk [vmem:[#allocation2 + $0x90] sm:$0xff] %vm17362_vm5, %v36720_v14  ;;  %17382 = vst.msk [vmem:[#allocation2 + $0x98] sm:$0xff] %vm17362_vm5, %v36720_v14 }
 0x59c   : > { %33501 = vmatprep.subr.mxu1 %v38679_v40  ;;  %17383 = vst.msk [vmem:[#allocation2 + $0xa0] sm:$0xff] %vm17362_vm5, %v36720_v14  ;;  %17384 = vst.msk [vmem:[#allocation2 + $0xa8] sm:$0xff] %vm17362_vm5, %v36720_v14 }
 0x59d   : > { %17385 = vst.msk [vmem:[#allocation2 + $0xb0] sm:$0xff] %vm17362_vm5, %v36720_v14  ;;  %17386 = vst.msk [vmem:[#allocation2 + $0xb8] sm:$0xff] %vm17362_vm5, %v36720_v14 }
 0x59e   : > { %v33378_v62 = vpop.f32.mrb[90].mxu0  ;;  %17387 = vst.msk [vmem:[#allocation2 + $0xc0] sm:$0xff] %vm17362_vm5, %v36720_v14  ;;  %17388 = vst.msk [vmem:[#allocation2 + $0xc8] sm:$0xff] %vm17362_vm5, %v36720_v14 }
 0x59f   : > { %v12115_v36 = vpop.f32.mrb[91].mxu0  ;;  %v33389_v5 = vpop.f32.mrb[90].mxu1  ;;  %17389 = vst.msk [vmem:[#allocation2 + $0xd0] sm:$0xff] %vm17362_vm5, %v36720_v14  ;;  %17390 = vst.msk [vmem:[#allocation2 + $0xd8] sm:$0xff] %vm17362_vm5, %v36720_v14 }
 0x5a0   : > { %33488 = vmatprep.mubr.msk.f32.mxu0 %vm2640_vm4, %v12115_v36  ;;  %v12190_v31 = vpop.f32.mrb[91].mxu1  ;;  %17391 = vst.msk [vmem:[#allocation2 + $0xe0] sm:$0xff] %vm17362_vm5, %v36720_v14  ;;  %17392 = vst.msk [vmem:[#allocation2 + $0xe8] sm:$0xff] %vm17362_vm5, %v36720_v14  ;;  %v40779_v36 = vld [vmem:[#allocation18_spill] sm:$0xff] }
 0x5a1   : > { %33489 = vmatmul.mubr.msk.f32.vlgmr.msra.gmra.mrb[34].mxu0 %vm2640_vm4, %v33378_v62  ;;  %33493 = vmatprep.mubr.msk.f32.mxu1 %vm2640_vm4, %v12190_v31  ;;  %25260 = vst.msk [vmem:[#allocation3] sm:$0xff] %vm17362_vm5, %v36720_v14  ;;  %25263 = vst.msk [vmem:[#allocation3 + $0x10] sm:$0xff] %vm17362_vm5, %v36720_v14  ;;  %v40778_v62 = vld [vmem:[#allocation19_spill] sm:$0xff]  ;;  %v40781_v31 = vld [vmem:[#allocation22_spill] sm:$0xff] }
 0x5a2   : > { %33497 = vmatpush3.msra.mxu0 %v38679_v40  ;;  %33494 = vmatmul.mubr.msk.f32.vlgmr.msra.gmra.mrb[34].mxu1 %vm2640_vm4, %v33389_v5  ;;  %25265 = vst.msk [vmem:[#allocation3 + $0x20] sm:$0xff] %vm17362_vm5, %v36720_v14  ;;  %25267 = vst.msk [vmem:[#allocation3 + $0x30] sm:$0xff] %vm17362_vm5, %v36720_v14  ;;  %v40780_v5 = vld [vmem:[#allocation23_spill] sm:$0xff] }
 0x5a3   : > { %33506 = vmatprep.subr.mxu0 %v38679_v40  ;;  %33502 = vmatpush3.msra.mxu1 %v38679_v40  ;;  %25269 = vst.msk [vmem:[#allocation3 + $0x40] sm:$0xff] %vm17362_vm5, %v36720_v14  ;;  %25271 = vst.msk [vmem:[#allocation3 + $0x50] sm:$0xff] %vm17362_vm5, %v36720_v14 }
 0x5a4   : > { %33511 = vmatprep.subr.mxu1 %v38679_v40  ;;  %25273 = vst.msk [vmem:[#allocation3 + $0x60] sm:$0xff] %vm17362_vm5, %v36720_v14  ;;  %25275 = vst.msk [vmem:[#allocation3 + $0x70] sm:$0xff] %vm17362_vm5, %v36720_v14 }
 0x5a5   : > { %25277 = vst.msk [vmem:[#allocation3 + $0x80] sm:$0xff] %vm17362_vm5, %v36720_v14 }
 0x5a6   : > { %v33400_v56 = vpop.f32.mrb[92].mxu0  ;;  %25262 = vst.msk [vmem:[#allocation3 + $0x8] sm:$0x3] %vm25261_vm8, %v36720_v14  ;;  %25264 = vst.msk [vmem:[#allocation3 + $0x18] sm:$0x3] %vm25261_vm8, %v36720_v14 }
 0x5a7   : > { %v12265_v15 = vpop.f32.mrb[93].mxu0  ;;  %v33411_v61 = vpop.f32.mrb[92].mxu1  ;;  %25266 = vst.msk [vmem:[#allocation3 + $0x28] sm:$0x3] %vm25261_vm8, %v36720_v14  ;;  %25268 = vst.msk [vmem:[#allocation3 + $0x38] sm:$0x3] %vm25261_vm8, %v36720_v14 }
 0x5a8   : > { %33498 = vmatprep.mubr.msk.f32.mxu0 %vm2640_vm4, %v12265_v15  ;;  %v12340_v38 = vpop.f32.mrb[93].mxu1  ;;  %v40783_v15 = vld [vmem:[#allocation26_spill] sm:$0xff]  ;;  %25270 = vst.msk [vmem:[#allocation3 + $0x48] sm:$0x3] %vm25261_vm8, %v36720_v14  ;;  %25272 = vst.msk [vmem:[#allocation3 + $0x58] sm:$0x3] %vm25261_vm8, %v36720_v14 }
 0x5a9   : > { %33499 = vmatmul.mubr.msk.f32.vlgmr.msra.gmra.mrb[36].mxu0 %vm2640_vm4, %v33400_v56  ;;  %33503 = vmatprep.mubr.msk.f32.mxu1 %vm2640_vm4, %v12340_v38  ;;  %v40782_v56 = vld [vmem:[#allocation27_spill] sm:$0xff]  ;;  %v40785_v38 = vld [vmem:[#allocation30_spill] sm:$0xff]  ;;  %25274 = vst.msk [vmem:[#allocation3 + $0x68] sm:$0x3] %vm25261_vm8, %v36720_v14  ;;  %25276 = vst.msk [vmem:[#allocation3 + $0x78] sm:$0x3] %vm25261_vm8, %v36720_v14 }
 0x5aa   : > { %33507 = vmatpush3.msra.mxu0 %v38679_v40  ;;  %33504 = vmatmul.mubr.msk.f32.vlgmr.msra.gmra.mrb[36].mxu1 %vm2640_vm4, %v33411_v61  ;;  %v40784_v61 = vld [vmem:[#allocation32_spill] sm:$0xff]  ;;  %25278 = vst.msk [vmem:[#allocation3 + $0x88] sm:$0x3] %vm25261_vm8, %v36720_v14 }
 0x5ab   : > { %33512 = vmatpush3.msra.mxu1 %v38679_v40  ;;  %33516 = vmatprep.subr.mxu0 %v38679_v40 }
 0x5ac   : > { %33521 = vmatprep.subr.mxu1 %v38679_v40 }
 0x5ae   : > { %v33422_v37 = vpop.f32.mrb[94].mxu0 }
 0x5af   : > { %v12415_v34 = vpop.f32.mrb[95].mxu0  ;;  %v33433_v19 = vpop.f32.mrb[94].mxu1 }
 0x5b0   : > { %33508 = vmatprep.mubr.msk.f32.mxu0 %vm2640_vm4, %v12415_v34  ;;  %v12490_v50 = vpop.f32.mrb[95].mxu1 }
 0x5b1   : > { %33509 = vmatmul.mubr.msk.f32.vlgmr.msra.gmra.mrb[38].mxu0 %vm2640_vm4, %v33422_v37  ;;  %33513 = vmatprep.mubr.msk.f32.mxu1 %vm2640_vm4, %v12490_v50  ;;  %v39092_v37 = vld [vmem:[%s40625_s5] ss:$0 sm:$0xff] }
 0x5b2   : > { %33514 = vmatmul.mubr.msk.f32.vlgmr.msra.gmra.mrb[38].mxu1 %vm2640_vm4, %v33433_v19  ;;  %33517 = vmatpush3.msra.mxu0 %v38679_v40 }
 0x5b3   : > { %33522 = vmatpush3.msra.mxu1 %v38679_v40  ;;  %35807 = vmatprep.subr.bf16.mxu0 %v38729_v30  ;;  %v36650_v40 = vld [vmem:[%s40621_s1] sm:$0xff] }
 0x5b4   : > { %33542 = vmatprep.subr.mxu1 %v38737_v7 }
 0x5b6   : > { %v33444_v0 = vpop.f32.mrb[96].mxu0 }
 0x5b7   : > { %v33455_v25 = vpop.f32.mrb[96].mxu1  ;;  %v12565_v44 = vpop.f32.mrb[97].mxu0 }
 0x5b8   : > { %v12640_v9 = vpop.f32.mrb[97].mxu1  ;;  %33518 = vmatprep.mubr.msk.f32.mxu0 %vm2640_vm4, %v12565_v44 }
 0x5b9   : > { %33523 = vmatprep.mubr.msk.f32.mxu1 %vm2640_vm4, %v12640_v9  ;;  %33519 = vmatmul.mubr.msk.f32.vlgmr.msra.gmra.mrb[40].mxu0 %vm2640_vm4, %v33444_v0 }
 0x5ba   : > { %33524 = vmatmul.mubr.msk.f32.vlgmr.msra.gmra.mrb[40].mxu1 %vm2640_vm4, %v33455_v25  ;;  %35809 = vmatpush3.bf16.msra.mxu0 %v38729_v30 }
 0x5bb   : > { %33544 = vmatprep.mubr.msk.f32.mxu1 %vm2640_vm4, %v37328_v46  ;;  %35812 = vmatprep.subr.msk.bf16.mxu0 %vm36844_vm3, %v38746_v29  ;;  %v36651_v46 = vld [vmem:[%s40621_s1 + $0x8] sm:$0x3f] }
 0x5bc   : > { %33543 = vmatpush3.msra.mxu1 %v38737_v7  ;;  %33534 = vmatprep.mubr.msk.f32.mxu0 %vm481_vm0, %v36650_v40 }
 0x5bd   : > { %33552 = vmatprep.subr.mxu1 %v38737_v7 }
 0x5be   : > { %35815 = vmatpush3.bf16.msk.msra.mxu0 %vm36844_vm3, %v38746_v29  ;;  %33545 = vmatmul.mubr.msk.f32.vlgmr.msra.gmra.mrb[28].mxu1 %vm2640_vm4, %v37326_v45  ;;  %v40746_v45 = vld [vmem:[#allocation8_spill] sm:$0xff] }
 0x5bf   : > { %33554 = vmatprep.mubr.msk.f32.mxu1 %vm2640_vm4, %v37336_v52  ;;  %33553 = vmatpush3.msra.mxu1 %v38737_v7  ;;  %v40750_v52 = vld [vmem:[#allocation16_spill] sm:$0xff] }
 0x5c0   : > { %33537 = vmatprep.subr.mxu0 %v38737_v7  ;;  %33562 = vmatprep.subr.mxu1 %v38737_v7 }
 0x5c1   : > { %33535 = vmatmul.mubr.msk.f32.vlgmr.msra.gmra.mrb[98].mxu0 %vm481_vm0, %v36651_v46 }
 0x5c2   : > { %33539 = vmatprep.mubr.msk.f32.mxu0 %vm2640_vm4, %v37324_v42  ;;  %33555 = vmatmul.mubr.msk.f32.vlgmr.msra.gmra.mrb[30].mxu1 %vm2640_vm4, %v37334_v51  ;;  %v40745_v42 = vld [vmem:[#allocation9_spill] sm:$0xff] }
 0x5c3   : > { %33564 = vmatprep.mubr.msk.f32.mxu1 %vm2640_vm4, %v37344_v58  ;;  %33538 = vmatpush3.msra.mxu0 %v38737_v7  ;;  %v40749_v51 = vld [vmem:[#allocation17_spill] sm:$0xff]  ;;  %v40754_v58 = vld [vmem:[#allocation24_spill] sm:$0xff] }
 0x5c4   : > { %33563 = vmatpush3.msra.mxu1 %v38737_v7  ;;  %33547 = vmatprep.subr.mxu0 %v38737_v7 }
 0x5c5   : > { %33540 = vmatmul.mubr.msk.f32.vlgmr.msra.gmra.mrb[28].mxu0 %vm2640_vm4, %v37322_v41  ;;  %33572 = vmatprep.subr.mxu1 %v38737_v7  ;;  %v38843_v41 = vld [vmem:[%s40624_s4 + $0x38] sm:$0xff] }
 0x5c6   : > { %33549 = vmatprep.mubr.msk.f32.mxu0 %vm2640_vm4, %v37332_v48  ;;  %33565 = vmatmul.mubr.msk.f32.vlgmr.msra.gmra.mrb[32].mxu1 %vm2640_vm4, %v37342_v57  ;;  %v40748_v48 = vld [vmem:[#allocation12_spill] sm:$0xff]  ;;  %v40753_v57 = vld [vmem:[#allocation25_spill] sm:$0xff] }
 0x5c7   : > { %33574 = vmatprep.mubr.msk.f32.mxu1 %vm2640_vm4, %v37352_v2  ;;  %33548 = vmatpush3.msra.mxu0 %v38737_v7  ;;  %v40758_v2 = vld [vmem:[#allocation31_spill] sm:$0xff] }
 0x5c8   : > { %33573 = vmatpush3.msra.mxu1 %v38737_v7  ;;  %33557 = vmatprep.subr.mxu0 %v38737_v7 }
 0x5c9   : > { %33550 = vmatmul.mubr.msk.f32.vlgmr.msra.gmra.mrb[30].mxu0 %vm2640_vm4, %v37330_v47  ;;  %33582 = vmatprep.subr.mxu1 %v38737_v7  ;;  %v40747_v47 = vld [vmem:[#allocation13_spill] sm:$0xff] }
 0x5ca   : > { %33559 = vmatprep.mubr.msk.f32.mxu0 %vm2640_vm4, %v37340_v54  ;;  %33575 = vmatmul.mubr.msk.f32.vlgmr.msra.gmra.mrb[34].mxu1 %vm2640_vm4, %v37350_v63  ;;  %v40752_v54 = vld [vmem:[#allocation20_spill] sm:$0xff]  ;;  %v40757_v63 = vld [vmem:[#allocation33_spill] sm:$0xff] }
 0x5cb   : > { %33584 = vmatprep.mubr.msk.f32.mxu1 %vm2640_vm4, %v37360_v11  ;;  %33558 = vmatpush3.msra.mxu0 %v38737_v7  ;;  %v40761_v11 = vld [vmem:[#allocation38_spill] sm:$0xff] }
 0x5cc   : > { %33583 = vmatpush3.msra.mxu1 %v38737_v7  ;;  %33567 = vmatprep.subr.mxu0 %v38737_v7 }
 0x5cd   : > { %33560 = vmatmul.mubr.msk.f32.vlgmr.msra.gmra.mrb[32].mxu0 %vm2640_vm4, %v37338_v53  ;;  %33592 = vmatprep.subr.mxu1 %v38737_v7  ;;  %v40751_v53 = vld [vmem:[#allocation21_spill] sm:$0xff] }
 0x5ce   : > { %33569 = vmatprep.mubr.msk.f32.mxu0 %vm2640_vm4, %v37348_v60  ;;  %33585 = vmatmul.mubr.msk.f32.vlgmr.msra.gmra.mrb[36].mxu1 %vm2640_vm4, %v37358_v8  ;;  %v40756_v60 = vld [vmem:[#allocation28_spill] sm:$0xff]  ;;  %v40760_v8 = vld [vmem:[#allocation7_spill] sm:$0xff] }
 0x5cf   : > { %33594 = vmatprep.mubr.msk.f32.mxu1 %vm2640_vm4, %v37368_v20  ;;  %33568 = vmatpush3.msra.mxu0 %v38737_v7  ;;  %v40765_v20 = vld [vmem:[#allocation46_spill] sm:$0xff] }
 0x5d0   : > { %33593 = vmatpush3.msra.mxu1 %v38737_v7  ;;  %33577 = vmatprep.subr.mxu0 %v38737_v7 }
 0x5d1   : > { %33570 = vmatmul.mubr.msk.f32.vlgmr.msra.gmra.mrb[34].mxu0 %vm2640_vm4, %v37346_v59  ;;  %33602 = vmatprep.subr.mxu1 %v38737_v7  ;;  %v40755_v59 = vld [vmem:[#allocation29_spill] sm:$0xff] }
 0x5d2   : > { %33579 = vmatprep.mubr.msk.f32.mxu0 %vm2640_vm4, %v37356_v4  ;;  %33595 = vmatmul.mubr.msk.f32.vlgmr.msra.gmra.mrb[38].mxu1 %vm2640_vm4, %v37366_v17  ;;  %v40759_v4 = vld [vmem:[#allocation34_spill] sm:$0xff]  ;;  %v40764_v17 = vld [vmem:[#allocation41_spill] sm:$0xff] }
 0x5d3   : > { %33578 = vmatpush3.msra.mxu0 %v38737_v7  ;;  %33603 = vmatpush3.msra.mxu1 %v38737_v7 }
 0x5d4   : > { %33587 = vmatprep.subr.mxu0 %v38737_v7  ;;  %35817 = vmatprep.subr.bf16.mxu1 %v38729_v30 }
 0x5d5   : > { %33580 = vmatmul.mubr.msk.f32.vlgmr.msra.gmra.mrb[36].mxu0 %vm2640_vm4, %v37354_v3  ;;  %v38904_v3 = vld [vmem:[%s40624_s4 + $0x40] sm:$0xff] }
 0x5d6   : > { %33589 = vmatprep.mubr.msk.f32.mxu0 %vm2640_vm4, %v37364_v13  ;;  %33588 = vmatpush3.msra.mxu0 %v38737_v7  ;;  %v40763_v13 = vld [vmem:[#allocation42_spill] sm:$0xff] }
 0x5d7   : > { %33597 = vmatprep.subr.mxu0 %v38737_v7 }
 0x5d9   : > { %33590 = vmatmul.mubr.msk.f32.vlgmr.msra.gmra.mrb[38].mxu0 %vm2640_vm4, %v37362_v12  ;;  %v40762_v12 = vld [vmem:[#allocation37_spill] sm:$0xff] }
 0x5da   : > { %33599 = vmatprep.mubr.msk.f32.mxu0 %vm2640_vm4, %v37372_v22  ;;  %33598 = vmatpush3.msra.mxu0 %v38737_v7  ;;  %v40767_v22 = vld [vmem:[#allocation50_spill] sm:$0xff] }
 0x5db   : > { %33618 = vmatprep.subr.mxu0 %v38843_v41 }
 0x5dd   : > { %33600 = vmatmul.mubr.msk.f32.vlgmr.msra.gmra.mrb[40].mxu0 %vm2640_vm4, %v37370_v21  ;;  %v40766_v21 = vld [vmem:[#allocation45_spill] sm:$0xff] }
 0x5de   : > { %33620 = vmatprep.mubr.msk.f32.mxu0 %vm2640_vm4, %v40745_v42  ;;  %33619 = vmatpush3.msra.mxu0 %v38843_v41 }
 0x5df   : > { %33628 = vmatprep.subr.mxu0 %v38843_v41 }
 0x5e1   : > { %33621 = vmatmul.mubr.msk.f32.vlgmr.msra.gmra.mrb[28].mxu0 %vm2640_vm4, %v40746_v45 }
 0x5e2   : > { %33630 = vmatprep.mubr.msk.f32.mxu0 %vm2640_vm4, %v40747_v47  ;;  %33629 = vmatpush3.msra.mxu0 %v38843_v41 }
 0x5e3   : > { %33638 = vmatprep.subr.mxu0 %v38843_v41 }
 0x5e5   : > { %33631 = vmatmul.mubr.msk.f32.vlgmr.msra.gmra.mrb[30].mxu0 %vm2640_vm4, %v40748_v48 }
 0x5e6   : > { %33640 = vmatprep.mubr.msk.f32.mxu0 %vm2640_vm4, %v40749_v51  ;;  %33639 = vmatpush3.msra.mxu0 %v38843_v41 }
 0x5e7   : > { %33648 = vmatprep.subr.mxu0 %v38843_v41 }
 0x5e9   : > { %33641 = vmatmul.mubr.msk.f32.vlgmr.msra.gmra.mrb[32].mxu0 %vm2640_vm4, %v40750_v52 }
 0x5ea   : > { %33650 = vmatprep.mubr.msk.f32.mxu0 %vm2640_vm4, %v40751_v53  ;;  %33649 = vmatpush3.msra.mxu0 %v38843_v41 }
 0x5eb   : > { %33658 = vmatprep.subr.mxu0 %v38843_v41 }
 0x5ed   : > { %33651 = vmatmul.mubr.msk.f32.vlgmr.msra.gmra.mrb[34].mxu0 %vm2640_vm4, %v40752_v54 }
 0x5ee   : > { %33660 = vmatprep.mubr.msk.f32.mxu0 %vm2640_vm4, %v40753_v57  ;;  %33659 = vmatpush3.msra.mxu0 %v38843_v41 }
 0x5ef   : > { %33668 = vmatprep.subr.mxu0 %v38843_v41 }
 0x5f1   : > { %33661 = vmatmul.mubr.msk.f32.vlgmr.msra.gmra.mrb[36].mxu0 %vm2640_vm4, %v40754_v58 }
 0x5f2   : > { %33670 = vmatprep.mubr.msk.f32.mxu0 %vm2640_vm4, %v40755_v59  ;;  %33669 = vmatpush3.msra.mxu0 %v38843_v41 }
 0x5f3   : > { %33678 = vmatprep.subr.mxu0 %v38843_v41 }
 0x5f5   : > { %33671 = vmatmul.mubr.msk.f32.vlgmr.msra.gmra.mrb[38].mxu0 %vm2640_vm4, %v40756_v60 }
 0x5f6   : > { %33680 = vmatprep.mubr.msk.f32.mxu0 %vm2640_vm4, %v40757_v63  ;;  %33679 = vmatpush3.msra.mxu0 %v38843_v41 }
 0x5f7   : > { %35827 = vmatprep.subr.bf16.mxu0 %v38729_v30 }
 0x5f9   : > { %33681 = vmatmul.mubr.msk.f32.vlgmr.msra.gmra.mrb[40].mxu0 %vm2640_vm4, %v40758_v2 }
 0x5fa   : > { %35829 = vmatpush3.bf16.msra.mxu0 %v38729_v30  ;;  %33696 = vmatprep.mubr.msk.f32.mxu0 %vm481_vm0, %v38511_v33  ;;  %v40768_v33 = vld [vmem:[#allocation49_spill] sm:$0xff] }
 0x5fb   : > { %35832 = vmatprep.subr.msk.bf16.mxu0 %vm36844_vm3, %v38746_v29 }
 0x5fe   : > { %35835 = vmatpush3.bf16.msk.msra.mxu0 %vm36844_vm3, %v38746_v29 }
 0x5ff   : > { %33699 = vmatprep.subr.mxu0 %v38904_v3 }
 0x601   : > { %33697 = vmatmul.mubr.msk.f32.vlgmr.msra.gmra.mrb[100].mxu0 %vm481_vm0, %v38528_v24  ;;  %v40769_v24 = vld [vmem:[#allocation54_spill] sm:$0xff] }
 0x602   : > { %33701 = vmatprep.mubr.msk.f32.mxu0 %vm2640_vm4, %v40759_v4  ;;  %33700 = vmatpush3.msra.mxu0 %v38904_v3 }
 0x603   : > { %33709 = vmatprep.subr.mxu0 %v38904_v3 }
 0x605   : > { %33702 = vmatmul.mubr.msk.f32.vlgmr.msra.gmra.mrb[28].mxu0 %vm2640_vm4, %v40760_v8 }
 0x606   : > { %33711 = vmatprep.mubr.msk.f32.mxu0 %vm2640_vm4, %v40761_v11  ;;  %33710 = vmatpush3.msra.mxu0 %v38904_v3 }
 0x607   : > { %33719 = vmatprep.subr.mxu0 %v38904_v3 }
 0x609   : > { %33712 = vmatmul.mubr.msk.f32.vlgmr.msra.gmra.mrb[30].mxu0 %vm2640_vm4, %v40762_v12 }
 0x60a   : > { %33721 = vmatprep.mubr.msk.f32.mxu0 %vm2640_vm4, %v40763_v13  ;;  %33720 = vmatpush3.msra.mxu0 %v38904_v3 }
 0x60b   : > { %33729 = vmatprep.subr.mxu0 %v38904_v3 }
 0x60d   : > { %33722 = vmatmul.mubr.msk.f32.vlgmr.msra.gmra.mrb[32].mxu0 %vm2640_vm4, %v40764_v17 }
 0x60e   : > { %33731 = vmatprep.mubr.msk.f32.mxu0 %vm2640_vm4, %v40765_v20  ;;  %33730 = vmatpush3.msra.mxu0 %v38904_v3 }
 0x60f   : > { %33739 = vmatprep.subr.mxu0 %v38904_v3 }
 0x611   : > { %33732 = vmatmul.mubr.msk.f32.vlgmr.msra.gmra.mrb[34].mxu0 %vm2640_vm4, %v40766_v21 }
 0x612   : > { %33741 = vmatprep.mubr.msk.f32.mxu0 %vm2640_vm4, %v40767_v22  ;;  %33740 = vmatpush3.msra.mxu0 %v38904_v3 }
 0x613   : > { %33749 = vmatprep.subr.mxu0 %v38904_v3 }
 0x615   : > { %33742 = vmatmul.mubr.msk.f32.vlgmr.msra.gmra.mrb[36].mxu0 %vm2640_vm4, %v40768_v33 }
 0x616   : > { %33751 = vmatprep.mubr.msk.f32.mxu0 %vm2640_vm4, %v40769_v24  ;;  %33750 = vmatpush3.msra.mxu0 %v38904_v3 }
 0x617   : > { %33759 = vmatprep.subr.mxu0 %v38904_v3 }
 0x619   : > { %33752 = vmatmul.mubr.msk.f32.vlgmr.msra.gmra.mrb[38].mxu0 %vm2640_vm4, %v40770_v27 }
 0x61a   : > { %33761 = vmatprep.mubr.msk.f32.mxu0 %vm2640_vm4, %v40771_v10  ;;  %33760 = vmatpush3.msra.mxu0 %v38904_v3 }
 0x61d   : > { %33762 = vmatmul.mubr.msk.f32.vlgmr.msra.gmra.mrb[40].mxu0 %vm2640_vm4, %v40772_v16 }
 0x61e   : > { %33787 = vmatprep.mubr.msk.f32.mxu0 %vm36722_vm7, %v36720_v14 }
 0x694   : > { %v33536_v18 = vpop.f32.mrb[98].mxu0 }
 0x695   : > { %v13882_v55 = vpop.f32.mrb[99].mxu0 }
 0x696   : > { %33604 = vmatprep.mubr.msk.f32.mxu1 %vm2640_vm4, %v13882_v55  ;;  %v40786_v55 = vld [vmem:[#allocation36_spill] sm:$0xff] }
 0x697   : > { %33605 = vmatmul.mubr.msk.f32.vlgmr.msra.gmra.mrb[40].mxu1 %vm2640_vm4, %v33536_v18 }
 0x698   : > { %35819 = vmatpush3.bf16.msra.mxu1 %v38729_v30  ;;  %33615 = vmatprep.mubr.msk.f32.mxu1 %vm481_vm0, %v36652_v6  ;;  %v40787_v6 = vld [vmem:[#allocation35_spill] sm:$0xff] }
 0x699   : > { %35822 = vmatprep.subr.msk.bf16.mxu1 %vm36844_vm3, %v38746_v29 }
 0x69c   : > { %35825 = vmatpush3.bf16.msk.msra.mxu1 %vm36844_vm3, %v38746_v29 }
 0x69d   : > { %33623 = vmatprep.subr.mxu1 %v38843_v41 }
 0x69f   : > { %33616 = vmatmul.mubr.msk.f32.vlgmr.msra.gmra.mrb[98].mxu1 %vm481_vm0, %v40773_v43  ;;  %v40788_v43 = vld [vmem:[#allocation40_spill] sm:$0xff] }
 0x6a0   : > { %33625 = vmatprep.mubr.msk.f32.mxu1 %vm2640_vm4, %v40774_v39  ;;  %33624 = vmatpush3.msra.mxu1 %v38843_v41  ;;  %v40789_v39 = vld [vmem:[#allocation39_spill] sm:$0xff] }
 0x6a1   : > { %33633 = vmatprep.subr.mxu1 %v38843_v41 }
 0x6a3   : > { %33626 = vmatmul.mubr.msk.f32.vlgmr.msra.gmra.mrb[28].mxu1 %vm2640_vm4, %v40775_v35  ;;  %v40790_v35 = vld [vmem:[#allocation44_spill] sm:$0xff] }
 0x6a4   : > { %33635 = vmatprep.mubr.msk.f32.mxu1 %vm2640_vm4, %v40776_v28  ;;  %33634 = vmatpush3.msra.mxu1 %v38843_v41  ;;  %v40791_v28 = vld [vmem:[#allocation43_spill] sm:$0xff] }
 0x6a5   : > { %33643 = vmatprep.subr.mxu1 %v38843_v41 }
 0x6a7   : > { %33636 = vmatmul.mubr.msk.f32.vlgmr.msra.gmra.mrb[30].mxu1 %vm2640_vm4, %v40777_v1  ;;  %v40792_v1 = vld [vmem:[#allocation48_spill] sm:$0xff] }
 0x6a8   : > { %33645 = vmatprep.mubr.msk.f32.mxu1 %vm2640_vm4, %v40778_v62  ;;  %33644 = vmatpush3.msra.mxu1 %v38843_v41  ;;  %v40793_v62 = vld [vmem:[#allocation47_spill] sm:$0xff] }
 0x6a9   : > { %33653 = vmatprep.subr.mxu1 %v38843_v41 }
 0x6ab   : > { %33646 = vmatmul.mubr.msk.f32.vlgmr.msra.gmra.mrb[32].mxu1 %vm2640_vm4, %v40779_v36  ;;  %v40794_v36 = vld [vmem:[#allocation52_spill] sm:$0xff] }
 0x6ac   : > { %33655 = vmatprep.mubr.msk.f32.mxu1 %vm2640_vm4, %v40780_v5  ;;  %33654 = vmatpush3.msra.mxu1 %v38843_v41  ;;  %v40795_v5 = vld [vmem:[#allocation51_spill] sm:$0xff] }
 0x6ad   : > { %33663 = vmatprep.subr.mxu1 %v38843_v41 }
 0x6af   : > { %33656 = vmatmul.mubr.msk.f32.vlgmr.msra.gmra.mrb[34].mxu1 %vm2640_vm4, %v40781_v31  ;;  %v40796_v31 = vld [vmem:[#allocation57_spill] sm:$0xff] }
 0x6b0   : > { %33665 = vmatprep.mubr.msk.f32.mxu1 %vm2640_vm4, %v40782_v56  ;;  %33664 = vmatpush3.msra.mxu1 %v38843_v41  ;;  %v40797_v56 = vld [vmem:[#allocation55_spill] sm:$0xff] }
 0x6b1   : > { %33673 = vmatprep.subr.mxu1 %v38843_v41 }
 0x6b3   : > { %33666 = vmatmul.mubr.msk.f32.vlgmr.msra.gmra.mrb[36].mxu1 %vm2640_vm4, %v40783_v15  ;;  %v17425_v15 = vld [vmem:[#allocation2] sm:$0xff] }
 0x6b4   : > { %33675 = vmatprep.mubr.msk.f32.mxu1 %vm2640_vm4, %v40784_v61  ;;  %33674 = vmatpush3.msra.mxu1 %v38843_v41  ;;  %v17426_v61 = vld [vmem:[#allocation2 + $0x8] sm:$0xff] }
 0x6b5   : > { %33683 = vmatprep.subr.mxu1 %v38843_v41 }
 0x6b7   : > { %33676 = vmatmul.mubr.msk.f32.vlgmr.msra.gmra.mrb[38].mxu1 %vm2640_vm4, %v40785_v38  ;;  %v39165_v38 = vpack.c.bf16 %v17426_v61, %v17425_v15 }
 0x6b8   : > { %33684 = vmatpush3.msra.mxu1 %v38843_v41 }
 0x6b9   : > { %33704 = vmatprep.subr.mxu1 %v38904_v3 }
 0x6d4   : > { %v39085_v32 = vpop.f32.mrb[100].mxu0 }
 0x6d5   : > { %v39087_v49 = vpop.f32.mrb[101].mxu0 }
 0x6d8   : > { %v33703_v34 = vpop.f32.mrb[28].mxu0 }
 0x6d9   : > { %v17307_v19 = vadd.f32 %v33703_v34, %v39092_v37  ;;  %v16281_v30 = vpop.f32.mrb[29].mxu0  ;;  %v36721_v34 = vmov 0.0|0.0  }
 0x6da   : > { %v17306_v50 = vadd.f32 %v39092_v37, %v16281_v30  ;;  %35842 = vmatprep.subr.bf16.mxu0 %v36721_v34 }
 0x6db   : > { %v17335_v7 = vmax.f32 %v17307_v19, 0.0 }
 0x6dc   : > { %v17334_v26 = vmax.f32 %v17306_v50, 0.0  ;;  %v33713_v23 = vpop.f32.mrb[30].mxu0 }
 0x6dd   : > { %17398 = vst.msk [vmem:[#allocation2 + $0x19] sm:$0x3f] %vm17397_vm6, %v17335_v7  ;;  %v17311_v0 = vadd.f32 %v33713_v23, %v39092_v37  ;;  %v16431_v25 = vpop.f32.mrb[31].mxu0 }
 0x6de   : > { %17396 = vst.msk [vmem:[#allocation2 + $0x11] sm:$0xff] %vm17362_vm5, %v17334_v26  ;;  %v17310_v44 = vadd.f32 %v39092_v37, %v16431_v25 }
 0x6df   : > { %v17339_v29 = vmax.f32 %v17311_v0, 0.0 }
 0x6e0   : > { %v17338_v9 = vmax.f32 %v17310_v44, 0.0  ;;  %v33723_v40 = vpop.f32.mrb[32].mxu0 }
 0x6e1   : > { %17402 = vst.msk [vmem:[#allocation2 + $0x39] sm:$0x3f] %vm17397_vm6, %v17339_v29  ;;  %v17315_v46 = vadd.f32 %v33723_v40, %v39092_v37  ;;  %v16581_v41 = vpop.f32.mrb[33].mxu0 }
 0x6e2   : > { %17401 = vst.msk [vmem:[#allocation2 + $0x31] sm:$0xff] %vm17362_vm5, %v17338_v9  ;;  %v17314_v42 = vadd.f32 %v39092_v37, %v16581_v41 }
 0x6e3   : > { %v17343_v45 = vmax.f32 %v17315_v46, 0.0 }
 0x6e4   : > { %v17342_v47 = vmax.f32 %v17314_v42, 0.0  ;;  %v33733_v48 = vpop.f32.mrb[34].mxu0 }
 0x6e5   : > { %17406 = vst.msk [vmem:[#allocation2 + $0x59] sm:$0x3f] %vm17397_vm6, %v17343_v45  ;;  %v17319_v51 = vadd.f32 %v33733_v48, %v39092_v37  ;;  %v16731_v52 = vpop.f32.mrb[35].mxu0 }
 0x6e6   : > { %17405 = vst.msk [vmem:[#allocation2 + $0x51] sm:$0xff] %vm17362_vm5, %v17342_v47  ;;  %v17318_v53 = vadd.f32 %v39092_v37, %v16731_v52 }
 0x6e7   : > { %v17347_v54 = vmax.f32 %v17319_v51, 0.0 }
 0x6e8   : > { %v17346_v57 = vmax.f32 %v17318_v53, 0.0  ;;  %v33743_v58 = vpop.f32.mrb[36].mxu0 }
 0x6e9   : > { %17410 = vst.msk [vmem:[#allocation2 + $0x79] sm:$0x3f] %vm17397_vm6, %v17347_v54  ;;  %v17323_v59 = vadd.f32 %v33743_v58, %v39092_v37  ;;  %v16881_v60 = vpop.f32.mrb[37].mxu0 }
 0x6ea   : > { %17409 = vst.msk [vmem:[#allocation2 + $0x71] sm:$0xff] %vm17362_vm5, %v17346_v57  ;;  %v17322_v63 = vadd.f32 %v39092_v37, %v16881_v60 }
 0x6eb   : > { %v17351_v2 = vmax.f32 %v17323_v59, 0.0 }
 0x6ec   : > { %v17350_v4 = vmax.f32 %v17322_v63, 0.0  ;;  %v33753_v8 = vpop.f32.mrb[38].mxu0 }
 0x6ed   : > { %17414 = vst.msk [vmem:[#allocation2 + $0x99] sm:$0x3f] %vm17397_vm6, %v17351_v2  ;;  %v17327_v11 = vadd.f32 %v33753_v8, %v39092_v37  ;;  %v17031_v12 = vpop.f32.mrb[39].mxu0 }
 0x6ee   : > { %17413 = vst.msk [vmem:[#allocation2 + $0x91] sm:$0xff] %vm17362_vm5, %v17350_v4  ;;  %v17326_v13 = vadd.f32 %v39092_v37, %v17031_v12 }
 0x6ef   : > { %v17355_v17 = vmax.f32 %v17327_v11, 0.0 }
 0x6f0   : > { %v17354_v20 = vmax.f32 %v17326_v13, 0.0  ;;  %v33763_v21 = vpop.f32.mrb[40].mxu0 }
 0x6f1   : > { %17418 = vst.msk [vmem:[#allocation2 + $0xb9] sm:$0x3f] %vm17397_vm6, %v17355_v17  ;;  %v17331_v22 = vadd.f32 %v33763_v21, %v39092_v37  ;;  %v17181_v33 = vpop.f32.mrb[41].mxu0 }
 0x6f2   : > { %17417 = vst.msk [vmem:[#allocation2 + $0xb1] sm:$0xff] %vm17362_vm5, %v17354_v20  ;;  %v17330_v24 = vadd.f32 %v39092_v37, %v17181_v33 }
 0x6f3   : > { %v17359_v27 = vmax.f32 %v17331_v22, 0.0 }
 0x6f4   : > { %v17358_v10 = vmax.f32 %v17330_v24, 0.0 }
 0x6f5   : > { %17422 = vst.msk [vmem:[#allocation2 + $0xd9] sm:$0x3f] %vm17397_vm6, %v17359_v27 }
 0x6f6   : > { %17421 = vst.msk [vmem:[#allocation2 + $0xd1] sm:$0xff] %vm17362_vm5, %v17358_v10 }
 0x772   : > { %v33617_v16 = vpop.f32.mrb[98].mxu1 }
 0x773   : > { %v15043_v18 = vpop.f32.mrb[99].mxu1 }
 0x774   : > { %33685 = vmatprep.mubr.msk.f32.mxu1 %vm2640_vm4, %v15043_v18 }
 0x775   : > { %33686 = vmatmul.mubr.msk.f32.vlgmr.msra.gmra.mrb[40].mxu1 %vm2640_vm4, %v33617_v16 }
 0x776   : > { %33705 = vmatpush3.msra.mxu1 %v38904_v3  ;;  %33706 = vmatprep.mubr.msk.f32.mxu1 %vm2640_vm4, %v40786_v55 }
 0x777   : > { %33714 = vmatprep.subr.mxu1 %v38904_v3 }
 0x779   : > { %33707 = vmatmul.mubr.msk.f32.vlgmr.msra.gmra.mrb[28].mxu1 %vm2640_vm4, %v40787_v6 }
 0x77a   : > { %33715 = vmatpush3.msra.mxu1 %v38904_v3  ;;  %33716 = vmatprep.mubr.msk.f32.mxu1 %vm2640_vm4, %v40788_v43 }
 0x77b   : > { %33724 = vmatprep.subr.mxu1 %v38904_v3 }
 0x77d   : > { %33717 = vmatmul.mubr.msk.f32.vlgmr.msra.gmra.mrb[30].mxu1 %vm2640_vm4, %v40789_v39 }
 0x77e   : > { %33725 = vmatpush3.msra.mxu1 %v38904_v3  ;;  %33726 = vmatprep.mubr.msk.f32.mxu1 %vm2640_vm4, %v40790_v35 }
 0x77f   : > { %33734 = vmatprep.subr.mxu1 %v38904_v3 }
 0x781   : > { %33727 = vmatmul.mubr.msk.f32.vlgmr.msra.gmra.mrb[32].mxu1 %vm2640_vm4, %v40791_v28 }
 0x782   : > { %33735 = vmatpush3.msra.mxu1 %v38904_v3  ;;  %33736 = vmatprep.mubr.msk.f32.mxu1 %vm2640_vm4, %v40792_v1 }
 0x783   : > { %33744 = vmatprep.subr.mxu1 %v38904_v3 }
 0x785   : > { %33737 = vmatmul.mubr.msk.f32.vlgmr.msra.gmra.mrb[34].mxu1 %vm2640_vm4, %v40793_v62 }
 0x786   : > { %33745 = vmatpush3.msra.mxu1 %v38904_v3  ;;  %33746 = vmatprep.mubr.msk.f32.mxu1 %vm2640_vm4, %v40794_v36 }
 0x787   : > { %33754 = vmatprep.subr.mxu1 %v38904_v3 }
 0x789   : > { %33747 = vmatmul.mubr.msk.f32.vlgmr.msra.gmra.mrb[36].mxu1 %vm2640_vm4, %v40795_v5 }
 0x78a   : > { %33756 = vmatprep.mubr.msk.f32.mxu1 %vm2640_vm4, %v40796_v31  ;;  %33755 = vmatpush3.msra.mxu1 %v38904_v3 }
 0x78b   : > { %33764 = vmatprep.subr.mxu1 %v38904_v3 }
 0x78d   : > { %33757 = vmatmul.mubr.msk.f32.vlgmr.msra.gmra.mrb[38].mxu1 %vm2640_vm4, %v40797_v56 }
 0x78e   : > { %33765 = vmatpush3.msra.mxu1 %v38904_v3  ;;  %33766 = vmatprep.mubr.msk.f32.mxu1 %vm2640_vm4, %v39087_v49  ;;  %v39176_v3 = vld [vmem:[%s40622_s2] sm:$0x7f] }
 0x78f   : > { %35836 = vmatprep.subr.bf16.mxu1 %v36721_v34 }
 0x791   : > { %33767 = vmatmul.mubr.msk.f32.vlgmr.msra.gmra.mrb[40].mxu1 %vm2640_vm4, %v39085_v32 }
 0x792   : > { %35838 = vmatpush3.bf16.msra.mxu1 %v39165_v38  ;;  %33773 = vmatprep.mubr.msk.f32.mxu1 %vm36722_vm7, %v36720_v14 }
 0x793   : > { %35839 = vmatprep.subr.bf16.mxu1 %v36721_v34 }
 0x795   : > { %33774 = vmatmul.mubr.msk.f32.vlgmr.msra.gmra.mrb[100].mxu1 %vm17362_vm5, %v39176_v3 }
 0x796   : > { %33780 = vmatprep.mubr.msk.f32.mxu1 %vm36722_vm7, %v36720_v14 }
 0x84c   : > { %v33708_v32 = vpop.f32.mrb[28].mxu1 }
 0x84d   : > { %v17309_v49 = vadd.f32 %v33708_v32, %v39092_v37  ;;  %v16356_v19 = vpop.f32.mrb[29].mxu1  ;;  %v39257_v32 = vld [vmem:[%s40622_s2 + $0x8] sm:$0x7f] }
 0x84e   : > { %v17308_v30 = vadd.f32 %v39092_v37, %v16356_v19 }
 0x84f   : > { %v17337_v50 = vmax.f32 %v17309_v49, 0.0 }
 0x850   : > { %v17336_v7 = vmax.f32 %v17308_v30, 0.0  ;;  %v33718_v26 = vpop.f32.mrb[30].mxu1  ;;  %v30546_v30 = vld [vmem:[%s40626_s6 + $0x10] sm:$0xff] }
 0x851   : > { %17400 = vst.msk [vmem:[#allocation2 + $0x29] sm:$0x3f] %vm17397_vm6, %v17337_v50  ;;  %v17313_v23 = vadd.f32 %v33718_v26, %v39092_v37  ;;  %v16506_v0 = vpop.f32.mrb[31].mxu1  ;;  %v30547_v50 = vld [vmem:[%s40626_s6 + $0x18] sm:$0xff] }
 0x852   : > { %17399 = vst.msk [vmem:[#allocation2 + $0x21] sm:$0xff] %vm17362_vm5, %v17336_v7  ;;  %v17312_v25 = vadd.f32 %v39092_v37, %v16506_v0  ;;  %v35879_v7 = vpack.c.bf16 %v30547_v50, %v30546_v30 }
 0x853   : > { %v17341_v44 = vmax.f32 %v17313_v23, 0.0 }
 0x854   : > { %v17340_v29 = vmax.f32 %v17312_v25, 0.0  ;;  %v33728_v9 = vpop.f32.mrb[32].mxu1 }
 0x855   : > { %17404 = vst.msk [vmem:[#allocation2 + $0x49] sm:$0x3f] %vm17397_vm6, %v17341_v44  ;;  %v17317_v40 = vadd.f32 %v33728_v9, %v39092_v37  ;;  %v16656_v46 = vpop.f32.mrb[33].mxu1 }
 0x856   : > { %17403 = vst.msk [vmem:[#allocation2 + $0x41] sm:$0xff] %vm17362_vm5, %v17340_v29  ;;  %v17316_v41 = vadd.f32 %v39092_v37, %v16656_v46 }
 0x857   : > { %v17345_v42 = vmax.f32 %v17317_v40, 0.0 }
 0x858   : > { %v17344_v45 = vmax.f32 %v17316_v41, 0.0  ;;  %v33738_v47 = vpop.f32.mrb[34].mxu1 }
 0x859   : > { %17408 = vst.msk [vmem:[#allocation2 + $0x69] sm:$0x3f] %vm17397_vm6, %v17345_v42  ;;  %v17321_v48 = vadd.f32 %v33738_v47, %v39092_v37  ;;  %v16806_v51 = vpop.f32.mrb[35].mxu1  ;;  %v17429_v52 = vld [vmem:[#allocation2 + $0x20] sm:$0xff]  ;;  %v17430_v53 = vld [vmem:[#allocation2 + $0x28] sm:$0xff] }
 0x85a   : > { %17407 = vst.msk [vmem:[#allocation2 + $0x61] sm:$0xff] %vm17362_vm5, %v17344_v45  ;;  %v17320_v54 = vadd.f32 %v39092_v37, %v16806_v51  ;;  %v39198_v57 = vpack.c.bf16 %v17430_v53, %v17429_v52 }
 0x85b   : > { %v17349_v58 = vmax.f32 %v17321_v48, 0.0 }
 0x85c   : > { %v17348_v59 = vmax.f32 %v17320_v54, 0.0  ;;  %v33748_v60 = vpop.f32.mrb[36].mxu1  ;;  %35841 = vmatpush3.bf16.msra.mxu1 %v39198_v57 }
 0x85d   : > { %17412 = vst.msk [vmem:[#allocation2 + $0x89] sm:$0x3f] %vm17397_vm6, %v17349_v58  ;;  %v17325_v63 = vadd.f32 %v33748_v60, %v39092_v37  ;;  %v16956_v2 = vpop.f32.mrb[37].mxu1  ;;  %v17433_v4 = vld [vmem:[#allocation2 + $0x40] sm:$0xff]  ;;  %v17434_v8 = vld [vmem:[#allocation2 + $0x48] sm:$0xff]  ;;  %35845 = vmatprep.subr.bf16.mxu1 %v36721_v34 }
 0x85e   : > { %17411 = vst.msk [vmem:[#allocation2 + $0x81] sm:$0xff] %vm17362_vm5, %v17348_v59  ;;  %v17324_v11 = vadd.f32 %v39092_v37, %v16956_v2  ;;  %v39206_v12 = vpack.c.bf16 %v17434_v8, %v17433_v4  ;;  %v17953_v58 = vld [vmem:[%s40626_s6] sm:$0xff]  ;;  %v17954_v59 = vld [vmem:[%s40626_s6 + $0x8] sm:$0xff] }
 0x85f   : > { %v17353_v13 = vmax.f32 %v17325_v63, 0.0  ;;  %33781 = vmatmul.mubr.msk.f32.vlgmr.msra.gmra.mrb[102].mxu1 %vm17362_vm5, %v39176_v3  ;;  %v35900_v8 = vpack.c.bf16 %v17954_v59, %v17953_v58 }
 0x860   : > { %v17352_v17 = vmax.f32 %v17324_v11, 0.0  ;;  %v33758_v20 = vpop.f32.mrb[38].mxu1  ;;  %35844 = vmatpush3.bf16.msra.mxu0 %v39206_v12  ;;  %33794 = vmatprep.mubr.msk.f32.mxu1 %vm36722_vm7, %v36720_v14 }
 0x861   : > { %17416 = vst.msk [vmem:[#allocation2 + $0xa9] sm:$0x3f] %vm17397_vm6, %v17353_v13  ;;  %v17329_v21 = vadd.f32 %v33758_v20, %v39092_v37  ;;  %v17106_v22 = vpop.f32.mrb[39].mxu1  ;;  %v17437_v33 = vld [vmem:[#allocation2 + $0x60] sm:$0xff]  ;;  %v17438_v24 = vld [vmem:[#allocation2 + $0x68] sm:$0xff]  ;;  %35848 = vmatprep.subr.bf16.mxu0 %v36721_v34 }
 0x862   : > { %17415 = vst.msk [vmem:[#allocation2 + $0xa1] sm:$0xff] %vm17362_vm5, %v17352_v17  ;;  %v17328_v27 = vadd.f32 %v39092_v37, %v17106_v22  ;;  %v39218_v10 = vpack.c.bf16 %v17438_v24, %v17437_v33 }
 0x863   : > { %v17357_v16 = vmax.f32 %v17329_v21, 0.0  ;;  %33788 = vmatmul.mubr.msk.f32.vlgmr.msra.gmra.mrb[102].mxu0 %vm17362_vm5, %v39176_v3  ;;  %v39409_v21 = vld [vmem:[%s40622_s2 + $0x10] sm:$0x7f] }
 0x864   : > { %v17356_v18 = vmax.f32 %v17328_v27, 0.0  ;;  %v33768_v55 = vpop.f32.mrb[40].mxu1  ;;  %35847 = vmatpush3.bf16.msra.mxu1 %v39218_v10  ;;  %33801 = vmatprep.mubr.msk.f32.mxu0 %vm36722_vm7, %v36720_v14 }
 0x865   : > { %17420 = vst.msk [vmem:[#allocation2 + $0xc9] sm:$0x3f] %vm17397_vm6, %v17357_v16  ;;  %v17333_v6 = vadd.f32 %v33768_v55, %v39092_v37  ;;  %v17262_v43 = vpop.f32.mrb[41].mxu1  ;;  %v17441_v39 = vld [vmem:[#allocation2 + $0x80] sm:$0xff]  ;;  %v17442_v35 = vld [vmem:[#allocation2 + $0x88] sm:$0xff]  ;;  %35851 = vmatprep.subr.bf16.mxu1 %v36721_v34 }
 0x866   : > { %17419 = vst.msk [vmem:[#allocation2 + $0xc1] sm:$0xff] %vm17362_vm5, %v17356_v18  ;;  %v17332_v28 = vadd.f32 %v39092_v37, %v17262_v43  ;;  %v39230_v1 = vpack.c.bf16 %v17442_v35, %v17441_v39 }
 0x867   : > { %v17361_v62 = vmax.f32 %v17333_v6, 0.0  ;;  %33795 = vmatmul.mubr.msk.f32.vlgmr.msra.gmra.mrb[104].mxu1 %vm17362_vm5, %v39176_v3 }
 0x868   : > { %v17360_v36 = vmax.f32 %v17332_v28, 0.0  ;;  %35850 = vmatpush3.bf16.msra.mxu0 %v39230_v1  ;;  %33808 = vmatprep.mubr.msk.f32.mxu1 %vm36722_vm7, %v36720_v14  ;;  %v39307_v49 = vpop.f32.mrb[100].mxu1 }
 0x869   : > { %17424 = vst.msk [vmem:[#allocation2 + $0xe9] sm:$0x3f] %vm17397_vm6, %v17361_v62  ;;  %v17445_v5 = vld [vmem:[#allocation2 + $0xa0] sm:$0xff]  ;;  %v17446_v31 = vld [vmem:[#allocation2 + $0xa8] sm:$0xff]  ;;  %35854 = vmatprep.subr.bf16.mxu0 %v36721_v34  ;;  %v33775_v19 = vpop.f32.mrb[101].mxu1 }
 0x86a   : > { %17423 = vst.msk [vmem:[#allocation2 + $0xe1] sm:$0xff] %vm17362_vm5, %v17360_v36  ;;  %v39240_v37 = vpack.c.bf16 %v17446_v31, %v17445_v5 }
 0x86b   : > { %33802 = vmatmul.mubr.msk.f32.vlgmr.msra.gmra.mrb[104].mxu0 %vm17362_vm5, %v39176_v3 }
 0x86c   : > { %35853 = vmatpush3.bf16.msra.mxu1 %v39240_v37  ;;  %33815 = vmatprep.mubr.msk.f32.mxu0 %vm36722_vm7, %v36720_v14 }
 0x86d   : > { %35857 = vmatprep.subr.bf16.mxu1 %v36721_v34  ;;  %v17449_v56 = vld [vmem:[#allocation2 + $0xc0] sm:$0xff]  ;;  %v17450_v15 = vld [vmem:[#allocation2 + $0xc8] sm:$0xff] }
 0x86e   : > { %v39248_v61 = vpack.c.bf16 %v17450_v15, %v17449_v56 }
 0x86f   : > { %33809 = vmatmul.mubr.msk.f32.vlgmr.msra.gmra.mrb[106].mxu1 %vm17362_vm5, %v39176_v3 }
 0x870   : > { %35856 = vmatpush3.bf16.msra.mxu0 %v39248_v61  ;;  %35859 = vmatpush3.bf16.msra.mxu1 %v39165_v38 }
 0x871   : > { %33822 = vmatprep.mubr.msk.f32.mxu1 %vm36722_vm7, %v36720_v14  ;;  %35860 = vmatprep.subr.bf16.mxu0 %v36721_v34 }
 0x872   : > { %35863 = vmatprep.subr.bf16.mxu1 %v36721_v34 }
 0x873   : > { %33816 = vmatmul.mubr.msk.f32.vlgmr.msra.gmra.mrb[106].mxu0 %vm17362_vm5, %v39176_v3  ;;  %33823 = vmatmul.mubr.msk.f32.vlgmr.msra.gmra.mrb[108].mxu1 %vm17362_vm5, %v39257_v32 }
 0x874   : > { %35862 = vmatpush3.bf16.msra.mxu0 %v39198_v57  ;;  %35865 = vmatpush3.bf16.msra.mxu1 %v39206_v12 }
 0x875   : > { %33829 = vmatprep.mubr.msk.f32.mxu0 %vm36722_vm7, %v36720_v14  ;;  %33836 = vmatprep.mubr.msk.f32.mxu1 %vm36722_vm7, %v36720_v14 }
 0x876   : > { %35866 = vmatprep.subr.bf16.mxu0 %v36721_v34  ;;  %35869 = vmatprep.subr.bf16.mxu1 %v36721_v34 }
 0x877   : > { %33830 = vmatmul.mubr.msk.f32.vlgmr.msra.gmra.mrb[108].mxu0 %vm17362_vm5, %v39257_v32  ;;  %33837 = vmatmul.mubr.msk.f32.vlgmr.msra.gmra.mrb[110].mxu1 %vm17362_vm5, %v39257_v32 }
 0x878   : > { %35868 = vmatpush3.bf16.msra.mxu0 %v39218_v10  ;;  %35871 = vmatpush3.bf16.msra.mxu1 %v39230_v1 }
 0x879   : > { %33843 = vmatprep.mubr.msk.f32.mxu0 %vm36722_vm7, %v36720_v14  ;;  %33850 = vmatprep.mubr.msk.f32.mxu1 %vm36722_vm7, %v36720_v14 }
 0x87a   : > { %35872 = vmatprep.subr.bf16.mxu0 %v36721_v34  ;;  %35875 = vmatprep.subr.bf16.mxu1 %v36721_v34 }
 0x87b   : > { %33844 = vmatmul.mubr.msk.f32.vlgmr.msra.gmra.mrb[110].mxu0 %vm17362_vm5, %v39257_v32  ;;  %33851 = vmatmul.mubr.msk.f32.vlgmr.msra.gmra.mrb[112].mxu1 %vm17362_vm5, %v39257_v32 }
 0x87c   : > { %35874 = vmatpush3.bf16.msra.mxu0 %v39240_v37  ;;  %35877 = vmatpush3.bf16.msra.mxu1 %v39248_v61 }
 0x87d   : > { %33857 = vmatprep.mubr.msk.f32.mxu0 %vm36722_vm7, %v36720_v14  ;;  %33864 = vmatprep.mubr.msk.f32.mxu1 %vm36722_vm7, %v36720_v14 }
 0x87e   : > { %35878 = vmatprep.subr.bf16.mxu0 %v36721_v34  ;;  %35881 = vmatprep.subr.bf16.mxu1 %v36721_v34 }
 0x87f   : > { %33858 = vmatmul.mubr.msk.f32.vlgmr.msra.gmra.mrb[112].mxu0 %vm17362_vm5, %v39257_v32  ;;  %33865 = vmatmul.mubr.msk.f32.vlgmr.msra.gmra.mrb[114].mxu1 %vm17362_vm5, %v39257_v32 }
 0x880   : > { %33871 = vmatprep.mubr.msk.f32.mxu0 %vm36722_vm7, %v36720_v14  ;;  %33878 = vmatprep.mubr.msk.f32.mxu1 %vm36722_vm7, %v36720_v14 }
 0x881   : > { %35880 = vmatpush3.bf16.msra.mxu0 %v35879_v7  ;;  %35883 = vmatpush3.bf16.msra.mxu1 %v35879_v7 }
 0x882   : > { %35884 = vmatprep.subr.bf16.mxu0 %v36721_v34  ;;  %35887 = vmatprep.subr.bf16.mxu1 %v36721_v34 }
 0x932   : > { %v39317_v26 = vpop.f32.mrb[102].mxu1 }
 0x933   : > { %v33782_v23 = vpop.f32.mrb[103].mxu1 }
 0x936   : > { %v39319_v0 = vpop.f32.mrb[102].mxu0 }
 0x937   : > { %v33789_v25 = vpop.f32.mrb[103].mxu0 }
 0x93a   : > { %v39321_v44 = vpop.f32.mrb[104].mxu1 }
 0x93b   : > { %v33796_v29 = vpop.f32.mrb[105].mxu1 }
 0x93e   : > { %v39323_v9 = vpop.f32.mrb[104].mxu0 }
 0x93f   : > { %v33803_v40 = vpop.f32.mrb[105].mxu0 }
 0x942   : > { %v39325_v46 = vpop.f32.mrb[106].mxu1 }
 0x943   : > { %v33810_v41 = vpop.f32.mrb[107].mxu1 }
 0x946   : > { %v18024_v42 = vpop.f32.mrb[108].mxu1  ;;  %v39327_v45 = vpop.f32.mrb[106].mxu0 }
 0x947   : > { %v33824_v47 = vpop.f32.mrb[109].mxu1  ;;  %33872 = vmatmul.mubr.msk.f32.vlgmr.msra.gmra.mrb[114].mxu0 %vm17362_vm5, %v18024_v42  ;;  %v33817_v48 = vpop.f32.mrb[107].mxu0 }
 0x948   : > { %35886 = vmatpush3.bf16.msra.mxu0 %v35879_v7  ;;  %33885 = vmatprep.mubr.msk.f32.mxu0 %vm36722_vm7, %v36720_v14 }
 0x949   : > { %35890 = vmatprep.subr.bf16.mxu0 %v36721_v34 }
 0x94a   : > { %v39333_v51 = vpop.f32.mrb[108].mxu0  ;;  %v39335_v52 = vpop.f32.mrb[110].mxu1 }
 0x94b   : > { %v33838_v53 = vpop.f32.mrb[111].mxu1  ;;  %33879 = vmatmul.mubr.msk.f32.vlgmr.msra.gmra.mrb[116].mxu1 %vm17362_vm5, %v39333_v51  ;;  %33886 = vmatmul.mubr.msk.f32.vlgmr.msra.gmra.mrb[116].mxu0 %vm17362_vm5, %v39335_v52  ;;  %v33831_v54 = vpop.f32.mrb[109].mxu0 }
 0x94c   : > { %35889 = vmatpush3.bf16.msra.mxu1 %v35879_v7  ;;  %35892 = vmatpush3.bf16.msra.mxu0 %v35879_v7 }
 0x94d   : > { %33892 = vmatprep.mubr.msk.f32.mxu1 %vm36722_vm7, %v36720_v14  ;;  %33899 = vmatprep.mubr.msk.f32.mxu0 %vm36722_vm7, %v36720_v14 }
 0x94e   : > { %v39351_v60 = vpop.f32.mrb[110].mxu0  ;;  %v39353_v63 = vpop.f32.mrb[112].mxu1  ;;  %35893 = vmatprep.subr.bf16.mxu1 %v36721_v34  ;;  %35896 = vmatprep.subr.bf16.mxu0 %v36721_v34 }
 0x94f   : > { %v33852_v2 = vpop.f32.mrb[113].mxu1  ;;  %33893 = vmatmul.mubr.msk.f32.vlgmr.msra.gmra.mrb[118].mxu1 %vm17362_vm5, %v39351_v60  ;;  %33900 = vmatmul.mubr.msk.f32.vlgmr.msra.gmra.mrb[118].mxu0 %vm17362_vm5, %v39353_v63  ;;  %v33845_v4 = vpop.f32.mrb[111].mxu0 }
 0x950   : > { %35895 = vmatpush3.bf16.msra.mxu1 %v35879_v7  ;;  %35898 = vmatpush3.bf16.msra.mxu0 %v35879_v7 }
 0x951   : > { %33906 = vmatprep.mubr.msk.f32.mxu1 %vm36722_vm7, %v36720_v14  ;;  %33913 = vmatprep.mubr.msk.f32.mxu0 %vm36722_vm7, %v36720_v14 }
 0x952   : > { %v39365_v11 = vpop.f32.mrb[112].mxu0  ;;  %v39367_v13 = vpop.f32.mrb[114].mxu1  ;;  %35899 = vmatprep.subr.bf16.mxu1 %v36721_v34  ;;  %35902 = vmatprep.subr.bf16.mxu0 %v36721_v34 }
 0x953   : > { %v33866_v17 = vpop.f32.mrb[115].mxu1  ;;  %33907 = vmatmul.mubr.msk.f32.vlgmr.msra.gmra.mrb[120].mxu1 %vm17362_vm5, %v39365_v11  ;;  %33914 = vmatmul.mubr.msk.f32.vlgmr.msra.gmra.mrb[120].mxu0 %vm17362_vm5, %v39367_v13  ;;  %v33859_v20 = vpop.f32.mrb[113].mxu0 }
 0x954   : > { %35901 = vmatpush3.bf16.msra.mxu1 %v35900_v8  ;;  %35904 = vmatpush3.bf16.msra.mxu0 %v35900_v8  ;;  %v17427_v20 = vld [vmem:[#allocation2 + $0x10] sm:$0xff] }
 0x955   : > { %33920 = vmatprep.mubr.msk.f32.mxu1 %vm36722_vm7, %v36720_v14  ;;  %33927 = vmatprep.mubr.msk.f32.mxu0 %vm36722_vm7, %v36720_v14 }
 0x956   : > { %35905 = vmatprep.subr.bf16.mxu1 %v36721_v34  ;;  %35908 = vmatprep.subr.bf16.mxu0 %v36721_v34 }
 0x957   : > { %33921 = vmatmul.mubr.msk.f32.vlgmr.msra.gmra.mrb[122].mxu1 %vm17362_vm5, %v39307_v49  ;;  %33928 = vmatmul.mubr.msk.f32.vlgmr.msra.gmra.mrb[122].mxu0 %vm17362_vm5, %v39317_v26 }
 0x958   : > { %35907 = vmatpush3.bf16.msra.mxu1 %v35900_v8  ;;  %35910 = vmatpush3.bf16.msra.mxu0 %v35900_v8 }
 0x959   : > { %33934 = vmatprep.mubr.msk.f32.mxu1 %vm36722_vm7, %v36720_v14  ;;  %33941 = vmatprep.mubr.msk.f32.mxu0 %vm36722_vm7, %v36720_v14 }
 0x95a   : > { %35911 = vmatprep.subr.bf16.mxu1 %v36721_v34  ;;  %35914 = vmatprep.subr.bf16.mxu0 %v36721_v34 }
 0x95b   : > { %33935 = vmatmul.mubr.msk.f32.vlgmr.msra.gmra.mrb[124].mxu1 %vm17362_vm5, %v39319_v0  ;;  %33942 = vmatmul.mubr.msk.f32.vlgmr.msra.gmra.mrb[124].mxu0 %vm17362_vm5, %v39321_v44 }
 0x95c   : > { %35913 = vmatpush3.bf16.msra.mxu1 %v35900_v8  ;;  %35916 = vmatpush3.bf16.msra.mxu0 %v35900_v8 }
 0x95d   : > { %33948 = vmatprep.mubr.msk.f32.mxu1 %vm36722_vm7, %v36720_v14  ;;  %33955 = vmatprep.mubr.msk.f32.mxu0 %vm36722_vm7, %v36720_v14 }
 0x95e   : > { %35917 = vmatprep.subr.bf16.mxu1 %v36721_v34  ;;  %35920 = vmatprep.subr.bf16.mxu0 %v36721_v34 }
 0x95f   : > { %33949 = vmatmul.mubr.msk.f32.vlgmr.msra.gmra.mrb[126].mxu1 %vm17362_vm5, %v39323_v9  ;;  %33956 = vmatmul.mubr.msk.f32.vlgmr.msra.gmra.mrb[126].mxu0 %vm17362_vm5, %v39325_v46 }
 0x960   : > { %35919 = vmatpush3.bf16.msra.mxu1 %v35900_v8  ;;  %35922 = vmatpush3.bf16.msra.mxu0 %v39165_v38  ;;  %v30569_v38 = vld [vmem:[%s40626_s6 + $0x20] sm:$0xff] }
 0x961   : > { %33962 = vmatprep.mubr.msk.f32.mxu1 %vm36722_vm7, %v36720_v14  ;;  %33969 = vmatprep.mubr.msk.f32.mxu0 %vm36722_vm7, %v36720_v14 }
 0x962   : > { %35923 = vmatprep.subr.bf16.mxu1 %v36721_v34  ;;  %35926 = vmatprep.subr.bf16.mxu0 %v36721_v34 }
 0x963   : > { %33963 = vmatmul.mubr.msk.f32.vlgmr.msra.gmra.mrb[128].mxu1 %vm17362_vm5, %v39327_v45  ;;  %33970 = vmatmul.mubr.msk.f32.vlgmr.msra.gmra.mrb[128].mxu0 %vm17362_vm5, %v39409_v21 }
 0x964   : > { %35925 = vmatpush3.bf16.msra.mxu1 %v39198_v57  ;;  %35928 = vmatpush3.bf16.msra.mxu0 %v39206_v12  ;;  %v30570_v57 = vld [vmem:[%s40626_s6 + $0x28] sm:$0xff] }
 0x965   : > { %33976 = vmatprep.mubr.msk.f32.mxu1 %vm36722_vm7, %v36720_v14  ;;  %33983 = vmatprep.mubr.msk.f32.mxu0 %vm36722_vm7, %v36720_v14  ;;  %v39467_v12 = vpack.c.bf16 %v30570_v57, %v30569_v38 }
 0x966   : > { %35929 = vmatprep.subr.bf16.mxu1 %v36721_v34  ;;  %35932 = vmatprep.subr.bf16.mxu0 %v36721_v34 }
 0x967   : > { %33977 = vmatmul.mubr.msk.f32.vlgmr.msra.gmra.mrb[130].mxu1 %vm17362_vm5, %v39409_v21  ;;  %33984 = vmatmul.mubr.msk.f32.vlgmr.msra.gmra.mrb[130].mxu0 %vm17362_vm5, %v39409_v21 }
 0x968   : > { %35931 = vmatpush3.bf16.msra.mxu1 %v39218_v10  ;;  %35934 = vmatpush3.bf16.msra.mxu0 %v39230_v1 }
 0x969   : > { %33990 = vmatprep.mubr.msk.f32.mxu1 %vm36722_vm7, %v36720_v14  ;;  %33997 = vmatprep.mubr.msk.f32.mxu0 %vm36722_vm7, %v36720_v14 }
 0x96a   : > { %35935 = vmatprep.subr.bf16.mxu1 %v36721_v34  ;;  %35938 = vmatprep.subr.bf16.mxu0 %v36721_v34 }
 0x96b   : > { %33991 = vmatmul.mubr.msk.f32.vlgmr.msra.gmra.mrb[132].mxu1 %vm17362_vm5, %v39409_v21  ;;  %33998 = vmatmul.mubr.msk.f32.vlgmr.msra.gmra.mrb[132].mxu0 %vm17362_vm5, %v39409_v21 }
 0x96c   : > { %35937 = vmatpush3.bf16.msra.mxu1 %v39240_v37  ;;  %35940 = vmatpush3.bf16.msra.mxu0 %v39248_v61 }
 0x96d   : > { %34004 = vmatprep.mubr.msk.f32.mxu1 %vm36722_vm7, %v36720_v14  ;;  %34011 = vmatprep.mubr.msk.f32.mxu0 %vm36722_vm7, %v36720_v14 }
 0x96e   : > { %35941 = vmatprep.subr.bf16.mxu1 %v36721_v34  ;;  %35944 = vmatprep.subr.bf16.mxu0 %v36721_v34 }
 0x96f   : > { %34005 = vmatmul.mubr.msk.f32.vlgmr.msra.gmra.mrb[134].mxu1 %vm17362_vm5, %v39409_v21  ;;  %34012 = vmatmul.mubr.msk.f32.vlgmr.msra.gmra.mrb[134].mxu0 %vm17362_vm5, %v39409_v21 }
 0x970   : > { %34018 = vmatprep.mubr.msk.f32.mxu1 %vm36722_vm7, %v36720_v14  ;;  %34025 = vmatprep.mubr.msk.f32.mxu0 %vm36722_vm7, %v36720_v14 }
 0x971   : > { %35943 = vmatpush3.bf16.msra.mxu1 %v39467_v12  ;;  %35946 = vmatpush3.bf16.msra.mxu0 %v39467_v12 }
 0x972   : > { %35947 = vmatprep.subr.bf16.mxu1 %v36721_v34  ;;  %35950 = vmatprep.subr.bf16.mxu0 %v36721_v34 }
 0xa1a   : > { %v18520_v22 = vpop.f32.mrb[114].mxu0 }
 0xa1b   : > { %v33873_v33 = vpop.f32.mrb[115].mxu0 }
 0xa1c   : > { %v17431_v33 = vld [vmem:[#allocation2 + $0x30] sm:$0xff] }
 0xa1e   : > { %v18666_v24 = vpop.f32.mrb[116].mxu0  ;;  %v18593_v27 = vpop.f32.mrb[116].mxu1 }
 0xa1f   : > { %v33887_v10 = vpop.f32.mrb[117].mxu0  ;;  %v33880_v16 = vpop.f32.mrb[117].mxu1 }
 0xa22   : > { %v18812_v18 = vpop.f32.mrb[118].mxu0  ;;  %v18739_v55 = vpop.f32.mrb[118].mxu1 }
 0xa23   : > { %v33901_v6 = vpop.f32.mrb[119].mxu0  ;;  %v33894_v43 = vpop.f32.mrb[119].mxu1 }
 0xa24   : > { %v17436_v6 = vld [vmem:[#allocation2 + $0x58] sm:$0xff]  ;;  %v17439_v43 = vld [vmem:[#allocation2 + $0x70] sm:$0xff] }
 0xa26   : > { %v18958_v39 = vpop.f32.mrb[120].mxu0  ;;  %v18885_v35 = vpop.f32.mrb[120].mxu1 }
 0xa27   : > { %v33915_v28 = vpop.f32.mrb[121].mxu0  ;;  %v33908_v1 = vpop.f32.mrb[121].mxu1 }
 0xa2a   : > { %v19031_v62 = vpop.f32.mrb[122].mxu1  ;;  %v19104_v36 = vpop.f32.mrb[122].mxu0 }
 0xa2b   : > { %v39473_v5 = vadd.f32 %v19031_v62, %v18520_v22  ;;  %v39475_v31 = vadd.f32 %v19104_v36, %v18593_v27  ;;  %v33922_v37 = vpop.f32.mrb[123].mxu1  ;;  %v33929_v56 = vpop.f32.mrb[123].mxu0  ;;  %v17428_v22 = vld [vmem:[#allocation2 + $0x18] sm:$0xff]  ;;  %v17443_v62 = vld [vmem:[#allocation2 + $0x90] sm:$0xff] }
 0xa2c   : > { %v39528_v16 = vpack.c.bf16 %v17428_v22, %v17427_v20  ;;  %v17444_v36 = vld [vmem:[#allocation2 + $0x98] sm:$0xff]  ;;  %v17447_v37 = vld [vmem:[#allocation2 + $0xb0] sm:$0xff] }
 0xa2d   : > { %v17448_v56 = vld [vmem:[#allocation2 + $0xb8] sm:$0xff] }
 0xa2e   : > { %v19177_v15 = vpop.f32.mrb[124].mxu1  ;;  %v19250_v61 = vpop.f32.mrb[124].mxu0 }
 0xa2f   : > { %v39477_v49 = vadd.f32 %v19177_v15, %v18666_v24  ;;  %v39479_v19 = vadd.f32 %v19250_v61, %v18739_v55  ;;  %v33943_v30 = vpop.f32.mrb[125].mxu0  ;;  %v33936_v50 = vpop.f32.mrb[125].mxu1  ;;  %v17432_v24 = vld [vmem:[#allocation2 + $0x38] sm:$0xff]  ;;  %v17435_v55 = vld [vmem:[#allocation2 + $0x50] sm:$0xff]  ;;  %v39560_v15 = vpack.c.bf16 %v17444_v36, %v17443_v62  ;;  %v39562_v61 = vpack.c.bf16 %v17448_v56, %v17447_v37 }
 0xa30   : > { %v39544_v28 = vpack.c.bf16 %v17436_v6, %v17435_v55  ;;  %v17451_v30 = vld [vmem:[#allocation2 + $0xd0] sm:$0xff]  ;;  %v17452_v50 = vld [vmem:[#allocation2 + $0xd8] sm:$0xff] }
 0xa32   : > { %v19323_v7 = vpop.f32.mrb[126].mxu1  ;;  %v19396_v23 = vpop.f32.mrb[126].mxu0 }
 0xa33   : > { %v39481_v25 = vadd.f32 %v19323_v7, %v18812_v18  ;;  %v39483_v29 = vadd.f32 %v19396_v23, %v18885_v35  ;;  %v33957_v40 = vpop.f32.mrb[127].mxu0  ;;  %v33950_v41 = vpop.f32.mrb[127].mxu1  ;;  %v39530_v18 = vpack.c.bf16 %v17432_v24, %v17431_v33  ;;  %v39575_v7 = vpack.c.bf16 %v17452_v50, %v17451_v30  ;;  %v30585_v23 = vld [vmem:[%s40626_s6 + $0x30] sm:$0xff] }
 0xa34   : > { %v30586_v40 = vld [vmem:[%s40626_s6 + $0x38] sm:$0xff] }
 0xa35   : > { %v35984_v41 = vpack.c.bf16 %v30586_v40, %v30585_v23 }
 0xa36   : > { %v19469_v42 = vpop.f32.mrb[128].mxu1  ;;  %v19542_v47 = vpop.f32.mrb[128].mxu0 }
 0xa37   : > { %v39485_v48 = vadd.f32 %v19469_v42, %v18958_v39  ;;  %v33971_v53 = vpop.f32.mrb[129].mxu0  ;;  %34019 = vmatmul.mubr.msk.f32.vlgmr.msra.gmra.mrb[136].mxu1 %vm17362_vm5, %v19542_v47  ;;  %v33964_v54 = vpop.f32.mrb[129].mxu1  ;;  %v17440_v39 = vld [vmem:[#allocation2 + $0x78] sm:$0xff] }
 0xa38   : > { %35949 = vmatpush3.bf16.msra.mxu1 %v39467_v12  ;;  %34032 = vmatprep.mubr.msk.f32.mxu1 %vm36722_vm7, %v36720_v14  ;;  %v39546_v1 = vpack.c.bf16 %v17440_v39, %v17439_v43 }
 0xa39   : > { %35953 = vmatprep.subr.bf16.mxu1 %v36721_v34 }
 0xa3a   : > { %v39492_v58 = vpop.f32.mrb[130].mxu1  ;;  %v39494_v59 = vpop.f32.mrb[130].mxu0 }
 0xa3b   : > { %v33985_v2 = vpop.f32.mrb[131].mxu0  ;;  %34026 = vmatmul.mubr.msk.f32.vlgmr.msra.gmra.mrb[136].mxu0 %vm17362_vm5, %v39492_v58  ;;  %34033 = vmatmul.mubr.msk.f32.vlgmr.msra.gmra.mrb[138].mxu1 %vm17362_vm5, %v39494_v59  ;;  %v33978_v4 = vpop.f32.mrb[131].mxu1 }
 0xa3c   : > { %35952 = vmatpush3.bf16.msra.mxu0 %v39467_v12  ;;  %35955 = vmatpush3.bf16.msra.mxu1 %v39467_v12 }
 0xa3d   : > { %34039 = vmatprep.mubr.msk.f32.mxu0 %vm36722_vm7, %v36720_v14  ;;  %34046 = vmatprep.mubr.msk.f32.mxu1 %vm36722_vm7, %v36720_v14 }
 0xa3e   : > { %v39506_v8 = vpop.f32.mrb[132].mxu1  ;;  %v39508_v17 = vpop.f32.mrb[132].mxu0  ;;  %35956 = vmatprep.subr.bf16.mxu0 %v36721_v34  ;;  %35959 = vmatprep.subr.bf16.mxu1 %v36721_v34 }
 0xa3f   : > { %v33999_v38 = vpop.f32.mrb[133].mxu0  ;;  %34040 = vmatmul.mubr.msk.f32.vlgmr.msra.gmra.mrb[138].mxu0 %vm17362_vm5, %v39506_v8  ;;  %34047 = vmatmul.mubr.msk.f32.vlgmr.msra.gmra.mrb[140].mxu1 %vm17362_vm5, %v39508_v17  ;;  %v33992_v57 = vpop.f32.mrb[133].mxu1 }
 0xa40   : > { %35958 = vmatpush3.bf16.msra.mxu0 %v39467_v12  ;;  %35961 = vmatpush3.bf16.msra.mxu1 %v39467_v12 }
 0xa41   : > { %34053 = vmatprep.mubr.msk.f32.mxu0 %vm36722_vm7, %v36720_v14  ;;  %34060 = vmatprep.mubr.msk.f32.mxu1 %vm36722_vm7, %v36720_v14 }
 0xa42   : > { %v39522_v27 = vpop.f32.mrb[134].mxu1  ;;  %v39524_v10 = vpop.f32.mrb[134].mxu0  ;;  %35962 = vmatprep.subr.bf16.mxu0 %v36721_v34  ;;  %35965 = vmatprep.subr.bf16.mxu1 %v36721_v34 }
 0xa43   : > { %v34013_v12 = vpop.f32.mrb[135].mxu0  ;;  %34054 = vmatmul.mubr.msk.f32.vlgmr.msra.gmra.mrb[140].mxu0 %vm17362_vm5, %v39522_v27  ;;  %34061 = vmatmul.mubr.msk.f32.vlgmr.msra.gmra.mrb[142].mxu1 %vm17362_vm5, %v39524_v10  ;;  %v34006_v35 = vpop.f32.mrb[135].mxu1 }
 0xa44   : > { %35964 = vmatpush3.bf16.msra.mxu0 %v39528_v16  ;;  %35967 = vmatpush3.bf16.msra.mxu1 %v39530_v18 }
 0xa45   : > { %34067 = vmatprep.mubr.msk.f32.mxu0 %vm36722_vm7, %v36720_v14  ;;  %34074 = vmatprep.mubr.msk.f32.mxu1 %vm36722_vm7, %v36720_v14 }
 0xa46   : > { %35968 = vmatprep.subr.bf16.mxu0 %v36721_v34  ;;  %35971 = vmatprep.subr.bf16.mxu1 %v36721_v34 }
 0xa47   : > { %34068 = vmatmul.mubr.msk.f32.vlgmr.msra.gmra.mrb[142].mxu0 %vm17362_vm5, %v39176_v3  ;;  %34075 = vmatmul.mubr.msk.f32.vlgmr.msra.gmra.mrb[144].mxu1 %vm17362_vm5, %v39176_v3 }
 0xa48   : > { %35970 = vmatpush3.bf16.msra.mxu0 %v39544_v28  ;;  %35973 = vmatpush3.bf16.msra.mxu1 %v39546_v1 }
 0xa49   : > { %34081 = vmatprep.mubr.msk.f32.mxu0 %vm36722_vm7, %v36720_v14  ;;  %34088 = vmatprep.mubr.msk.f32.mxu1 %vm36722_vm7, %v36720_v14 }
 0xa4a   : > { %35974 = vmatprep.subr.bf16.mxu0 %v36721_v34  ;;  %35977 = vmatprep.subr.bf16.mxu1 %v36721_v34 }
 0xa4b   : > { %34082 = vmatmul.mubr.msk.f32.vlgmr.msra.gmra.mrb[144].mxu0 %vm17362_vm5, %v39176_v3  ;;  %34089 = vmatmul.mubr.msk.f32.vlgmr.msra.gmra.mrb[146].mxu1 %vm17362_vm5, %v39176_v3 }
 0xa4c   : > { %35976 = vmatpush3.bf16.msra.mxu0 %v39560_v15  ;;  %35979 = vmatpush3.bf16.msra.mxu1 %v39562_v61 }
 0xa4d   : > { %34095 = vmatprep.mubr.msk.f32.mxu0 %vm36722_vm7, %v36720_v14  ;;  %34102 = vmatprep.mubr.msk.f32.mxu1 %vm36722_vm7, %v36720_v14 }
 0xa4e   : > { %35980 = vmatprep.subr.bf16.mxu0 %v36721_v34  ;;  %35983 = vmatprep.subr.bf16.mxu1 %v36721_v34 }
 0xa4f   : > { %34096 = vmatmul.mubr.msk.f32.vlgmr.msra.gmra.mrb[146].mxu0 %vm17362_vm5, %v39176_v3  ;;  %34103 = vmatmul.mubr.msk.f32.vlgmr.msra.gmra.mrb[148].mxu1 %vm17362_vm5, %v39176_v3 }
 0xa50   : > { %35982 = vmatpush3.bf16.msra.mxu0 %v39575_v7  ;;  %34109 = vmatprep.mubr.msk.f32.mxu0 %vm36722_vm7, %v36720_v14 }
 0xa51   : > { %35986 = vmatprep.subr.bf16.mxu0 %v36721_v34  ;;  %34116 = vmatprep.mubr.msk.f32.mxu1 %vm36722_vm7, %v36720_v14 }
 0xa52   : > { %35985 = vmatpush3.bf16.msra.mxu1 %v35984_v41 }
 0xa53   : > { %34110 = vmatmul.mubr.msk.f32.vlgmr.msra.gmra.mrb[148].mxu0 %vm17362_vm5, %v39176_v3  ;;  %35989 = vmatprep.subr.bf16.mxu1 %v36721_v34 }
 0xa54   : > { %34123 = vmatprep.mubr.msk.f32.mxu0 %vm36722_vm7, %v36720_v14  ;;  %35988 = vmatpush3.bf16.msra.mxu0 %v35984_v41 }
 0xa55   : > { %35992 = vmatprep.subr.bf16.mxu0 %v36721_v34 }
 0xb0a   : > { %v20038_v42 = vpop.f32.mrb[136].mxu1 }
 0xb0b   : > { %v39601_v3 = vadd.f32 %v20038_v42, %v39473_v5  ;;  %v34020_v47 = vpop.f32.mrb[137].mxu1 }
 0xb0c   : > { %v30602_v47 = vld [vmem:[%s40626_s6 + $0x48] sm:$0xff] }
 0xb0e   : > { %v20111_v53 = vpop.f32.mrb[136].mxu0  ;;  %v20184_v54 = vpop.f32.mrb[138].mxu1 }
 0xb0f   : > { %v39604_v2 = vadd.f32 %v20111_v53, %v39475_v31  ;;  %v39607_v4 = vadd.f32 %v20184_v54, %v39477_v49  ;;  %v34034_v20 = vpop.f32.mrb[139].mxu1  ;;  %v34027_v38 = vpop.f32.mrb[137].mxu0 }
 0xb12   : > { %v20257_v57 = vpop.f32.mrb[138].mxu0  ;;  %v20330_v22 = vpop.f32.mrb[140].mxu1 }
 0xb13   : > { %v39610_v33 = vadd.f32 %v20257_v57, %v39479_v19  ;;  %v39613_v24 = vadd.f32 %v20330_v22, %v39481_v25  ;;  %v34048_v5 = vpop.f32.mrb[141].mxu1  ;;  %v34041_v55 = vpop.f32.mrb[139].mxu0 }
 0xb16   : > { %v20403_v12 = vpop.f32.mrb[140].mxu0  ;;  %v20476_v6 = vpop.f32.mrb[142].mxu1 }
 0xb17   : > { %v39616_v31 = vadd.f32 %v20403_v12, %v39483_v29  ;;  %v39619_v49 = vadd.f32 %v20476_v6, %v39485_v48  ;;  %v34062_v43 = vpop.f32.mrb[143].mxu1  ;;  %v34055_v39 = vpop.f32.mrb[141].mxu0 }
 0xb1a   : > { %v20553_v35 = vpop.f32.mrb[142].mxu0  ;;  %v20623_v62 = vpop.f32.mrb[144].mxu1 }
 0xb1b   : > { %v34076_v36 = vpop.f32.mrb[145].mxu1  ;;  %34117 = vmatmul.mubr.msk.f32.vlgmr.msra.gmra.mrb[150].mxu1 %vm17362_vm5, %v20553_v35  ;;  %34124 = vmatmul.mubr.msk.f32.vlgmr.msra.gmra.mrb[150].mxu0 %vm17362_vm5, %v20623_v62  ;;  %v34069_v19 = vpop.f32.mrb[143].mxu0 }
 0xb1c   : > { %35991 = vmatpush3.bf16.msra.mxu1 %v35984_v41  ;;  %35994 = vmatpush3.bf16.msra.mxu0 %v35984_v41 }
 0xb1d   : > { %34130 = vmatprep.mubr.msk.f32.mxu1 %vm36722_vm7, %v36720_v14  ;;  %34137 = vmatprep.mubr.msk.f32.mxu0 %vm36722_vm7, %v36720_v14 }
 0xb1e   : > { %v20693_v25 = vpop.f32.mrb[144].mxu0  ;;  %v20763_v29 = vpop.f32.mrb[146].mxu1  ;;  %35995 = vmatprep.subr.bf16.mxu1 %v36721_v34  ;;  %35998 = vmatprep.subr.bf16.mxu0 %v36721_v34 }
 0xb1f   : > { %v34090_v48 = vpop.f32.mrb[147].mxu1  ;;  %34131 = vmatmul.mubr.msk.f32.vlgmr.msra.gmra.mrb[152].mxu1 %vm17362_vm5, %v20693_v25  ;;  %34138 = vmatmul.mubr.msk.f32.vlgmr.msra.gmra.mrb[152].mxu0 %vm17362_vm5, %v20763_v29  ;;  %v34083_v37 = vpop.f32.mrb[145].mxu0 }
 0xb20   : > { %35997 = vmatpush3.bf16.msra.mxu1 %v35984_v41  ;;  %36000 = vmatpush3.bf16.msra.mxu0 %v35984_v41 }
 0xb21   : > { %34144 = vmatprep.mubr.msk.f32.mxu1 %vm36722_vm7, %v36720_v14  ;;  %34151 = vmatprep.mubr.msk.f32.mxu0 %vm36722_vm7, %v36720_v14 }
 0xb22   : > { %v20833_v56 = vpop.f32.mrb[146].mxu0  ;;  %v20903_v30 = vpop.f32.mrb[148].mxu1  ;;  %36001 = vmatprep.subr.bf16.mxu1 %v36721_v34  ;;  %36004 = vmatprep.subr.bf16.mxu0 %v36721_v34 }
 0xb23   : > { %v34104_v50 = vpop.f32.mrb[149].mxu1  ;;  %34145 = vmatmul.mubr.msk.f32.vlgmr.msra.gmra.mrb[154].mxu1 %vm17362_vm5, %v20833_v56  ;;  %34152 = vmatmul.mubr.msk.f32.vlgmr.msra.gmra.mrb[154].mxu0 %vm17362_vm5, %v20903_v30  ;;  %v34097_v23 = vpop.f32.mrb[147].mxu0 }
 0xb24   : > { %36003 = vmatpush3.bf16.msra.mxu1 %v35984_v41  ;;  %36006 = vmatpush3.bf16.msra.mxu0 %v39528_v16  ;;  %v30601_v41 = vld [vmem:[%s40626_s6 + $0x40] sm:$0xff] }
 0xb25   : > { %34158 = vmatprep.mubr.msk.f32.mxu1 %vm36722_vm7, %v36720_v14  ;;  %34165 = vmatprep.mubr.msk.f32.mxu0 %vm36722_vm7, %v36720_v14  ;;  %v36026_v53 = vpack.c.bf16 %v30602_v47, %v30601_v41 }
 0xb26   : > { %v20973_v40 = vpop.f32.mrb[148].mxu0  ;;  %36007 = vmatprep.subr.bf16.mxu1 %v36721_v34  ;;  %36010 = vmatprep.subr.bf16.mxu0 %v36721_v34 }
 0xb27   : > { %34159 = vmatmul.mubr.msk.f32.vlgmr.msra.gmra.mrb[156].mxu1 %vm17362_vm5, %v20973_v40  ;;  %34166 = vmatmul.mubr.msk.f32.vlgmr.msra.gmra.mrb[156].mxu0 %vm17362_vm5, %v39257_v32  ;;  %v34111_v42 = vpop.f32.mrb[149].mxu0 }
 0xb28   : > { %36009 = vmatpush3.bf16.msra.mxu1 %v39530_v18  ;;  %36012 = vmatpush3.bf16.msra.mxu0 %v39544_v28 }
 0xb29   : > { %34172 = vmatprep.mubr.msk.f32.mxu1 %vm36722_vm7, %v36720_v14  ;;  %34179 = vmatprep.mubr.msk.f32.mxu0 %vm36722_vm7, %v36720_v14 }
 0xb2a   : > { %36013 = vmatprep.subr.bf16.mxu1 %v36721_v34  ;;  %36016 = vmatprep.subr.bf16.mxu0 %v36721_v34 }
 0xb2b   : > { %34173 = vmatmul.mubr.msk.f32.vlgmr.msra.gmra.mrb[158].mxu1 %vm17362_vm5, %v39257_v32  ;;  %34180 = vmatmul.mubr.msk.f32.vlgmr.msra.gmra.mrb[158].mxu0 %vm17362_vm5, %v39257_v32 }
 0xb2c   : > { %36015 = vmatpush3.bf16.msra.mxu1 %v39546_v1  ;;  %36018 = vmatpush3.bf16.msra.mxu0 %v39560_v15 }
 0xb2d   : > { %34186 = vmatprep.mubr.msk.f32.mxu1 %vm36722_vm7, %v36720_v14  ;;  %34193 = vmatprep.mubr.msk.f32.mxu0 %vm36722_vm7, %v36720_v14 }
 0xb2e   : > { %36019 = vmatprep.subr.bf16.mxu1 %v36721_v34  ;;  %36022 = vmatprep.subr.bf16.mxu0 %v36721_v34 }
 0xb2f   : > { %34187 = vmatmul.mubr.msk.f32.vlgmr.msra.gmra.mrb[160].mxu1 %vm17362_vm5, %v39257_v32  ;;  %34194 = vmatmul.mubr.msk.f32.vlgmr.msra.gmra.mrb[160].mxu0 %vm17362_vm5, %v39257_v32 }
 0xb30   : > { %36021 = vmatpush3.bf16.msra.mxu1 %v39562_v61  ;;  %36024 = vmatpush3.bf16.msra.mxu0 %v39575_v7 }
 0xb31   : > { %34200 = vmatprep.mubr.msk.f32.mxu1 %vm36722_vm7, %v36720_v14  ;;  %34207 = vmatprep.mubr.msk.f32.mxu0 %vm36722_vm7, %v36720_v14 }
 0xb32   : > { %36025 = vmatprep.subr.bf16.mxu1 %v36721_v34  ;;  %36028 = vmatprep.subr.bf16.mxu0 %v36721_v34 }
 0xb33   : > { %34201 = vmatmul.mubr.msk.f32.vlgmr.msra.gmra.mrb[162].mxu1 %vm17362_vm5, %v39257_v32  ;;  %34208 = vmatmul.mubr.msk.f32.vlgmr.msra.gmra.mrb[162].mxu0 %vm17362_vm5, %v39257_v32 }
 0xb34   : > { %34214 = vmatprep.mubr.msk.f32.mxu1 %vm36722_vm7, %v36720_v14  ;;  %34221 = vmatprep.mubr.msk.f32.mxu0 %vm36722_vm7, %v36720_v14 }
 0xb35   : > { %36027 = vmatpush3.bf16.msra.mxu1 %v36026_v53  ;;  %36030 = vmatpush3.bf16.msra.mxu0 %v36026_v53 }
 0xb36   : > { %36031 = vmatprep.subr.bf16.mxu1 %v36721_v34  ;;  %36034 = vmatprep.subr.bf16.mxu0 %v36721_v34 }
 0xbee   : > { %v21049_v32 = vpop.f32.mrb[150].mxu1  ;;  %v21122_v54 = vpop.f32.mrb[150].mxu0 }
 0xbef   : > { %v39698_v20 = vadd.f32 %v21049_v32, %v39601_v3  ;;  %v39701_v38 = vadd.f32 %v21122_v54, %v39604_v2  ;;  %v34125_v57 = vpop.f32.mrb[151].mxu0  ;;  %v34118_v22 = vpop.f32.mrb[151].mxu1 }
 0xbf2   : > { %v21195_v5 = vpop.f32.mrb[152].mxu1  ;;  %v21268_v55 = vpop.f32.mrb[152].mxu0 }
 0xbf3   : > { %v39704_v12 = vadd.f32 %v21195_v5, %v39607_v4  ;;  %v39707_v6 = vadd.f32 %v21268_v55, %v39610_v33  ;;  %v34139_v43 = vpop.f32.mrb[153].mxu0  ;;  %v34132_v39 = vpop.f32.mrb[153].mxu1 }
 0xbf6   : > { %v21341_v35 = vpop.f32.mrb[154].mxu1  ;;  %v21414_v62 = vpop.f32.mrb[154].mxu0 }
 0xbf7   : > { %v39710_v3 = vadd.f32 %v21341_v35, %v39613_v24  ;;  %v39713_v2 = vadd.f32 %v21414_v62, %v39616_v31  ;;  %v34153_v36 = vpop.f32.mrb[155].mxu0  ;;  %v34146_v19 = vpop.f32.mrb[155].mxu1 }
 0xbfa   : > { %v21487_v25 = vpop.f32.mrb[156].mxu1  ;;  %v21564_v29 = vpop.f32.mrb[156].mxu0 }
 0xbfb   : > { %v39716_v4 = vadd.f32 %v21487_v25, %v39619_v49  ;;  %v34167_v48 = vpop.f32.mrb[157].mxu0  ;;  %34215 = vmatmul.mubr.msk.f32.vlgmr.msra.gmra.mrb[164].mxu1 %vm17362_vm5, %v21564_v29  ;;  %v34160_v33 = vpop.f32.mrb[157].mxu1 }
 0xbfc   : > { %36033 = vmatpush3.bf16.msra.mxu1 %v36026_v53  ;;  %34228 = vmatprep.mubr.msk.f32.mxu1 %vm36722_vm7, %v36720_v14 }
 0xbfd   : > { %36037 = vmatprep.subr.bf16.mxu1 %v36721_v34 }
 0xbfe   : > { %v21634_v24 = vpop.f32.mrb[158].mxu1  ;;  %v21704_v31 = vpop.f32.mrb[158].mxu0 }
 0xbff   : > { %v34181_v37 = vpop.f32.mrb[159].mxu0  ;;  %34222 = vmatmul.mubr.msk.f32.vlgmr.msra.gmra.mrb[164].mxu0 %vm17362_vm5, %v21634_v24  ;;  %34229 = vmatmul.mubr.msk.f32.vlgmr.msra.gmra.mrb[166].mxu1 %vm17362_vm5, %v21704_v31  ;;  %v34174_v56 = vpop.f32.mrb[159].mxu1  ;;  %v17453_v31 = vld [vmem:[#allocation2 + $0xe0] sm:$0xff] }
 0xc00   : > { %36036 = vmatpush3.bf16.msra.mxu0 %v36026_v53  ;;  %36039 = vmatpush3.bf16.msra.mxu1 %v36026_v53  ;;  %v17454_v37 = vld [vmem:[#allocation2 + $0xe8] sm:$0xff]  ;;  %v30627_v56 = vld [vmem:[%s40626_s6 + $0x60] sm:$0xff] }
 0xc01   : > { %34235 = vmatprep.mubr.msk.f32.mxu0 %vm36722_vm7, %v36720_v14  ;;  %34242 = vmatprep.mubr.msk.f32.mxu1 %vm36722_vm7, %v36720_v14 }
 0xc02   : > { %v21774_v49 = vpop.f32.mrb[160].mxu1  ;;  %v21844_v30 = vpop.f32.mrb[160].mxu0  ;;  %36040 = vmatprep.subr.bf16.mxu0 %v36721_v34  ;;  %36043 = vmatprep.subr.bf16.mxu1 %v36721_v34 }
 0xc03   : > { %v34195_v50 = vpop.f32.mrb[161].mxu0  ;;  %34236 = vmatmul.mubr.msk.f32.vlgmr.msra.gmra.mrb[166].mxu0 %vm17362_vm5, %v21774_v49  ;;  %34243 = vmatmul.mubr.msk.f32.vlgmr.msra.gmra.mrb[168].mxu1 %vm17362_vm5, %v21844_v30  ;;  %v34188_v23 = vpop.f32.mrb[161].mxu1  ;;  %v30628_v49 = vld [vmem:[%s40626_s6 + $0x68] sm:$0xff] }
 0xc04   : > { %36042 = vmatpush3.bf16.msra.mxu0 %v36026_v53  ;;  %36045 = vmatpush3.bf16.msra.mxu1 %v36026_v53  ;;  %v39837_v23 = vpack.c.bf16 %v17454_v37, %v17453_v31 }
 0xc05   : > { %34249 = vmatprep.mubr.msk.f32.mxu0 %vm36722_vm7, %v36720_v14  ;;  %34256 = vmatprep.mubr.msk.f32.mxu1 %vm36722_vm7, %v36720_v14 }
 0xc06   : > { %v21914_v40 = vpop.f32.mrb[162].mxu1  ;;  %v21984_v42 = vpop.f32.mrb[162].mxu0  ;;  %36046 = vmatprep.subr.bf16.mxu0 %v36721_v34  ;;  %36049 = vmatprep.subr.bf16.mxu1 %v36721_v34 }
 0xc07   : > { %v34209_v41 = vpop.f32.mrb[163].mxu0  ;;  %34250 = vmatmul.mubr.msk.f32.vlgmr.msra.gmra.mrb[168].mxu0 %vm17362_vm5, %v21914_v40  ;;  %34257 = vmatmul.mubr.msk.f32.vlgmr.msra.gmra.mrb[170].mxu1 %vm17362_vm5, %v21984_v42  ;;  %v34202_v47 = vpop.f32.mrb[163].mxu1 }
 0xc08   : > { %36048 = vmatpush3.bf16.msra.mxu0 %v39528_v16  ;;  %36051 = vmatpush3.bf16.msra.mxu1 %v39530_v18  ;;  %v30617_v16 = vld [vmem:[%s40626_s6 + $0x50] sm:$0xff]  ;;  %v30618_v18 = vld [vmem:[%s40626_s6 + $0x58] sm:$0xff]  ;;  %v36092_v41 = vpack.c.bf16 %v30628_v49, %v30627_v56 }
 0xc09   : > { %34263 = vmatprep.mubr.msk.f32.mxu0 %vm36722_vm7, %v36720_v14  ;;  %34270 = vmatprep.mubr.msk.f32.mxu1 %vm36722_vm7, %v36720_v14 }
 0xc0a   : > { %36052 = vmatprep.subr.bf16.mxu0 %v36721_v34  ;;  %36055 = vmatprep.subr.bf16.mxu1 %v36721_v34 }
 0xc0b   : > { %34264 = vmatmul.mubr.msk.f32.vlgmr.msra.gmra.mrb[170].mxu0 %vm17362_vm5, %v39409_v21  ;;  %34271 = vmatmul.mubr.msk.f32.vlgmr.msra.gmra.mrb[172].mxu1 %vm17362_vm5, %v39409_v21 }
 0xc0c   : > { %36054 = vmatpush3.bf16.msra.mxu0 %v39544_v28  ;;  %36057 = vmatpush3.bf16.msra.mxu1 %v39546_v1  ;;  %v36068_v28 = vpack.c.bf16 %v30618_v18, %v30617_v16  ;;  %v36653_v16 = vld [vmem:[%s40622_s2] sm:$0x7f] }
 0xc0d   : > { %34277 = vmatprep.mubr.msk.f32.mxu0 %vm36722_vm7, %v36720_v14  ;;  %34284 = vmatprep.mubr.msk.f32.mxu1 %vm36722_vm7, %v36720_v14 }
 0xc0e   : > { %36058 = vmatprep.subr.bf16.mxu0 %v36721_v34  ;;  %36061 = vmatprep.subr.bf16.mxu1 %v36721_v34 }
 0xc0f   : > { %34278 = vmatmul.mubr.msk.f32.vlgmr.msra.gmra.mrb[172].mxu0 %vm17362_vm5, %v39409_v21  ;;  %34285 = vmatmul.mubr.msk.f32.vlgmr.msra.gmra.mrb[174].mxu1 %vm17362_vm5, %v39409_v21 }
 0xc10   : > { %36060 = vmatpush3.bf16.msra.mxu0 %v39560_v15  ;;  %36063 = vmatpush3.bf16.msra.mxu1 %v39562_v61 }
 0xc11   : > { %34291 = vmatprep.mubr.msk.f32.mxu0 %vm36722_vm7, %v36720_v14  ;;  %34298 = vmatprep.mubr.msk.f32.mxu1 %vm36722_vm7, %v36720_v14 }
 0xc12   : > { %36064 = vmatprep.subr.bf16.mxu0 %v36721_v34  ;;  %36067 = vmatprep.subr.bf16.mxu1 %v36721_v34 }
 0xc13   : > { %34292 = vmatmul.mubr.msk.f32.vlgmr.msra.gmra.mrb[174].mxu0 %vm17362_vm5, %v39409_v21  ;;  %34299 = vmatmul.mubr.msk.f32.vlgmr.msra.gmra.mrb[176].mxu1 %vm17362_vm5, %v39409_v21 }
 0xc14   : > { %36066 = vmatpush3.bf16.msra.mxu0 %v39575_v7  ;;  %34305 = vmatprep.mubr.msk.f32.mxu0 %vm36722_vm7, %v36720_v14 }
 0xc15   : > { %36070 = vmatprep.subr.bf16.mxu0 %v36721_v34  ;;  %34312 = vmatprep.mubr.msk.f32.mxu1 %vm36722_vm7, %v36720_v14 }
 0xc16   : > { %36069 = vmatpush3.bf16.msra.mxu1 %v36068_v28 }
 0xc17   : > { %34306 = vmatmul.mubr.msk.f32.vlgmr.msra.gmra.mrb[176].mxu0 %vm17362_vm5, %v39409_v21  ;;  %36073 = vmatprep.subr.bf16.mxu1 %v36721_v34 }
 0xc18   : > { %34319 = vmatprep.mubr.msk.f32.mxu0 %vm36722_vm7, %v36720_v14  ;;  %36072 = vmatpush3.bf16.msra.mxu0 %v36068_v28 }
 0xc19   : > { %36076 = vmatprep.subr.bf16.mxu0 %v36721_v34 }
 0xcce   : > { %v22060_v1 = vpop.f32.mrb[164].mxu1 }
 0xccf   : > { %v39795_v15 = vadd.f32 %v22060_v1, %v39698_v20  ;;  %v34216_v61 = vpop.f32.mrb[165].mxu1 }
 0xcd2   : > { %v22133_v7 = vpop.f32.mrb[164].mxu0  ;;  %v22206_v53 = vpop.f32.mrb[166].mxu1 }
 0xcd3   : > { %v39798_v32 = vadd.f32 %v22133_v7, %v39701_v38  ;;  %v39801_v54 = vadd.f32 %v22206_v53, %v39704_v12  ;;  %v34230_v57 = vpop.f32.mrb[167].mxu1  ;;  %v34223_v22 = vpop.f32.mrb[165].mxu0 }
 0xcd6   : > { %v22279_v5 = vpop.f32.mrb[166].mxu0  ;;  %v22352_v55 = vpop.f32.mrb[168].mxu1 }
 0xcd7   : > { %v39804_v43 = vadd.f32 %v22279_v5, %v39707_v6  ;;  %v39807_v39 = vadd.f32 %v22352_v55, %v39710_v3  ;;  %v34244_v20 = vpop.f32.mrb[169].mxu1  ;;  %v34237_v35 = vpop.f32.mrb[167].mxu0 }
 0xcda   : > { %v22425_v62 = vpop.f32.mrb[168].mxu0  ;;  %v22498_v36 = vpop.f32.mrb[170].mxu1 }
 0xcdb   : > { %v39810_v38 = vadd.f32 %v22425_v62, %v39713_v2  ;;  %v39813_v12 = vadd.f32 %v22498_v36, %v39716_v4  ;;  %v34258_v19 = vpop.f32.mrb[171].mxu1  ;;  %v34251_v25 = vpop.f32.mrb[169].mxu0 }
 0xcde   : > { %v22575_v29 = vpop.f32.mrb[170].mxu0  ;;  %v22645_v48 = vpop.f32.mrb[172].mxu1 }
 0xcdf   : > { %v34272_v33 = vpop.f32.mrb[173].mxu1  ;;  %34313 = vmatmul.mubr.msk.f32.vlgmr.msra.gmra.mrb[178].mxu1 %vm17362_vm5, %v22575_v29  ;;  %34320 = vmatmul.mubr.msk.f32.vlgmr.msra.gmra.mrb[178].mxu0 %vm17362_vm5, %v22645_v48  ;;  %v34265_v6 = vpop.f32.mrb[171].mxu0 }
 0xce0   : > { %36078 = vmatpush3.bf16.msra.mxu0 %v36068_v28  ;;  %36075 = vmatpush3.bf16.msra.mxu1 %v36068_v28 }
 0xce1   : > { %34326 = vmatprep.mubr.msk.f32.mxu1 %vm36722_vm7, %v36720_v14  ;;  %34333 = vmatprep.mubr.msk.f32.mxu0 %vm36722_vm7, %v36720_v14 }
 0xce2   : > { %v22715_v3 = vpop.f32.mrb[172].mxu0  ;;  %v22785_v2 = vpop.f32.mrb[174].mxu1  ;;  %36082 = vmatprep.subr.bf16.mxu0 %v36721_v34  ;;  %36079 = vmatprep.subr.bf16.mxu1 %v36721_v34 }
 0xce3   : > { %v34286_v4 = vpop.f32.mrb[175].mxu1  ;;  %34327 = vmatmul.mubr.msk.f32.vlgmr.msra.gmra.mrb[180].mxu1 %vm17362_vm5, %v22715_v3  ;;  %34334 = vmatmul.mubr.msk.f32.vlgmr.msra.gmra.mrb[180].mxu0 %vm17362_vm5, %v22785_v2  ;;  %v34279_v24 = vpop.f32.mrb[173].mxu0 }
 0xce4   : > { %36084 = vmatpush3.bf16.msra.mxu0 %v36068_v28  ;;  %36081 = vmatpush3.bf16.msra.mxu1 %v36068_v28 }
 0xce5   : > { %34340 = vmatprep.mubr.msk.f32.mxu1 %vm36722_vm7, %v36720_v14  ;;  %34347 = vmatprep.mubr.msk.f32.mxu0 %vm36722_vm7, %v36720_v14 }
 0xce6   : > { %v22855_v30 = vpop.f32.mrb[174].mxu0  ;;  %v22925_v50 = vpop.f32.mrb[176].mxu1  ;;  %36088 = vmatprep.subr.bf16.mxu0 %v36721_v34  ;;  %36085 = vmatprep.subr.bf16.mxu1 %v36721_v34 }
 0xce7   : > { %v34300_v40 = vpop.f32.mrb[177].mxu1  ;;  %34341 = vmatmul.mubr.msk.f32.vlgmr.msra.gmra.mrb[182].mxu1 %vm17362_vm5, %v22855_v30  ;;  %34348 = vmatmul.mubr.msk.f32.vlgmr.msra.gmra.mrb[182].mxu0 %vm17362_vm5, %v22925_v50  ;;  %v34293_v42 = vpop.f32.mrb[175].mxu0 }
 0xce8   : > { %36090 = vmatpush3.bf16.msra.mxu0 %v39837_v23  ;;  %36087 = vmatpush3.bf16.msra.mxu1 %v36068_v28 }
 0xce9   : > { %34354 = vmatprep.mubr.msk.f32.mxu1 %vm36722_vm7, %v36720_v14  ;;  %34361 = vmatprep.mubr.msk.f32.mxu0 %vm36722_vm7, %v36720_v14 }
 0xcea   : > { %v22995_v47 = vpop.f32.mrb[176].mxu0  ;;  %36094 = vmatprep.subr.bf16.mxu0 %v36721_v34  ;;  %36091 = vmatprep.subr.bf16.mxu1 %v36721_v34 }
 0xceb   : > { %34355 = vmatmul.mubr.msk.f32.vlgmr.msra.gmra.mrb[184].mxu1 %vm17362_vm5, %v22995_v47  ;;  %34362 = vmatmul.mubr.msk.f32.vlgmr.msra.gmra.mrb[184].mxu0 %vm17362_vm5, %v36653_v16  ;;  %v34307_v18 = vpop.f32.mrb[177].mxu0 }
 0xcec   : > { %36096 = vmatpush3.bf16.msra.mxu0 %v36092_v41  ;;  %36093 = vmatpush3.bf16.msra.mxu1 %v36092_v41 }
 0xced   : > { %34368 = vmatprep.mubr.msk.f32.mxu1 %vm36722_vm7, %v36720_v14  ;;  %34375 = vmatprep.mubr.msk.f32.mxu0 %vm36722_vm7, %v36720_v14 }
 0xcee   : > { %36100 = vmatprep.subr.bf16.mxu0 %v36721_v34  ;;  %36097 = vmatprep.subr.bf16.mxu1 %v36721_v34 }
 0xcef   : > { %34369 = vmatmul.mubr.msk.f32.vlgmr.msra.gmra.mrb[186].mxu1 %vm17362_vm5, %v39317_v26  ;;  %34376 = vmatmul.mubr.msk.f32.vlgmr.msra.gmra.mrb[186].mxu0 %vm17362_vm5, %v39319_v0  ;;  %v30637_v26 = vld [vmem:[%s40626_s6 + $0x70] sm:$0xff]  ;;  %v30638_v0 = vld [vmem:[%s40626_s6 + $0x78] sm:$0xff] }
 0xcf0   : > { %36102 = vmatpush3.bf16.msra.mxu0 %v36092_v41  ;;  %36099 = vmatpush3.bf16.msra.mxu1 %v36092_v41 }
 0xcf1   : > { %34382 = vmatprep.mubr.msk.f32.mxu1 %vm36722_vm7, %v36720_v14  ;;  %34389 = vmatprep.mubr.msk.f32.mxu0 %vm36722_vm7, %v36720_v14 }
 0xcf2   : > { %36106 = vmatprep.subr.bf16.mxu0 %v36721_v34  ;;  %36103 = vmatprep.subr.bf16.mxu1 %v36721_v34 }
 0xcf3   : > { %34383 = vmatmul.mubr.msk.f32.vlgmr.msra.gmra.mrb[188].mxu1 %vm17362_vm5, %v39321_v44  ;;  %34390 = vmatmul.mubr.msk.f32.vlgmr.msra.gmra.mrb[188].mxu0 %vm17362_vm5, %v39323_v9  ;;  %v39892_v44 = vpack.c.bf16 %v30638_v0, %v30637_v26  ;;  %v36654_v9 = vld [vmem:[%s40622_s2 + $0x8] sm:$0x7f] }
 0xcf4   : > { %36108 = vmatpush3.bf16.msra.mxu0 %v36092_v41  ;;  %36105 = vmatpush3.bf16.msra.mxu1 %v36092_v41 }
 0xcf5   : > { %34396 = vmatprep.mubr.msk.f32.mxu1 %vm36722_vm7, %v36720_v14  ;;  %34403 = vmatprep.mubr.msk.f32.mxu0 %vm36722_vm7, %v36720_v14 }
 0xcf6   : > { %36112 = vmatprep.subr.bf16.mxu0 %v36721_v34  ;;  %36109 = vmatprep.subr.bf16.mxu1 %v36721_v34 }
 0xcf7   : > { %34397 = vmatmul.mubr.msk.f32.vlgmr.msra.gmra.mrb[190].mxu1 %vm17362_vm5, %v39325_v46  ;;  %34404 = vmatmul.mubr.msk.f32.vlgmr.msra.gmra.mrb[190].mxu0 %vm17362_vm5, %v39327_v45  ;;  %v30647_v46 = vld [vmem:[%s40626_s6 + $0x80] sm:$0xff]  ;;  %v30648_v45 = vld [vmem:[%s40626_s6 + $0x88] sm:$0xff] }
 0xcf8   : > { %36114 = vmatpush3.bf16.msra.mxu0 %v39837_v23  ;;  %34417 = vmatprep.mubr.msk.f32.mxu0 %vm36722_vm7, %v36720_v14 }
 0xcf9   : > { %36118 = vmatprep.subr.bf16.mxu0 %v36721_v34  ;;  %36111 = vmatpush3.bf16.msra.mxu1 %v36092_v41 }
 0xcfa   : > { %34410 = vmatprep.mubr.msk.f32.mxu1 %vm36722_vm7, %v36720_v14  ;;  %36115 = vmatprep.subr.bf16.mxu1 %v36721_v34 }
 0xcfb   : > { %34418 = vmatmul.mubr.msk.f32.vlgmr.msra.gmra.mrb[192].mxu0 %vm17362_vm5, %v36654_v9 }
 0xcfc   : > { %36120 = vmatpush3.bf16.msra.mxu0 %v39892_v44  ;;  %34431 = vmatprep.mubr.msk.f32.mxu0 %vm36722_vm7, %v36720_v14 }
 0xcfd   : > { %36124 = vmatprep.subr.bf16.mxu0 %v36721_v34 }
 0xcff   : > { %34432 = vmatmul.mubr.msk.f32.vlgmr.msra.gmra.mrb[194].mxu0 %vm17362_vm5, %v39335_v52  ;;  %v39929_v52 = vpack.c.bf16 %v30648_v45, %v30647_v46 }
 0xd00   : > { %36126 = vmatpush3.bf16.msra.mxu0 %v39892_v44  ;;  %34445 = vmatprep.mubr.msk.f32.mxu0 %vm36722_vm7, %v36720_v14 }
 0xd01   : > { %36130 = vmatprep.subr.bf16.mxu0 %v36721_v34 }
 0xd03   : > { %34446 = vmatmul.mubr.msk.f32.vlgmr.msra.gmra.mrb[196].mxu0 %vm17362_vm5, %v39353_v63  ;;  %v25290_v63 = vld [vmem:[#allocation3] sm:$0xff] }
 0xd04   : > { %36132 = vmatpush3.bf16.msra.mxu0 %v39892_v44  ;;  %34459 = vmatprep.mubr.msk.f32.mxu0 %vm36722_vm7, %v36720_v14 }
 0xd05   : > { %36136 = vmatprep.subr.bf16.mxu0 %v36721_v34 }
 0xd07   : > { %34460 = vmatmul.mubr.msk.f32.vlgmr.msra.gmra.mrb[198].mxu0 %vm17362_vm5, %v39367_v13  ;;  %v25291_v13 = vld [vmem:[#allocation3 + $0x8] sm:$0x3] }
 0xd08   : > { %36138 = vmatpush3.bf16.msra.mxu0 %v39837_v23  ;;  %34473 = vmatprep.mubr.msk.f32.mxu0 %vm36722_vm7, %v36720_v14 }
 0xd09   : > { %36142 = vmatprep.subr.bf16.mxu0 %v36721_v34 }
 0xd0b   : > { %34474 = vmatmul.mubr.msk.f32.vlgmr.msra.gmra.mrb[200].mxu0 %vm17362_vm5, %v39409_v21  ;;  %v39963_v21 = vpack.c.bf16 %v25291_v13, %v25290_v63  ;;  %v40050_v63 = vld [vmem:[%s40627_s7] ss:$0 sm:$0xff] }
 0xd0c   : > { %36144 = vmatpush3.bf16.msra.mxu0 %v39929_v52  ;;  %34487 = vmatprep.mubr.msk.f32.mxu0 %vm36722_vm7, %v36720_v14 }
 0xd0d   : > { %36148 = vmatprep.subr.bf16.mxu0 %v36721_v34 }
 0xd0f   : > { %34488 = vmatmul.mubr.msk.f32.vlgmr.msra.gmra.mrb[202].mxu0 %vm17362_vm5, %v39494_v59 }
 0xd10   : > { %36150 = vmatpush3.bf16.msra.mxu0 %v39929_v52  ;;  %34501 = vmatprep.mubr.msk.f32.mxu0 %vm36722_vm7, %v36720_v14 }
 0xd11   : > { %36154 = vmatprep.subr.bf16.mxu0 %v36721_v34 }
 0xd13   : > { %34502 = vmatmul.mubr.msk.f32.vlgmr.msra.gmra.mrb[204].mxu0 %vm17362_vm5, %v39508_v17  ;;  %v39976_v17 = vld [vmem:[%s40623_s3] sm:$0xf] }
 0xd14   : > { %36156 = vmatpush3.bf16.msra.mxu0 %v39929_v52  ;;  %34515 = vmatprep.mubr.msk.f32.mxu0 %vm36722_vm7, %v36720_v14 }
 0xd15   : > { %36160 = vmatprep.subr.bf16.mxu0 %v36721_v34 }
 0xd17   : > { %34516 = vmatmul.mubr.msk.f32.vlgmr.msra.gmra.mrb[206].mxu0 %vm17362_vm5, %v39524_v10 }
 0xd18   : > { %34529 = vmatprep.mubr.msk.f32.mxu0 %vm36722_vm7, %v36720_v14  ;;  %36163 = vmatpush3.bf16.msk.msra.mxu0 %vm39966_vm10, %v39963_v21 }
 0xd19   : > { %36168 = vmatprep.subr.bf16.mxu0 %v36721_v34 }
 0xd1b   : > { %34530 = vmatmul.mubr.msk.f32.vlgmr.msra.gmra.mrb[208].mxu0 %vm25313_vm11, %v39976_v17 }
 0xd1c   : > { %34543 = vmatprep.mubr.msk.f32.mxu0 %vm36722_vm7, %v36720_v14 }
 0xdb2   : > { %v23071_v10 = vpop.f32.mrb[178].mxu1  ;;  %v23144_v28 = vpop.f32.mrb[178].mxu0 }
 0xdb3   : > { %v23513_v1 = vadd.f32 %v23071_v10, %v39795_v15  ;;  %v23514_v61 = vadd.f32 %v23144_v28, %v39798_v32  ;;  %v34321_v7 = vpop.f32.mrb[179].mxu0  ;;  %v34314_v53 = vpop.f32.mrb[179].mxu1 }
 0xdb6   : > { %v23217_v57 = vpop.f32.mrb[180].mxu1  ;;  %v23290_v22 = vpop.f32.mrb[180].mxu0 }
 0xdb7   : > { %v23515_v5 = vadd.f32 %v23217_v57, %v39801_v54  ;;  %v23516_v55 = vadd.f32 %v23290_v22, %v39804_v43  ;;  %v34335_v20 = vpop.f32.mrb[181].mxu0  ;;  %v34328_v35 = vpop.f32.mrb[181].mxu1 }
 0xdb8   : > { %v25295_v20 = vld [vmem:[#allocation3 + $0x28] sm:$0x3] }
 0xdba   : > { %v23363_v62 = vpop.f32.mrb[182].mxu1  ;;  %v23436_v36 = vpop.f32.mrb[182].mxu0 }
 0xdbb   : > { %v23517_v19 = vadd.f32 %v23363_v62, %v39807_v39  ;;  %v23518_v25 = vadd.f32 %v23436_v36, %v39810_v38  ;;  %v34349_v29 = vpop.f32.mrb[183].mxu0  ;;  %v34342_v15 = vpop.f32.mrb[183].mxu1 }
 0xdbc   : > { %v25303_v15 = vld [vmem:[#allocation3 + $0x68] sm:$0x3] }
 0xdbe   : > { %v23509_v48 = vpop.f32.mrb[184].mxu1  ;;  %v23586_v32 = vpop.f32.mrb[184].mxu0 }
 0xdbf   : > { %v39990_v33 = vadd.f32 %v23509_v48, %v39813_v12  ;;  %v34363_v6 = vpop.f32.mrb[185].mxu0  ;;  %34411 = vmatmul.mubr.msk.f32.vlgmr.msra.gmra.mrb[192].mxu1 %vm17362_vm5, %v23586_v32  ;;  %v34356_v54 = vpop.f32.mrb[185].mxu1 }
 0xdc0   : > { %36117 = vmatpush3.bf16.msra.mxu1 %v39892_v44  ;;  %34424 = vmatprep.mubr.msk.f32.mxu1 %vm36722_vm7, %v36720_v14  ;;  %v40087_v6 = vld [vmem:[%s40623_s3 + $0x4] sm:$0xf] }
 0xdc1   : > { %36121 = vmatprep.subr.bf16.mxu1 %v36721_v34 }
 0xdc2   : > { %v23659_v43 = vpop.f32.mrb[186].mxu1  ;;  %v23729_v39 = vpop.f32.mrb[186].mxu0 }
 0xdc3   : > { %v39997_v38 = vadd.f32 %v23659_v43, %v23513_v1  ;;  %v24087_v3 = vadd.f32 %v23729_v39, %v23514_v61  ;;  %v34370_v2 = vpop.f32.mrb[187].mxu1  ;;  %v34377_v4 = vpop.f32.mrb[187].mxu0  ;;  %34425 = vmatmul.mubr.msk.f32.vlgmr.msra.gmra.mrb[194].mxu1 %vm17362_vm5, %v39333_v51  ;;  %v30675_v39 = vld [vmem:[%s40628_s8 + $0x10] sm:$0xff] }
 0xdc4   : > { %36123 = vmatpush3.bf16.msra.mxu1 %v39892_v44  ;;  %34438 = vmatprep.mubr.msk.f32.mxu1 %vm36722_vm7, %v36720_v14 }
 0xdc5   : > { %36127 = vmatprep.subr.bf16.mxu1 %v36721_v34 }
 0xdc6   : > { %v23799_v12 = vpop.f32.mrb[188].mxu1  ;;  %v23869_v24 = vpop.f32.mrb[188].mxu0 }
 0xdc7   : > { %v40005_v31 = vadd.f32 %v23799_v12, %v23515_v5  ;;  %v24089_v37 = vadd.f32 %v23869_v24, %v23516_v55  ;;  %v34384_v56 = vpop.f32.mrb[189].mxu1  ;;  %v34391_v49 = vpop.f32.mrb[189].mxu0  ;;  %34439 = vmatmul.mubr.msk.f32.vlgmr.msra.gmra.mrb[196].mxu1 %vm17362_vm5, %v39351_v60 }
 0xdc8   : > { %36129 = vmatpush3.bf16.msra.mxu1 %v39892_v44  ;;  %34452 = vmatprep.mubr.msk.f32.mxu1 %vm36722_vm7, %v36720_v14 }
 0xdc9   : > { %36133 = vmatprep.subr.bf16.mxu1 %v36721_v34 }
 0xdca   : > { %v23939_v51 = vpop.f32.mrb[190].mxu1  ;;  %v24009_v30 = vpop.f32.mrb[190].mxu0 }
 0xdcb   : > { %v40013_v50 = vadd.f32 %v23939_v51, %v23517_v19  ;;  %v24091_v23 = vadd.f32 %v24009_v30, %v23518_v25  ;;  %v34398_v40 = vpop.f32.mrb[191].mxu1  ;;  %v34405_v42 = vpop.f32.mrb[191].mxu0  ;;  %34453 = vmatmul.mubr.msk.f32.vlgmr.msra.gmra.mrb[198].mxu1 %vm17362_vm5, %v39365_v11  ;;  %v25299_v19 = vld [vmem:[#allocation3 + $0x48] sm:$0x3] }
 0xdcc   : > { %36135 = vmatpush3.bf16.msra.mxu1 %v39892_v44  ;;  %34466 = vmatprep.mubr.msk.f32.mxu1 %vm36722_vm7, %v36720_v14 }
 0xdcd   : > { %36139 = vmatprep.subr.bf16.mxu1 %v36721_v34 }
 0xdce   : > { %v24159_v60 = vpop.f32.mrb[192].mxu0 }
 0xdcf   : > { %v34419_v41 = vpop.f32.mrb[193].mxu0  ;;  %34467 = vmatmul.mubr.msk.f32.vlgmr.msra.gmra.mrb[200].mxu1 %vm17362_vm5, %v24159_v60 }
 0xdd0   : > { %36141 = vmatpush3.bf16.msra.mxu1 %v39929_v52  ;;  %34480 = vmatprep.mubr.msk.f32.mxu1 %vm36722_vm7, %v36720_v14 }
 0xdd1   : > { %36145 = vmatprep.subr.bf16.mxu1 %v36721_v34 }
 0xdd2   : > { %v24302_v47 = vpop.f32.mrb[194].mxu0 }
 0xdd3   : > { %v24660_v11 = vadd.f32 %v24302_v47, %v24087_v3  ;;  %v34433_v16 = vpop.f32.mrb[195].mxu0  ;;  %34481 = vmatmul.mubr.msk.f32.vlgmr.msra.gmra.mrb[202].mxu1 %vm17362_vm5, %v39492_v58  ;;  %v30676_v3 = vld [vmem:[%s40628_s8 + $0x18] sm:$0xff] }
 0xdd4   : > { %36147 = vmatpush3.bf16.msra.mxu1 %v39929_v52  ;;  %34494 = vmatprep.mubr.msk.f32.mxu1 %vm36722_vm7, %v36720_v14  ;;  %v40133_v2 = vpack.c.bf16 %v30676_v3, %v30675_v39 }
 0xdd5   : > { %36151 = vmatprep.subr.bf16.mxu1 %v36721_v34 }
 0xdd6   : > { %v24442_v18 = vpop.f32.mrb[196].mxu0 }
 0xdd7   : > { %v24662_v26 = vadd.f32 %v24442_v18, %v24089_v37  ;;  %v34447_v0 = vpop.f32.mrb[197].mxu0  ;;  %34495 = vmatmul.mubr.msk.f32.vlgmr.msra.gmra.mrb[204].mxu1 %vm17362_vm5, %v39506_v8 }
 0xdd8   : > { %36153 = vmatpush3.bf16.msra.mxu1 %v39929_v52  ;;  %34508 = vmatprep.mubr.msk.f32.mxu1 %vm36722_vm7, %v36720_v14 }
 0xdd9   : > { %36157 = vmatprep.subr.bf16.mxu1 %v36721_v34 }
 0xdda   : > { %v24582_v58 = vpop.f32.mrb[198].mxu0 }
 0xddb   : > { %v24664_v44 = vadd.f32 %v24582_v58, %v24091_v23  ;;  %v34461_v9 = vpop.f32.mrb[199].mxu0  ;;  %34509 = vmatmul.mubr.msk.f32.vlgmr.msra.gmra.mrb[206].mxu1 %vm17362_vm5, %v39522_v27 }
 0xddc   : > { %36159 = vmatpush3.bf16.msra.mxu1 %v39929_v52  ;;  %34522 = vmatprep.mubr.msk.f32.mxu1 %vm36722_vm7, %v36720_v14 }
 0xddd   : > { %36164 = vmatprep.subr.bf16.mxu1 %v36721_v34 }
 0xdde   : > { %v24732_v8 = vpop.f32.mrb[200].mxu0 }
 0xddf   : > { %v34475_v46 = vpop.f32.mrb[201].mxu0  ;;  %34523 = vmatmul.mubr.msk.f32.vlgmr.msra.gmra.mrb[208].mxu1 %vm17362_vm5, %v24732_v8 }
 0xde0   : > { %34536 = vmatprep.mubr.msk.f32.mxu1 %vm36722_vm7, %v36720_v14 }
 0xde2   : > { %v24875_v45 = vpop.f32.mrb[202].mxu0 }
 0xde3   : > { %v25233_v27 = vadd.f32 %v24875_v45, %v24660_v11  ;;  %v34489_v52 = vpop.f32.mrb[203].mxu0 }
 0xde5   : > { %v25247_v13 = vadd.f32 %v40050_v63, %v25233_v27 }
 0xde6   : > { %v25015_v10 = vpop.f32.mrb[204].mxu0 }
 0xde7   : > { %v25254_v28 = vmax.f32 %v25247_v13, 0.0  ;;  %v25235_v1 = vadd.f32 %v25015_v10, %v24662_v26  ;;  %v34503_v61 = vpop.f32.mrb[205].mxu0 }
 0xde9   : > { %25284 = vst.msk [vmem:[#allocation3 + $0x21] sm:$0x7f] %vm25282_vm12, %v25254_v28  ;;  %v25249_v7 = vadd.f32 %v40050_v63, %v25235_v1 }
 0xdea   : > { %v25155_v53 = vpop.f32.mrb[206].mxu0 }
 0xdeb   : > { %v25256_v57 = vmax.f32 %v25249_v7, 0.0  ;;  %v25237_v22 = vadd.f32 %v25155_v53, %v24664_v44  ;;  %v34517_v5 = vpop.f32.mrb[207].mxu0 }
 0xdec   : > { %v25611_v5 = vld [vmem:[%s40628_s8 + $0x8] sm:$0xff] }
 0xded   : > { %25286 = vst.msk [vmem:[#allocation3 + $0x41] sm:$0x7f] %vm25282_vm12, %v25256_v57  ;;  %v25251_v55 = vadd.f32 %v40050_v63, %v25237_v22  ;;  %v25610_v22 = vld [vmem:[%s40628_s8] sm:$0xff] }
 0xdee   : > { %v40125_v54 = vpop.f32.mrb[208].mxu0 }
 0xdef   : > { %v25258_v35 = vmax.f32 %v25251_v55, 0.0  ;;  %v34531_v43 = vpop.f32.mrb[209].mxu0 }
 0xdf0   : > { %v25294_v62 = vld [vmem:[#allocation3 + $0x20] sm:$0xff] }
 0xdf1   : > { %25288 = vst.msk [vmem:[#allocation3 + $0x61] sm:$0x7f] %vm25282_vm12, %v25258_v35  ;;  %v40058_v36 = vpack.c.bf16 %v25295_v20, %v25294_v62  ;;  %v36205_v62 = vpack.c.bf16 %v25611_v5, %v25610_v22  ;;  %v30707_v22 = vld [vmem:[%s40628_s8 + $0x30] sm:$0xff]  ;;  %v30708_v5 = vld [vmem:[%s40628_s8 + $0x38] sm:$0xff] }
 0xdf3   : > { %36167 = vmatpush3.bf16.msk.msra.mxu1 %vm39966_vm10, %v40058_v36 }
 0xdf4   : > { %v25298_v25 = vld [vmem:[#allocation3 + $0x40] sm:$0xff]  ;;  %36172 = vmatprep.subr.bf16.mxu1 %v36721_v34 }
 0xdf5   : > { %v40064_v29 = vpack.c.bf16 %v25299_v19, %v25298_v25 }
 0xdf6   : > { %34537 = vmatmul.mubr.msk.f32.vlgmr.msra.gmra.mrb[210].mxu1 %vm25313_vm11, %v39976_v17 }
 0xdf7   : > { %36171 = vmatpush3.bf16.msk.msra.mxu0 %vm39966_vm10, %v40064_v29  ;;  %34550 = vmatprep.mubr.msk.f32.mxu1 %vm36722_vm7, %v36720_v14 }
 0xdf8   : > { %36176 = vmatprep.subr.bf16.mxu0 %v36721_v34  ;;  %v25302_v48 = vld [vmem:[#allocation3 + $0x60] sm:$0xff] }
 0xdf9   : > { %v40074_v32 = vpack.c.bf16 %v25303_v15, %v25302_v48 }
 0xdfa   : > { %34544 = vmatmul.mubr.msk.f32.vlgmr.msra.gmra.mrb[210].mxu0 %vm25313_vm11, %v39976_v17 }
 0xdfb   : > { %36175 = vmatpush3.bf16.msk.msra.mxu1 %vm39966_vm10, %v40074_v32  ;;  %36179 = vmatpush3.bf16.msk.msra.mxu0 %vm39966_vm10, %v39963_v21 }
 0xdfc   : > { %34557 = vmatprep.mubr.msk.f32.mxu0 %vm36722_vm7, %v36720_v14  ;;  %36180 = vmatprep.subr.bf16.mxu1 %v36721_v34 }
 0xdfd   : > { %36184 = vmatprep.subr.bf16.mxu0 %v36721_v34 }
 0xdfe   : > { %34551 = vmatmul.mubr.msk.f32.vlgmr.msra.gmra.mrb[212].mxu1 %vm25313_vm11, %v39976_v17  ;;  %34558 = vmatmul.mubr.msk.f32.vlgmr.msra.gmra.mrb[212].mxu0 %vm25313_vm11, %v40087_v6 }
 0xdff   : > { %36183 = vmatpush3.bf16.msk.msra.mxu1 %vm39966_vm10, %v40058_v36  ;;  %36187 = vmatpush3.bf16.msk.msra.mxu0 %vm39966_vm10, %v40064_v29 }
 0xe00   : > { %34564 = vmatprep.mubr.msk.f32.mxu1 %vm36722_vm7, %v36720_v14  ;;  %34571 = vmatprep.mubr.msk.f32.mxu0 %vm36722_vm7, %v36720_v14 }
 0xe01   : > { %36188 = vmatprep.subr.bf16.mxu1 %v36721_v34  ;;  %36192 = vmatprep.subr.bf16.mxu0 %v36721_v34 }
 0xe02   : > { %34565 = vmatmul.mubr.msk.f32.vlgmr.msra.gmra.mrb[214].mxu1 %vm25313_vm11, %v40087_v6  ;;  %34572 = vmatmul.mubr.msk.f32.vlgmr.msra.gmra.mrb[214].mxu0 %vm25313_vm11, %v40087_v6 }
 0xe03   : > { %36191 = vmatpush3.bf16.msk.msra.mxu1 %vm39966_vm10, %v40074_v32  ;;  %34578 = vmatprep.mubr.msk.f32.mxu1 %vm36722_vm7, %v36720_v14 }
 0xe04   : > { %34585 = vmatprep.mubr.msk.f32.mxu0 %vm36722_vm7, %v36720_v14  ;;  %36195 = vmatprep.subr.bf16.mxu1 %v36721_v34 }
 0xe05   : > { %36194 = vmatpush3.bf16.msra.mxu0 %v40133_v2 }
 0xe06   : > { %34579 = vmatmul.mubr.msk.f32.vlgmr.msra.gmra.mrb[216].mxu1 %vm25313_vm11, %v40087_v6  ;;  %36198 = vmatprep.subr.bf16.mxu0 %v36721_v34 }
 0xe07   : > { %34592 = vmatprep.mubr.msk.f32.mxu1 %vm36722_vm7, %v36720_v14  ;;  %36197 = vmatpush3.bf16.msra.mxu1 %v40133_v2 }
 0xe08   : > { %36201 = vmatprep.subr.bf16.mxu1 %v36721_v34 }
 0xe92   : > { %v24082_v4 = vpop.f32.mrb[192].mxu1 }
 0xe93   : > { %v24092_v12 = vadd.f32 %v24082_v4, %v39990_v33  ;;  %v34412_v24 = vpop.f32.mrb[193].mxu1 }
 0xe96   : > { %v24232_v37 = vpop.f32.mrb[194].mxu1 }
 0xe97   : > { %v24659_v56 = vadd.f32 %v24232_v37, %v39997_v38  ;;  %v34426_v49 = vpop.f32.mrb[195].mxu1 }
 0xe9a   : > { %v24372_v51 = vpop.f32.mrb[196].mxu1 }
 0xe9b   : > { %v24661_v30 = vadd.f32 %v24372_v51, %v40005_v31  ;;  %v34440_v23 = vpop.f32.mrb[197].mxu1 }
 0xe9e   : > { %v24512_v40 = vpop.f32.mrb[198].mxu1 }
 0xe9f   : > { %v24663_v42 = vadd.f32 %v24512_v40, %v40013_v50  ;;  %v34454_v60 = vpop.f32.mrb[199].mxu1 }
 0xea2   : > { %v24655_v41 = vpop.f32.mrb[200].mxu1 }
 0xea3   : > { %v24665_v47 = vadd.f32 %v24655_v41, %v24092_v12  ;;  %v34468_v11 = vpop.f32.mrb[201].mxu1 }
 0xea6   : > { %v24805_v16 = vpop.f32.mrb[202].mxu1 }
 0xea7   : > { %v25232_v18 = vadd.f32 %v24805_v16, %v24659_v56  ;;  %v34482_v26 = vpop.f32.mrb[203].mxu1 }
 0xea9   : > { %v25246_v33 = vadd.f32 %v40050_v63, %v25232_v18 }
 0xeaa   : > { %v24945_v0 = vpop.f32.mrb[204].mxu1 }
 0xeab   : > { %v25253_v58 = vmax.f32 %v25246_v33, 0.0  ;;  %v25234_v38 = vadd.f32 %v24945_v0, %v24661_v30  ;;  %v34496_v44 = vpop.f32.mrb[205].mxu1 }
 0xead   : > { %25283 = vst.msk [vmem:[#allocation3 + $0x11] sm:$0x7f] %vm25282_vm12, %v25253_v58  ;;  %v25248_v31 = vadd.f32 %v40050_v63, %v25234_v38  ;;  %v25293_v58 = vld [vmem:[#allocation3 + $0x18] sm:$0x3] }
 0xeae   : > { %v25085_v9 = vpop.f32.mrb[206].mxu1 }
 0xeaf   : > { %v25255_v8 = vmax.f32 %v25248_v31, 0.0  ;;  %v25236_v50 = vadd.f32 %v25085_v9, %v24663_v42  ;;  %v34510_v46 = vpop.f32.mrb[207].mxu1  ;;  %v25297_v9 = vld [vmem:[#allocation3 + $0x38] sm:$0x3] }
 0xeb1   : > { %25285 = vst.msk [vmem:[#allocation3 + $0x31] sm:$0x7f] %vm25282_vm12, %v25255_v8  ;;  %v25250_v45 = vadd.f32 %v40050_v63, %v25236_v50 }
 0xeb2   : > { %v25228_v27 = vpop.f32.mrb[208].mxu1 }
 0xeb3   : > { %v25257_v52 = vmax.f32 %v25250_v45, 0.0  ;;  %v25238_v13 = vadd.f32 %v25228_v27, %v24665_v47  ;;  %v34524_v10 = vpop.f32.mrb[209].mxu1  ;;  %v25301_v27 = vld [vmem:[#allocation3 + $0x58] sm:$0x3] }
 0xeb4   : > { %v25292_v0 = vld [vmem:[#allocation3 + $0x10] sm:$0xff] }
 0xeb5   : > { %25287 = vst.msk [vmem:[#allocation3 + $0x51] sm:$0x7f] %vm25282_vm12, %v25257_v52  ;;  %v25252_v28 = vadd.f32 %v40050_v63, %v25238_v13  ;;  %v40269_v31 = vpack.c.bf16 %v25293_v58, %v25292_v0 }
 0xeb7   : > { %v25259_v1 = vmax.f32 %v25252_v28, 0.0 }
 0xeb8   : > { %v25296_v46 = vld [vmem:[#allocation3 + $0x30] sm:$0xff] }
 0xeb9   : > { %25289 = vst.msk [vmem:[#allocation3 + $0x71] sm:$0x7f] %vm25282_vm12, %v25259_v1  ;;  %v40286_v13 = vpack.c.bf16 %v25297_v9, %v25296_v46  ;;  %v25305_v1 = vld [vmem:[#allocation3 + $0x78] sm:$0x3] }
 0xebc   : > { %v25300_v45 = vld [vmem:[#allocation3 + $0x50] sm:$0xff] }
 0xebd   : > { %v40288_v10 = vpack.c.bf16 %v25301_v27, %v25300_v45 }
 0xec0   : > { %v25304_v28 = vld [vmem:[#allocation3 + $0x70] sm:$0xff] }
 0xec9   : > { %v40151_v61 = vpop.f32.mrb[210].mxu1 }
 0xeca   : > { %v34538_v7 = vpop.f32.mrb[211].mxu1 }
 0xecd   : > { %v40153_v53 = vpop.f32.mrb[210].mxu0 }
 0xece   : > { %v34545_v57 = vpop.f32.mrb[211].mxu0 }
 0xecf   : > { %v40305_v57 = vpack.c.bf16 %v25305_v1, %v25304_v28 }
 0xed1   : > { %v25681_v55 = vpop.f32.mrb[212].mxu0  ;;  %v40161_v20 = vpop.f32.mrb[212].mxu1 }
 0xed2   : > { %v34559_v63 = vpop.f32.mrb[213].mxu0  ;;  %34586 = vmatmul.mubr.msk.f32.vlgmr.msra.gmra.mrb[216].mxu0 %vm17362_vm5, %v25681_v55  ;;  %v34552_v35 = vpop.f32.mrb[213].mxu1  ;;  %v36261_v55 = vpack.c.bf16 %v30708_v5, %v30707_v22 }
 0xed3   : > { %36200 = vmatpush3.bf16.msra.mxu0 %v40133_v2  ;;  %34599 = vmatprep.mubr.msk.f32.mxu0 %vm36722_vm7, %v36720_v14 }
 0xed4   : > { %36204 = vmatprep.subr.bf16.mxu0 %v36721_v34 }
 0xed5   : > { %v40168_v19 = vpop.f32.mrb[214].mxu1  ;;  %v40170_v25 = vpop.f32.mrb[214].mxu0 }
 0xed6   : > { %v34573_v15 = vpop.f32.mrb[215].mxu0  ;;  %34593 = vmatmul.mubr.msk.f32.vlgmr.msra.gmra.mrb[218].mxu1 %vm17362_vm5, %v40168_v19  ;;  %34600 = vmatmul.mubr.msk.f32.vlgmr.msra.gmra.mrb[218].mxu0 %vm17362_vm5, %v40170_v25  ;;  %v34566_v48 = vpop.f32.mrb[215].mxu1 }
 0xed7   : > { %36203 = vmatpush3.bf16.msra.mxu1 %v40133_v2  ;;  %36206 = vmatpush3.bf16.msra.mxu0 %v36205_v62 }
 0xed8   : > { %34606 = vmatprep.mubr.msk.f32.mxu1 %vm36722_vm7, %v36720_v14  ;;  %34613 = vmatprep.mubr.msk.f32.mxu0 %vm36722_vm7, %v36720_v14 }
 0xed9   : > { %v40181_v43 = vpop.f32.mrb[216].mxu1  ;;  %36207 = vmatprep.subr.bf16.mxu1 %v36721_v34  ;;  %36210 = vmatprep.subr.bf16.mxu0 %v36721_v34 }
 0xeda   : > { %34607 = vmatmul.mubr.msk.f32.vlgmr.msra.gmra.mrb[220].mxu1 %vm17362_vm5, %v40181_v43  ;;  %34614 = vmatmul.mubr.msk.f32.vlgmr.msra.gmra.mrb[220].mxu0 %vm17362_vm5, %v40125_v54  ;;  %v34580_v39 = vpop.f32.mrb[217].mxu1  ;;  %v40205_v54 = vld [vmem:[%s40623_s3 + $0x8] sm:$0xf] }
 0xedb   : > { %36209 = vmatpush3.bf16.msra.mxu1 %v36205_v62  ;;  %36212 = vmatpush3.bf16.msra.mxu0 %v36205_v62 }
 0xedc   : > { %34620 = vmatprep.mubr.msk.f32.mxu1 %vm36722_vm7, %v36720_v14  ;;  %34627 = vmatprep.mubr.msk.f32.mxu0 %vm36722_vm7, %v36720_v14 }
 0xedd   : > { %36213 = vmatprep.subr.bf16.mxu1 %v36721_v34  ;;  %36216 = vmatprep.subr.bf16.mxu0 %v36721_v34 }
 0xede   : > { %34621 = vmatmul.mubr.msk.f32.vlgmr.msra.gmra.mrb[222].mxu1 %vm17362_vm5, %v40151_v61  ;;  %34628 = vmatmul.mubr.msk.f32.vlgmr.msra.gmra.mrb[222].mxu0 %vm17362_vm5, %v40153_v53 }
 0xedf   : > { %36215 = vmatpush3.bf16.msra.mxu1 %v36205_v62  ;;  %36219 = vmatpush3.bf16.msk.msra.mxu0 %vm39966_vm10, %v39963_v21  ;;  %v30693_v21 = vld [vmem:[%s40628_s8 + $0x20] sm:$0xff] }
 0xee0   : > { %34634 = vmatprep.mubr.msk.f32.mxu1 %vm36722_vm7, %v36720_v14  ;;  %34641 = vmatprep.mubr.msk.f32.mxu0 %vm36722_vm7, %v36720_v14 }
 0xee1   : > { %36220 = vmatprep.subr.bf16.mxu1 %v36721_v34  ;;  %36224 = vmatprep.subr.bf16.mxu0 %v36721_v34 }
 0xee2   : > { %34635 = vmatmul.mubr.msk.f32.vlgmr.msra.gmra.mrb[224].mxu1 %vm17362_vm5, %v40161_v20  ;;  %34642 = vmatmul.mubr.msk.f32.vlgmr.msra.gmra.mrb[224].mxu0 %vm25313_vm11, %v40205_v54 }
 0xee3   : > { %36223 = vmatpush3.bf16.msk.msra.mxu1 %vm39966_vm10, %v40058_v36  ;;  %36227 = vmatpush3.bf16.msk.msra.mxu0 %vm39966_vm10, %v40064_v29  ;;  %v30694_v36 = vld [vmem:[%s40628_s8 + $0x28] sm:$0xff] }
 0xee4   : > { %34648 = vmatprep.mubr.msk.f32.mxu1 %vm36722_vm7, %v36720_v14  ;;  %34655 = vmatprep.mubr.msk.f32.mxu0 %vm36722_vm7, %v36720_v14  ;;  %v36233_v29 = vpack.c.bf16 %v30694_v36, %v30693_v21 }
 0xee5   : > { %36228 = vmatprep.subr.bf16.mxu1 %v36721_v34  ;;  %36232 = vmatprep.subr.bf16.mxu0 %v36721_v34 }
 0xee6   : > { %34649 = vmatmul.mubr.msk.f32.vlgmr.msra.gmra.mrb[226].mxu1 %vm25313_vm11, %v40205_v54  ;;  %34656 = vmatmul.mubr.msk.f32.vlgmr.msra.gmra.mrb[226].mxu0 %vm25313_vm11, %v40205_v54 }
 0xee7   : > { %36231 = vmatpush3.bf16.msk.msra.mxu1 %vm39966_vm10, %v40074_v32  ;;  %34662 = vmatprep.mubr.msk.f32.mxu1 %vm36722_vm7, %v36720_v14 }
 0xee8   : > { %34669 = vmatprep.mubr.msk.f32.mxu0 %vm36722_vm7, %v36720_v14  ;;  %36235 = vmatprep.subr.bf16.mxu1 %v36721_v34 }
 0xee9   : > { %36234 = vmatpush3.bf16.msra.mxu0 %v36233_v29 }
 0xeea   : > { %34663 = vmatmul.mubr.msk.f32.vlgmr.msra.gmra.mrb[228].mxu1 %vm25313_vm11, %v40205_v54  ;;  %36238 = vmatprep.subr.bf16.mxu0 %v36721_v34 }
 0xeeb   : > { %34676 = vmatprep.mubr.msk.f32.mxu1 %vm36722_vm7, %v36720_v14  ;;  %36237 = vmatpush3.bf16.msra.mxu1 %v36233_v29 }
 0xeec   : > { %36241 = vmatprep.subr.bf16.mxu1 %v36721_v34 }
 0xfa5   : > { %v25967_v32 = vpop.f32.mrb[216].mxu0 }
 0xfa6   : > { %v34587_v3 = vpop.f32.mrb[217].mxu0 }
 0xfa9   : > { %v26113_v2 = vpop.f32.mrb[218].mxu0  ;;  %v26040_v4 = vpop.f32.mrb[218].mxu1 }
 0xfaa   : > { %v34601_v12 = vpop.f32.mrb[219].mxu0  ;;  %v34594_v24 = vpop.f32.mrb[219].mxu1 }
 0xfad   : > { %v26259_v37 = vpop.f32.mrb[220].mxu0  ;;  %v26186_v56 = vpop.f32.mrb[220].mxu1 }
 0xfae   : > { %v40253_v49 = vadd.f32 %v26259_v37, %v25967_v32  ;;  %v34615_v51 = vpop.f32.mrb[221].mxu0  ;;  %v34608_v30 = vpop.f32.mrb[221].mxu1 }
 0xfb1   : > { %v26405_v23 = vpop.f32.mrb[222].mxu0  ;;  %v26332_v40 = vpop.f32.mrb[222].mxu1 }
 0xfb2   : > { %v40255_v42 = vadd.f32 %v26405_v23, %v26113_v2  ;;  %v34629_v60 = vpop.f32.mrb[223].mxu0  ;;  %v40257_v41 = vadd.f32 %v26332_v40, %v26040_v4  ;;  %v34622_v47 = vpop.f32.mrb[223].mxu1  ;;  %v30721_v23 = vld [vmem:[%s40628_s8 + $0x40] sm:$0xff]  ;;  %v30722_v40 = vld [vmem:[%s40628_s8 + $0x48] sm:$0xff] }
 0xfb5   : > { %v26551_v11 = vpop.f32.mrb[224].mxu0  ;;  %v26478_v16 = vpop.f32.mrb[224].mxu1 }
 0xfb6   : > { %v34643_v18 = vpop.f32.mrb[225].mxu0  ;;  %34670 = vmatmul.mubr.msk.f32.vlgmr.msra.gmra.mrb[228].mxu0 %vm17362_vm5, %v26551_v11  ;;  %v40260_v26 = vadd.f32 %v26478_v16, %v26186_v56  ;;  %v34636_v33 = vpop.f32.mrb[225].mxu1 }
 0xfb7   : > { %36240 = vmatpush3.bf16.msra.mxu0 %v36233_v29  ;;  %34683 = vmatprep.mubr.msk.f32.mxu0 %vm36722_vm7, %v36720_v14 }
 0xfb8   : > { %36244 = vmatprep.subr.bf16.mxu0 %v36721_v34 }
 0xfb9   : > { %v40265_v38 = vpop.f32.mrb[226].mxu1  ;;  %v40267_v44 = vpop.f32.mrb[226].mxu0 }
 0xfba   : > { %v34657_v8 = vpop.f32.mrb[227].mxu0  ;;  %34677 = vmatmul.mubr.msk.f32.vlgmr.msra.gmra.mrb[230].mxu1 %vm17362_vm5, %v40265_v38  ;;  %34684 = vmatmul.mubr.msk.f32.vlgmr.msra.gmra.mrb[230].mxu0 %vm17362_vm5, %v40267_v44  ;;  %v34650_v50 = vpop.f32.mrb[227].mxu1 }
 0xfbb   : > { %36243 = vmatpush3.bf16.msra.mxu1 %v36233_v29  ;;  %36247 = vmatpush3.bf16.msk.msra.mxu0 %vm39966_vm10, %v40269_v31 }
 0xfbc   : > { %34690 = vmatprep.mubr.msk.f32.mxu1 %vm36722_vm7, %v36720_v14  ;;  %34697 = vmatprep.mubr.msk.f32.mxu0 %vm36722_vm7, %v36720_v14 }
 0xfbd   : > { %v40282_v52 = vpop.f32.mrb[228].mxu1  ;;  %36248 = vmatprep.subr.bf16.mxu1 %v36721_v34  ;;  %36252 = vmatprep.subr.bf16.mxu0 %v36721_v34 }
 0xfbe   : > { %34691 = vmatmul.mubr.msk.f32.vlgmr.msra.gmra.mrb[232].mxu1 %vm17362_vm5, %v40282_v52  ;;  %34698 = vmatmul.mubr.msk.f32.vlgmr.msra.gmra.mrb[232].mxu0 %vm25313_vm11, %v39976_v17  ;;  %v34664_v7 = vpop.f32.mrb[229].mxu1 }
 0xfbf   : > { %36251 = vmatpush3.bf16.msk.msra.mxu1 %vm39966_vm10, %v40286_v13  ;;  %36255 = vmatpush3.bf16.msk.msra.mxu0 %vm39966_vm10, %v40288_v10 }
 0xfc0   : > { %34704 = vmatprep.mubr.msk.f32.mxu1 %vm36722_vm7, %v36720_v14  ;;  %34711 = vmatprep.mubr.msk.f32.mxu0 %vm36722_vm7, %v36720_v14 }
 0xfc1   : > { %36256 = vmatprep.subr.bf16.mxu1 %v36721_v34  ;;  %36260 = vmatprep.subr.bf16.mxu0 %v36721_v34 }
 0xfc2   : > { %34705 = vmatmul.mubr.msk.f32.vlgmr.msra.gmra.mrb[234].mxu1 %vm25313_vm11, %v39976_v17  ;;  %34712 = vmatmul.mubr.msk.f32.vlgmr.msra.gmra.mrb[234].mxu0 %vm25313_vm11, %v39976_v17 }
 0xfc3   : > { %36259 = vmatpush3.bf16.msk.msra.mxu1 %vm39966_vm10, %v40305_v57  ;;  %34718 = vmatprep.mubr.msk.f32.mxu1 %vm36722_vm7, %v36720_v14 }
 0xfc4   : > { %34725 = vmatprep.mubr.msk.f32.mxu0 %vm36722_vm7, %v36720_v14  ;;  %36263 = vmatprep.subr.bf16.mxu1 %v36721_v34 }
 0xfc5   : > { %36262 = vmatpush3.bf16.msra.mxu0 %v36261_v55 }
 0xfc6   : > { %34719 = vmatmul.mubr.msk.f32.vlgmr.msra.gmra.mrb[236].mxu1 %vm25313_vm11, %v39976_v17  ;;  %36266 = vmatprep.subr.bf16.mxu0 %v36721_v34 }
 0xfc7   : > { %34732 = vmatprep.mubr.msk.f32.mxu1 %vm36722_vm7, %v36720_v14  ;;  %36265 = vmatpush3.bf16.msra.mxu1 %v36261_v55 }
 0xfc8   : > { %36269 = vmatprep.subr.bf16.mxu1 %v36721_v34 }
0x1089   : > { %v26837_v63 = vpop.f32.mrb[228].mxu0 }
0x108a   : > { %v27060_v35 = vadd.f32 %v26837_v63, %v40253_v49  ;;  %v34671_v62 = vpop.f32.mrb[229].mxu0 }
0x108d   : > { %v26910_v15 = vpop.f32.mrb[230].mxu1  ;;  %v26983_v48 = vpop.f32.mrb[230].mxu0 }
0x108e   : > { %v27061_v39 = vadd.f32 %v26910_v15, %v40257_v41  ;;  %v27062_v21 = vadd.f32 %v26983_v48, %v40255_v42  ;;  %v34685_v36 = vpop.f32.mrb[231].mxu0  ;;  %v34678_v29 = vpop.f32.mrb[231].mxu1  ;;  %v36289_v42 = vpack.c.bf16 %v30722_v40, %v30721_v23 }
0x108f   : > { %v25307_v36 = vld [vmem:[#allocation3 + $0x88] sm:$0x3] }
0x1091   : > { %v27056_v32 = vpop.f32.mrb[232].mxu1  ;;  %v27133_v3 = vpop.f32.mrb[232].mxu0 }
0x1092   : > { %v27063_v2 = vadd.f32 %v27056_v32, %v40260_v26  ;;  %v34699_v4 = vpop.f32.mrb[233].mxu0  ;;  %34726 = vmatmul.mubr.msk.f32.vlgmr.msra.gmra.mrb[236].mxu0 %vm17362_vm5, %v27133_v3  ;;  %v34692_v12 = vpop.f32.mrb[233].mxu1 }
0x1093   : > { %36268 = vmatpush3.bf16.msra.mxu0 %v36261_v55  ;;  %34739 = vmatprep.mubr.msk.f32.mxu0 %vm36722_vm7, %v36720_v14 }
0x1094   : > { %36272 = vmatprep.subr.bf16.mxu0 %v36721_v34 }
0x1095   : > { %v27206_v24 = vpop.f32.mrb[234].mxu1  ;;  %v27279_v37 = vpop.f32.mrb[234].mxu0 }
0x1096   : > { %v34713_v56 = vpop.f32.mrb[235].mxu0  ;;  %34733 = vmatmul.mubr.msk.f32.vlgmr.msra.gmra.mrb[238].mxu1 %vm17362_vm5, %v27206_v24  ;;  %34740 = vmatmul.mubr.msk.f32.vlgmr.msra.gmra.mrb[238].mxu0 %vm17362_vm5, %v27279_v37  ;;  %v34706_v49 = vpop.f32.mrb[235].mxu1  ;;  %v30743_v24 = vld [vmem:[%s40628_s8 + $0x60] sm:$0xff]  ;;  %v30744_v37 = vld [vmem:[%s40628_s8 + $0x68] sm:$0xff] }
0x1097   : > { %36271 = vmatpush3.bf16.msra.mxu1 %v36261_v55  ;;  %36275 = vmatpush3.bf16.msk.msra.mxu0 %vm39966_vm10, %v40269_v31  ;;  %v36333_v23 = vpack.c.bf16 %v30744_v37, %v30743_v24 }
0x1098   : > { %34746 = vmatprep.mubr.msk.f32.mxu1 %vm36722_vm7, %v36720_v14  ;;  %34753 = vmatprep.mubr.msk.f32.mxu0 %vm36722_vm7, %v36720_v14 }
0x1099   : > { %v27352_v51 = vpop.f32.mrb[236].mxu1  ;;  %36276 = vmatprep.subr.bf16.mxu1 %v36721_v34  ;;  %36280 = vmatprep.subr.bf16.mxu0 %v36721_v34 }
0x109a   : > { %34747 = vmatmul.mubr.msk.f32.vlgmr.msra.gmra.mrb[240].mxu1 %vm17362_vm5, %v27352_v51  ;;  %34754 = vmatmul.mubr.msk.f32.vlgmr.msra.gmra.mrb[240].mxu0 %vm25313_vm11, %v40087_v6  ;;  %v34720_v30 = vpop.f32.mrb[237].mxu1 }
0x109b   : > { %36279 = vmatpush3.bf16.msk.msra.mxu1 %vm39966_vm10, %v40286_v13  ;;  %36283 = vmatpush3.bf16.msk.msra.mxu0 %vm39966_vm10, %v40288_v10 }
0x109c   : > { %34760 = vmatprep.mubr.msk.f32.mxu1 %vm36722_vm7, %v36720_v14  ;;  %34767 = vmatprep.mubr.msk.f32.mxu0 %vm36722_vm7, %v36720_v14 }
0x109d   : > { %36284 = vmatprep.subr.bf16.mxu1 %v36721_v34  ;;  %36288 = vmatprep.subr.bf16.mxu0 %v36721_v34 }
0x109e   : > { %34761 = vmatmul.mubr.msk.f32.vlgmr.msra.gmra.mrb[242].mxu1 %vm25313_vm11, %v40087_v6  ;;  %34768 = vmatmul.mubr.msk.f32.vlgmr.msra.gmra.mrb[242].mxu0 %vm25313_vm11, %v40087_v6 }
0x109f   : > { %36287 = vmatpush3.bf16.msk.msra.mxu1 %vm39966_vm10, %v40305_v57  ;;  %34774 = vmatprep.mubr.msk.f32.mxu1 %vm36722_vm7, %v36720_v14 }
0x10a0   : > { %34781 = vmatprep.mubr.msk.f32.mxu0 %vm36722_vm7, %v36720_v14  ;;  %36291 = vmatprep.subr.bf16.mxu1 %v36721_v34 }
0x10a1   : > { %36290 = vmatpush3.bf16.msra.mxu0 %v36289_v42 }
0x10a2   : > { %34775 = vmatmul.mubr.msk.f32.vlgmr.msra.gmra.mrb[244].mxu1 %vm25313_vm11, %v40087_v6  ;;  %36294 = vmatprep.subr.bf16.mxu0 %v36721_v34 }
0x10a3   : > { %34788 = vmatprep.mubr.msk.f32.mxu1 %vm36722_vm7, %v36720_v14  ;;  %36293 = vmatpush3.bf16.msra.mxu1 %v36289_v42 }
0x10a4   : > { %36297 = vmatprep.subr.bf16.mxu1 %v36721_v34 }
0x1165   : > { %v27428_v60 = vpop.f32.mrb[236].mxu0 }
0x1166   : > { %v27651_v41 = vadd.f32 %v27428_v60, %v27060_v35  ;;  %v34727_v47 = vpop.f32.mrb[237].mxu0  ;;  %v30752_v60 = vld [vmem:[%s40628_s8 + $0x78] sm:$0xff] }
0x1169   : > { %v27501_v11 = vpop.f32.mrb[238].mxu1  ;;  %v27574_v16 = vpop.f32.mrb[238].mxu0 }
0x116a   : > { %v27652_v18 = vadd.f32 %v27501_v11, %v27061_v39  ;;  %v27653_v26 = vadd.f32 %v27574_v16, %v27062_v21  ;;  %v34741_v33 = vpop.f32.mrb[239].mxu0  ;;  %v34734_v0 = vpop.f32.mrb[239].mxu1  ;;  %v25306_v21 = vld [vmem:[#allocation3 + $0x80] sm:$0xff] }
0x116b   : > { %v40455_v12 = vpack.c.bf16 %v25307_v36, %v25306_v21 }
0x116d   : > { %v27647_v58 = vpop.f32.mrb[240].mxu1  ;;  %v27721_v9 = vpop.f32.mrb[240].mxu0 }
0x116e   : > { %v27654_v8 = vadd.f32 %v27647_v58, %v27063_v2  ;;  %v34755_v50 = vpop.f32.mrb[241].mxu0  ;;  %34782 = vmatmul.mubr.msk.f32.vlgmr.msra.gmra.mrb[244].mxu0 %vm17362_vm5, %v27721_v9  ;;  %v34748_v46 = vpop.f32.mrb[241].mxu1 }
0x116f   : > { %36296 = vmatpush3.bf16.msra.mxu0 %v36289_v42  ;;  %34795 = vmatprep.mubr.msk.f32.mxu0 %vm36722_vm7, %v36720_v14 }
0x1170   : > { %36300 = vmatprep.subr.bf16.mxu0 %v36721_v34 }
0x1171   : > { %v27791_v45 = vpop.f32.mrb[242].mxu1  ;;  %v27861_v27 = vpop.f32.mrb[242].mxu0 }
0x1172   : > { %v34769_v28 = vpop.f32.mrb[243].mxu0  ;;  %34789 = vmatmul.mubr.msk.f32.vlgmr.msra.gmra.mrb[246].mxu1 %vm17362_vm5, %v27791_v45  ;;  %34796 = vmatmul.mubr.msk.f32.vlgmr.msra.gmra.mrb[246].mxu0 %vm17362_vm5, %v27861_v27  ;;  %v34762_v1 = vpop.f32.mrb[243].mxu1 }
0x1173   : > { %36299 = vmatpush3.bf16.msra.mxu1 %v36289_v42  ;;  %36303 = vmatpush3.bf16.msk.msra.mxu0 %vm39966_vm10, %v40269_v31  ;;  %v30735_v31 = vld [vmem:[%s40628_s8 + $0x50] sm:$0xff]  ;;  %v30759_v1 = vld [vmem:[%s40628_s8 + $0x80] sm:$0xff] }
0x1174   : > { %34802 = vmatprep.mubr.msk.f32.mxu1 %vm36722_vm7, %v36720_v14  ;;  %34809 = vmatprep.mubr.msk.f32.mxu0 %vm36722_vm7, %v36720_v14 }
0x1175   : > { %v27931_v7 = vpop.f32.mrb[244].mxu1  ;;  %36304 = vmatprep.subr.bf16.mxu1 %v36721_v34  ;;  %36308 = vmatprep.subr.bf16.mxu0 %v36721_v34 }
0x1176   : > { %34803 = vmatmul.mubr.msk.f32.vlgmr.msra.gmra.mrb[248].mxu1 %vm17362_vm5, %v27931_v7  ;;  %34810 = vmatmul.mubr.msk.f32.vlgmr.msra.gmra.mrb[248].mxu0 %vm25313_vm11, %v40205_v54  ;;  %v34776_v22 = vpop.f32.mrb[245].mxu1  ;;  %v30760_v7 = vld [vmem:[%s40628_s8 + $0x88] sm:$0xff] }
0x1177   : > { %36307 = vmatpush3.bf16.msk.msra.mxu1 %vm39966_vm10, %v40286_v13  ;;  %36311 = vmatpush3.bf16.msk.msra.mxu0 %vm39966_vm10, %v40288_v10  ;;  %v30736_v13 = vld [vmem:[%s40628_s8 + $0x58] sm:$0xff] }
0x1178   : > { %34816 = vmatprep.mubr.msk.f32.mxu1 %vm36722_vm7, %v36720_v14  ;;  %34823 = vmatprep.mubr.msk.f32.mxu0 %vm36722_vm7, %v36720_v14  ;;  %v36317_v10 = vpack.c.bf16 %v30736_v13, %v30735_v31 }
0x1179   : > { %36312 = vmatprep.subr.bf16.mxu1 %v36721_v34  ;;  %36316 = vmatprep.subr.bf16.mxu0 %v36721_v34 }
0x117a   : > { %34817 = vmatmul.mubr.msk.f32.vlgmr.msra.gmra.mrb[250].mxu1 %vm25313_vm11, %v40205_v54  ;;  %34824 = vmatmul.mubr.msk.f32.vlgmr.msra.gmra.mrb[250].mxu0 %vm25313_vm11, %v40205_v54 }
0x117b   : > { %36315 = vmatpush3.bf16.msk.msra.mxu1 %vm39966_vm10, %v40305_v57  ;;  %34830 = vmatprep.mubr.msk.f32.mxu1 %vm36722_vm7, %v36720_v14 }
0x117c   : > { %34837 = vmatprep.mubr.msk.f32.mxu0 %vm36722_vm7, %v36720_v14  ;;  %36319 = vmatprep.subr.bf16.mxu1 %v36721_v34 }
0x117d   : > { %36318 = vmatpush3.bf16.msra.mxu0 %v36317_v10 }
0x117e   : > { %34831 = vmatmul.mubr.msk.f32.vlgmr.msra.gmra.mrb[252].mxu1 %vm25313_vm11, %v40205_v54  ;;  %36322 = vmatprep.subr.bf16.mxu0 %v36721_v34 }
0x117f   : > { %34844 = vmatprep.mubr.msk.f32.mxu1 %vm36722_vm7, %v36720_v14  ;;  %36321 = vmatpush3.bf16.msra.mxu1 %v36317_v10 }
0x1180   : > { %36325 = vmatprep.subr.bf16.mxu1 %v36721_v34 }
0x1241   : > { %v28007_v57 = vpop.f32.mrb[244].mxu0 }
0x1242   : > { %v40444_v5 = vadd.f32 %v28007_v57, %v27651_v41  ;;  %v34783_v55 = vpop.f32.mrb[245].mxu0 }
0x1245   : > { %v28080_v63 = vpop.f32.mrb[246].mxu1  ;;  %v28153_v35 = vpop.f32.mrb[246].mxu0 }
0x1246   : > { %v40446_v62 = vadd.f32 %v28080_v63, %v27652_v18  ;;  %v40448_v15 = vadd.f32 %v28153_v35, %v27653_v26  ;;  %v34797_v48 = vpop.f32.mrb[247].mxu0  ;;  %v34790_v39 = vpop.f32.mrb[247].mxu1 }
0x1249   : > { %v28226_v29 = vpop.f32.mrb[248].mxu1  ;;  %v28300_v32 = vpop.f32.mrb[248].mxu0 }
0x124a   : > { %v40450_v3 = vadd.f32 %v28226_v29, %v27654_v8  ;;  %v34811_v2 = vpop.f32.mrb[249].mxu0  ;;  %34838 = vmatmul.mubr.msk.f32.vlgmr.msra.gmra.mrb[252].mxu0 %vm17362_vm5, %v28300_v32  ;;  %v34804_v4 = vpop.f32.mrb[249].mxu1 }
0x124b   : > { %36324 = vmatpush3.bf16.msra.mxu0 %v36317_v10  ;;  %34851 = vmatprep.mubr.msk.f32.mxu0 %vm36722_vm7, %v36720_v14 }
0x124c   : > { %36328 = vmatprep.subr.bf16.mxu0 %v36721_v34 }
0x124d   : > { %v28370_v56 = vpop.f32.mrb[250].mxu1  ;;  %v28440_v49 = vpop.f32.mrb[250].mxu0 }
0x124e   : > { %v34825_v51 = vpop.f32.mrb[251].mxu0  ;;  %34845 = vmatmul.mubr.msk.f32.vlgmr.msra.gmra.mrb[254].mxu1 %vm17362_vm5, %v28370_v56  ;;  %34852 = vmatmul.mubr.msk.f32.vlgmr.msra.gmra.mrb[254].mxu0 %vm17362_vm5, %v28440_v49  ;;  %v34818_v30 = vpop.f32.mrb[251].mxu1 }
0x124f   : > { %36327 = vmatpush3.bf16.msra.mxu1 %v36317_v10  ;;  %36331 = vmatpush3.bf16.msk.msra.mxu0 %vm39966_vm10, %v40455_v12 }
0x1250   : > { %34858 = vmatprep.mubr.msk.f32.mxu1 %vm36722_vm7, %v36720_v14  ;;  %34865 = vmatprep.mubr.msk.f32.mxu0 %vm36722_vm7, %v36720_v14 }
0x1251   : > { %v28510_v40 = vpop.f32.mrb[252].mxu1  ;;  %36332 = vmatprep.subr.bf16.mxu1 %v36721_v34  ;;  %36335 = vmatprep.subr.bf16.mxu0 %v36721_v34 }
0x1252   : > { %34859 = vmatmul.mubr.msk.f32.vlgmr.msra.gmra.mrb[0].mxu1 %vm17362_vm5, %v28510_v40  ;;  %34866 = vmatmul.mubr.msk.f32.vlgmr.msra.gmra.mrb[0].mxu0 %vm25313_vm11, %v39976_v17  ;;  %v34832_v42 = vpop.f32.mrb[253].mxu1  ;;  %v30751_v17 = vld [vmem:[%s40628_s8 + $0x70] sm:$0xff] }
0x1253   : > { %36334 = vmatpush3.bf16.msra.mxu1 %v36333_v23  ;;  %36337 = vmatpush3.bf16.msra.mxu0 %v36333_v23 }
0x1254   : > { %34872 = vmatprep.mubr.msk.f32.mxu1 %vm36722_vm7, %v36720_v14  ;;  %34879 = vmatprep.mubr.msk.f32.mxu0 %vm36722_vm7, %v36720_v14 }
0x1255   : > { %36338 = vmatprep.subr.bf16.mxu1 %v36721_v34  ;;  %36341 = vmatprep.subr.bf16.mxu0 %v36721_v34 }
0x1256   : > { %34873 = vmatmul.mubr.msk.f32.vlgmr.msra.gmra.mrb[2].mxu1 %vm17362_vm5, %v40151_v61  ;;  %34880 = vmatmul.mubr.msk.f32.vlgmr.msra.gmra.mrb[2].mxu0 %vm17362_vm5, %v40153_v53  ;;  %v36349_v61 = vpack.c.bf16 %v30752_v60, %v30751_v17 }
0x1257   : > { %36340 = vmatpush3.bf16.msra.mxu1 %v36333_v23  ;;  %34886 = vmatprep.mubr.msk.f32.mxu1 %vm36722_vm7, %v36720_v14 }
0x1258   : > { %36344 = vmatprep.subr.bf16.mxu1 %v36721_v34  ;;  %36343 = vmatpush3.bf16.msra.mxu0 %v36333_v23 }
0x1259   : > { %34893 = vmatprep.mubr.msk.f32.mxu0 %vm36722_vm7, %v36720_v14  ;;  %36348 = vmatprep.subr.bf16.mxu0 %v36721_v34 }
0x125a   : > { %34887 = vmatmul.mubr.msk.f32.vlgmr.msra.gmra.mrb[4].mxu1 %vm17362_vm5, %v40161_v20 }
0x125b   : > { %36347 = vmatpush3.bf16.msk.msra.mxu1 %vm39966_vm10, %v40455_v12  ;;  %34900 = vmatprep.mubr.msk.f32.mxu1 %vm36722_vm7, %v36720_v14 }
0x125c   : > { %36351 = vmatprep.subr.bf16.mxu1 %v36721_v34 }
0x125e   : > { %34901 = vmatmul.mubr.msk.f32.vlgmr.msra.gmra.mrb[6].mxu1 %vm25313_vm11, %v40087_v6 }
0x125f   : > { %36353 = vmatpush3.bf16.msra.mxu1 %v36349_v61  ;;  %34914 = vmatprep.mubr.msk.f32.mxu1 %vm36722_vm7, %v36720_v14 }
0x1260   : > { %36357 = vmatprep.subr.bf16.mxu1 %v36721_v34 }
0x1262   : > { %34915 = vmatmul.mubr.msk.f32.vlgmr.msra.gmra.mrb[8].mxu1 %vm17362_vm5, %v40170_v25 }
0x1263   : > { %36359 = vmatpush3.bf16.msra.mxu1 %v36349_v61  ;;  %34928 = vmatprep.mubr.msk.f32.mxu1 %vm36722_vm7, %v36720_v14 }
0x1264   : > { %36364 = vmatprep.subr.bf16.mxu1 %v36721_v34 }
0x131d   : > { %v28586_v53 = vpop.f32.mrb[252].mxu0 }
0x131e   : > { %v28809_v20 = vadd.f32 %v28586_v53, %v40444_v5  ;;  %v34839_v41 = vpop.f32.mrb[253].mxu0 }
0x1321   : > { %v28659_v6 = vpop.f32.mrb[254].mxu1  ;;  %v28732_v47 = vpop.f32.mrb[254].mxu0 }
0x1322   : > { %v28810_v11 = vadd.f32 %v28659_v6, %v40446_v62  ;;  %v28811_v16 = vadd.f32 %v28732_v47, %v40448_v15  ;;  %v34853_v18 = vpop.f32.mrb[255].mxu0  ;;  %v34846_v26 = vpop.f32.mrb[255].mxu1 }
0x1325   : > { %v28805_v33 = vpop.f32.mrb[0].mxu1  ;;  %v28882_v25 = vpop.f32.mrb[0].mxu0 }
0x1326   : > { %v28812_v0 = vadd.f32 %v28805_v33, %v40450_v3  ;;  %v34867_v58 = vpop.f32.mrb[1].mxu0  ;;  %34894 = vmatmul.mubr.msk.f32.vlgmr.msra.gmra.mrb[4].mxu0 %vm17362_vm5, %v28882_v25  ;;  %v34860_v9 = vpop.f32.mrb[1].mxu1 }
0x1327   : > { %36350 = vmatpush3.bf16.msra.mxu0 %v36349_v61  ;;  %34907 = vmatprep.mubr.msk.f32.mxu0 %vm36722_vm7, %v36720_v14 }
0x1328   : > { %36354 = vmatprep.subr.bf16.mxu0 %v36721_v34 }
0x1329   : > { %v28955_v8 = vpop.f32.mrb[2].mxu1  ;;  %v29025_v50 = vpop.f32.mrb[2].mxu0 }
0x132a   : > { %v29172_v46 = vadd.f32 %v28955_v8, %v28809_v20  ;;  %v29173_v45 = vadd.f32 %v29025_v50, %v28810_v11  ;;  %v34874_v27 = vpop.f32.mrb[3].mxu1  ;;  %v34881_v28 = vpop.f32.mrb[3].mxu0  ;;  %34908 = vmatmul.mubr.msk.f32.vlgmr.msra.gmra.mrb[6].mxu0 %vm17362_vm5, %v40168_v19  ;;  %v36365_v19 = vpack.c.bf16 %v30760_v7, %v30759_v1 }
0x132b   : > { %36356 = vmatpush3.bf16.msra.mxu0 %v36349_v61  ;;  %34921 = vmatprep.mubr.msk.f32.mxu0 %vm36722_vm7, %v36720_v14 }
0x132c   : > { %36360 = vmatprep.subr.bf16.mxu0 %v36721_v34 }
0x132d   : > { %v29095_v22 = vpop.f32.mrb[4].mxu1 }
0x132e   : > { %v29174_v31 = vadd.f32 %v29095_v22, %v28811_v16  ;;  %v34888_v13 = vpop.f32.mrb[5].mxu1  ;;  %34922 = vmatmul.mubr.msk.f32.vlgmr.msra.gmra.mrb[8].mxu0 %vm17362_vm5, %v40181_v43 }
0x132f   : > { %36363 = vmatpush3.bf16.msk.msra.mxu0 %vm39966_vm10, %v40455_v12  ;;  %34935 = vmatprep.mubr.msk.f32.mxu0 %vm36722_vm7, %v36720_v14 }
0x1330   : > { %36367 = vmatprep.subr.bf16.mxu0 %v36721_v34 }
0x1331   : > { %v29242_v10 = vpop.f32.mrb[6].mxu1 }
0x1332   : > { %34929 = vmatmul.mubr.msk.f32.vlgmr.msra.gmra.mrb[10].mxu1 %vm17362_vm5, %v29242_v10  ;;  %34936 = vmatmul.mubr.msk.f32.vlgmr.msra.gmra.mrb[10].mxu0 %vm25313_vm11, %v40205_v54  ;;  %v34902_v57 = vpop.f32.mrb[7].mxu1 }
0x1333   : > { %36366 = vmatpush3.bf16.msra.mxu1 %v36365_v19  ;;  %36369 = vmatpush3.bf16.msra.mxu0 %v36365_v19 }
0x1334   : > { %34942 = vmatprep.mubr.msk.f32.mxu1 %vm36722_vm7, %v36720_v14  ;;  %34949 = vmatprep.mubr.msk.f32.mxu0 %vm36722_vm7, %v36720_v14 }
0x1335   : > { %v29385_v59 = vpop.f32.mrb[8].mxu1  ;;  %36370 = vmatprep.subr.bf16.mxu1 %v36721_v34  ;;  %36373 = vmatprep.subr.bf16.mxu0 %v36721_v34 }
0x1336   : > { %v29533_v43 = vadd.f32 %v29385_v59, %v29173_v45  ;;  %v34916_v5 = vpop.f32.mrb[9].mxu1  ;;  %34943 = vmatmul.mubr.msk.f32.vlgmr.msra.gmra.mrb[12].mxu1 %vm17362_vm5, %v40265_v38  ;;  %34950 = vmatmul.mubr.msk.f32.vlgmr.msra.gmra.mrb[12].mxu0 %vm17362_vm5, %v40267_v44 }
0x1337   : > { %36372 = vmatpush3.bf16.msra.mxu1 %v36365_v19  ;;  %34956 = vmatprep.mubr.msk.f32.mxu1 %vm36722_vm7, %v36720_v14 }
0x1338   : > { %36375 = vmatpush3.bf16.msra.mxu0 %v36365_v19  ;;  %34963 = vmatprep.mubr.msk.f32.mxu0 %vm36722_vm7, %v36720_v14 }
0x133a   : > { %34957 = vmatmul.mubr.msk.f32.vlgmr.msra.gmra.mrb[14].mxu1 %vm17362_vm5, %v40282_v52  ;;  %v30765_v52 = vld [vmem:[%s40629_s9] ss:$0 sm:$0xff] }
0x13f9   : > { %v29168_v34 = vpop.f32.mrb[4].mxu0 }
0x13fa   : > { %v29175_v54 = vadd.f32 %v29168_v34, %v28812_v0  ;;  %v34895_v55 = vpop.f32.mrb[5].mxu0 }
0x13fd   : > { %v29315_v63 = vpop.f32.mrb[6].mxu0 }
0x13fe   : > { %v29532_v35 = vadd.f32 %v29315_v63, %v29172_v46  ;;  %v34909_v38 = vpop.f32.mrb[7].mxu0 }
0x1401   : > { %v29455_v62 = vpop.f32.mrb[8].mxu0 }
0x1402   : > { %v29534_v15 = vadd.f32 %v29455_v62, %v29174_v31  ;;  %v34923_v44 = vpop.f32.mrb[9].mxu0 }
0x1405   : > { %v29528_v48 = vpop.f32.mrb[10].mxu1  ;;  %v29602_v39 = vpop.f32.mrb[10].mxu0 }
0x1406   : > { %v29535_v21 = vadd.f32 %v29528_v48, %v29175_v54  ;;  %v34937_v36 = vpop.f32.mrb[11].mxu0  ;;  %34964 = vmatmul.mubr.msk.f32.vlgmr.msra.gmra.mrb[14].mxu0 %vm17362_vm5, %v29602_v39  ;;  %v34930_v29 = vpop.f32.mrb[11].mxu1 }
0x1409   : > { %v29675_v14 = vpop.f32.mrb[12].mxu1  ;;  %v29745_v32 = vpop.f32.mrb[12].mxu0 }
0x140a   : > { %v29892_v3 = vadd.f32 %v29675_v14, %v29532_v35  ;;  %v29893_v2 = vadd.f32 %v29745_v32, %v29533_v43  ;;  %v34944_v4 = vpop.f32.mrb[13].mxu1  ;;  %v34951_v12 = vpop.f32.mrb[13].mxu0 }
0x140c   : > { %v29903_v24 = vadd.f32 %v30765_v52, %v29892_v3  ;;  %v29904_v37 = vadd.f32 %v30765_v52, %v29893_v2 }
0x140d   : > { %v29815_v56 = vpop.f32.mrb[14].mxu1 }
0x140e   : > { %v29907_v49 = vmax.f32 %v29903_v24, 0.0  ;;  %v29908_v51 = vmax.f32 %v29904_v37, 0.0  ;;  %v29894_v30 = vadd.f32 %v29815_v56, %v29534_v15  ;;  %v34958_v23 = vpop.f32.mrb[15].mxu1 }
0x1410   : > { %v29912_v40 = vsel %vm29911_vm13, %v29907_v49, 0.0  ;;  %v29913_v42 = vsel %vm29911_vm13, %v29908_v51, 0.0  ;;  %v29905_v17 = vadd.f32 %v30765_v52, %v29894_v30 }
0x1411   : > { %v29914_v60 = vadd.f32 %v29913_v42, %v29912_v40 }
0x1412   : > { %v29909_v61 = vmax.f32 %v29905_v17, 0.0 }
0x1414   : > { %v29915_v53 = vsel %vm29911_vm13, %v29909_v61, 0.0 }
0x1415   : > { %v29916_v20 = vadd.f32 %v29915_v53, %v29914_v60 }
0x14d9   : > { %v29888_v41 = vpop.f32.mrb[14].mxu0 }
0x14da   : > { %v29895_v6 = vadd.f32 %v29888_v41, %v29535_v21  ;;  %v34965_v47 = vpop.f32.mrb[15].mxu0 }
0x14dc   : > { %v29906_v11 = vadd.f32 %v30765_v52, %v29895_v6 }
0x14de   : > { %v29910_v16 = vmax.f32 %v29906_v11, 0.0 }
0x14e0   : > { %v29917_v18 = vsel %vm29911_vm13, %v29910_v16, 0.0 }
0x14e1   : > { %v29918_v26 = vadd.f32 %v29917_v18, %v29916_v20 }
0x14e3   : > { %v29920_v33 = vmul.f32 0.25, %v29918_v26 }
0x14e5   : > { %v29921_v25 = vsel %vm29911_vm13, %v29920_v33, 0.0 }
0x14e6   : > { %v29922_v0 = vrot.slane %v29921_v25, 4 }
0x14e8   : > { %v29923_v58 = vadd.f32 %v29922_v0, %v29921_v25 }
0x14ea   : > { %v29924_v9 = vrot.slane %v29923_v58, 2 }
0x14ec   : > { %v29925_v8 = vadd.f32 %v29924_v9, %v29923_v58 }
0x14ee   : > { %v29926_v50 = vrot.slane %v29925_v8, 1 }
0x14f0   : > { %v29927_v46 = vadd.f32 %v29926_v50, %v29925_v8 }
0x14f2   : > { %v29928_v45 = vmul.f32 0.25, %v29927_v46 }
0x14f4   : > { %29930 = vst.msk [vmem:[%s351_s20] sm:$0x1] %vm29929_vm14, %v29928_v45 }
0x14f5   : > { %36668 = shalt.err (!%p36665_p3)
}
0x14f6   : > { %s36669_s12 = scalar_lea.hbm %s40578_s11, 16  ;;  %s36673_s25 = scalar_lea.hbm %s40630_s10, 32 }
0x14f7   : > { %p36670_p4 = scmp.ne.s32.totalorder %s40578_s11, %s36669_s12  ;;  %p36674_p9 = scmp.lt.u32.totalorder %s40578_s11, %s40630_s10 }
0x14f8   : > { %p36675_p10 = scmp.lt.u32.totalorder %s36673_s25, %s36669_s12  ;;  %p36677_p12 = scmp.lt.u32.totalorder %s36669_s12, %s40578_s11 }
0x14f9   : > { %p36671_p7 = pnand %p36670_p4, %p36817_p5 }
0x14fa   : > { %p36676_p11 = por %p36675_p10, %p36674_p9 }
0x14fb   : > { %p36672_p8 = pneg %p36671_p7 }
0x14fc   : > { %p36678_p13 = por %p36677_p12, %p36676_p11 }
0x14fe   : > { %p36679_p0 = pnand %p36678_p13, %p36672_p8 }
0x1500   : > { %36682 = shalt.err (!%p36679_p0)
}
0x1501   : > { %36601 = dma.vmem_to_hbm [thread:$0]  (%p36817_p5), %s40580_s21, 16, %s40578_s11, %s29932_s27  }
0x1502 PF: > { %p36607_p1 = scmp.ge.s32.totalorder %s36717_s16, 2  ;;  %s29956_s28 = sand.u32 1, %s36705_s13  }
0x1503   : > { %s29957_s29 = scalar_lea.sflag [#allocation5], %s29956_s28 }
0x1504   : > { %p36604_p2 = pnand %p36607_p1, %p36821_p6 }
0x1506   : > { %36700 = dma.done.wait (!%p36604_p2), %s29957_s29, 16  }
0x1507   : > { %36702 = vsyncadd (!%p36604_p2), %s29957_s29, 4294967280  ;;  %p20_p3 = scmp.ge.s32.totalorder %s36804_s19, 4   ;;  %s40800_s13 = smov %s36709_s14 }
0x1508   : > { %s40801_s14 = smov %s36713_s15  ;;  %s40802_s15 = smov %s36815_s22 }
0x1509   : > { %s40803_s16 = smov %s36804_s19  ;;  %22 = sbr.rel (!%p20_p3) target bundleno = 3 (0x3), region = 127 }
0x1510   :  { %29961 = vsyncpa [#allocation5], 1 }
0x1511   :  { %29963 = vsyncpa [#allocation5 + $0x1], 1 }

</bundles_post_ra>
